<compile_context>
chip_gen: v7x
topology: tpu7x:2x2x1
jax: 0.10.0
libtpu: 0.0.40
codegen_flags: <defaults>
</compile_context>

<pallas_src>
import functools

import jax
import jax.numpy as jnp
from jax import lax
from jax.experimental import pallas as pl
from jax.experimental.pallas import tpu as pltpu

KH, KW = 5, 3          # CNNs_on_cw conv kernel size
PAD_H, PAD_W = 2, 1    # 'same' padding for a (5, 3) kernel
C_MID = 128            # conv1/conv2 channel width
NTAPS = KH * KW        # 15


def _full_spec(shape):
    n = len(shape)
    return pl.BlockSpec(shape, lambda i, n=n: (0,) * n)


# -----------------------------------------------------------------------------
# Fused conv stack: conv1(1->128) + ReLU + conv2(128->128) + ReLU + conv3(128->1)
# Layout: per image, activations are (C=128 sublanes, P=H*W lanes).
# Grid is parallel over blocks of images; inside, a fori_loop chunks per image so
# all intermediates stay register/VMEM-small.
# -----------------------------------------------------------------------------
def _conv_stack_kernel(p1_ref, w1_ref, b1_ref, w2_ref, b2_ref, w3_ref, b3_ref,
                       o_ref, *, nblk, H, W):
    P = H * W
    MAXOFF = PAD_H * W + PAD_W          # largest |flat tap offset|

    # kw-edge validity masks (only kw=0 and kw=2 touch a W boundary).
    wpos = lax.broadcasted_iota(jnp.int32, (1, P), 1) % W
    w_ok = [wpos >= 1, None, wpos <= W - 2]

    zpad = jnp.zeros((C_MID, MAXOFF), jnp.bfloat16)

    def padded(v):
        # zero-extend along the (lane) pixel axis once per conv layer
        return jnp.concatenate([zpad, v, zpad], axis=1)      # (128, P + 2*MAXOFF)

    def tap(vpad, kh, kw):
        # value-level lane slice: v'[c, p] = v[c, p + off] with zero fill
        off = (kh - PAD_H) * W + (kw - PAD_W)
        s = vpad[:, MAXOFF + off: MAXOFF + off + P]
        m = w_ok[kw]
        return s if m is None else jnp.where(m, s, jnp.zeros_like(s))

    def per_image(n, carry):
        # ---- conv1 (Cin=1): one im2col MXU matmul, K=16 (bf16) ---------------
        p1 = p1_ref[n]                                           # (16, P) bf16
        a1 = jnp.dot(w1_ref[...], p1,
                     preferred_element_type=jnp.float32)         # (128, P) f32
        h1 = jnp.maximum(a1 + b1_ref[...], 0.0).astype(jnp.bfloat16)
        h1p = padded(h1)

        # ---- conv2: 15 per-tap bf16 MXU matmuls, per-image f32 accumulator ---
        acc2 = jnp.zeros((C_MID, P), jnp.float32)
        for kh in range(KH):
            for kw in range(KW):
                acc2 = acc2 + jnp.dot(w2_ref[kh * KW + kw], tap(h1p, kh, kw),
                                      preferred_element_type=jnp.float32)
        h2 = jnp.maximum(acc2 + b2_ref[...], 0.0).astype(jnp.bfloat16)
        h2p = padded(h2)

        # ---- conv3 (Cout=1): per-tap (1,128)x(128,P) dots -> lane-dense row --
        acc3 = jnp.zeros((1, P), jnp.float32)
        for kh in range(KH):
            for kw in range(KW):
                acc3 = acc3 + jnp.dot(w3_ref[kh * KW + kw].reshape(1, C_MID),
                                      tap(h2p, kh, kw),
                                      preferred_element_type=jnp.float32)
        # b3 is (1,1) -- correct only because conv3 has a single output channel.
        o_ref[pl.ds(n, 1), :] = acc3 + b3_ref[...]
        return carry

    lax.fori_loop(0, nblk, per_image, 0)


def conv_stack(x, w1_oihw, b1, w2_oihw, b2, w3_oihw, b3, *, cw, fea):
    """x: (S, B, cw*fea) f32; conv weights in torch OIHW layout.
    Returns the GRU input as a lane-dense (S*B, cw*fea) f32 array."""
    S, B, _ = x.shape
    N = S * B
    H, W = cw, fea
    P = H * W

    # im2col for conv1 (Cin=1), transposed: taps on sublanes, pixels on lanes.
    img = x.reshape(N, H, W)
    xp = jnp.pad(img, ((0, 0), (PAD_H, PAD_H), (PAD_W, PAD_W)))
    p1 = jnp.stack([xp[:, kh:kh + H, kw:kw + W].reshape(N, P)
                    for kh in range(KH) for kw in range(KW)], axis=1)  # (N,15,P)
    p1 = jnp.pad(p1, ((0, 0), (0, 1), (0, 0))).astype(jnp.bfloat16)    # (N,16,P)

    # weight re-layouts: torch OIHW -> channels-on-sublanes per-tap matrices
    w1_m = jnp.pad(w1_oihw.reshape(C_MID, NTAPS),
                   ((0, 0), (0, 1))).astype(jnp.bfloat16)              # (128,16)
    w2_t = jnp.transpose(w2_oihw, (2, 3, 0, 1)).reshape(
        NTAPS, C_MID, C_MID).astype(jnp.bfloat16)                      # (15,Co,Ci)
    w3_t = jnp.transpose(w3_oihw.reshape(C_MID, KH, KW),
                         (1, 2, 0)).reshape(NTAPS, C_MID).astype(jnp.bfloat16)

    # 2 parallel blocks (v7x megacore) when the output block stays sublane-aligned.
    n_blocks = 2 if (N % 2 == 0 and (N // 2) % 8 == 0) else 1
    nblk = N // n_blocks

    kernel = functools.partial(_conv_stack_kernel, nblk=nblk, H=H, W=W)
    out = pl.pallas_call(
        kernel,
        out_shape=jax.ShapeDtypeStruct((N, P), jnp.float32),
        grid=(n_blocks,),
        in_specs=[pl.BlockSpec((nblk, NTAPS + 1, P), lambda i: (i, 0, 0)),
                  _full_spec((C_MID, NTAPS + 1)),
                  _full_spec((C_MID, 1)),
                  _full_spec((NTAPS, C_MID, C_MID)),
                  _full_spec((C_MID, 1)),
                  _full_spec((NTAPS, C_MID)),
                  _full_spec((1, 1))],
        out_specs=pl.BlockSpec((nblk, P), lambda i: (i, 0)),
        compiler_params=pltpu.CompilerParams(
            dimension_semantics=("parallel",)),
    )(p1, w1_m, b1.reshape(C_MID, 1), w2_t, b2.reshape(C_MID, 1),
      w3_t, b3.reshape(1, 1))
    return out                                                          # (N, P)


# -----------------------------------------------------------------------------
# GRU (resgate=0) + output projection:
#   zt = sigmoid(Wzx x_k + b_z + Uzh h)
#   at = Whx x_k + b_h + Uhh h
#   hcand = relu(at) * drop_scale
#   h = zt * h + (1 - zt) * hcand
#   y_k = h Wo + b_o        (projection hoisted after the recurrence)
# -----------------------------------------------------------------------------
def _gru_kernel(x_ref, wx_ref, bx_ref, u_ref, wo_ref, bo_ref, o_ref,
                *, S, B, Hd, drop_scale):
    # fused bf16 pre-projection of the whole sequence for both gates at once
    wx = (jnp.dot(x_ref[...].astype(jnp.bfloat16), wx_ref[...],
                  preferred_element_type=jnp.float32)
          + bx_ref[...])                                        # (S*B, 2*Hd) f32

    h = jnp.zeros((B, Hd), jnp.float32)                         # h_init = zeros
    hs = []
    # statically unrolled (S is small here); switch to lax.fori_loop for large S
    for k in range(S):
        g = wx[k * B:(k + 1) * B, :] + jnp.dot(
            h, u_ref[...], preferred_element_type=jnp.float32)  # (B, 2*Hd)
        zt = jax.nn.sigmoid(g[:, :Hd])
        hcand = jnp.maximum(g[:, Hd:], 0.0)
        if drop_scale != 1.0:                                   # test_flag==1 path
            hcand = hcand * drop_scale
        h = zt * h + (1.0 - zt) * hcand
        hs.append(h)                                            # stays in registers

    hall = jnp.concatenate(hs, axis=0)                          # (S*B, Hd)
    o_ref[...] = (jnp.dot(hall, wo_ref[...],
                          preferred_element_type=jnp.float32) + bo_ref[...])


def gru_forward(xc2d, wx_fused, bx_fused, u_fused, wo_t, bo, *, S, B,
                drop_scale):
    D = xc2d.shape[1]
    Hd = u_fused.shape[0]
    C = wo_t.shape[1]
    kernel = functools.partial(_gru_kernel, S=S, B=B, Hd=Hd,
                               drop_scale=float(drop_scale))
    y = pl.pallas_call(
        kernel,
        out_shape=jax.ShapeDtypeStruct((S * B, C), jnp.float32),
        grid=(1,),
        in_specs=[_full_spec((S * B, D)), _full_spec((D, 2 * Hd)),
                  _full_spec((1, 2 * Hd)), _full_spec((Hd, 2 * Hd)),
                  _full_spec((Hd, C)), _full_spec((1, C))],
        out_specs=_full_spec((S * B, C)),
        compiler_params=pltpu.CompilerParams(
            dimension_semantics=("arbitrary",)),
    )(xc2d, wx_fused, bx_fused.reshape(1, 2 * Hd), u_fused, wo_t,
      bo.reshape(1, C))
    return y.reshape(S, B, C)


# -----------------------------------------------------------------------------
# Full CNN_GRU forward (cost='mse', test_flag=1)
# -----------------------------------------------------------------------------
def cnn_gru_forward(x, lab, params, *, cw_size, drop_rate):
    S, B, D = x.shape
    fea = D // cw_size

    # CNNs_on_cw: (S, B, D) -> fused conv stack -> (S*B, D) lane-dense GRU input
    xc2d = conv_stack(x, params["conv1_w"], params["conv1_b"],
                      params["conv2_w"], params["conv2_b"],
                      params["conv3_w"], params["conv3_b"],
                      cw=cw_size, fea=fea)

    # test_flag == 1 -> drop_mask is the scalar (1 - drop_rate)
    drop_scale = 1.0 - drop_rate

    # nn.Linear stores weight as (out, in); kernels consume (in, out).
    wx_fused = jnp.concatenate([params["wzx_w"].T, params["whx_w"].T],
                               axis=1).astype(jnp.bfloat16)
    bx_fused = jnp.concatenate([params["wzx_b"], params["whx_b"]])
    u_fused = jnp.concatenate([params["uzh_w"].T, params["uhh_w"].T], axis=1)

    out = gru_forward(xc2d, wx_fused, bx_fused, u_fused,
                      params["fco_w"].T, params["fco_b"],
                      S=S, B=B, drop_scale=drop_scale)

    # cost == 'mse' (scalar glue reduction kept in plain JAX)
    loss = jnp.mean((out - lab) ** 2)
    err = jnp.zeros((1,), jnp.float32)
    pout = out
    return loss, err, pout


# TODO(synk): bidir / twin_reg / resgate / minimal_gru / batchnorm / laynorm /
# skip_conn / nll-loss branches of CNN_GRU.forward (and the train-time Bernoulli
# drop mask) are not exercised by this configuration and are not implemented.

if __name__ == "__main__":
    STEPS, BATCH = 8, 2
    CW_LEFT, CW_RIGHT = 5, 5
    CW = CW_LEFT + CW_RIGHT + 1          # 11
    FEA = 16
    INPUT_DIM = CW * FEA                 # 176
    HIDDEN = 32
    NUM_CLASSES = 4
    DROP_RATE = 0.0

    key = jax.random.PRNGKey(0)
    ks = jax.random.split(key, 20)

    def rnd(k, shape, scale=0.1):
        return (scale * jax.random.normal(k, shape)).astype(jnp.float32)

    params = {
        # CNNs_on_cw (OIHW, as in nn.Conv2d)
        "conv1_w": rnd(ks[0], (128, 1, 5, 3)),
        "conv1_b": rnd(ks[1], (128,)),
        "conv2_w": rnd(ks[2], (128, 128, 5, 3), scale=0.02),
        "conv2_b": rnd(ks[3], (128,)),
        "conv3_w": rnd(ks[4], (1, 128, 5, 3), scale=0.05),
        "conv3_b": rnd(ks[5], (1,)),
        # GRU layer 0 (nn.Linear weight layout: (out, in))
        "wzx_w": rnd(ks[6], (HIDDEN, INPUT_DIM)),
        "wzx_b": rnd(ks[7], (HIDDEN,)),
        "whx_w": rnd(ks[8], (HIDDEN, INPUT_DIM)),
        "whx_b": rnd(ks[9], (HIDDEN,)),
        "uzh_w": rnd(ks[10], (HIDDEN, HIDDEN)),
        "uhh_w": rnd(ks[11], (HIDDEN, HIDDEN)),
        # output layer
        "fco_w": rnd(ks[12], (NUM_CLASSES, HIDDEN)),
        "fco_b": rnd(ks[13], (NUM_CLASSES,)),
    }

    x = rnd(ks[14], (STEPS, BATCH, INPUT_DIM), scale=1.0)
    lab = rnd(ks[15], (STEPS, BATCH, NUM_CLASSES), scale=1.0)

    fwd = jax.jit(functools.partial(cnn_gru_forward,
                                    cw_size=CW, drop_rate=DROP_RATE))
    loss, err, pout = fwd(x, lab, params)
    jax.block_until_ready((loss, err, pout))

    assert pout.shape == (STEPS, BATCH, NUM_CLASSES)
    assert bool(jnp.isfinite(loss)) and bool(jnp.all(jnp.isfinite(pout)))
    print("KERNEL_OK")
</pallas_src>

<mosaic_0001>
module attributes {stable_mosaic.version = 11 : i64} {
  func.func @_conv_stack_kernel(%arg0: i32, %arg1: memref<8x16x176xbf16, #tpu.memory_space<vmem>>, %arg2: memref<128x16xbf16, #tpu.memory_space<vmem>>, %arg3: memref<128x1xf32, #tpu.memory_space<vmem>>, %arg4: memref<15x128x128xbf16, #tpu.memory_space<vmem>>, %arg5: memref<128x1xf32, #tpu.memory_space<vmem>>, %arg6: memref<15x128xbf16, #tpu.memory_space<vmem>>, %arg7: memref<1x1xf32, #tpu.memory_space<vmem>>, %arg8: memref<8x176xf32, #tpu.memory_space<vmem>>) attributes {dimension_semantics = [#tpu.dimension_semantics<parallel>], iteration_bounds = array<i64: 2>, scalar_prefetch = 0 : i64, scratch_operands = 0 : i64, tpu.core_type = #tpu.core_type<tc>, window_params = [{transform_indices = @transform_0, window_bounds = array<i64: 8, 16, 176>}, {pipeline_mode = #tpu.pipeline_mode<synchronous>, transform_indices = @transform_1, window_bounds = array<i64: 128, 16>}, {pipeline_mode = #tpu.pipeline_mode<synchronous>, transform_indices = @transform_2, window_bounds = array<i64: 128, 1>}, {pipeline_mode = #tpu.pipeline_mode<synchronous>, transform_indices = @transform_3, window_bounds = array<i64: 15, 128, 128>}, {pipeline_mode = #tpu.pipeline_mode<synchronous>, transform_indices = @transform_4, window_bounds = array<i64: 128, 1>}, {pipeline_mode = #tpu.pipeline_mode<synchronous>, transform_indices = @transform_5, window_bounds = array<i64: 15, 128>}, {pipeline_mode = #tpu.pipeline_mode<synchronous>, transform_indices = @transform_6, window_bounds = array<i64: 1, 1>}, {transform_indices = @transform_7, window_bounds = array<i64: 8, 176>}]} {
    %0 = tpu.iota {dimensions = array<i32: 1>} : vector<1x176xi32>
    %c16_i32 = arith.constant 16 : i32
    %c0_i32 = arith.constant 0 : i32
    %1 = arith.cmpi eq, %c16_i32, %c0_i32 : i32
    %c1_i32 = arith.constant 1 : i32
    %2 = arith.select %1, %c1_i32, %c16_i32 : i32
    %3 = vector.broadcast %2 : i32 to vector<1x176xi32>
    %4 = arith.remsi %0, %3 : vector<1x176xi32>
    %c0_i32_0 = arith.constant 0 : i32
    %5 = vector.broadcast %c0_i32_0 : i32 to vector<1x176xi32>
    %6 = arith.cmpi ne, %4, %5 : vector<1x176xi32>
    %c0_i32_1 = arith.constant 0 : i32
    %7 = vector.broadcast %c0_i32_1 : i32 to vector<1x176xi32>
    %8 = arith.cmpi slt, %4, %7 : vector<1x176xi32>
    %c0_i32_2 = arith.constant 0 : i32
    %9 = arith.cmpi slt, %2, %c0_i32_2 : i32
    %10 = vector.broadcast %9 : i1 to vector<1x176xi1>
    %11 = vector.broadcast %10 : vector<1x176xi1> to vector<1x176xi1>
    %12 = arith.xori %8, %11 : vector<1x176xi1>
    %13 = arith.andi %12, %6 : vector<1x176xi1>
    %14 = vector.broadcast %2 : i32 to vector<1x176xi32>
    %15 = arith.addi %4, %14 : vector<1x176xi32>
    %16 = arith.select %13, %15, %4 : vector<1x176xi1>, vector<1x176xi32>
    %c1_i32_3 = arith.constant 1 : i32
    %17 = vector.broadcast %c1_i32_3 : i32 to vector<1x176xi32>
    %18 = arith.cmpi sge, %16, %17 : vector<1x176xi32>
    %c14_i32 = arith.constant 14 : i32
    %19 = vector.broadcast %c14_i32 : i32 to vector<1x176xi32>
    %20 = arith.cmpi sle, %16, %19 : vector<1x176xi32>
    %cst = arith.constant 0.000000e+00 : bf16
    %21 = vector.broadcast %cst : bf16 to vector<128x33xbf16>
    %c0_i32_4 = arith.constant 0 : i32
    %c8_i32 = arith.constant 8 : i32
    %22 = arith.addi %c0_i32_4, %c8_i32 : i32
    %c1_i32_5 = arith.constant 1 : i32
    scf.for %arg9 = %c0_i32_4 to %22 step %c1_i32_5  : i32 {
      %23 = arith.index_cast %arg9 : i32 to index
      %c0 = arith.constant 0 : index
      %c0_7 = arith.constant 0 : index
      %24 = vector.load %arg1[%23, %c0, %c0_7] : memref<8x16x176xbf16, #tpu.memory_space<vmem>>, vector<1x16x176xbf16>
      %25 = vector.shape_cast %24 : vector<1x16x176xbf16> to vector<16x176xbf16>
      %c0_8 = arith.constant 0 : index
      %c0_9 = arith.constant 0 : index
      %26 = vector.load %arg2[%c0_8, %c0_9] : memref<128x16xbf16, #tpu.memory_space<vmem>>, vector<128x16xbf16>
      %cst_10 = arith.constant dense<0.000000e+00> : vector<128x176xf32>
      %27 = tpu.matmul %26, %25, %cst_10 {dimension_numbers = #tpu.dot_dimension_numbers<[1], [0], [0], [1], [0, 0, 1, 1], [], []>} : vector<128x16xbf16>, vector<16x176xbf16>, vector<128x176xf32> -> vector<128x176xf32>
      %c0_11 = arith.constant 0 : index
      %c0_12 = arith.constant 0 : index
      %28 = vector.load %arg3[%c0_11, %c0_12] : memref<128x1xf32, #tpu.memory_space<vmem>>, vector<128x1xf32>
      %29 = vector.broadcast %28 : vector<128x1xf32> to vector<128x176xf32>
      %30 = arith.addf %27, %29 : vector<128x176xf32>
      %cst_13 = arith.constant 0.000000e+00 : f32
      %31 = vector.broadcast %cst_13 : f32 to vector<128x176xf32>
      %32 = arith.maximumf %30, %31 : vector<128x176xf32>
      %33 = arith.truncf %32 : vector<128x176xf32> to vector<128x176xbf16>
      %34 = tpu.concatenate %21, %33, %21 in 1 : vector<128x33xbf16>, vector<128x176xbf16>, vector<128x33xbf16> -> vector<128x242xbf16>
      %cst_14 = arith.constant 0.000000e+00 : f32
      %35 = vector.broadcast %cst_14 : f32 to vector<128x176xf32>
      %c0_15 = arith.constant 0 : index
      %c0_16 = arith.constant 0 : index
      %c0_17 = arith.constant 0 : index
      %36 = vector.load %arg4[%c0_15, %c0_16, %c0_17] : memref<15x128x128xbf16, #tpu.memory_space<vmem>>, vector<1x128x128xbf16>
      %37 = vector.shape_cast %36 : vector<1x128x128xbf16> to vector<128x128xbf16>
      %38 = vector.extract_strided_slice %34 {offsets = [0, 0], sizes = [128, 176], strides = [1, 1]} : vector<128x242xbf16> to vector<128x176xbf16>
      %cst_18 = arith.constant 0.000000e+00 : bf16
      %39 = vector.broadcast %cst_18 : bf16 to vector<128x176xbf16>
      %40 = vector.shape_cast %18 : vector<1x176xi1> to vector<1x176xi1>
      %41 = vector.broadcast %40 : vector<1x176xi1> to vector<128x176xi1>
      %42 = arith.select %41, %38, %39 : vector<128x176xi1>, vector<128x176xbf16>
      %cst_19 = arith.constant dense<0.000000e+00> : vector<128x176xf32>
      %43 = tpu.matmul %37, %42, %cst_19 {dimension_numbers = #tpu.dot_dimension_numbers<[1], [0], [0], [1], [0, 0, 1, 1], [], []>} : vector<128x128xbf16>, vector<128x176xbf16>, vector<128x176xf32> -> vector<128x176xf32>
      %44 = arith.addf %35, %43 : vector<128x176xf32>
      %c1 = arith.constant 1 : index
      %c0_20 = arith.constant 0 : index
      %c0_21 = arith.constant 0 : index
      %45 = vector.load %arg4[%c1, %c0_20, %c0_21] : memref<15x128x128xbf16, #tpu.memory_space<vmem>>, vector<1x128x128xbf16>
      %46 = vector.shape_cast %45 : vector<1x128x128xbf16> to vector<128x128xbf16>
      %47 = vector.extract_strided_slice %34 {offsets = [0, 1], sizes = [128, 176], strides = [1, 1]} : vector<128x242xbf16> to vector<128x176xbf16>
      %cst_22 = arith.constant dense<0.000000e+00> : vector<128x176xf32>
      %48 = tpu.matmul %46, %47, %cst_22 {dimension_numbers = #tpu.dot_dimension_numbers<[1], [0], [0], [1], [0, 0, 1, 1], [], []>} : vector<128x128xbf16>, vector<128x176xbf16>, vector<128x176xf32> -> vector<128x176xf32>
      %49 = arith.addf %44, %48 : vector<128x176xf32>
      %c2 = arith.constant 2 : index
      %c0_23 = arith.constant 0 : index
      %c0_24 = arith.constant 0 : index
      %50 = vector.load %arg4[%c2, %c0_23, %c0_24] : memref<15x128x128xbf16, #tpu.memory_space<vmem>>, vector<1x128x128xbf16>
      %51 = vector.shape_cast %50 : vector<1x128x128xbf16> to vector<128x128xbf16>
      %52 = vector.extract_strided_slice %34 {offsets = [0, 2], sizes = [128, 176], strides = [1, 1]} : vector<128x242xbf16> to vector<128x176xbf16>
      %cst_25 = arith.constant 0.000000e+00 : bf16
      %53 = vector.broadcast %cst_25 : bf16 to vector<128x176xbf16>
      %54 = vector.shape_cast %20 : vector<1x176xi1> to vector<1x176xi1>
      %55 = vector.broadcast %54 : vector<1x176xi1> to vector<128x176xi1>
      %56 = arith.select %55, %52, %53 : vector<128x176xi1>, vector<128x176xbf16>
      %cst_26 = arith.constant dense<0.000000e+00> : vector<128x176xf32>
      %57 = tpu.matmul %51, %56, %cst_26 {dimension_numbers = #tpu.dot_dimension_numbers<[1], [0], [0], [1], [0, 0, 1, 1], [], []>} : vector<128x128xbf16>, vector<128x176xbf16>, vector<128x176xf32> -> vector<128x176xf32>
      %58 = arith.addf %49, %57 : vector<128x176xf32>
      %c3 = arith.constant 3 : index
      %c0_27 = arith.constant 0 : index
      %c0_28 = arith.constant 0 : index
      %59 = vector.load %arg4[%c3, %c0_27, %c0_28] : memref<15x128x128xbf16, #tpu.memory_space<vmem>>, vector<1x128x128xbf16>
      %60 = vector.shape_cast %59 : vector<1x128x128xbf16> to vector<128x128xbf16>
      %61 = vector.extract_strided_slice %34 {offsets = [0, 16], sizes = [128, 176], strides = [1, 1]} : vector<128x242xbf16> to vector<128x176xbf16>
      %cst_29 = arith.constant 0.000000e+00 : bf16
      %62 = vector.broadcast %cst_29 : bf16 to vector<128x176xbf16>
      %63 = vector.shape_cast %18 : vector<1x176xi1> to vector<1x176xi1>
      %64 = vector.broadcast %63 : vector<1x176xi1> to vector<128x176xi1>
      %65 = arith.select %64, %61, %62 : vector<128x176xi1>, vector<128x176xbf16>
      %cst_30 = arith.constant dense<0.000000e+00> : vector<128x176xf32>
      %66 = tpu.matmul %60, %65, %cst_30 {dimension_numbers = #tpu.dot_dimension_numbers<[1], [0], [0], [1], [0, 0, 1, 1], [], []>} : vector<128x128xbf16>, vector<128x176xbf16>, vector<128x176xf32> -> vector<128x176xf32>
      %67 = arith.addf %58, %66 : vector<128x176xf32>
      %c4 = arith.constant 4 : index
      %c0_31 = arith.constant 0 : index
      %c0_32 = arith.constant 0 : index
      %68 = vector.load %arg4[%c4, %c0_31, %c0_32] : memref<15x128x128xbf16, #tpu.memory_space<vmem>>, vector<1x128x128xbf16>
      %69 = vector.shape_cast %68 : vector<1x128x128xbf16> to vector<128x128xbf16>
      %70 = vector.extract_strided_slice %34 {offsets = [0, 17], sizes = [128, 176], strides = [1, 1]} : vector<128x242xbf16> to vector<128x176xbf16>
      %cst_33 = arith.constant dense<0.000000e+00> : vector<128x176xf32>
      %71 = tpu.matmul %69, %70, %cst_33 {dimension_numbers = #tpu.dot_dimension_numbers<[1], [0], [0], [1], [0, 0, 1, 1], [], []>} : vector<128x128xbf16>, vector<128x176xbf16>, vector<128x176xf32> -> vector<128x176xf32>
      %72 = arith.addf %67, %71 : vector<128x176xf32>
      %c5 = arith.constant 5 : index
      %c0_34 = arith.constant 0 : index
      %c0_35 = arith.constant 0 : index
      %73 = vector.load %arg4[%c5, %c0_34, %c0_35] : memref<15x128x128xbf16, #tpu.memory_space<vmem>>, vector<1x128x128xbf16>
      %74 = vector.shape_cast %73 : vector<1x128x128xbf16> to vector<128x128xbf16>
      %75 = vector.extract_strided_slice %34 {offsets = [0, 18], sizes = [128, 176], strides = [1, 1]} : vector<128x242xbf16> to vector<128x176xbf16>
      %cst_36 = arith.constant 0.000000e+00 : bf16
      %76 = vector.broadcast %cst_36 : bf16 to vector<128x176xbf16>
      %77 = vector.shape_cast %20 : vector<1x176xi1> to vector<1x176xi1>
      %78 = vector.broadcast %77 : vector<1x176xi1> to vector<128x176xi1>
      %79 = arith.select %78, %75, %76 : vector<128x176xi1>, vector<128x176xbf16>
      %cst_37 = arith.constant dense<0.000000e+00> : vector<128x176xf32>
      %80 = tpu.matmul %74, %79, %cst_37 {dimension_numbers = #tpu.dot_dimension_numbers<[1], [0], [0], [1], [0, 0, 1, 1], [], []>} : vector<128x128xbf16>, vector<128x176xbf16>, vector<128x176xf32> -> vector<128x176xf32>
      %81 = arith.addf %72, %80 : vector<128x176xf32>
      %c6 = arith.constant 6 : index
      %c0_38 = arith.constant 0 : index
      %c0_39 = arith.constant 0 : index
      %82 = vector.load %arg4[%c6, %c0_38, %c0_39] : memref<15x128x128xbf16, #tpu.memory_space<vmem>>, vector<1x128x128xbf16>
      %83 = vector.shape_cast %82 : vector<1x128x128xbf16> to vector<128x128xbf16>
      %84 = vector.extract_strided_slice %34 {offsets = [0, 32], sizes = [128, 176], strides = [1, 1]} : vector<128x242xbf16> to vector<128x176xbf16>
      %cst_40 = arith.constant 0.000000e+00 : bf16
      %85 = vector.broadcast %cst_40 : bf16 to vector<128x176xbf16>
      %86 = vector.shape_cast %18 : vector<1x176xi1> to vector<1x176xi1>
      %87 = vector.broadcast %86 : vector<1x176xi1> to vector<128x176xi1>
      %88 = arith.select %87, %84, %85 : vector<128x176xi1>, vector<128x176xbf16>
      %cst_41 = arith.constant dense<0.000000e+00> : vector<128x176xf32>
      %89 = tpu.matmul %83, %88, %cst_41 {dimension_numbers = #tpu.dot_dimension_numbers<[1], [0], [0], [1], [0, 0, 1, 1], [], []>} : vector<128x128xbf16>, vector<128x176xbf16>, vector<128x176xf32> -> vector<128x176xf32>
      %90 = arith.addf %81, %89 : vector<128x176xf32>
      %c7 = arith.constant 7 : index
      %c0_42 = arith.constant 0 : index
      %c0_43 = arith.constant 0 : index
      %91 = vector.load %arg4[%c7, %c0_42, %c0_43] : memref<15x128x128xbf16, #tpu.memory_space<vmem>>, vector<1x128x128xbf16>
      %92 = vector.shape_cast %91 : vector<1x128x128xbf16> to vector<128x128xbf16>
      %93 = vector.extract_strided_slice %34 {offsets = [0, 33], sizes = [128, 176], strides = [1, 1]} : vector<128x242xbf16> to vector<128x176xbf16>
      %cst_44 = arith.constant dense<0.000000e+00> : vector<128x176xf32>
      %94 = tpu.matmul %92, %93, %cst_44 {dimension_numbers = #tpu.dot_dimension_numbers<[1], [0], [0], [1], [0, 0, 1, 1], [], []>} : vector<128x128xbf16>, vector<128x176xbf16>, vector<128x176xf32> -> vector<128x176xf32>
      %95 = arith.addf %90, %94 : vector<128x176xf32>
      %c8 = arith.constant 8 : index
      %c0_45 = arith.constant 0 : index
      %c0_46 = arith.constant 0 : index
      %96 = vector.load %arg4[%c8, %c0_45, %c0_46] : memref<15x128x128xbf16, #tpu.memory_space<vmem>>, vector<1x128x128xbf16>
      %97 = vector.shape_cast %96 : vector<1x128x128xbf16> to vector<128x128xbf16>
      %98 = vector.extract_strided_slice %34 {offsets = [0, 34], sizes = [128, 176], strides = [1, 1]} : vector<128x242xbf16> to vector<128x176xbf16>
      %cst_47 = arith.constant 0.000000e+00 : bf16
      %99 = vector.broadcast %cst_47 : bf16 to vector<128x176xbf16>
      %100 = vector.shape_cast %20 : vector<1x176xi1> to vector<1x176xi1>
      %101 = vector.broadcast %100 : vector<1x176xi1> to vector<128x176xi1>
      %102 = arith.select %101, %98, %99 : vector<128x176xi1>, vector<128x176xbf16>
      %cst_48 = arith.constant dense<0.000000e+00> : vector<128x176xf32>
      %103 = tpu.matmul %97, %102, %cst_48 {dimension_numbers = #tpu.dot_dimension_numbers<[1], [0], [0], [1], [0, 0, 1, 1], [], []>} : vector<128x128xbf16>, vector<128x176xbf16>, vector<128x176xf32> -> vector<128x176xf32>
      %104 = arith.addf %95, %103 : vector<128x176xf32>
      %c9 = arith.constant 9 : index
      %c0_49 = arith.constant 0 : index
      %c0_50 = arith.constant 0 : index
      %105 = vector.load %arg4[%c9, %c0_49, %c0_50] : memref<15x128x128xbf16, #tpu.memory_space<vmem>>, vector<1x128x128xbf16>
      %106 = vector.shape_cast %105 : vector<1x128x128xbf16> to vector<128x128xbf16>
      %107 = vector.extract_strided_slice %34 {offsets = [0, 48], sizes = [128, 176], strides = [1, 1]} : vector<128x242xbf16> to vector<128x176xbf16>
      %cst_51 = arith.constant 0.000000e+00 : bf16
      %108 = vector.broadcast %cst_51 : bf16 to vector<128x176xbf16>
      %109 = vector.shape_cast %18 : vector<1x176xi1> to vector<1x176xi1>
      %110 = vector.broadcast %109 : vector<1x176xi1> to vector<128x176xi1>
      %111 = arith.select %110, %107, %108 : vector<128x176xi1>, vector<128x176xbf16>
      %cst_52 = arith.constant dense<0.000000e+00> : vector<128x176xf32>
      %112 = tpu.matmul %106, %111, %cst_52 {dimension_numbers = #tpu.dot_dimension_numbers<[1], [0], [0], [1], [0, 0, 1, 1], [], []>} : vector<128x128xbf16>, vector<128x176xbf16>, vector<128x176xf32> -> vector<128x176xf32>
      %113 = arith.addf %104, %112 : vector<128x176xf32>
      %c10 = arith.constant 10 : index
      %c0_53 = arith.constant 0 : index
      %c0_54 = arith.constant 0 : index
      %114 = vector.load %arg4[%c10, %c0_53, %c0_54] : memref<15x128x128xbf16, #tpu.memory_space<vmem>>, vector<1x128x128xbf16>
      %115 = vector.shape_cast %114 : vector<1x128x128xbf16> to vector<128x128xbf16>
      %116 = vector.extract_strided_slice %34 {offsets = [0, 49], sizes = [128, 176], strides = [1, 1]} : vector<128x242xbf16> to vector<128x176xbf16>
      %cst_55 = arith.constant dense<0.000000e+00> : vector<128x176xf32>
      %117 = tpu.matmul %115, %116, %cst_55 {dimension_numbers = #tpu.dot_dimension_numbers<[1], [0], [0], [1], [0, 0, 1, 1], [], []>} : vector<128x128xbf16>, vector<128x176xbf16>, vector<128x176xf32> -> vector<128x176xf32>
      %118 = arith.addf %113, %117 : vector<128x176xf32>
      %c11 = arith.constant 11 : index
      %c0_56 = arith.constant 0 : index
      %c0_57 = arith.constant 0 : index
      %119 = vector.load %arg4[%c11, %c0_56, %c0_57] : memref<15x128x128xbf16, #tpu.memory_space<vmem>>, vector<1x128x128xbf16>
      %120 = vector.shape_cast %119 : vector<1x128x128xbf16> to vector<128x128xbf16>
      %121 = vector.extract_strided_slice %34 {offsets = [0, 50], sizes = [128, 176], strides = [1, 1]} : vector<128x242xbf16> to vector<128x176xbf16>
      %cst_58 = arith.constant 0.000000e+00 : bf16
      %122 = vector.broadcast %cst_58 : bf16 to vector<128x176xbf16>
      %123 = vector.shape_cast %20 : vector<1x176xi1> to vector<1x176xi1>
      %124 = vector.broadcast %123 : vector<1x176xi1> to vector<128x176xi1>
      %125 = arith.select %124, %121, %122 : vector<128x176xi1>, vector<128x176xbf16>
      %cst_59 = arith.constant dense<0.000000e+00> : vector<128x176xf32>
      %126 = tpu.matmul %120, %125, %cst_59 {dimension_numbers = #tpu.dot_dimension_numbers<[1], [0], [0], [1], [0, 0, 1, 1], [], []>} : vector<128x128xbf16>, vector<128x176xbf16>, vector<128x176xf32> -> vector<128x176xf32>
      %127 = arith.addf %118, %126 : vector<128x176xf32>
      %c12 = arith.constant 12 : index
      %c0_60 = arith.constant 0 : index
      %c0_61 = arith.constant 0 : index
      %128 = vector.load %arg4[%c12, %c0_60, %c0_61] : memref<15x128x128xbf16, #tpu.memory_space<vmem>>, vector<1x128x128xbf16>
      %129 = vector.shape_cast %128 : vector<1x128x128xbf16> to vector<128x128xbf16>
      %130 = vector.extract_strided_slice %34 {offsets = [0, 64], sizes = [128, 176], strides = [1, 1]} : vector<128x242xbf16> to vector<128x176xbf16>
      %cst_62 = arith.constant 0.000000e+00 : bf16
      %131 = vector.broadcast %cst_62 : bf16 to vector<128x176xbf16>
      %132 = vector.shape_cast %18 : vector<1x176xi1> to vector<1x176xi1>
      %133 = vector.broadcast %132 : vector<1x176xi1> to vector<128x176xi1>
      %134 = arith.select %133, %130, %131 : vector<128x176xi1>, vector<128x176xbf16>
      %cst_63 = arith.constant dense<0.000000e+00> : vector<128x176xf32>
      %135 = tpu.matmul %129, %134, %cst_63 {dimension_numbers = #tpu.dot_dimension_numbers<[1], [0], [0], [1], [0, 0, 1, 1], [], []>} : vector<128x128xbf16>, vector<128x176xbf16>, vector<128x176xf32> -> vector<128x176xf32>
      %136 = arith.addf %127, %135 : vector<128x176xf32>
      %c13 = arith.constant 13 : index
      %c0_64 = arith.constant 0 : index
      %c0_65 = arith.constant 0 : index
      %137 = vector.load %arg4[%c13, %c0_64, %c0_65] : memref<15x128x128xbf16, #tpu.memory_space<vmem>>, vector<1x128x128xbf16>
      %138 = vector.shape_cast %137 : vector<1x128x128xbf16> to vector<128x128xbf16>
      %139 = vector.extract_strided_slice %34 {offsets = [0, 65], sizes = [128, 176], strides = [1, 1]} : vector<128x242xbf16> to vector<128x176xbf16>
      %cst_66 = arith.constant dense<0.000000e+00> : vector<128x176xf32>
      %140 = tpu.matmul %138, %139, %cst_66 {dimension_numbers = #tpu.dot_dimension_numbers<[1], [0], [0], [1], [0, 0, 1, 1], [], []>} : vector<128x128xbf16>, vector<128x176xbf16>, vector<128x176xf32> -> vector<128x176xf32>
      %141 = arith.addf %136, %140 : vector<128x176xf32>
      %c14 = arith.constant 14 : index
      %c0_67 = arith.constant 0 : index
      %c0_68 = arith.constant 0 : index
      %142 = vector.load %arg4[%c14, %c0_67, %c0_68] : memref<15x128x128xbf16, #tpu.memory_space<vmem>>, vector<1x128x128xbf16>
      %143 = vector.shape_cast %142 : vector<1x128x128xbf16> to vector<128x128xbf16>
      %144 = vector.extract_strided_slice %34 {offsets = [0, 66], sizes = [128, 176], strides = [1, 1]} : vector<128x242xbf16> to vector<128x176xbf16>
      %cst_69 = arith.constant 0.000000e+00 : bf16
      %145 = vector.broadcast %cst_69 : bf16 to vector<128x176xbf16>
      %146 = vector.shape_cast %20 : vector<1x176xi1> to vector<1x176xi1>
      %147 = vector.broadcast %146 : vector<1x176xi1> to vector<128x176xi1>
      %148 = arith.select %147, %144, %145 : vector<128x176xi1>, vector<128x176xbf16>
      %cst_70 = arith.constant dense<0.000000e+00> : vector<128x176xf32>
      %149 = tpu.matmul %143, %148, %cst_70 {dimension_numbers = #tpu.dot_dimension_numbers<[1], [0], [0], [1], [0, 0, 1, 1], [], []>} : vector<128x128xbf16>, vector<128x176xbf16>, vector<128x176xf32> -> vector<128x176xf32>
      %150 = arith.addf %141, %149 : vector<128x176xf32>
      %c0_71 = arith.constant 0 : index
      %c0_72 = arith.constant 0 : index
      %151 = vector.load %arg5[%c0_71, %c0_72] : memref<128x1xf32, #tpu.memory_space<vmem>>, vector<128x1xf32>
      %152 = vector.broadcast %151 : vector<128x1xf32> to vector<128x176xf32>
      %153 = arith.addf %150, %152 : vector<128x176xf32>
      %cst_73 = arith.constant 0.000000e+00 : f32
      %154 = vector.broadcast %cst_73 : f32 to vector<128x176xf32>
      %155 = arith.maximumf %153, %154 : vector<128x176xf32>
      %156 = arith.truncf %155 : vector<128x176xf32> to vector<128x176xbf16>
      %157 = tpu.concatenate %21, %156, %21 in 1 : vector<128x33xbf16>, vector<128x176xbf16>, vector<128x33xbf16> -> vector<128x242xbf16>
      %cst_74 = arith.constant 0.000000e+00 : f32
      %158 = vector.broadcast %cst_74 : f32 to vector<1x176xf32>
      %c0_75 = arith.constant 0 : index
      %c0_76 = arith.constant 0 : index
      %159 = vector.load %arg6[%c0_75, %c0_76] : memref<15x128xbf16, #tpu.memory_space<vmem>>, vector<1x128xbf16>
      %160 = vector.shape_cast %159 : vector<1x128xbf16> to vector<128xbf16>
      %161 = vector.shape_cast %160 : vector<128xbf16> to vector<1x128xbf16>
      %162 = vector.extract_strided_slice %157 {offsets = [0, 0], sizes = [128, 176], strides = [1, 1]} : vector<128x242xbf16> to vector<128x176xbf16>
      %cst_77 = arith.constant 0.000000e+00 : bf16
      %163 = vector.broadcast %cst_77 : bf16 to vector<128x176xbf16>
      %164 = vector.shape_cast %18 : vector<1x176xi1> to vector<1x176xi1>
      %165 = vector.broadcast %164 : vector<1x176xi1> to vector<128x176xi1>
      %166 = arith.select %165, %162, %163 : vector<128x176xi1>, vector<128x176xbf16>
      %cst_78 = arith.constant dense<0.000000e+00> : vector<1x176xf32>
      %167 = tpu.matmul %161, %166, %cst_78 {dimension_numbers = #tpu.dot_dimension_numbers<[1], [0], [0], [1], [0, 0, 1, 1], [], []>} : vector<1x128xbf16>, vector<128x176xbf16>, vector<1x176xf32> -> vector<1x176xf32>
      %168 = arith.addf %158, %167 : vector<1x176xf32>
      %c1_79 = arith.constant 1 : index
      %c0_80 = arith.constant 0 : index
      %169 = vector.load %arg6[%c1_79, %c0_80] : memref<15x128xbf16, #tpu.memory_space<vmem>>, vector<1x128xbf16>
      %170 = vector.shape_cast %169 : vector<1x128xbf16> to vector<128xbf16>
      %171 = vector.shape_cast %170 : vector<128xbf16> to vector<1x128xbf16>
      %172 = vector.extract_strided_slice %157 {offsets = [0, 1], sizes = [128, 176], strides = [1, 1]} : vector<128x242xbf16> to vector<128x176xbf16>
      %cst_81 = arith.constant dense<0.000000e+00> : vector<1x176xf32>
      %173 = tpu.matmul %171, %172, %cst_81 {dimension_numbers = #tpu.dot_dimension_numbers<[1], [0], [0], [1], [0, 0, 1, 1], [], []>} : vector<1x128xbf16>, vector<128x176xbf16>, vector<1x176xf32> -> vector<1x176xf32>
      %174 = arith.addf %168, %173 : vector<1x176xf32>
      %c2_82 = arith.constant 2 : index
      %c0_83 = arith.constant 0 : index
      %175 = vector.load %arg6[%c2_82, %c0_83] : memref<15x128xbf16, #tpu.memory_space<vmem>>, vector<1x128xbf16>
      %176 = vector.shape_cast %175 : vector<1x128xbf16> to vector<128xbf16>
      %177 = vector.shape_cast %176 : vector<128xbf16> to vector<1x128xbf16>
      %178 = vector.extract_strided_slice %157 {offsets = [0, 2], sizes = [128, 176], strides = [1, 1]} : vector<128x242xbf16> to vector<128x176xbf16>
      %cst_84 = arith.constant 0.000000e+00 : bf16
      %179 = vector.broadcast %cst_84 : bf16 to vector<128x176xbf16>
      %180 = vector.shape_cast %20 : vector<1x176xi1> to vector<1x176xi1>
      %181 = vector.broadcast %180 : vector<1x176xi1> to vector<128x176xi1>
      %182 = arith.select %181, %178, %179 : vector<128x176xi1>, vector<128x176xbf16>
      %cst_85 = arith.constant dense<0.000000e+00> : vector<1x176xf32>
      %183 = tpu.matmul %177, %182, %cst_85 {dimension_numbers = #tpu.dot_dimension_numbers<[1], [0], [0], [1], [0, 0, 1, 1], [], []>} : vector<1x128xbf16>, vector<128x176xbf16>, vector<1x176xf32> -> vector<1x176xf32>
      %184 = arith.addf %174, %183 : vector<1x176xf32>
      %c3_86 = arith.constant 3 : index
      %c0_87 = arith.constant 0 : index
      %185 = vector.load %arg6[%c3_86, %c0_87] : memref<15x128xbf16, #tpu.memory_space<vmem>>, vector<1x128xbf16>
      %186 = vector.shape_cast %185 : vector<1x128xbf16> to vector<128xbf16>
      %187 = vector.shape_cast %186 : vector<128xbf16> to vector<1x128xbf16>
      %188 = vector.extract_strided_slice %157 {offsets = [0, 16], sizes = [128, 176], strides = [1, 1]} : vector<128x242xbf16> to vector<128x176xbf16>
      %cst_88 = arith.constant 0.000000e+00 : bf16
      %189 = vector.broadcast %cst_88 : bf16 to vector<128x176xbf16>
      %190 = vector.shape_cast %18 : vector<1x176xi1> to vector<1x176xi1>
      %191 = vector.broadcast %190 : vector<1x176xi1> to vector<128x176xi1>
      %192 = arith.select %191, %188, %189 : vector<128x176xi1>, vector<128x176xbf16>
      %cst_89 = arith.constant dense<0.000000e+00> : vector<1x176xf32>
      %193 = tpu.matmul %187, %192, %cst_89 {dimension_numbers = #tpu.dot_dimension_numbers<[1], [0], [0], [1], [0, 0, 1, 1], [], []>} : vector<1x128xbf16>, vector<128x176xbf16>, vector<1x176xf32> -> vector<1x176xf32>
      %194 = arith.addf %184, %193 : vector<1x176xf32>
      %c4_90 = arith.constant 4 : index
      %c0_91 = arith.constant 0 : index
      %195 = vector.load %arg6[%c4_90, %c0_91] : memref<15x128xbf16, #tpu.memory_space<vmem>>, vector<1x128xbf16>
      %196 = vector.shape_cast %195 : vector<1x128xbf16> to vector<128xbf16>
      %197 = vector.shape_cast %196 : vector<128xbf16> to vector<1x128xbf16>
      %198 = vector.extract_strided_slice %157 {offsets = [0, 17], sizes = [128, 176], strides = [1, 1]} : vector<128x242xbf16> to vector<128x176xbf16>
      %cst_92 = arith.constant dense<0.000000e+00> : vector<1x176xf32>
      %199 = tpu.matmul %197, %198, %cst_92 {dimension_numbers = #tpu.dot_dimension_numbers<[1], [0], [0], [1], [0, 0, 1, 1], [], []>} : vector<1x128xbf16>, vector<128x176xbf16>, vector<1x176xf32> -> vector<1x176xf32>
      %200 = arith.addf %194, %199 : vector<1x176xf32>
      %c5_93 = arith.constant 5 : index
      %c0_94 = arith.constant 0 : index
      %201 = vector.load %arg6[%c5_93, %c0_94] : memref<15x128xbf16, #tpu.memory_space<vmem>>, vector<1x128xbf16>
      %202 = vector.shape_cast %201 : vector<1x128xbf16> to vector<128xbf16>
      %203 = vector.shape_cast %202 : vector<128xbf16> to vector<1x128xbf16>
      %204 = vector.extract_strided_slice %157 {offsets = [0, 18], sizes = [128, 176], strides = [1, 1]} : vector<128x242xbf16> to vector<128x176xbf16>
      %cst_95 = arith.constant 0.000000e+00 : bf16
      %205 = vector.broadcast %cst_95 : bf16 to vector<128x176xbf16>
      %206 = vector.shape_cast %20 : vector<1x176xi1> to vector<1x176xi1>
      %207 = vector.broadcast %206 : vector<1x176xi1> to vector<128x176xi1>
      %208 = arith.select %207, %204, %205 : vector<128x176xi1>, vector<128x176xbf16>
      %cst_96 = arith.constant dense<0.000000e+00> : vector<1x176xf32>
      %209 = tpu.matmul %203, %208, %cst_96 {dimension_numbers = #tpu.dot_dimension_numbers<[1], [0], [0], [1], [0, 0, 1, 1], [], []>} : vector<1x128xbf16>, vector<128x176xbf16>, vector<1x176xf32> -> vector<1x176xf32>
      %210 = arith.addf %200, %209 : vector<1x176xf32>
      %c6_97 = arith.constant 6 : index
      %c0_98 = arith.constant 0 : index
      %211 = vector.load %arg6[%c6_97, %c0_98] : memref<15x128xbf16, #tpu.memory_space<vmem>>, vector<1x128xbf16>
      %212 = vector.shape_cast %211 : vector<1x128xbf16> to vector<128xbf16>
      %213 = vector.shape_cast %212 : vector<128xbf16> to vector<1x128xbf16>
      %214 = vector.extract_strided_slice %157 {offsets = [0, 32], sizes = [128, 176], strides = [1, 1]} : vector<128x242xbf16> to vector<128x176xbf16>
      %cst_99 = arith.constant 0.000000e+00 : bf16
      %215 = vector.broadcast %cst_99 : bf16 to vector<128x176xbf16>
      %216 = vector.shape_cast %18 : vector<1x176xi1> to vector<1x176xi1>
      %217 = vector.broadcast %216 : vector<1x176xi1> to vector<128x176xi1>
      %218 = arith.select %217, %214, %215 : vector<128x176xi1>, vector<128x176xbf16>
      %cst_100 = arith.constant dense<0.000000e+00> : vector<1x176xf32>
      %219 = tpu.matmul %213, %218, %cst_100 {dimension_numbers = #tpu.dot_dimension_numbers<[1], [0], [0], [1], [0, 0, 1, 1], [], []>} : vector<1x128xbf16>, vector<128x176xbf16>, vector<1x176xf32> -> vector<1x176xf32>
      %220 = arith.addf %210, %219 : vector<1x176xf32>
      %c7_101 = arith.constant 7 : index
      %c0_102 = arith.constant 0 : index
      %221 = vector.load %arg6[%c7_101, %c0_102] : memref<15x128xbf16, #tpu.memory_space<vmem>>, vector<1x128xbf16>
      %222 = vector.shape_cast %221 : vector<1x128xbf16> to vector<128xbf16>
      %223 = vector.shape_cast %222 : vector<128xbf16> to vector<1x128xbf16>
      %224 = vector.extract_strided_slice %157 {offsets = [0, 33], sizes = [128, 176], strides = [1, 1]} : vector<128x242xbf16> to vector<128x176xbf16>
      %cst_103 = arith.constant dense<0.000000e+00> : vector<1x176xf32>
      %225 = tpu.matmul %223, %224, %cst_103 {dimension_numbers = #tpu.dot_dimension_numbers<[1], [0], [0], [1], [0, 0, 1, 1], [], []>} : vector<1x128xbf16>, vector<128x176xbf16>, vector<1x176xf32> -> vector<1x176xf32>
      %226 = arith.addf %220, %225 : vector<1x176xf32>
      %c8_104 = arith.constant 8 : index
      %c0_105 = arith.constant 0 : index
      %227 = vector.load %arg6[%c8_104, %c0_105] : memref<15x128xbf16, #tpu.memory_space<vmem>>, vector<1x128xbf16>
      %228 = vector.shape_cast %227 : vector<1x128xbf16> to vector<128xbf16>
      %229 = vector.shape_cast %228 : vector<128xbf16> to vector<1x128xbf16>
      %230 = vector.extract_strided_slice %157 {offsets = [0, 34], sizes = [128, 176], strides = [1, 1]} : vector<128x242xbf16> to vector<128x176xbf16>
      %cst_106 = arith.constant 0.000000e+00 : bf16
      %231 = vector.broadcast %cst_106 : bf16 to vector<128x176xbf16>
      %232 = vector.shape_cast %20 : vector<1x176xi1> to vector<1x176xi1>
      %233 = vector.broadcast %232 : vector<1x176xi1> to vector<128x176xi1>
      %234 = arith.select %233, %230, %231 : vector<128x176xi1>, vector<128x176xbf16>
      %cst_107 = arith.constant dense<0.000000e+00> : vector<1x176xf32>
      %235 = tpu.matmul %229, %234, %cst_107 {dimension_numbers = #tpu.dot_dimension_numbers<[1], [0], [0], [1], [0, 0, 1, 1], [], []>} : vector<1x128xbf16>, vector<128x176xbf16>, vector<1x176xf32> -> vector<1x176xf32>
      %236 = arith.addf %226, %235 : vector<1x176xf32>
      %c9_108 = arith.constant 9 : index
      %c0_109 = arith.constant 0 : index
      %237 = vector.load %arg6[%c9_108, %c0_109] : memref<15x128xbf16, #tpu.memory_space<vmem>>, vector<1x128xbf16>
      %238 = vector.shape_cast %237 : vector<1x128xbf16> to vector<128xbf16>
      %239 = vector.shape_cast %238 : vector<128xbf16> to vector<1x128xbf16>
      %240 = vector.extract_strided_slice %157 {offsets = [0, 48], sizes = [128, 176], strides = [1, 1]} : vector<128x242xbf16> to vector<128x176xbf16>
      %cst_110 = arith.constant 0.000000e+00 : bf16
      %241 = vector.broadcast %cst_110 : bf16 to vector<128x176xbf16>
      %242 = vector.shape_cast %18 : vector<1x176xi1> to vector<1x176xi1>
      %243 = vector.broadcast %242 : vector<1x176xi1> to vector<128x176xi1>
      %244 = arith.select %243, %240, %241 : vector<128x176xi1>, vector<128x176xbf16>
      %cst_111 = arith.constant dense<0.000000e+00> : vector<1x176xf32>
      %245 = tpu.matmul %239, %244, %cst_111 {dimension_numbers = #tpu.dot_dimension_numbers<[1], [0], [0], [1], [0, 0, 1, 1], [], []>} : vector<1x128xbf16>, vector<128x176xbf16>, vector<1x176xf32> -> vector<1x176xf32>
      %246 = arith.addf %236, %245 : vector<1x176xf32>
      %c10_112 = arith.constant 10 : index
      %c0_113 = arith.constant 0 : index
      %247 = vector.load %arg6[%c10_112, %c0_113] : memref<15x128xbf16, #tpu.memory_space<vmem>>, vector<1x128xbf16>
      %248 = vector.shape_cast %247 : vector<1x128xbf16> to vector<128xbf16>
      %249 = vector.shape_cast %248 : vector<128xbf16> to vector<1x128xbf16>
      %250 = vector.extract_strided_slice %157 {offsets = [0, 49], sizes = [128, 176], strides = [1, 1]} : vector<128x242xbf16> to vector<128x176xbf16>
      %cst_114 = arith.constant dense<0.000000e+00> : vector<1x176xf32>
      %251 = tpu.matmul %249, %250, %cst_114 {dimension_numbers = #tpu.dot_dimension_numbers<[1], [0], [0], [1], [0, 0, 1, 1], [], []>} : vector<1x128xbf16>, vector<128x176xbf16>, vector<1x176xf32> -> vector<1x176xf32>
      %252 = arith.addf %246, %251 : vector<1x176xf32>
      %c11_115 = arith.constant 11 : index
      %c0_116 = arith.constant 0 : index
      %253 = vector.load %arg6[%c11_115, %c0_116] : memref<15x128xbf16, #tpu.memory_space<vmem>>, vector<1x128xbf16>
      %254 = vector.shape_cast %253 : vector<1x128xbf16> to vector<128xbf16>
      %255 = vector.shape_cast %254 : vector<128xbf16> to vector<1x128xbf16>
      %256 = vector.extract_strided_slice %157 {offsets = [0, 50], sizes = [128, 176], strides = [1, 1]} : vector<128x242xbf16> to vector<128x176xbf16>
      %cst_117 = arith.constant 0.000000e+00 : bf16
      %257 = vector.broadcast %cst_117 : bf16 to vector<128x176xbf16>
      %258 = vector.shape_cast %20 : vector<1x176xi1> to vector<1x176xi1>
      %259 = vector.broadcast %258 : vector<1x176xi1> to vector<128x176xi1>
      %260 = arith.select %259, %256, %257 : vector<128x176xi1>, vector<128x176xbf16>
      %cst_118 = arith.constant dense<0.000000e+00> : vector<1x176xf32>
      %261 = tpu.matmul %255, %260, %cst_118 {dimension_numbers = #tpu.dot_dimension_numbers<[1], [0], [0], [1], [0, 0, 1, 1], [], []>} : vector<1x128xbf16>, vector<128x176xbf16>, vector<1x176xf32> -> vector<1x176xf32>
      %262 = arith.addf %252, %261 : vector<1x176xf32>
      %c12_119 = arith.constant 12 : index
      %c0_120 = arith.constant 0 : index
      %263 = vector.load %arg6[%c12_119, %c0_120] : memref<15x128xbf16, #tpu.memory_space<vmem>>, vector<1x128xbf16>
      %264 = vector.shape_cast %263 : vector<1x128xbf16> to vector<128xbf16>
      %265 = vector.shape_cast %264 : vector<128xbf16> to vector<1x128xbf16>
      %266 = vector.extract_strided_slice %157 {offsets = [0, 64], sizes = [128, 176], strides = [1, 1]} : vector<128x242xbf16> to vector<128x176xbf16>
      %cst_121 = arith.constant 0.000000e+00 : bf16
      %267 = vector.broadcast %cst_121 : bf16 to vector<128x176xbf16>
      %268 = vector.shape_cast %18 : vector<1x176xi1> to vector<1x176xi1>
      %269 = vector.broadcast %268 : vector<1x176xi1> to vector<128x176xi1>
      %270 = arith.select %269, %266, %267 : vector<128x176xi1>, vector<128x176xbf16>
      %cst_122 = arith.constant dense<0.000000e+00> : vector<1x176xf32>
      %271 = tpu.matmul %265, %270, %cst_122 {dimension_numbers = #tpu.dot_dimension_numbers<[1], [0], [0], [1], [0, 0, 1, 1], [], []>} : vector<1x128xbf16>, vector<128x176xbf16>, vector<1x176xf32> -> vector<1x176xf32>
      %272 = arith.addf %262, %271 : vector<1x176xf32>
      %c13_123 = arith.constant 13 : index
      %c0_124 = arith.constant 0 : index
      %273 = vector.load %arg6[%c13_123, %c0_124] : memref<15x128xbf16, #tpu.memory_space<vmem>>, vector<1x128xbf16>
      %274 = vector.shape_cast %273 : vector<1x128xbf16> to vector<128xbf16>
      %275 = vector.shape_cast %274 : vector<128xbf16> to vector<1x128xbf16>
      %276 = vector.extract_strided_slice %157 {offsets = [0, 65], sizes = [128, 176], strides = [1, 1]} : vector<128x242xbf16> to vector<128x176xbf16>
      %cst_125 = arith.constant dense<0.000000e+00> : vector<1x176xf32>
      %277 = tpu.matmul %275, %276, %cst_125 {dimension_numbers = #tpu.dot_dimension_numbers<[1], [0], [0], [1], [0, 0, 1, 1], [], []>} : vector<1x128xbf16>, vector<128x176xbf16>, vector<1x176xf32> -> vector<1x176xf32>
      %278 = arith.addf %272, %277 : vector<1x176xf32>
      %c14_126 = arith.constant 14 : index
      %c0_127 = arith.constant 0 : index
      %279 = vector.load %arg6[%c14_126, %c0_127] : memref<15x128xbf16, #tpu.memory_space<vmem>>, vector<1x128xbf16>
      %280 = vector.shape_cast %279 : vector<1x128xbf16> to vector<128xbf16>
      %281 = vector.shape_cast %280 : vector<128xbf16> to vector<1x128xbf16>
      %282 = vector.extract_strided_slice %157 {offsets = [0, 66], sizes = [128, 176], strides = [1, 1]} : vector<128x242xbf16> to vector<128x176xbf16>
      %cst_128 = arith.constant 0.000000e+00 : bf16
      %283 = vector.broadcast %cst_128 : bf16 to vector<128x176xbf16>
      %284 = vector.shape_cast %20 : vector<1x176xi1> to vector<1x176xi1>
      %285 = vector.broadcast %284 : vector<1x176xi1> to vector<128x176xi1>
      %286 = arith.select %285, %282, %283 : vector<128x176xi1>, vector<128x176xbf16>
      %cst_129 = arith.constant dense<0.000000e+00> : vector<1x176xf32>
      %287 = tpu.matmul %281, %286, %cst_129 {dimension_numbers = #tpu.dot_dimension_numbers<[1], [0], [0], [1], [0, 0, 1, 1], [], []>} : vector<1x128xbf16>, vector<128x176xbf16>, vector<1x176xf32> -> vector<1x176xf32>
      %288 = arith.addf %278, %287 : vector<1x176xf32>
      %c0_130 = arith.constant 0 : index
      %c0_131 = arith.constant 0 : index
      %289 = vector.load %arg7[%c0_130, %c0_131] : memref<1x1xf32, #tpu.memory_space<vmem>>, vector<1x1xf32>
      %290 = vector.broadcast %289 : vector<1x1xf32> to vector<1x176xf32>
      %291 = arith.addf %288, %290 : vector<1x176xf32>
      %292 = arith.index_cast %arg9 : i32 to index
      %c0_132 = arith.constant 0 : index
      %293 = vector.load %arg8[%292, %c0_132] : memref<8x176xf32, #tpu.memory_space<vmem>>, vector<1x176xf32>
      tpu.vector_store %arg8[%292, %c0_132], %291 {strides = array<i32>} : memref<8x176xf32, #tpu.memory_space<vmem>>, vector<1x176xf32>,
    }
    %c8_i32_6 = arith.constant 8 : i32
    return
  }
  func.func @transform_0(%arg0: i32) -> (i32, i32, i32) {
    %c0_i32 = arith.constant 0 : i32
    %c0_i32_0 = arith.constant 0 : i32
    %c0_i32_1 = arith.constant 0 : i32
    return %arg0, %c0_i32, %c0_i32_0 : i32, i32, i32
  }
  func.func @transform_1(%arg0: i32) -> (i32, i32) {
    %c0_i32 = arith.constant 0 : i32
    %c0_i32_0 = arith.constant 0 : i32
    %c0_i32_1 = arith.constant 0 : i32
    return %c0_i32, %c0_i32_0 : i32, i32
  }
  func.func @transform_2(%arg0: i32) -> (i32, i32) {
    %c0_i32 = arith.constant 0 : i32
    %c0_i32_0 = arith.constant 0 : i32
    %c0_i32_1 = arith.constant 0 : i32
    return %c0_i32, %c0_i32_0 : i32, i32
  }
  func.func @transform_3(%arg0: i32) -> (i32, i32, i32) {
    %c0_i32 = arith.constant 0 : i32
    %c0_i32_0 = arith.constant 0 : i32
    %c0_i32_1 = arith.constant 0 : i32
    %c0_i32_2 = arith.constant 0 : i32
    return %c0_i32, %c0_i32_0, %c0_i32_1 : i32, i32, i32
  }
  func.func @transform_4(%arg0: i32) -> (i32, i32) {
    %c0_i32 = arith.constant 0 : i32
    %c0_i32_0 = arith.constant 0 : i32
    %c0_i32_1 = arith.constant 0 : i32
    return %c0_i32, %c0_i32_0 : i32, i32
  }
  func.func @transform_5(%arg0: i32) -> (i32, i32) {
    %c0_i32 = arith.constant 0 : i32
    %c0_i32_0 = arith.constant 0 : i32
    %c0_i32_1 = arith.constant 0 : i32
    return %c0_i32, %c0_i32_0 : i32, i32
  }
  func.func @transform_6(%arg0: i32) -> (i32, i32) {
    %c0_i32 = arith.constant 0 : i32
    %c0_i32_0 = arith.constant 0 : i32
    %c0_i32_1 = arith.constant 0 : i32
    return %c0_i32, %c0_i32_0 : i32, i32
  }
  func.func @transform_7(%arg0: i32) -> (i32, i32) {
    %c0_i32 = arith.constant 0 : i32
    %c0_i32_0 = arith.constant 0 : i32
    return %arg0, %c0_i32 : i32, i32
  }
}

module attributes {stable_mosaic.version = 11 : i64} {
  func.func @_gru_kernel(%arg0: i32, %arg1: memref<16x176xf32, #tpu.memory_space<vmem>>, %arg2: memref<176x64xbf16, #tpu.memory_space<vmem>>, %arg3: memref<1x64xf32, #tpu.memory_space<vmem>>, %arg4: memref<32x64xf32, #tpu.memory_space<vmem>>, %arg5: memref<32x4xf32, #tpu.memory_space<vmem>>, %arg6: memref<1x4xf32, #tpu.memory_space<vmem>>, %arg7: memref<16x4xf32, #tpu.memory_space<vmem>>) attributes {dimension_semantics = [#tpu.dimension_semantics<arbitrary>], iteration_bounds = array<i64: 1>, scalar_prefetch = 0 : i64, scratch_operands = 0 : i64, tpu.core_type = #tpu.core_type<tc>, window_params = [{pipeline_mode = #tpu.pipeline_mode<synchronous>, transform_indices = @transform_0, window_bounds = array<i64: 16, 176>}, {pipeline_mode = #tpu.pipeline_mode<synchronous>, transform_indices = @transform_1, window_bounds = array<i64: 176, 64>}, {pipeline_mode = #tpu.pipeline_mode<synchronous>, transform_indices = @transform_2, window_bounds = array<i64: 1, 64>}, {pipeline_mode = #tpu.pipeline_mode<synchronous>, transform_indices = @transform_3, window_bounds = array<i64: 32, 64>}, {pipeline_mode = #tpu.pipeline_mode<synchronous>, transform_indices = @transform_4, window_bounds = array<i64: 32, 4>}, {pipeline_mode = #tpu.pipeline_mode<synchronous>, transform_indices = @transform_5, window_bounds = array<i64: 1, 4>}, {pipeline_mode = #tpu.pipeline_mode<synchronous>, transform_indices = @transform_6, window_bounds = array<i64: 16, 4>}]} {
    %c0 = arith.constant 0 : index
    %c0_0 = arith.constant 0 : index
    %0 = vector.load %arg1[%c0, %c0_0] : memref<16x176xf32, #tpu.memory_space<vmem>>, vector<16x176xf32>
    %1 = arith.truncf %0 : vector<16x176xf32> to vector<16x176xbf16>
    %c0_1 = arith.constant 0 : index
    %c0_2 = arith.constant 0 : index
    %2 = vector.load %arg2[%c0_1, %c0_2] : memref<176x64xbf16, #tpu.memory_space<vmem>>, vector<176x64xbf16>
    %cst = arith.constant dense<0.000000e+00> : vector<16x64xf32>
    %3 = tpu.matmul %1, %2, %cst {dimension_numbers = #tpu.dot_dimension_numbers<[1], [0], [0], [1], [0, 0, 1, 1], [], []>} : vector<16x176xbf16>, vector<176x64xbf16>, vector<16x64xf32> -> vector<16x64xf32>
    %c0_3 = arith.constant 0 : index
    %c0_4 = arith.constant 0 : index
    %4 = vector.load %arg3[%c0_3, %c0_4] : memref<1x64xf32, #tpu.memory_space<vmem>>, vector<1x64xf32>
    %5 = vector.broadcast %4 : vector<1x64xf32> to vector<16x64xf32>
    %6 = arith.addf %3, %5 : vector<16x64xf32>
    %cst_5 = arith.constant 0.000000e+00 : f32
    %7 = vector.broadcast %cst_5 : f32 to vector<2x32xf32>
    %8 = vector.extract_strided_slice %6 {offsets = [0, 0], sizes = [2, 64], strides = [1, 1]} : vector<16x64xf32> to vector<2x64xf32>
    %c0_6 = arith.constant 0 : index
    %c0_7 = arith.constant 0 : index
    %9 = vector.load %arg4[%c0_6, %c0_7] : memref<32x64xf32, #tpu.memory_space<vmem>>, vector<32x64xf32>
    %cst_8 = arith.constant dense<0.000000e+00> : vector<2x64xf32>
    %10 = tpu.matmul %7, %9, %cst_8 {dimension_numbers = #tpu.dot_dimension_numbers<[1], [0], [0], [1], [0, 0, 1, 1], [], []>} : vector<2x32xf32>, vector<32x64xf32>, vector<2x64xf32> -> vector<2x64xf32>
    %11 = arith.addf %8, %10 : vector<2x64xf32>
    %12 = vector.extract_strided_slice %11 {offsets = [0, 0], sizes = [2, 32], strides = [1, 1]} : vector<2x64xf32> to vector<2x32xf32>
    %13 = arith.negf %12 : vector<2x32xf32>
    %14 = math.exp %13 : vector<2x32xf32>
    %cst_9 = arith.constant 1.000000e+00 : f32
    %15 = vector.broadcast %cst_9 : f32 to vector<2x32xf32>
    %16 = arith.addf %15, %14 : vector<2x32xf32>
    %17 = arith.divf %15, %16 : vector<2x32xf32>
    %18 = vector.extract_strided_slice %11 {offsets = [0, 32], sizes = [2, 32], strides = [1, 1]} : vector<2x64xf32> to vector<2x32xf32>
    %cst_10 = arith.constant 0.000000e+00 : f32
    %19 = vector.broadcast %cst_10 : f32 to vector<2x32xf32>
    %20 = arith.maximumf %18, %19 : vector<2x32xf32>
    %21 = arith.mulf %17, %7 : vector<2x32xf32>
    %cst_11 = arith.constant 1.000000e+00 : f32
    %22 = vector.broadcast %cst_11 : f32 to vector<2x32xf32>
    %23 = arith.subf %22, %17 : vector<2x32xf32>
    %24 = arith.mulf %23, %20 : vector<2x32xf32>
    %25 = arith.addf %21, %24 : vector<2x32xf32>
    %26 = vector.extract_strided_slice %6 {offsets = [2, 0], sizes = [2, 64], strides = [1, 1]} : vector<16x64xf32> to vector<2x64xf32>
    %c0_12 = arith.constant 0 : index
    %c0_13 = arith.constant 0 : index
    %27 = vector.load %arg4[%c0_12, %c0_13] : memref<32x64xf32, #tpu.memory_space<vmem>>, vector<32x64xf32>
    %cst_14 = arith.constant dense<0.000000e+00> : vector<2x64xf32>
    %28 = tpu.matmul %25, %27, %cst_14 {dimension_numbers = #tpu.dot_dimension_numbers<[1], [0], [0], [1], [0, 0, 1, 1], [], []>} : vector<2x32xf32>, vector<32x64xf32>, vector<2x64xf32> -> vector<2x64xf32>
    %29 = arith.addf %26, %28 : vector<2x64xf32>
    %30 = vector.extract_strided_slice %29 {offsets = [0, 0], sizes = [2, 32], strides = [1, 1]} : vector<2x64xf32> to vector<2x32xf32>
    %31 = arith.negf %30 : vector<2x32xf32>
    %32 = math.exp %31 : vector<2x32xf32>
    %cst_15 = arith.constant 1.000000e+00 : f32
    %33 = vector.broadcast %cst_15 : f32 to vector<2x32xf32>
    %34 = arith.addf %33, %32 : vector<2x32xf32>
    %35 = arith.divf %33, %34 : vector<2x32xf32>
    %36 = vector.extract_strided_slice %29 {offsets = [0, 32], sizes = [2, 32], strides = [1, 1]} : vector<2x64xf32> to vector<2x32xf32>
    %cst_16 = arith.constant 0.000000e+00 : f32
    %37 = vector.broadcast %cst_16 : f32 to vector<2x32xf32>
    %38 = arith.maximumf %36, %37 : vector<2x32xf32>
    %39 = arith.mulf %35, %25 : vector<2x32xf32>
    %cst_17 = arith.constant 1.000000e+00 : f32
    %40 = vector.broadcast %cst_17 : f32 to vector<2x32xf32>
    %41 = arith.subf %40, %35 : vector<2x32xf32>
    %42 = arith.mulf %41, %38 : vector<2x32xf32>
    %43 = arith.addf %39, %42 : vector<2x32xf32>
    %44 = vector.extract_strided_slice %6 {offsets = [4, 0], sizes = [2, 64], strides = [1, 1]} : vector<16x64xf32> to vector<2x64xf32>
    %c0_18 = arith.constant 0 : index
    %c0_19 = arith.constant 0 : index
    %45 = vector.load %arg4[%c0_18, %c0_19] : memref<32x64xf32, #tpu.memory_space<vmem>>, vector<32x64xf32>
    %cst_20 = arith.constant dense<0.000000e+00> : vector<2x64xf32>
    %46 = tpu.matmul %43, %45, %cst_20 {dimension_numbers = #tpu.dot_dimension_numbers<[1], [0], [0], [1], [0, 0, 1, 1], [], []>} : vector<2x32xf32>, vector<32x64xf32>, vector<2x64xf32> -> vector<2x64xf32>
    %47 = arith.addf %44, %46 : vector<2x64xf32>
    %48 = vector.extract_strided_slice %47 {offsets = [0, 0], sizes = [2, 32], strides = [1, 1]} : vector<2x64xf32> to vector<2x32xf32>
    %49 = arith.negf %48 : vector<2x32xf32>
    %50 = math.exp %49 : vector<2x32xf32>
    %cst_21 = arith.constant 1.000000e+00 : f32
    %51 = vector.broadcast %cst_21 : f32 to vector<2x32xf32>
    %52 = arith.addf %51, %50 : vector<2x32xf32>
    %53 = arith.divf %51, %52 : vector<2x32xf32>
    %54 = vector.extract_strided_slice %47 {offsets = [0, 32], sizes = [2, 32], strides = [1, 1]} : vector<2x64xf32> to vector<2x32xf32>
    %cst_22 = arith.constant 0.000000e+00 : f32
    %55 = vector.broadcast %cst_22 : f32 to vector<2x32xf32>
    %56 = arith.maximumf %54, %55 : vector<2x32xf32>
    %57 = arith.mulf %53, %43 : vector<2x32xf32>
    %cst_23 = arith.constant 1.000000e+00 : f32
    %58 = vector.broadcast %cst_23 : f32 to vector<2x32xf32>
    %59 = arith.subf %58, %53 : vector<2x32xf32>
    %60 = arith.mulf %59, %56 : vector<2x32xf32>
    %61 = arith.addf %57, %60 : vector<2x32xf32>
    %62 = vector.extract_strided_slice %6 {offsets = [6, 0], sizes = [2, 64], strides = [1, 1]} : vector<16x64xf32> to vector<2x64xf32>
    %c0_24 = arith.constant 0 : index
    %c0_25 = arith.constant 0 : index
    %63 = vector.load %arg4[%c0_24, %c0_25] : memref<32x64xf32, #tpu.memory_space<vmem>>, vector<32x64xf32>
    %cst_26 = arith.constant dense<0.000000e+00> : vector<2x64xf32>
    %64 = tpu.matmul %61, %63, %cst_26 {dimension_numbers = #tpu.dot_dimension_numbers<[1], [0], [0], [1], [0, 0, 1, 1], [], []>} : vector<2x32xf32>, vector<32x64xf32>, vector<2x64xf32> -> vector<2x64xf32>
    %65 = arith.addf %62, %64 : vector<2x64xf32>
    %66 = vector.extract_strided_slice %65 {offsets = [0, 0], sizes = [2, 32], strides = [1, 1]} : vector<2x64xf32> to vector<2x32xf32>
    %67 = arith.negf %66 : vector<2x32xf32>
    %68 = math.exp %67 : vector<2x32xf32>
    %cst_27 = arith.constant 1.000000e+00 : f32
    %69 = vector.broadcast %cst_27 : f32 to vector<2x32xf32>
    %70 = arith.addf %69, %68 : vector<2x32xf32>
    %71 = arith.divf %69, %70 : vector<2x32xf32>
    %72 = vector.extract_strided_slice %65 {offsets = [0, 32], sizes = [2, 32], strides = [1, 1]} : vector<2x64xf32> to vector<2x32xf32>
    %cst_28 = arith.constant 0.000000e+00 : f32
    %73 = vector.broadcast %cst_28 : f32 to vector<2x32xf32>
    %74 = arith.maximumf %72, %73 : vector<2x32xf32>
    %75 = arith.mulf %71, %61 : vector<2x32xf32>
    %cst_29 = arith.constant 1.000000e+00 : f32
    %76 = vector.broadcast %cst_29 : f32 to vector<2x32xf32>
    %77 = arith.subf %76, %71 : vector<2x32xf32>
    %78 = arith.mulf %77, %74 : vector<2x32xf32>
    %79 = arith.addf %75, %78 : vector<2x32xf32>
    %80 = vector.extract_strided_slice %6 {offsets = [8, 0], sizes = [2, 64], strides = [1, 1]} : vector<16x64xf32> to vector<2x64xf32>
    %c0_30 = arith.constant 0 : index
    %c0_31 = arith.constant 0 : index
    %81 = vector.load %arg4[%c0_30, %c0_31] : memref<32x64xf32, #tpu.memory_space<vmem>>, vector<32x64xf32>
    %cst_32 = arith.constant dense<0.000000e+00> : vector<2x64xf32>
    %82 = tpu.matmul %79, %81, %cst_32 {dimension_numbers = #tpu.dot_dimension_numbers<[1], [0], [0], [1], [0, 0, 1, 1], [], []>} : vector<2x32xf32>, vector<32x64xf32>, vector<2x64xf32> -> vector<2x64xf32>
    %83 = arith.addf %80, %82 : vector<2x64xf32>
    %84 = vector.extract_strided_slice %83 {offsets = [0, 0], sizes = [2, 32], strides = [1, 1]} : vector<2x64xf32> to vector<2x32xf32>
    %85 = arith.negf %84 : vector<2x32xf32>
    %86 = math.exp %85 : vector<2x32xf32>
    %cst_33 = arith.constant 1.000000e+00 : f32
    %87 = vector.broadcast %cst_33 : f32 to vector<2x32xf32>
    %88 = arith.addf %87, %86 : vector<2x32xf32>
    %89 = arith.divf %87, %88 : vector<2x32xf32>
    %90 = vector.extract_strided_slice %83 {offsets = [0, 32], sizes = [2, 32], strides = [1, 1]} : vector<2x64xf32> to vector<2x32xf32>
    %cst_34 = arith.constant 0.000000e+00 : f32
    %91 = vector.broadcast %cst_34 : f32 to vector<2x32xf32>
    %92 = arith.maximumf %90, %91 : vector<2x32xf32>
    %93 = arith.mulf %89, %79 : vector<2x32xf32>
    %cst_35 = arith.constant 1.000000e+00 : f32
    %94 = vector.broadcast %cst_35 : f32 to vector<2x32xf32>
    %95 = arith.subf %94, %89 : vector<2x32xf32>
    %96 = arith.mulf %95, %92 : vector<2x32xf32>
    %97 = arith.addf %93, %96 : vector<2x32xf32>
    %98 = vector.extract_strided_slice %6 {offsets = [10, 0], sizes = [2, 64], strides = [1, 1]} : vector<16x64xf32> to vector<2x64xf32>
    %c0_36 = arith.constant 0 : index
    %c0_37 = arith.constant 0 : index
    %99 = vector.load %arg4[%c0_36, %c0_37] : memref<32x64xf32, #tpu.memory_space<vmem>>, vector<32x64xf32>
    %cst_38 = arith.constant dense<0.000000e+00> : vector<2x64xf32>
    %100 = tpu.matmul %97, %99, %cst_38 {dimension_numbers = #tpu.dot_dimension_numbers<[1], [0], [0], [1], [0, 0, 1, 1], [], []>} : vector<2x32xf32>, vector<32x64xf32>, vector<2x64xf32> -> vector<2x64xf32>
    %101 = arith.addf %98, %100 : vector<2x64xf32>
    %102 = vector.extract_strided_slice %101 {offsets = [0, 0], sizes = [2, 32], strides = [1, 1]} : vector<2x64xf32> to vector<2x32xf32>
    %103 = arith.negf %102 : vector<2x32xf32>
    %104 = math.exp %103 : vector<2x32xf32>
    %cst_39 = arith.constant 1.000000e+00 : f32
    %105 = vector.broadcast %cst_39 : f32 to vector<2x32xf32>
    %106 = arith.addf %105, %104 : vector<2x32xf32>
    %107 = arith.divf %105, %106 : vector<2x32xf32>
    %108 = vector.extract_strided_slice %101 {offsets = [0, 32], sizes = [2, 32], strides = [1, 1]} : vector<2x64xf32> to vector<2x32xf32>
    %cst_40 = arith.constant 0.000000e+00 : f32
    %109 = vector.broadcast %cst_40 : f32 to vector<2x32xf32>
    %110 = arith.maximumf %108, %109 : vector<2x32xf32>
    %111 = arith.mulf %107, %97 : vector<2x32xf32>
    %cst_41 = arith.constant 1.000000e+00 : f32
    %112 = vector.broadcast %cst_41 : f32 to vector<2x32xf32>
    %113 = arith.subf %112, %107 : vector<2x32xf32>
    %114 = arith.mulf %113, %110 : vector<2x32xf32>
    %115 = arith.addf %111, %114 : vector<2x32xf32>
    %116 = vector.extract_strided_slice %6 {offsets = [12, 0], sizes = [2, 64], strides = [1, 1]} : vector<16x64xf32> to vector<2x64xf32>
    %c0_42 = arith.constant 0 : index
    %c0_43 = arith.constant 0 : index
    %117 = vector.load %arg4[%c0_42, %c0_43] : memref<32x64xf32, #tpu.memory_space<vmem>>, vector<32x64xf32>
    %cst_44 = arith.constant dense<0.000000e+00> : vector<2x64xf32>
    %118 = tpu.matmul %115, %117, %cst_44 {dimension_numbers = #tpu.dot_dimension_numbers<[1], [0], [0], [1], [0, 0, 1, 1], [], []>} : vector<2x32xf32>, vector<32x64xf32>, vector<2x64xf32> -> vector<2x64xf32>
    %119 = arith.addf %116, %118 : vector<2x64xf32>
    %120 = vector.extract_strided_slice %119 {offsets = [0, 0], sizes = [2, 32], strides = [1, 1]} : vector<2x64xf32> to vector<2x32xf32>
    %121 = arith.negf %120 : vector<2x32xf32>
    %122 = math.exp %121 : vector<2x32xf32>
    %cst_45 = arith.constant 1.000000e+00 : f32
    %123 = vector.broadcast %cst_45 : f32 to vector<2x32xf32>
    %124 = arith.addf %123, %122 : vector<2x32xf32>
    %125 = arith.divf %123, %124 : vector<2x32xf32>
    %126 = vector.extract_strided_slice %119 {offsets = [0, 32], sizes = [2, 32], strides = [1, 1]} : vector<2x64xf32> to vector<2x32xf32>
    %cst_46 = arith.constant 0.000000e+00 : f32
    %127 = vector.broadcast %cst_46 : f32 to vector<2x32xf32>
    %128 = arith.maximumf %126, %127 : vector<2x32xf32>
    %129 = arith.mulf %125, %115 : vector<2x32xf32>
    %cst_47 = arith.constant 1.000000e+00 : f32
    %130 = vector.broadcast %cst_47 : f32 to vector<2x32xf32>
    %131 = arith.subf %130, %125 : vector<2x32xf32>
    %132 = arith.mulf %131, %128 : vector<2x32xf32>
    %133 = arith.addf %129, %132 : vector<2x32xf32>
    %134 = vector.extract_strided_slice %6 {offsets = [14, 0], sizes = [2, 64], strides = [1, 1]} : vector<16x64xf32> to vector<2x64xf32>
    %c0_48 = arith.constant 0 : index
    %c0_49 = arith.constant 0 : index
    %135 = vector.load %arg4[%c0_48, %c0_49] : memref<32x64xf32, #tpu.memory_space<vmem>>, vector<32x64xf32>
    %cst_50 = arith.constant dense<0.000000e+00> : vector<2x64xf32>
    %136 = tpu.matmul %133, %135, %cst_50 {dimension_numbers = #tpu.dot_dimension_numbers<[1], [0], [0], [1], [0, 0, 1, 1], [], []>} : vector<2x32xf32>, vector<32x64xf32>, vector<2x64xf32> -> vector<2x64xf32>
    %137 = arith.addf %134, %136 : vector<2x64xf32>
    %138 = vector.extract_strided_slice %137 {offsets = [0, 0], sizes = [2, 32], strides = [1, 1]} : vector<2x64xf32> to vector<2x32xf32>
    %139 = arith.negf %138 : vector<2x32xf32>
    %140 = math.exp %139 : vector<2x32xf32>
    %cst_51 = arith.constant 1.000000e+00 : f32
    %141 = vector.broadcast %cst_51 : f32 to vector<2x32xf32>
    %142 = arith.addf %141, %140 : vector<2x32xf32>
    %143 = arith.divf %141, %142 : vector<2x32xf32>
    %144 = vector.extract_strided_slice %137 {offsets = [0, 32], sizes = [2, 32], strides = [1, 1]} : vector<2x64xf32> to vector<2x32xf32>
    %cst_52 = arith.constant 0.000000e+00 : f32
    %145 = vector.broadcast %cst_52 : f32 to vector<2x32xf32>
    %146 = arith.maximumf %144, %145 : vector<2x32xf32>
    %147 = arith.mulf %143, %133 : vector<2x32xf32>
    %cst_53 = arith.constant 1.000000e+00 : f32
    %148 = vector.broadcast %cst_53 : f32 to vector<2x32xf32>
    %149 = arith.subf %148, %143 : vector<2x32xf32>
    %150 = arith.mulf %149, %146 : vector<2x32xf32>
    %151 = arith.addf %147, %150 : vector<2x32xf32>
    %152 = tpu.concatenate %25, %43, %61, %79, %97, %115, %133, %151 in 0 : vector<2x32xf32>, vector<2x32xf32>, vector<2x32xf32>, vector<2x32xf32>, vector<2x32xf32>, vector<2x32xf32>, vector<2x32xf32>, vector<2x32xf32> -> vector<16x32xf32>
    %c0_54 = arith.constant 0 : index
    %c0_55 = arith.constant 0 : index
    %153 = vector.load %arg5[%c0_54, %c0_55] : memref<32x4xf32, #tpu.memory_space<vmem>>, vector<32x4xf32>
    %cst_56 = arith.constant dense<0.000000e+00> : vector<16x4xf32>
    %154 = tpu.matmul %152, %153, %cst_56 {dimension_numbers = #tpu.dot_dimension_numbers<[1], [0], [0], [1], [0, 0, 1, 1], [], []>} : vector<16x32xf32>, vector<32x4xf32>, vector<16x4xf32> -> vector<16x4xf32>
    %c0_57 = arith.constant 0 : index
    %c0_58 = arith.constant 0 : index
    %155 = vector.load %arg6[%c0_57, %c0_58] : memref<1x4xf32, #tpu.memory_space<vmem>>, vector<1x4xf32>
    %156 = vector.broadcast %155 : vector<1x4xf32> to vector<16x4xf32>
    %157 = arith.addf %154, %156 : vector<16x4xf32>
    %c0_59 = arith.constant 0 : index
    %c0_60 = arith.constant 0 : index
    %158 = vector.load %arg7[%c0_59, %c0_60] : memref<16x4xf32, #tpu.memory_space<vmem>>, vector<16x4xf32>
    tpu.vector_store %arg7[%c0_59, %c0_60], %157 {strides = array<i32>} : memref<16x4xf32, #tpu.memory_space<vmem>>, vector<16x4xf32>,
    return
  }
  func.func @transform_0(%arg0: i32) -> (i32, i32) {
    %c0_i32 = arith.constant 0 : i32
    %c0_i32_0 = arith.constant 0 : i32
    %c0_i32_1 = arith.constant 0 : i32
    return %c0_i32, %c0_i32_0 : i32, i32
  }
  func.func @transform_1(%arg0: i32) -> (i32, i32) {
    %c0_i32 = arith.constant 0 : i32
    %c0_i32_0 = arith.constant 0 : i32
    %c0_i32_1 = arith.constant 0 : i32
    return %c0_i32, %c0_i32_0 : i32, i32
  }
  func.func @transform_2(%arg0: i32) -> (i32, i32) {
    %c0_i32 = arith.constant 0 : i32
    %c0_i32_0 = arith.constant 0 : i32
    %c0_i32_1 = arith.constant 0 : i32
    return %c0_i32, %c0_i32_0 : i32, i32
  }
  func.func @transform_3(%arg0: i32) -> (i32, i32) {
    %c0_i32 = arith.constant 0 : i32
    %c0_i32_0 = arith.constant 0 : i32
    %c0_i32_1 = arith.constant 0 : i32
    return %c0_i32, %c0_i32_0 : i32, i32
  }
  func.func @transform_4(%arg0: i32) -> (i32, i32) {
    %c0_i32 = arith.constant 0 : i32
    %c0_i32_0 = arith.constant 0 : i32
    %c0_i32_1 = arith.constant 0 : i32
    return %c0_i32, %c0_i32_0 : i32, i32
  }
  func.func @transform_5(%arg0: i32) -> (i32, i32) {
    %c0_i32 = arith.constant 0 : i32
    %c0_i32_0 = arith.constant 0 : i32
    %c0_i32_1 = arith.constant 0 : i32
    return %c0_i32, %c0_i32_0 : i32, i32
  }
  func.func @transform_6(%arg0: i32) -> (i32, i32) {
    %c0_i32 = arith.constant 0 : i32
    %c0_i32_0 = arith.constant 0 : i32
    %c0_i32_1 = arith.constant 0 : i32
    return %c0_i32, %c0_i32_0 : i32, i32
  }
}

</mosaic_0001>

<bundles_post_ra>
// kernel: cnn_gru_forward.3
= control target key start
LH: loop header
LB: loop body
LE: loop exit
PB: predicated region body
PF: predicated region fallthrough
CT: control target
= control target key end

     0   :  { %v1311_v0 = vmov 0   ;;  %v1312_v2 = vmov 0.0|0.0   ;;  %vm1313_vm0 = vmmov 0   ;;  %v1314_v3 = vmov 0.0   ;;  %s1520_s1 = inlined_call_operand.vmem [shape: bf16[176,64], index: 1, kind: input, shape index: {}]   ;;  %s1521_s3 = inlined_call_operand.vmem [shape: f32[32,64], index: 3, kind: input, shape index: {}]   ;;  %s1522_s0 = inlined_call_operand.vmem [shape: f32[16,176], index: 0, kind: input, shape index: {}]   ;;  %s1523_s2 = inlined_call_operand.vmem [shape: f32[1,64], index: 2, kind: input, shape index: {}]   ;;  %s1524_s4 = inlined_call_operand.vmem [shape: f32[32,4], index: 4, kind: input, shape index: {}]   ;;  %s1525_s5 = inlined_call_operand.vmem [shape: f32[1,4], index: 5, kind: input, shape index: {}]   ;;  %s1526_s6 = inlined_call_operand.vmem [shape: f32[16,4], index: 6, kind: output, shape index: {}]  }
   0x1   :  { %129 = vmatprep.subr.bf16.mxu0 %v1311_v0  ;;  %v1268_v1 = vld [vmem:[%s1520_s1] sm:$0xff]   ;;  %1207 = vmatprep.subr.bf16.mxu1 %v1312_v2  ;;  %v1269_v4 = vld [vmem:[%s1520_s1 + $0x8] sm:$0xff]   ;;  %v1270_v5 = vld [vmem:[%s1520_s1 + $0x10] sm:$0xff]   ;;  %vm125_vm1 = vcmask 392192   ;;  %vm174_vm2 = vcmask 261120   ;;  %vm923_vm3 = vcmask 1041408  }
   0x2   :  { %1116 = vmatprep.mubr.msk.f32.mxu1 %vm1313_vm0, %v1314_v3  ;;  %130 = vmatpush1.bf16.msra.mxu0 %v1268_v1  ;;  %v1271_v6 = vld [vmem:[%s1520_s1 + $0x18] sm:$0xff]   ;;  %v170_v7 = vld [vmem:[%s1521_s3] sm:$0xff]  ;;  %v171_v8 = vld [vmem:[%s1521_s3 + $0x8] sm:$0xff]  ;;  %vm925_vm4 = vcmask 1043456   ;;  %vm927_vm5 = vcmask 1045504   ;;  %vm1024_vm6 = vcmask 31744  }
   0x3   :  { %131 = vmatprep.subr.bf16.mxu0 %v1311_v0  ;;  %v1372_v9 = vpack.c.bf16 %v171_v8, %v170_v7  ;;  %v172_v10 = vld [vmem:[%s1521_s3 + $0x10] sm:$0xff]  ;;  %v173_v11 = vld [vmem:[%s1521_s3 + $0x18] sm:$0xff]  ;;  %v25_v12 = vld [vmem:[%s1522_s0 + $0x8] sm:$0xff] }
   0x4   :  { %v27_v13 = vld [vmem:[%s1522_s0 + $0x18] sm:$0xff]  ;;  %v1387_v14 = vpack.c.bf16 %v173_v11, %v172_v10  ;;  %v1272_v16 = vld [vmem:[%s1520_s1 + $0x20] sm:$0xff]   ;;  %v1273_v17 = vld [vmem:[%s1520_s1 + $0x28] sm:$0xff]  }
   0x5   :  { %1209 = vmatpush3.bf16.msra.mxu1 %v1372_v9  ;;  %v29_v15 = vpack.c.bf16 %v27_v13, %v25_v12  ;;  %v1274_v18 = vld [vmem:[%s1520_s1 + $0x30] sm:$0xff]   ;;  %v1275_v19 = vld [vmem:[%s1520_s1 + $0x38] sm:$0xff]   ;;  %v1276_v20 = vld [vmem:[%s1520_s1 + $0x40] sm:$0xff]  }
   0x6   :  { %132 = vmatpush1.bf16.msra.mxu0 %v1269_v4  ;;  %1210 = vmatprep.subr.bf16.mxu1 %v1312_v2  ;;  %v1277_v21 = vld [vmem:[%s1520_s1 + $0x48] sm:$0xff]   ;;  %v1278_v22 = vld [vmem:[%s1520_s1 + $0x50] sm:$0xff]   ;;  %v24_v23 = vld [vmem:[%s1522_s0] sm:$0xff] }
   0x7   :  { %133 = vmatprep.subr.bf16.mxu0 %v1311_v0  ;;  %1043 = vmatprep.mubr.msk.bf16.mxu0 %vm125_vm1, %v29_v15  ;;  %v26_v24 = vld [vmem:[%s1522_s0 + $0x10] sm:$0xff]  ;;  %v1031_v28 = vld [vmem:[%s1523_s2] ss:$0 sm:$0xff]  ;;  %s1315_s0 = smov 96  }
   0x8   :  { %v28_v25 = vpack.c.bf16 %v26_v24, %v24_v23 }
   0x9   :  { %1212 = vmatpush3.bf16.msra.mxu1 %v1387_v14 }
   0xa   :  { %134 = vmatpush1.bf16.msra.mxu0 %v1270_v5  ;;  %1213 = vmatprep.subr.bf16.mxu1 %v1312_v2 }
   0xb   :  { %135 = vmatprep.subr.bf16.mxu0 %v1311_v0 }
   0xc   :  { %1117 = vmatmul.mubr.f32.vlgmr.msra.gmra.mrb[0].mxu1 %v1314_v3 }
   0xd   :  { %1215 = vmatpush3.bf16.msra.mxu1 %v1372_v9  ;;  %1127 = vmatprep.mubr.msk.f32.mxu1 %vm1313_vm0, %v1314_v3 }
   0xe   :  { %136 = vmatpush1.bf16.msra.mxu0 %v1271_v6  ;;  %1216 = vmatprep.subr.bf16.mxu1 %v1312_v2 }
   0xf   :  { %137 = vmatprep.subr.bf16.mxu0 %v1311_v0 }
  0x11   :  { %1218 = vmatpush3.bf16.msra.mxu1 %v1387_v14 }
  0x12   :  { %138 = vmatpush1.bf16.msra.mxu0 %v1272_v16  ;;  %1219 = vmatprep.subr.bf16.mxu1 %v1312_v2 }
  0x13   :  { %139 = vmatprep.subr.bf16.mxu0 %v1311_v0 }
  0x16   :  { %140 = vmatpush1.bf16.msra.mxu0 %v1273_v17 }
  0x17   :  { %141 = vmatprep.subr.bf16.mxu0 %v1311_v0 }
  0x1a   :  { %142 = vmatpush1.bf16.msra.mxu0 %v1274_v18 }
  0x1b   :  { %143 = vmatprep.subr.bf16.mxu0 %v1311_v0 }
  0x1e   :  { %144 = vmatpush1.bf16.msra.mxu0 %v1275_v19 }
  0x1f   :  { %145 = vmatprep.subr.bf16.mxu0 %v1311_v0 }
  0x22   :  { %146 = vmatpush1.bf16.msra.mxu0 %v1276_v20 }
  0x23   :  { %147 = vmatprep.subr.bf16.mxu0 %v1311_v0 }
  0x26   :  { %148 = vmatpush1.bf16.msra.mxu0 %v1277_v21 }
  0x27   :  { %149 = vmatprep.subr.bf16.mxu0 %v1311_v0 }
  0x2a   :  { %150 = vmatpush1.bf16.msra.mxu0 %v1278_v22 }
  0x2b   :  { %1243 = vmatprep.subr.bf16.mxu0 %v1312_v2 }
  0x2d   :  { %162 = vmatmul.mubr.bf16.vlgmr.msra.gmra.mrb[0].mxu0 %v28_v25 }
  0x2e   :  { %1245 = vmatpush3.bf16.msra.mxu0 %v1372_v9  ;;  %1182 = vmatprep.mubr.msk.f32.mxu0 %vm1313_vm0, %v1314_v3 }
  0x2f   :  { %1246 = vmatprep.subr.bf16.mxu0 %v1312_v2 }
  0x32   :  { %1248 = vmatpush3.bf16.msra.mxu0 %v1387_v14 }
  0xdf   :  { %v244_v26 = vpop.f32.mrb[0].mxu1 }
  0xe0   :  { %v1118_v27 = vpop.f32.mrb[1].mxu1 }
 0x100   :  { %v163_v29 = vpop.f32.mrb[0].mxu0 }
 0x101   :  { %v1435_v30 = vadd.f32 %v1031_v28, %v163_v29  ;;  %v165_v31 = vpop.f32.mrb[1].mxu0 }
 0x102   :  { %v166_v32 = vpop.f32.mrb[2].mxu0 }
 0x103   :  { %v248_v33 = vadd.f32 %v244_v26, %v1435_v30  ;;  %v1438_v34 = vadd.f32 %v1031_v28, %v166_v32  ;;  %v168_v35 = vpop.f32.mrb[3].mxu0 }
 0x105   :  { %v255_v36 = vmax.f32 %v248_v33, 0.0  ;;  %v1044_v37 = vmul.f32 -1.442695, %v248_v33 }
 0x107   :  { %259 = vrot.lane.b32.xlu0 %v255_v36, %s1315_s0  ;;  %1279 = vpow2.f32 %v1044_v37 }
 0x111   :  { %v1280_v38 = vpop.eup %1279 }
 0x112   :  { %v252_v39 = vadd.f32 1.0, %v1280_v38 }
 0x114   :  { %1281 = vrcp.f32 %v252_v39 }
 0x11e   :  { %v1282_v40 = vpop.eup %1281 }
 0x11f   :  { %v257_v41 = vsub.f32 1.0, %v1282_v40  ;;  %v256_v43 = vmul.f32 0.0, %v1282_v40 }
 0x179   :  { %v260_v42 = vpop.permute.xlu0 %259 }
 0x17a   :  { %v262_v44 = vmul.f32 %v260_v42, %v257_v41 }
 0x17c   :  { %v263_v45 = vadd.f32 %v262_v44, %v256_v43 }
 0x17e   :  { %1128 = vmatmul.mubr.msk.f32.vlgmr.msra.gmra.mrb[2].mxu1 %vm174_vm2, %v263_v45  ;;  %v348_v55 = vrot.slane %v263_v45, 6 }
 0x17f   :  { %1221 = vmatpush3.bf16.msra.mxu1 %v1372_v9  ;;  %1138 = vmatprep.mubr.msk.f32.mxu1 %vm1313_vm0, %v1314_v3 }
 0x180   :  { %1222 = vmatprep.subr.bf16.mxu1 %v1312_v2 }
 0x183   :  { %1224 = vmatpush3.bf16.msra.mxu1 %v1387_v14 }
 0x184   :  { %1225 = vmatprep.subr.bf16.mxu1 %v1312_v2 }
 0x251   :  { %v333_v46 = vpop.f32.mrb[2].mxu1 }
 0x252   :  { %v338_v47 = vrot.slane %v333_v46, 6  ;;  %v1129_v48 = vpop.f32.mrb[3].mxu1 }
 0x254   :  { %v340_v49 = vadd.f32 %v338_v47, %v1435_v30 }
 0x256   :  { %v347_v50 = vmax.f32 %v340_v49, 0.0  ;;  %v1046_v51 = vmul.f32 -1.442695, %v340_v49 }
 0x258   :  { %353 = vrot.lane.b32.xlu0 %v347_v50, %s1315_s0  ;;  %1283 = vpow2.f32 %v1046_v51 }
 0x262   :  { %v1284_v52 = vpop.eup %1283 }
 0x263   :  { %v344_v53 = vadd.f32 1.0, %v1284_v52 }
 0x265   :  { %1285 = vrcp.f32 %v344_v53 }
 0x26f   :  { %v1286_v54 = vpop.eup %1285 }
 0x270   :  { %v351_v56 = vsub.f32 1.0, %v1286_v54  ;;  %v350_v58 = vmul.f32 %v1286_v54, %v348_v55 }
 0x2ca   :  { %v354_v57 = vpop.permute.xlu0 %353 }
 0x2cb   :  { %v356_v59 = vmul.f32 %v354_v57, %v351_v56 }
 0x2cd   :  { %v357_v60 = vadd.f32 %v356_v59, %v350_v58 }
 0x2cf   :  { %v359_v61 = vrot.slane %v357_v60, 2  ;;  %v443_v8 = vrot.slane %v357_v60, 6  ;;  %v924_v17 = vsel %vm923_vm3, %v263_v45, %v357_v60 }
 0x2d1   :  { %1139 = vmatmul.mubr.msk.f32.vlgmr.msra.gmra.mrb[4].mxu1 %vm174_vm2, %v359_v61 }
 0x2d2   :  { %1227 = vmatpush3.bf16.msra.mxu1 %v1372_v9  ;;  %1149 = vmatprep.mubr.msk.f32.mxu1 %vm1313_vm0, %v1314_v3 }
 0x2d3   :  { %1228 = vmatprep.subr.bf16.mxu1 %v1312_v2 }
 0x2d6   :  { %1230 = vmatpush3.bf16.msra.mxu1 %v1387_v14 }
 0x2d7   :  { %1231 = vmatprep.subr.bf16.mxu1 %v1312_v2 }
 0x3a4   :  { %v428_v62 = vpop.f32.mrb[4].mxu1 }
 0x3a5   :  { %v433_v63 = vrot.slane %v428_v62, 4  ;;  %v1140_v0 = vpop.f32.mrb[5].mxu1 }
 0x3a7   :  { %v435_v1 = vadd.f32 %v433_v63, %v1435_v30 }
 0x3a9   :  { %v1048_v4 = vmul.f32 -1.442695, %v435_v1  ;;  %v442_v5 = vmax.f32 %v435_v1, 0.0 }
 0x3ab   :  { %1287 = vpow2.f32 %v1048_v4  ;;  %448 = vrot.lane.b32.xlu1 %v442_v5, %s1315_s0 }
 0x3b5   :  { %v1288_v6 = vpop.eup %1287 }
 0x3b6   :  { %v439_v7 = vadd.f32 1.0, %v1288_v6 }
 0x3b8   :  { %1289 = vrcp.f32 %v439_v7 }
 0x3c2   :  { %v1290_v10 = vpop.eup %1289 }
 0x3c3   :  { %v445_v11 = vmul.f32 %v1290_v10, %v443_v8  ;;  %v446_v12 = vsub.f32 1.0, %v1290_v10 }
 0x41d   :  { %v449_v13 = vpop.permute.xlu1 %448 }
 0x41e   :  { %v451_v15 = vmul.f32 %v449_v13, %v446_v12 }
 0x420   :  { %v452_v16 = vadd.f32 %v451_v15, %v445_v11 }
 0x422   :  { %v454_v18 = vrot.slane %v452_v16, 4  ;;  %v926_v19 = vsel %vm925_vm4, %v924_v17, %v452_v16  ;;  %v538_v28 = vrot.slane %v452_v16, 6 }
 0x424   :  { %1150 = vmatmul.mubr.msk.f32.vlgmr.msra.gmra.mrb[6].mxu1 %vm174_vm2, %v454_v18 }
 0x425   :  { %1233 = vmatpush3.bf16.msra.mxu1 %v1372_v9  ;;  %1160 = vmatprep.mubr.msk.f32.mxu1 %vm1313_vm0, %v1314_v3 }
 0x426   :  { %1234 = vmatprep.subr.bf16.mxu1 %v1312_v2 }
 0x429   :  { %1236 = vmatpush3.bf16.msra.mxu1 %v1387_v14 }
 0x42a   :  { %1237 = vmatprep.subr.bf16.mxu1 %v1312_v2 }
 0x4f7   :  { %v523_v20 = vpop.f32.mrb[6].mxu1 }
 0x4f8   :  { %v528_v21 = vrot.slane %v523_v20, 2  ;;  %v1151_v22 = vpop.f32.mrb[7].mxu1 }
 0x4f9   :  { %v933_v22 = vld [vmem:[%s1524_s4 + $0x8] sm:$0xff] }
 0x4fa   :  { %v530_v23 = vadd.f32 %v528_v21, %v1435_v30  ;;  %v932_v21 = vld [vmem:[%s1524_s4] sm:$0xff] }
 0x4fc   :  { %v1050_v24 = vmul.f32 -1.442695, %v530_v23  ;;  %v537_v25 = vmax.f32 %v530_v23, 0.0  ;;  %v1255_v23 = vpack.c.bf16 %v933_v22, %v932_v21 }
 0x4fe   :  { %1291 = vpow2.f32 %v1050_v24  ;;  %543 = vrot.lane.b32.xlu1 %v537_v25, %s1315_s0  ;;  %1256 = vmatprep.subr.bf16.mxu0 %v1255_v23  ;;  %v934_v24 = vld [vmem:[%s1524_s4 + $0x10] sm:$0xff]  ;;  %v935_v25 = vld [vmem:[%s1524_s4 + $0x18] sm:$0xff] }
 0x508   :  { %v1292_v26 = vpop.eup %1291 }
 0x509   :  { %v534_v27 = vadd.f32 1.0, %v1292_v26  ;;  %v1259_v26 = vpack.c.bf16 %v935_v25, %v934_v24 }
 0x50b   :  { %1293 = vrcp.f32 %v534_v27 }
 0x515   :  { %v1294_v29 = vpop.eup %1293 }
 0x516   :  { %v540_v31 = vmul.f32 %v1294_v29, %v538_v28  ;;  %v541_v32 = vsub.f32 1.0, %v1294_v29 }
 0x570   :  { %v544_v33 = vpop.permute.xlu1 %543 }
 0x571   :  { %v546_v35 = vmul.f32 %v544_v33, %v541_v32 }
 0x573   :  { %v547_v36 = vadd.f32 %v546_v35, %v540_v31 }
 0x575   :  { %v549_v37 = vrot.slane %v547_v36, 6  ;;  %v928_v38 = vsel %vm927_vm5, %v926_v19, %v547_v36 }
 0x577   :  { %1161 = vmatmul.mubr.msk.f32.vlgmr.msra.gmra.mrb[8].mxu1 %vm174_vm2, %v549_v37 }
 0x578   :  { %1239 = vmatpush3.bf16.msra.mxu1 %v1372_v9  ;;  %1171 = vmatprep.mubr.msk.f32.mxu1 %vm1313_vm0, %v1314_v3 }
 0x579   :  { %1240 = vmatprep.subr.bf16.mxu1 %v1312_v2 }
 0x57c   :  { %1242 = vmatpush3.bf16.msra.mxu1 %v1387_v14 }
 0x57d   :  { %1249 = vmatprep.subr.bf16.mxu1 %v1312_v2 }
 0x64a   :  { %v618_v30 = vpop.f32.mrb[8].mxu1 }
 0x64b   :  { %v622_v39 = vadd.f32 %v618_v30, %v1438_v34  ;;  %v1162_v40 = vpop.f32.mrb[9].mxu1 }
 0x64d   :  { %v629_v41 = vmax.f32 %v622_v39, 0.0  ;;  %v1052_v42 = vmul.f32 -1.442695, %v622_v39 }
 0x64f   :  { %634 = vrot.lane.b32.xlu0 %v629_v41, %s1315_s0  ;;  %1295 = vpow2.f32 %v1052_v42 }
 0x659   :  { %v1296_v43 = vpop.eup %1295 }
 0x65a   :  { %v626_v44 = vadd.f32 1.0, %v1296_v43 }
 0x65c   :  { %1297 = vrcp.f32 %v626_v44 }
 0x666   :  { %v1298_v45 = vpop.eup %1297 }
 0x667   :  { %v632_v46 = vsub.f32 1.0, %v1298_v45  ;;  %v631_v48 = vmul.f32 %v1298_v45, %v549_v37 }
 0x6c1   :  { %v635_v47 = vpop.permute.xlu0 %634 }
 0x6c2   :  { %v637_v49 = vmul.f32 %v635_v47, %v632_v46 }
 0x6c4   :  { %v638_v50 = vadd.f32 %v637_v49, %v631_v48 }
 0x6c6   :  { %1172 = vmatmul.mubr.msk.f32.vlgmr.msra.gmra.mrb[10].mxu1 %vm174_vm2, %v638_v50  ;;  %v723_v59 = vrot.slane %v638_v50, 6 }
 0x6c7   :  { %1251 = vmatpush3.bf16.msra.mxu1 %v1372_v9  ;;  %1193 = vmatprep.mubr.msk.f32.mxu1 %vm1313_vm0, %v1314_v3 }
 0x6c8   :  { %1252 = vmatprep.subr.bf16.mxu1 %v1312_v2 }
 0x6cb   :  { %1254 = vmatpush3.bf16.msra.mxu1 %v1387_v14 }
 0x799   :  { %v708_v51 = vpop.f32.mrb[10].mxu1 }
 0x79a   :  { %v713_v52 = vrot.slane %v708_v51, 6  ;;  %v1173_v53 = vpop.f32.mrb[11].mxu1 }
 0x79c   :  { %v715_v54 = vadd.f32 %v713_v52, %v1438_v34 }
 0x79e   :  { %v722_v55 = vmax.f32 %v715_v54, 0.0  ;;  %v1054_v56 = vmul.f32 -1.442695, %v715_v54 }
 0x7a0   :  { %728 = vrot.lane.b32.xlu1 %v722_v55, %s1315_s0  ;;  %1299 = vpow2.f32 %v1054_v56 }
 0x7aa   :  { %v1300_v57 = vpop.eup %1299 }
 0x7ab   :  { %v719_v58 = vadd.f32 1.0, %v1300_v57 }
 0x7ad   :  { %1301 = vrcp.f32 %v719_v58 }
 0x7b7   :  { %v1302_v9 = vpop.eup %1301 }
 0x7b8   :  { %v726_v3 = vsub.f32 1.0, %v1302_v9  ;;  %v725_v2 = vmul.f32 %v1302_v9, %v723_v59 }
 0x812   :  { %v729_v60 = vpop.permute.xlu1 %728 }
 0x813   :  { %v731_v61 = vmul.f32 %v729_v60, %v726_v3 }
 0x815   :  { %v732_v14 = vadd.f32 %v731_v61, %v725_v2 }
 0x817   :  { %v734_v62 = vrot.slane %v732_v14, 2  ;;  %v818_v10 = vrot.slane %v732_v14, 6  ;;  %v929_v18 = vsel %vm923_vm3, %v638_v50, %v732_v14 }
 0x819   :  { %1183 = vmatmul.mubr.msk.f32.vlgmr.msra.gmra.mrb[4].mxu0 %vm174_vm2, %v734_v62 }
 0x81a   :  { %1204 = vmatprep.mubr.msk.f32.mxu0 %vm174_vm2, %v928_v38  ;;  %1258 = vmatpush3.bf16.msra.mxu0 %v1255_v23 }
 0x81b   :  { %1260 = vmatprep.subr.bf16.mxu0 %v1259_v26 }
 0x81e   :  { %1262 = vmatpush3.bf16.msra.mxu0 %v1259_v26 }
 0x8ec   :  { %v803_v63 = vpop.f32.mrb[4].mxu0 }
 0x8ed   :  { %v808_v0 = vrot.slane %v803_v63, 4  ;;  %v1184_v1 = vpop.f32.mrb[5].mxu0 }
 0x8ef   :  { %v810_v4 = vadd.f32 %v808_v0, %v1438_v34 }
 0x8f1   :  { %v1056_v5 = vmul.f32 -1.442695, %v810_v4  ;;  %v817_v6 = vmax.f32 %v810_v4, 0.0 }
 0x8f3   :  { %1303 = vpow2.f32 %v1056_v5  ;;  %823 = vrot.lane.b32.xlu0 %v817_v6, %s1315_s0 }
 0x8fd   :  { %v1304_v7 = vpop.eup %1303 }
 0x8fe   :  { %v814_v8 = vadd.f32 1.0, %v1304_v7 }
 0x900   :  { %1305 = vrcp.f32 %v814_v8 }
 0x90a   :  { %v1306_v11 = vpop.eup %1305 }
 0x90b   :  { %v820_v12 = vmul.f32 %v1306_v11, %v818_v10  ;;  %v821_v13 = vsub.f32 1.0, %v1306_v11 }
 0x965   :  { %v824_v15 = vpop.permute.xlu0 %823 }
 0x966   :  { %v826_v16 = vmul.f32 %v824_v15, %v821_v13 }
 0x968   :  { %v827_v17 = vadd.f32 %v826_v16, %v820_v12 }
 0x96a   :  { %v829_v19 = vrot.slane %v827_v17, 4  ;;  %v930_v20 = vsel %vm925_vm4, %v929_v18, %v827_v17  ;;  %v913_v37 = vrot.slane %v827_v17, 6 }
 0x96c   :  { %1194 = vmatmul.mubr.msk.f32.vlgmr.msra.gmra.mrb[12].mxu1 %vm174_vm2, %v829_v19 }
 0xa3f   :  { %v898_v27 = vpop.f32.mrb[12].mxu1 }
 0xa40   :  { %v903_v28 = vrot.slane %v898_v27, 2  ;;  %v1195_v29 = vpop.f32.mrb[13].mxu1 }
 0xa42   :  { %v905_v31 = vadd.f32 %v903_v28, %v1438_v34  ;;  %v1059_v34 = vld [vmem:[%s1525_s5] ss:$0 sm:$0xff] }
 0xa44   :  { %v1058_v32 = vmul.f32 -1.442695, %v905_v31  ;;  %v912_v33 = vmax.f32 %v905_v31, 0.0 }
 0xa46   :  { %1307 = vpow2.f32 %v1058_v32  ;;  %918 = vrot.lane.b32.xlu1 %v912_v33, %s1315_s0 }
 0xa50   :  { %v1308_v35 = vpop.eup %1307 }
 0xa51   :  { %v909_v36 = vadd.f32 1.0, %v1308_v35 }
 0xa53   :  { %1309 = vrcp.f32 %v909_v36 }
 0xa5d   :  { %v1310_v38 = vpop.eup %1309 }
 0xa5e   :  { %v915_v30 = vmul.f32 %v1310_v38, %v913_v37  ;;  %v916_v39 = vsub.f32 1.0, %v1310_v38 }
 0xab8   :  { %v919_v40 = vpop.permute.xlu1 %918 }
 0xab9   :  { %v921_v41 = vmul.f32 %v919_v40, %v916_v39 }
 0xabb   :  { %v922_v42 = vadd.f32 %v921_v41, %v915_v30 }
 0xabd   :  { %v931_v43 = vsel %vm927_vm5, %v930_v20, %v922_v42 }
 0xabe   :  { %1205 = vmatmul.mubr.msk.f32.vlgmr.msra.gmra.mrb[6].mxu0 %vm174_vm2, %v931_v43 }
 0xb91   :  { %v1206_v44 = vpop.f32.mrb[6].mxu0 }
 0xb92   :  { %v1021_v45 = vadd.f32 %v1206_v44, %v1059_v34  ;;  %v1015_v46 = vpop.f32.mrb[7].mxu0 }
 0xb93   :  { %v1016_v47 = vadd.f32 %v1059_v34, %v1015_v46 }
 0xb94   :  { %1026 = vst.msk [vmem:[%s1526_s6 + $0x8] sm:$0xff] %vm1024_vm6, %v1021_v45 }
 0xb95   :  { %1025 = vst.msk [vmem:[%s1526_s6] sm:$0xff] %vm1024_vm6, %v1016_v47 }

// kernel: cnn_gru_forward.2
= control target key start
LH: loop header
LB: loop body
LE: loop exit
PB: predicated region body
PF: predicated region fallthrough
CT: control target
= control target key end

     0   :  { %s8438_s26 = smov 0   ;;  %s11888_s0 = inlined_call_operand.vmem [shape: bf16[16,16,176], index: 0, kind: input, shape index: {}]   ;;  %s11889_s1 = inlined_call_operand.vmem [shape: bf16[128,16], index: 1, kind: input, shape index: {}]   ;;  %s11890_s2 = inlined_call_operand.vmem [shape: f32[128,1], index: 2, kind: input, shape index: {}]   ;;  %s11891_s3 = inlined_call_operand.vmem [shape: bf16[15,128,128], index: 3, kind: input, shape index: {}]   ;;  %s11892_s4 = inlined_call_operand.vmem [shape: f32[128,1], index: 4, kind: input, shape index: {}]   ;;  %s11893_s5 = inlined_call_operand.vmem [shape: bf16[15,128], index: 5, kind: input, shape index: {}]   ;;  %s11894_s6 = inlined_call_operand.<no memory space> [shape: f32[1,1], index: 6, kind: input, shape index: {}]   ;;  %s11895_s7 = inlined_call_operand.vmem [shape: f32[16,176], index: 7, kind: output, shape index: {}]  }
   0x1   :  { %v12_v0 = vstv %s11894_s6 }
   0x2   :  { %13 = vst [vmem:[#allocation2] sm:$0x1] %v12_v0 }
   0x3 LB: > { %s7302_s27 = sadd.s32 4294967295, %s8364_s26   ;;  %p7306_p0 = scmp.ge.s32.totalorder %s8364_s26, 1  ;;  %s8364_s26 = sphi %s8438_s26, %s19_s26  }
   0x4   : > { %p241_p1 = scmp.lt.s32.totalorder %s8364_s26, 3 }
   0x6   : > { %p242_p2 = pnand %p7306_p0, %p241_p1 }
   0x7   : > { %s7307_s28 = sshll.u32 (!%p242_p2), %s7302_s27, 3  ;;  %p281_p3 = scmp.lt.s32.totalorder (!%p242_p2), %s7302_s27, 1  ;;  %v11926_v1 = vlaneseq (!%p242_p2)  ;;  %v11975_v6 = vmov (!%p242_p2), 0  ;;  %v11978_v7 = vmov (!%p242_p2), 0  ;;  %v11981_v8 = vmov (!%p242_p2), 0 }
   0x8   : > { %245 = sbr.rel (%p242_p2) target bundleno = 2696 (0xa88), region = 48  ;;  %p275_p4 = scmp.lt.s32.totalorder (!%p242_p2), %s7307_s28, 15  ;;  %v11984_v9 = vmov (!%p242_p2), 0 }
   0x9   : > { %v290_v2 = vand.u32 (!%p242_p2), 127, %v11926_v1  ;;  %s8473_s13 = smov (!%p242_p2), 0  }
   0xb   : > { %v291_v3 = vadd.s32 (!%p242_p2), 128, %v290_v2  ;;  %v296_v4 = vand.u32 (!%p242_p2), 15, %v290_v2 }
   0xd   : > { %v303_v5 = vand.u32 (!%p242_p2), 15, %v291_v3  ;;  %vm8457_vm0 = vcmp.ge.s32.totalorder (!%p242_p2), %v296_v4, 1  ;;  %vm8461_vm1 = vcmp.le.s32.totalorder (!%p242_p2), %v296_v4, 14 }
   0xe   : > { %v11976_v6 = vsel (!%p242_p2), %vm8457_vm0, 4294967295, %v11975_v6  ;;  %v11979_v7 = vsel (!%p242_p2), %vm8461_vm1, 4294967295, %v11978_v7 }
   0xf   : > { %s12208_s27 = smov (!%p281_p3, %s7302_s27), 1  ;;  %s12210_s28 = smov (!%p275_p4, %s7307_s28), 15  ;;  %11977 = vst [vmem:[#allocation3_spill] sm:$0xff] %v11976_v6  ;;  %11980 = vst [vmem:[#allocation4_spill] sm:$0xff] %v11979_v7  ;;  %vm8465_vm2 = vcmp.ge.s32.totalorder %v303_v5, 1  ;;  %vm8469_vm3 = vcmp.le.s32.totalorder %v303_v5, 14 }
  0x10   : > { %s7705_s6 = sshll.u32 %s12208_s27, 4  ;;  %s7704_s29 = sshll.u32 %s12210_s28, 4  ;;  %v11982_v8 = vsel %vm8465_vm2, 4294967295, %v11981_v8  ;;  %v11985_v9 = vsel %vm8469_vm3, 4294967295, %v11984_v9 }
  0x11   : > { %s8450_s9 = scalar_lea.vmem %s11895_s7, %s7705_s6  ;;  %s8455_s12 = scalar_lea.vmem %s11888_s0, %s7704_s29  ;;  %11983 = vst [vmem:[#allocation5_spill] sm:$0xff] %v11982_v8  ;;  %11986 = vst [vmem:[#allocation6_spill] sm:$0xff] %v11985_v9 }
  0x12 LB: >> { %v11927_v10 = vmov 0   ;;  %s7706_s14 = sshll.u32 %s8368_s13, 4  ;;  %v8218_v13 = vld [vmem:[%s11889_s1] sm:$0xff]   ;;  %vm493_vm4 = vcmask 130048   ;;  %v349_v15 = vld [vmem:[%s11890_s2 + $0x10] sm:$0xff]  ;;  %v348_v16 = vld [vmem:[%s11890_s2 + $0x8] sm:$0xff]  ;;  %v11987_v1 = vlaneseq  ;;  %s8368_s13 = sphi %s8473_s13, %s325_s13  }
  0x13   : >> { %550 = vmatprep.mubr.bf16.mxu0 %v11927_v10  ;;  %8213 = vset.pattern.permute.xlu0 %v11927_v10  ;;  %s328_s15 = scalar_lea.vmem %s8455_s12, %s7706_s14  ;;  %v347_v14 = vld [vmem:[%s11890_s2] sm:$0xff]  ;;  %v350_v17 = vld [vmem:[%s11890_s2 + $0x18] sm:$0xff]  ;;  %v8219_v18 = vld [vmem:[%s11889_s1 + $0x8] sm:$0xff]   ;;  %s8371_s24 = smov 16   ;;  %vm727_vm6 = vcmask 269312   ;;  %vm762_vm8 = vcmask 662528  }
  0x14   : >> { %8214 = vset.pattern.permute.xlu1 %v11927_v10  ;;  %1762 = vmatprep.mubr.bf16.mxu1 %v11927_v10  ;;  %v8215_v11 = vld [vmem:[%s328_s15 + $0x4] ss:$8 sps:$4 sm:$0xff]   ;;  %v8217_v12 = vld [vmem:[%s328_s15] ss:$8 sps:$4 sm:$0xff]   ;;  %v353_v21 = vld [vmem:[%s11890_s2 + $0x30] sm:$0xff]  ;;  %v8573_v37 = vshrl.u32 %v11987_v1, 7 }
  0x15   : >> { %518 = vmatprep.subr.bf16.mxu0 %v8215_v11  ;;  %365 = vperm.xlu0 %8213, %v347_v14   ;;  %v351_v19 = vld [vmem:[%s11890_s2 + $0x20] sm:$0xff]  ;;  %v352_v20 = vld [vmem:[%s11890_s2 + $0x28] sm:$0xff]  ;;  %v354_v22 = vld [vmem:[%s11890_s2 + $0x38] sm:$0xff]  ;;  %s8372_s25 = smov 33   ;;  %s8373_s27 = smov 112   ;;  %vm11899_vm11 = vcmask 916480  }
  0x16   : >> { %519 = vmatpush1.bf16.msra.mxu0 %v8217_v12  ;;  %375 = vperm.xlu1 %8214, %v349_v15   ;;  %v8220_v23 = vld [vmem:[%s11889_s1 + $0x10] sm:$0xff]   ;;  %v355_v24 = vld [vmem:[%s11890_s2 + $0x40] sm:$0xff]  ;;  %v356_v25 = vld [vmem:[%s11890_s2 + $0x48] sm:$0xff]  ;;  %11988 = vst [vmem:[#allocation7_spill] sm:$0xff] %v8573_v37  ;;  %v8580_v38 = vsub.s32 0, %v8573_v37  ;;  %v815_v40 = vsub.s32 4, %v8573_v37 }
  0x17   : >> { %v357_v26 = vld [vmem:[%s11890_s2 + $0x50] sm:$0xff]  ;;  %v358_v27 = vld [vmem:[%s11890_s2 + $0x58] sm:$0xff]  ;;  %v359_v29 = vld [vmem:[%s11890_s2 + $0x60] sm:$0xff]  ;;  %s8374_s28 = smov 111   ;;  %s8375_s6 = smov 18   ;;  %vm11897_vm12 = vcmask 908288  }
  0x18   : >> { %v8221_v28 = vld [vmem:[%s11889_s1 + $0x18] sm:$0xff]   ;;  %v360_v30 = vld [vmem:[%s11890_s2 + $0x68] sm:$0xff]  ;;  %v361_v31 = vld [vmem:[%s11890_s2 + $0x70] sm:$0xff]  ;;  %11991 = vst [vmem:[#allocation8_spill] sm:$0xff] %v8580_v38  ;;  %vm2163_vm13 = vcmask 146432   ;;  %s8376_s8 = smov 110  }
  0x19   : >> { %7324 = vmatmul.mubr.msk.bf16.vlgmr.msra.gmra.mrb[0].mxu0 %vm493_vm4, %v8218_v13  ;;  %370 = vperm.xlu0 %8213, %v348_v16   ;;  %v362_v32 = vld [vmem:[%s11890_s2 + $0x78] sm:$0xff]  ;;  %v8222_v33 = vld [vmem:[%s11889_s1 + $0x20] sm:$0xff]   ;;  %v8223_v34 = vld [vmem:[%s11889_s1 + $0x28] sm:$0xff]   ;;  %s8377_s14 = smov 32   ;;  %s8378_s30 = smov 96  }
  0x1a   : >> { %560 = vmatprep.mubr.bf16.mxu0 %v11927_v10  ;;  %380 = vperm.xlu1 %8214, %v350_v17   ;;  %v8224_v35 = vld [vmem:[%s11889_s1 + $0x30] sm:$0xff]   ;;  %v8225_v36 = vld [vmem:[%s11889_s1 + $0x38] sm:$0xff]   ;;  %vm807_vm5 = vmpackc.low %vm8465_vm2, %vm8457_vm0  ;;  %s8380_s15 = smov 34   ;;  %s8381_s18 = smov 94  }
  0x1b   : >> { %v808_v39 = vsel %vm807_vm5, 65537, %v11927_v10  ;;  %vm1268_vm10 = vmpackc.low %vm8469_vm3, %vm8461_vm1  ;;  %s8382_s21 = smov 48   ;;  %s8384_s10 = smov 79  }
  0x1c   : >> { %v8585_v41 = vrot.slane %v808_v39, %v8580_v38  ;;  %v8589_v42 = vrot.slane %v808_v39, %v815_v40  ;;  %s8385_s11 = smov 50   ;;  %s8387_s22 = smov 78  }
  0x1d   : >> { %385 = vperm.xlu0 %8213, %v351_v19   ;;  %s11923_s23 = smov 64   ;;  %s8389_s29 = smov 2  }
  0x1e   : >> { %390 = vperm.xlu1 %8214, %v352_v20   ;;  %11992 = vst [vmem:[#allocation9_spill] sm:$0xff] %v8585_v41  ;;  %11993 = vst [vmem:[#allocation10_spill] sm:$0xff] %v8589_v42  ;;  %s11919_s19 = smov 63   ;;  %s12165_s16 = smov 62  }
  0x21   : >> { %7325 = vmatmul.mubr.msk.bf16.gmra.mrb[4].mxu0 %vm493_vm4, %v8219_v18  ;;  %395 = vperm.xlu0 %8213, %v353_v21  }
  0x22   : >> { %570 = vmatprep.mubr.bf16.mxu0 %v11927_v10  ;;  %400 = vperm.xlu1 %8214, %v354_v22  }
  0x25   : >> { %405 = vperm.xlu0 %8213, %v355_v24  }
  0x26   : >> { %410 = vperm.xlu1 %8214, %v356_v25  }
  0x29   : >> { %7326 = vmatmul.mubr.msk.bf16.gmra.mrb[8].mxu0 %vm493_vm4, %v8220_v23  ;;  %415 = vperm.xlu0 %8213, %v357_v26  }
  0x2a   : >> { %580 = vmatprep.mubr.bf16.mxu0 %v11927_v10  ;;  %420 = vperm.xlu1 %8214, %v358_v27  }
  0x2d   : >> { %425 = vperm.xlu0 %8213, %v359_v29  }
  0x2e   : >> { %430 = vperm.xlu1 %8214, %v360_v30  }
  0x31   : >> { %7327 = vmatmul.mubr.msk.bf16.gmra.mrb[12].mxu0 %vm493_vm4, %v8221_v28  ;;  %435 = vperm.xlu0 %8213, %v361_v31  }
  0x32   : >> { %590 = vmatprep.mubr.bf16.mxu0 %v11927_v10  ;;  %440 = vperm.xlu1 %8214, %v362_v32  }
  0x35   : >> { %1585 = vrot.lane.b32.xlu0 %v8585_v41, %s8371_s24 }
  0x36   : >> { %1587 = vrot.lane.b32.xlu1 %v8589_v42, %s8371_s24  ;;  %s8383_s24 = smov 80  }
  0x39   : >> { %7328 = vmatmul.mubr.msk.bf16.gmra.mrb[16].mxu0 %vm493_vm4, %v8222_v33 }
  0x3a   : >> { %600 = vmatprep.mubr.bf16.mxu0 %v11927_v10 }
  0x41   : >> { %7329 = vmatmul.mubr.msk.bf16.gmra.mrb[20].mxu0 %vm493_vm4, %v8223_v34 }
  0x42   : >> { %610 = vmatprep.mubr.bf16.mxu0 %v11927_v10 }
  0x49   : >> { %7330 = vmatmul.mubr.msk.bf16.gmra.mrb[24].mxu0 %vm493_vm4, %v8224_v35 }
  0x4a   : >> { %620 = vmatprep.mubr.bf16.mxu0 %v11927_v10 }
  0x51   : >> { %7331 = vmatmul.mubr.msk.bf16.gmra.mrb[28].mxu0 %vm493_vm4, %v8225_v36 }
  0x52   : >> { %1005 = vmatprep.mubr.bf16.mxu0 %v11927_v10 }
  0x94   : >> { %v366_v43 = vpop.permute.xlu0 %365 }
  0x95   : >> { %v376_v52 = vpop.permute.xlu1 %375 }
  0x98   : >> { %v371_v45 = vpop.permute.xlu0 %370 }
  0x99   : >> { %v381_v63 = vpop.permute.xlu1 %380 }
  0x9c   : >> { %v386_v16 = vpop.permute.xlu0 %385 }
  0x9d   : >> { %v391_v21 = vpop.permute.xlu1 %390 }
  0xa0   : >> { %v396_v32 = vpop.permute.xlu0 %395 }
  0xa1   : >> { %v401_v39 = vpop.permute.xlu1 %400 }
  0xec   : >> { %v552_v44 = vpop.f32.mrb[0].mxu0 }
  0xed   : >> { %v553_v46 = vadd.f32 %v552_v44, %v366_v43  ;;  %v554_v47 = vpop.f32.mrb[1].mxu0 }
  0xee   : >> { %v555_v48 = vadd.f32 %v554_v47, %v366_v43  ;;  %v556_v49 = vpop.f32.mrb[2].mxu0 }
  0xef   : >> { %v557_v50 = vadd.f32 %v556_v49, %v371_v45  ;;  %v558_v51 = vpop.f32.mrb[3].mxu0  ;;  %v631_v54 = vmax.f32 %v553_v46, 0.0 }
  0xf0   : >> { %v559_v53 = vadd.f32 %v558_v51, %v371_v45  ;;  %v632_v56 = vmax.f32 %v555_v48, 0.0 }
  0xf1   : >> { %v633_v55 = vmax.f32 %v557_v50, 0.0 }
  0xf2   : >> { %v634_v57 = vmax.f32 %v559_v53, 0.0  ;;  %v406_v53 = vpop.permute.xlu0 %405 }
  0xf3   : >> { %v663_v58 = vpack.c.bf16 %v633_v55, %v631_v54 }
  0xf4   : >> { %v664_v59 = vpack.c.bf16 %v634_v57, %v632_v56  ;;  %v562_v60 = vpop.f32.mrb[4].mxu0 }
  0xf5   : >> { %v563_v61 = vadd.f32 %v562_v60, %v376_v52  ;;  %v564_v62 = vpop.f32.mrb[5].mxu0  ;;  %695 = vrot.lane.b32.xlu0 %v663_v58, %s8372_s25  ;;  %v411_v58 = vpop.permute.xlu1 %410 }
  0xf6   : >> { %v565_v0 = vadd.f32 %v564_v62, %v376_v52  ;;  %v566_v2 = vpop.f32.mrb[6].mxu0  ;;  %697 = vrot.lane.b32.xlu1 %v664_v59, %s8372_s25 }
  0xf7   : >> { %v567_v3 = vadd.f32 %v566_v2, %v381_v63  ;;  %v568_v4 = vpop.f32.mrb[7].mxu0  ;;  %v635_v11 = vmax.f32 %v563_v61, 0.0 }
  0xf8   : >> { %v569_v5 = vadd.f32 %v568_v4, %v381_v63  ;;  %v636_v13 = vmax.f32 %v565_v0, 0.0 }
  0xf9   : >> { %v637_v12 = vmax.f32 %v567_v3, 0.0 }
  0xfa   : >> { %v638_v14 = vmax.f32 %v569_v5, 0.0 }
  0xfb   : >> { %v665_v15 = vpack.c.bf16 %v637_v12, %v635_v11  ;;  %v416_v11 = vpop.permute.xlu0 %415 }
  0xfc   : >> { %v666_v17 = vpack.c.bf16 %v638_v14, %v636_v13  ;;  %v572_v18 = vpop.f32.mrb[8].mxu0 }
  0xfd   : >> { %v573_v19 = vadd.f32 %v572_v18, %v386_v16  ;;  %v574_v20 = vpop.f32.mrb[9].mxu0  ;;  %699 = vrot.lane.b32.xlu0 %v665_v15, %s8372_s25 }
  0xfe   : >> { %v575_v22 = vadd.f32 %v574_v20, %v386_v16  ;;  %v576_v23 = vpop.f32.mrb[10].mxu0  ;;  %701 = vrot.lane.b32.xlu1 %v666_v17, %s8372_s25  ;;  %v421_v16 = vpop.permute.xlu1 %420 }
  0xff   : >> { %v577_v24 = vadd.f32 %v576_v23, %v391_v21  ;;  %v578_v25 = vpop.f32.mrb[11].mxu0  ;;  %v639_v27 = vmax.f32 %v573_v19, 0.0 }
 0x100   : >> { %v579_v26 = vadd.f32 %v578_v25, %v391_v21  ;;  %v640_v29 = vmax.f32 %v575_v22, 0.0 }
 0x101   : >> { %v641_v28 = vmax.f32 %v577_v24, 0.0 }
 0x102   : >> { %v642_v30 = vmax.f32 %v579_v26, 0.0 }
 0x103   : >> { %v667_v31 = vpack.c.bf16 %v641_v28, %v639_v27  ;;  %v426_v27 = vpop.permute.xlu0 %425 }
 0x104   : >> { %v668_v33 = vpack.c.bf16 %v642_v30, %v640_v29  ;;  %v582_v34 = vpop.f32.mrb[12].mxu0 }
 0x105   : >> { %v583_v35 = vadd.f32 %v582_v34, %v396_v32  ;;  %v584_v36 = vpop.f32.mrb[13].mxu0  ;;  %703 = vrot.lane.b32.xlu0 %v667_v31, %s8372_s25 }
 0x106   : >> { %v585_v43 = vadd.f32 %v584_v36, %v396_v32  ;;  %v586_v44 = vpop.f32.mrb[14].mxu0  ;;  %705 = vrot.lane.b32.xlu1 %v668_v33, %s8372_s25  ;;  %v431_v32 = vpop.permute.xlu1 %430 }
 0x107   : >> { %v587_v45 = vadd.f32 %v586_v44, %v401_v39  ;;  %v588_v46 = vpop.f32.mrb[15].mxu0  ;;  %v643_v48 = vmax.f32 %v583_v35, 0.0 }
 0x108   : >> { %v589_v47 = vadd.f32 %v588_v46, %v401_v39  ;;  %v644_v50 = vmax.f32 %v585_v43, 0.0 }
 0x109   : >> { %v645_v49 = vmax.f32 %v587_v45, 0.0 }
 0x10a   : >> { %v646_v51 = vmax.f32 %v589_v47, 0.0 }
 0x10b   : >> { %v669_v52 = vpack.c.bf16 %v645_v49, %v643_v48  ;;  %v436_v48 = vpop.permute.xlu0 %435 }
 0x10c   : >> { %v670_v54 = vpack.c.bf16 %v646_v51, %v644_v50  ;;  %v592_v55 = vpop.f32.mrb[16].mxu0 }
 0x10d   : >> { %v593_v56 = vadd.f32 %v592_v55, %v406_v53  ;;  %v594_v57 = vpop.f32.mrb[17].mxu0  ;;  %707 = vrot.lane.b32.xlu0 %v669_v52, %s8372_s25 }
 0x10e   : >> { %v595_v59 = vadd.f32 %v594_v57, %v406_v53  ;;  %v596_v60 = vpop.f32.mrb[18].mxu0  ;;  %709 = vrot.lane.b32.xlu1 %v670_v54, %s8372_s25  ;;  %v441_v53 = vpop.permute.xlu1 %440 }
 0x10f   : >> { %v597_v61 = vadd.f32 %v596_v60, %v411_v58  ;;  %v598_v62 = vpop.f32.mrb[19].mxu0  ;;  %v647_v0 = vmax.f32 %v593_v56, 0.0 }
 0x110   : >> { %v599_v63 = vadd.f32 %v598_v62, %v411_v58  ;;  %v648_v3 = vmax.f32 %v595_v59, 0.0 }
 0x111   : >> { %v649_v2 = vmax.f32 %v597_v61, 0.0 }
 0x112   : >> { %v650_v4 = vmax.f32 %v599_v63, 0.0 }
 0x113   : >> { %v671_v5 = vpack.c.bf16 %v649_v2, %v647_v0  ;;  %v8609_v2 = vpop.permute.xlu0 %1585 }
 0x114   : >> { %v672_v12 = vpack.c.bf16 %v650_v4, %v648_v3  ;;  %v602_v13 = vpop.f32.mrb[20].mxu0  ;;  %11994 = vst [vmem:[#allocation11_spill] sm:$0xff] %v8609_v2  ;;  %v1588_v3 = vpop.permute.xlu1 %1587  ;;  %vm1591_vm7 = vcmp.ne.s16.totalorder %v8609_v2, 0 }
 0x115   : >> { %v603_v14 = vadd.f32 %v602_v13, %v416_v11  ;;  %v604_v15 = vpop.f32.mrb[21].mxu0  ;;  %711 = vrot.lane.b32.xlu0 %v671_v5, %s8372_s25  ;;  %v8613_v4 = vsel %vm493_vm4, %v8609_v2, %v1588_v3  ;;  %vm11896_vm4 = vcmask 900096  }
 0x116   : >> { %v605_v17 = vadd.f32 %v604_v15, %v416_v11  ;;  %v606_v18 = vpop.f32.mrb[22].mxu0  ;;  %713 = vrot.lane.b32.xlu1 %v672_v12, %s8372_s25  ;;  %11995 = vst [vmem:[#allocation12_spill] sm:$0xff] %v8613_v4  ;;  %vm1592_vm9 = vcmp.ne.s16.totalorder %v8613_v4, 0 }
 0x117   : >> { %v607_v19 = vadd.f32 %v606_v18, %v421_v16  ;;  %v608_v20 = vpop.f32.mrb[23].mxu0  ;;  %v651_v22 = vmax.f32 %v603_v14, 0.0 }
 0x118   : >> { %v609_v21 = vadd.f32 %v608_v20, %v421_v16  ;;  %v652_v24 = vmax.f32 %v605_v17, 0.0 }
 0x119   : >> { %v653_v23 = vmax.f32 %v607_v19, 0.0 }
 0x11a   : >> { %v654_v25 = vmax.f32 %v609_v21, 0.0 }
 0x11b   : >> { %v673_v26 = vpack.c.bf16 %v653_v23, %v651_v22 }
 0x11c   : >> { %v674_v28 = vpack.c.bf16 %v654_v25, %v652_v24  ;;  %v612_v29 = vpop.f32.mrb[24].mxu0 }
 0x11d   : >> { %v613_v30 = vadd.f32 %v612_v29, %v426_v27  ;;  %v614_v31 = vpop.f32.mrb[25].mxu0  ;;  %715 = vrot.lane.b32.xlu0 %v673_v26, %s8372_s25 }
 0x11e   : >> { %v615_v33 = vadd.f32 %v614_v31, %v426_v27  ;;  %v616_v34 = vpop.f32.mrb[26].mxu0  ;;  %717 = vrot.lane.b32.xlu1 %v674_v28, %s8372_s25 }
 0x11f   : >> { %v617_v35 = vadd.f32 %v616_v34, %v431_v32  ;;  %v618_v36 = vpop.f32.mrb[27].mxu0  ;;  %v655_v43 = vmax.f32 %v613_v30, 0.0 }
 0x120   : >> { %v619_v39 = vadd.f32 %v618_v36, %v431_v32  ;;  %v656_v45 = vmax.f32 %v615_v33, 0.0 }
 0x121   : >> { %v657_v44 = vmax.f32 %v617_v35, 0.0 }
 0x122   : >> { %v658_v46 = vmax.f32 %v619_v39, 0.0 }
 0x123   : >> { %v675_v47 = vpack.c.bf16 %v657_v44, %v655_v43 }
 0x124   : >> { %v676_v49 = vpack.c.bf16 %v658_v46, %v656_v45  ;;  %v622_v50 = vpop.f32.mrb[28].mxu0 }
 0x125   : >> { %v623_v51 = vadd.f32 %v622_v50, %v436_v48  ;;  %v624_v52 = vpop.f32.mrb[29].mxu0  ;;  %719 = vrot.lane.b32.xlu0 %v675_v47, %s8372_s25 }
 0x126   : >> { %v625_v54 = vadd.f32 %v624_v52, %v436_v48  ;;  %v626_v55 = vpop.f32.mrb[30].mxu0  ;;  %721 = vrot.lane.b32.xlu1 %v676_v49, %s8372_s25 }
 0x127   : >> { %v627_v56 = vadd.f32 %v626_v55, %v441_v53  ;;  %v628_v57 = vpop.f32.mrb[31].mxu0  ;;  %v659_v59 = vmax.f32 %v623_v51, 0.0 }
 0x128   : >> { %v629_v58 = vadd.f32 %v628_v57, %v441_v53  ;;  %v660_v61 = vmax.f32 %v625_v54, 0.0 }
 0x129   : >> { %v661_v60 = vmax.f32 %v627_v56, 0.0 }
 0x12a   : >> { %v662_v62 = vmax.f32 %v629_v58, 0.0 }
 0x12b   : >> { %v677_v63 = vpack.c.bf16 %v661_v60, %v659_v59 }
 0x12c   : >> { %v678_v0 = vpack.c.bf16 %v662_v62, %v660_v61 }
 0x12d   : >> { %723 = vrot.lane.b32.xlu0 %v677_v63, %s8372_s25 }
 0x12e   : >> { %725 = vrot.lane.b32.xlu1 %v678_v0, %s8372_s25 }
 0x167   : >> { %v696_v5 = vpop.permute.xlu0 %695 }
 0x168   : >> { %v8618_v11 = vsel %vm727_vm6, 0, %v696_v5  ;;  %v698_v12 = vpop.permute.xlu1 %697 }
 0x169   : >> { %v728_v13 = vsel %vm727_vm6, %v696_v5, %v698_v12  ;;  %v1593_v14 = vsel %vm1591_vm7, %v8618_v11, 0 }
 0x16a   : >> { %v8625_v15 = vsel %vm762_vm8, %v728_v13, 0  ;;  %1673 = vrot.lane.b32.xlu0 %v1593_v14, %s8373_s27 }
 0x16b   : >> { %v1594_v16 = vsel %vm1592_vm9, %v8625_v15, 0 }
 0x16c   : >> { %1675 = vrot.lane.b32.xlu1 %v1594_v16, %s8373_s27 }
 0x16f   : >> { %v700_v17 = vpop.permute.xlu0 %699 }
 0x170   : >> { %v8633_v18 = vsel %vm727_vm6, 0, %v700_v17  ;;  %v702_v19 = vpop.permute.xlu1 %701 }
 0x171   : >> { %v729_v20 = vsel %vm727_vm6, %v700_v17, %v702_v19  ;;  %v1595_v21 = vsel %vm1591_vm7, %v8633_v18, 0  ;;  %v1269_v17 = vsel %vm1268_vm10, 65537, %v11927_v10  ;;  %vm2470_vm10 = vcmask 261120  }
 0x172   : >> { %v8640_v22 = vsel %vm762_vm8, %v729_v20, 0  ;;  %1677 = vrot.lane.b32.xlu0 %v1595_v21, %s8373_s27  ;;  %v8745_v19 = vrot.slane %v1269_v17, %v8580_v38  ;;  %v8751_v20 = vrot.slane %v1269_v17, %v815_v40 }
 0x173   : >> { %v1596_v23 = vsel %vm1592_vm9, %v8640_v22, 0 }
 0x174   : >> { %1679 = vrot.lane.b32.xlu1 %v1596_v23, %s8373_s27 }
 0x177   : >> { %v704_v24 = vpop.permute.xlu0 %703 }
 0x178   : >> { %v8648_v25 = vsel %vm727_vm6, 0, %v704_v24  ;;  %v706_v26 = vpop.permute.xlu1 %705 }
 0x179   : >> { %v730_v27 = vsel %vm727_vm6, %v704_v24, %v706_v26  ;;  %v1597_v28 = vsel %vm1591_vm7, %v8648_v25, 0 }
 0x17a   : >> { %v8655_v29 = vsel %vm762_vm8, %v730_v27, 0  ;;  %1681 = vrot.lane.b32.xlu0 %v1597_v28, %s8373_s27 }
 0x17b   : >> { %v1598_v30 = vsel %vm1592_vm9, %v8655_v29, 0 }
 0x17c   : >> { %1683 = vrot.lane.b32.xlu1 %v1598_v30, %s8373_s27 }
 0x17f   : >> { %v708_v31 = vpop.permute.xlu0 %707 }
 0x180   : >> { %v8663_v32 = vsel %vm727_vm6, 0, %v708_v31  ;;  %v710_v33 = vpop.permute.xlu1 %709 }
 0x181   : >> { %v731_v34 = vsel %vm727_vm6, %v708_v31, %v710_v33  ;;  %v1599_v35 = vsel %vm1591_vm7, %v8663_v32, 0 }
 0x182   : >> { %v8670_v36 = vsel %vm762_vm8, %v731_v34, 0  ;;  %1685 = vrot.lane.b32.xlu0 %v1599_v35, %s8373_s27 }
 0x183   : >> { %v1600_v39 = vsel %vm1592_vm9, %v8670_v36, 0 }
 0x184   : >> { %1687 = vrot.lane.b32.xlu1 %v1600_v39, %s8373_s27 }
 0x187   : >> { %v712_v43 = vpop.permute.xlu0 %711 }
 0x188   : >> { %v8678_v44 = vsel %vm727_vm6, 0, %v712_v43  ;;  %v714_v45 = vpop.permute.xlu1 %713 }
 0x189   : >> { %v732_v46 = vsel %vm727_vm6, %v712_v43, %v714_v45  ;;  %v1601_v47 = vsel %vm1591_vm7, %v8678_v44, 0 }
 0x18a   : >> { %v8685_v48 = vsel %vm762_vm8, %v732_v46, 0  ;;  %1689 = vrot.lane.b32.xlu0 %v1601_v47, %s8373_s27 }
 0x18b   : >> { %v1602_v49 = vsel %vm1592_vm9, %v8685_v48, 0 }
 0x18c   : >> { %1691 = vrot.lane.b32.xlu1 %v1602_v49, %s8373_s27 }
 0x18f   : >> { %v716_v50 = vpop.permute.xlu0 %715 }
 0x190   : >> { %v8693_v51 = vsel %vm727_vm6, 0, %v716_v50  ;;  %v718_v52 = vpop.permute.xlu1 %717 }
 0x191   : >> { %v733_v53 = vsel %vm727_vm6, %v716_v50, %v718_v52  ;;  %v1603_v54 = vsel %vm1591_vm7, %v8693_v51, 0 }
 0x192   : >> { %v8700_v55 = vsel %vm762_vm8, %v733_v53, 0  ;;  %1693 = vrot.lane.b32.xlu0 %v1603_v54, %s8373_s27 }
 0x193   : >> { %v1604_v56 = vsel %vm1592_vm9, %v8700_v55, 0 }
 0x194   : >> { %1695 = vrot.lane.b32.xlu1 %v1604_v56, %s8373_s27 }
 0x197   : >> { %v720_v57 = vpop.permute.xlu0 %719 }
 0x198   : >> { %v8708_v58 = vsel %vm727_vm6, 0, %v720_v57  ;;  %v722_v59 = vpop.permute.xlu1 %721 }
 0x199   : >> { %v734_v60 = vsel %vm727_vm6, %v720_v57, %v722_v59  ;;  %v1605_v61 = vsel %vm1591_vm7, %v8708_v58, 0  ;;  %v8226_v59 = vld [vmem:[%s11891_s3 + $0xc0] sm:$0xff]  }
 0x19a   : >> { %v8715_v62 = vsel %vm762_vm8, %v734_v60, 0  ;;  %1697 = vrot.lane.b32.xlu0 %v1605_v61, %s8373_s27 }
 0x19b   : >> { %v1606_v63 = vsel %vm1592_vm9, %v8715_v62, 0 }
 0x19c   : >> { %1699 = vrot.lane.b32.xlu1 %v1606_v63, %s8373_s27 }
 0x19f   : >> { %v724_v0 = vpop.permute.xlu0 %723 }
 0x1a0   : >> { %v8723_v3 = vsel %vm727_vm6, 0, %v724_v0  ;;  %v726_v5 = vpop.permute.xlu1 %725 }
 0x1a1   : >> { %v735_v12 = vsel %vm727_vm6, %v724_v0, %v726_v5  ;;  %v1607_v13 = vsel %vm1591_vm7, %v8723_v3, 0 }
 0x1a2   : >> { %v8734_v14 = vsel %vm762_vm8, %v735_v12, 0  ;;  %1701 = vrot.lane.b32.xlu0 %v1607_v13, %s8373_s27 }
 0x1a3   : >> { %v1608_v16 = vsel %vm1592_vm9, %v8734_v14, 0 }
 0x1a4   : >> { %1703 = vrot.lane.b32.xlu1 %v1608_v16, %s8373_s27 }
 0x1a6   : >> { %1940 = vrot.lane.b32.xlu0 %v8618_v11, %s8374_s28 }
 0x1a8   : >> { %1942 = vrot.lane.b32.xlu1 %v8625_v15, %s8374_s28 }
 0x1aa   : >> { %2159 = vrot.lane.b32.xlu0 %v8745_v19, %s8375_s6 }
 0x1ac   : >> { %2161 = vrot.lane.b32.xlu1 %v8751_v20, %s8375_s6  ;;  %s8386_s6 = smov 127  }
 0x1ae   : >> { %1944 = vrot.lane.b32.xlu0 %v8633_v18, %s8374_s28 }
 0x1b0   : >> { %1946 = vrot.lane.b32.xlu1 %v8640_v22, %s8374_s28 }
 0x1b2   : >> { %1948 = vrot.lane.b32.xlu0 %v8648_v25, %s8374_s28 }
 0x1b4   : >> { %1950 = vrot.lane.b32.xlu1 %v8655_v29, %s8374_s28 }
 0x1b6   : >> { %1952 = vrot.lane.b32.xlu0 %v8663_v32, %s8374_s28 }
 0x1b8   : >> { %1954 = vrot.lane.b32.xlu1 %v8670_v36, %s8374_s28 }
 0x1ba   : >> { %1956 = vrot.lane.b32.xlu0 %v8678_v44, %s8374_s28 }
 0x1bc   : >> { %1958 = vrot.lane.b32.xlu1 %v8685_v48, %s8374_s28 }
 0x1be   : >> { %1960 = vrot.lane.b32.xlu0 %v8693_v51, %s8374_s28 }
 0x1c0   : >> { %1962 = vrot.lane.b32.xlu1 %v8700_v55, %s8374_s28 }
 0x1c2   : >> { %1964 = vrot.lane.b32.xlu0 %v8708_v58, %s8374_s28 }
 0x1c4   : >> { %1966 = vrot.lane.b32.xlu1 %v8715_v62, %s8374_s28 }
 0x1c6   : >> { %1968 = vrot.lane.b32.xlu0 %v8723_v3, %s8374_s28 }
 0x1c8   : >> { %1970 = vrot.lane.b32.xlu1 %v8734_v14, %s8374_s28 }
 0x1dc   : >> { %v1674_v40 = vpop.permute.xlu0 %1673 }
 0x1de   : >> { %v1676_v21 = vpop.permute.xlu1 %1675 }
 0x1df   : >> { %1730 = vmatprep.subr.bf16.mxu1 %v1676_v21  ;;  %v1706_v23 = vsel %vm11899_vm11, %v1674_v40, %v1676_v21  ;;  %v8227_v40 = vld [vmem:[%s11891_s3 + $0xc8] sm:$0xff]  }
 0x1e0   : >> { %1731 = vmatpush1.bf16.msra.mxu1 %v1706_v23 }
 0x1e4   : >> { %v1678_v24 = vpop.permute.xlu0 %1677 }
 0x1e6   : >> { %v1680_v26 = vpop.permute.xlu1 %1679 }
 0x1e7   : >> { %1732 = vmatprep.subr.bf16.mxu1 %v1680_v26  ;;  %v1707_v27 = vsel %vm11899_vm11, %v1678_v24, %v1680_v26 }
 0x1e8   : >> { %1733 = vmatpush1.bf16.msra.mxu1 %v1707_v27 }
 0x1ec   : >> { %v1682_v28 = vpop.permute.xlu0 %1681 }
 0x1ee   : >> { %v1684_v30 = vpop.permute.xlu1 %1683 }
 0x1ef   : >> { %1734 = vmatprep.subr.bf16.mxu1 %v1684_v30  ;;  %v1708_v31 = vsel %vm11899_vm11, %v1682_v28, %v1684_v30 }
 0x1f0   : >> { %1735 = vmatpush1.bf16.msra.mxu1 %v1708_v31 }
 0x1f4   : >> { %v1686_v33 = vpop.permute.xlu0 %1685 }
 0x1f6   : >> { %v1688_v34 = vpop.permute.xlu1 %1687 }
 0x1f7   : >> { %1736 = vmatprep.subr.bf16.mxu1 %v1688_v34  ;;  %v1709_v35 = vsel %vm11899_vm11, %v1686_v33, %v1688_v34  ;;  %v8228_v33 = vld [vmem:[%s11891_s3 + $0xd0] sm:$0xff]  }
 0x1f8   : >> { %1737 = vmatpush1.bf16.msra.mxu1 %v1709_v35 }
 0x1fc   : >> { %v1690_v39 = vpop.permute.xlu0 %1689 }
 0x1fe   : >> { %v1692_v43 = vpop.permute.xlu1 %1691 }
 0x1ff   : >> { %1738 = vmatprep.subr.bf16.mxu1 %v1692_v43  ;;  %v1710_v45 = vsel %vm11899_vm11, %v1690_v39, %v1692_v43 }
 0x200   : >> { %1739 = vmatpush1.bf16.msra.mxu1 %v1710_v45 }
 0x204   : >> { %v1694_v46 = vpop.permute.xlu0 %1693 }
 0x206   : >> { %v1696_v47 = vpop.permute.xlu1 %1695 }
 0x207   : >> { %1740 = vmatprep.subr.bf16.mxu1 %v1696_v47  ;;  %v1711_v49 = vsel %vm11899_vm11, %v1694_v46, %v1696_v47 }
 0x208   : >> { %1741 = vmatpush1.bf16.msra.mxu1 %v1711_v49 }
 0x20c   : >> { %v1698_v50 = vpop.permute.xlu0 %1697 }
 0x20e   : >> { %v1700_v52 = vpop.permute.xlu1 %1699 }
 0x20f   : >> { %1742 = vmatprep.subr.bf16.mxu1 %v1700_v52  ;;  %v1712_v53 = vsel %vm11899_vm11, %v1698_v50, %v1700_v52 }
 0x210   : >> { %1743 = vmatpush1.bf16.msra.mxu1 %v1712_v53  ;;  %v8229_v53 = vld [vmem:[%s11891_s3 + $0xd8] sm:$0xff]  }
 0x214   : >> { %v1702_v54 = vpop.permute.xlu0 %1701 }
 0x216   : >> { %v1704_v56 = vpop.permute.xlu1 %1703 }
 0x217   : >> { %1744 = vmatprep.subr.bf16.mxu1 %v1704_v56  ;;  %v1713_v57 = vsel %vm11899_vm11, %v1702_v54, %v1704_v56 }
 0x218   : >> { %1745 = vmatpush1.bf16.msra.mxu1 %v1713_v57  ;;  %v1941_v60 = vpop.permute.xlu0 %1940 }
 0x21a   : >> { %v1943_v61 = vpop.permute.xlu1 %1942 }
 0x21b   : >> { %1997 = vmatprep.subr.bf16.mxu1 %v1943_v61  ;;  %1763 = vmatmul.mubr.bf16.vlgmr.msra.gmra.mrb[0].mxu1 %v8226_v59  ;;  %v1973_v63 = vsel %vm11897_vm12, %v1941_v60, %v1943_v61 }
 0x21c   : >> { %1998 = vmatpush1.bf16.msra.mxu1 %v1973_v63  ;;  %v8795_v0 = vpop.permute.xlu0 %2159  ;;  %1772 = vmatprep.mubr.bf16.mxu1 %v11927_v10 }
 0x21d   : >> { %11998 = vst [vmem:[#allocation13_spill] sm:$0xff] %v8795_v0  ;;  %vm2165_vm14 = vcmp.ne.s16.totalorder %v8795_v0, 0 }
 0x21e   : >> { %v2162_v5 = vpop.permute.xlu1 %2161  ;;  %v2167_v12 = vsel %vm2165_vm14, %v8618_v11, 0  ;;  %v2169_v27 = vsel %vm2165_vm14, %v8633_v18, 0  ;;  %v2171_v35 = vsel %vm2165_vm14, %v8648_v25, 0  ;;  %v2173_v47 = vsel %vm2165_vm14, %v8663_v32, 0 }
 0x21f   : >> { %v8803_v13 = vsel %vm2163_vm13, %v8795_v0, %v2162_v5  ;;  %2247 = vrot.lane.b32.xlu0 %v2167_v12, %s8376_s8  ;;  %v2175_v56 = vsel %vm2165_vm14, %v8678_v44, 0  ;;  %v2177_v63 = vsel %vm2165_vm14, %v8693_v51, 0 }
 0x220   : >> { %11999 = vst [vmem:[#allocation14_spill] sm:$0xff] %v8803_v13  ;;  %vm11918_vm15 = vcmp.ne.s16.totalorder %v8803_v13, 0  ;;  %v1945_v16 = vpop.permute.xlu0 %1944 }
 0x221   : >> { %v2168_v17 = vsel %vm11918_vm15, %v8625_v15, 0  ;;  %v2170_v31 = vsel %vm11918_vm15, %v8640_v22, 0  ;;  %v2172_v45 = vsel %vm11918_vm15, %v8655_v29, 0  ;;  %v2174_v52 = vsel %vm11918_vm15, %v8670_v36, 0 }
 0x222   : >> { %v1947_v21 = vpop.permute.xlu1 %1946  ;;  %2249 = vrot.lane.b32.xlu1 %v2168_v17, %s8376_s8  ;;  %v2176_v60 = vsel %vm11918_vm15, %v8685_v48, 0  ;;  %v2178_v12 = vsel %vm11918_vm15, %v8700_v55, 0 }
 0x223   : >> { %1999 = vmatprep.subr.bf16.mxu1 %v1947_v21  ;;  %2466 = vrot.lane.b32.xlu0 %v8585_v41, %s8377_s14  ;;  %v1974_v23 = vsel %vm11897_vm12, %v1945_v16, %v1947_v21  ;;  %v8230_v16 = vld [vmem:[%s11891_s3 + $0xe0] sm:$0xff]   ;;  %v2179_v21 = vsel %vm2165_vm14, %v8708_v58, 0 }
 0x224   : >> { %2000 = vmatpush1.bf16.msra.mxu1 %v1974_v23  ;;  %v1949_v24 = vpop.permute.xlu0 %1948 }
 0x225   : >> { %1773 = vmatmul.mubr.bf16.gmra.mrb[4].mxu1 %v8227_v40 }
 0x226   : >> { %v1951_v26 = vpop.permute.xlu1 %1950  ;;  %2468 = vrot.lane.b32.xlu1 %v8589_v42, %s8377_s14  ;;  %1782 = vmatprep.mubr.bf16.mxu1 %v11927_v10  ;;  %s8379_s14 = smov 95  }
 0x227   : >> { %2251 = vrot.lane.b32.xlu0 %v2169_v27, %s8376_s8  ;;  %2001 = vmatprep.subr.bf16.mxu1 %v1951_v26  ;;  %v1975_v28 = vsel %vm11897_vm12, %v1949_v24, %v1951_v26  ;;  %v2180_v24 = vsel %vm11918_vm15, %v8715_v62, 0  ;;  %v2181_v26 = vsel %vm2165_vm14, %v8723_v3, 0  ;;  %v2182_v27 = vsel %vm11918_vm15, %v8734_v14, 0 }
 0x228   : >> { %2002 = vmatpush1.bf16.msra.mxu1 %v1975_v28  ;;  %v1953_v30 = vpop.permute.xlu0 %1952  ;;  %v8231_v28 = vld [vmem:[%s11891_s3 + $0xe8] sm:$0xff]  }
 0x22a   : >> { %v1955_v34 = vpop.permute.xlu1 %1954  ;;  %2253 = vrot.lane.b32.xlu1 %v2170_v31, %s8376_s8  ;;  %v8233_v31 = vld [vmem:[%s11891_s3 + $0xf8] sm:$0xff]  }
 0x22b   : >> { %2255 = vrot.lane.b32.xlu0 %v2171_v35, %s8376_s8  ;;  %2003 = vmatprep.subr.bf16.mxu1 %v1955_v34  ;;  %v1976_v39 = vsel %vm11897_vm12, %v1953_v30, %v1955_v34  ;;  %v8232_v30 = vld [vmem:[%s11891_s3 + $0xf0] sm:$0xff]   ;;  %v8235_v34 = vld [vmem:[%s11891_s3 + $0x108] sm:$0xff]  }
 0x22c   : >> { %2004 = vmatpush1.bf16.msra.mxu1 %v1976_v39  ;;  %v1957_v43 = vpop.permute.xlu0 %1956  ;;  %v8236_v35 = vld [vmem:[%s11891_s3 + $0x110] sm:$0xff]   ;;  %v8237_v39 = vld [vmem:[%s11891_s3 + $0x118] sm:$0xff]  }
 0x22d   : >> { %1783 = vmatmul.mubr.bf16.gmra.mrb[8].mxu1 %v8228_v33  ;;  %v8234_v33 = vld [vmem:[%s11891_s3 + $0x100] sm:$0xff]  }
 0x22e   : >> { %v1959_v46 = vpop.permute.xlu1 %1958  ;;  %2257 = vrot.lane.b32.xlu1 %v2172_v45, %s8376_s8  ;;  %1792 = vmatprep.mubr.bf16.mxu1 %v11927_v10  ;;  %v8239_v45 = vld [vmem:[%s11891_s3 + $0x128] sm:$0xff]  }
 0x22f   : >> { %2259 = vrot.lane.b32.xlu0 %v2173_v47, %s8376_s8  ;;  %2005 = vmatprep.subr.bf16.mxu1 %v1959_v46  ;;  %v1977_v49 = vsel %vm11897_vm12, %v1957_v43, %v1959_v46  ;;  %v8238_v43 = vld [vmem:[%s11891_s3 + $0x120] sm:$0xff]   ;;  %v8240_v46 = vld [vmem:[%s11891_s3 + $0x130] sm:$0xff]  }
 0x230   : >> { %2006 = vmatpush1.bf16.msra.mxu1 %v1977_v49  ;;  %v1961_v50 = vpop.permute.xlu0 %1960  ;;  %v8241_v49 = vld [vmem:[%s11891_s3 + $0x138] sm:$0xff]  }
 0x232   : >> { %v1963_v54 = vpop.permute.xlu1 %1962  ;;  %2261 = vrot.lane.b32.xlu1 %v2174_v52, %s8376_s8 }
 0x233   : >> { %2263 = vrot.lane.b32.xlu0 %v2175_v56, %s8376_s8  ;;  %2007 = vmatprep.subr.bf16.mxu1 %v1963_v54  ;;  %v1978_v57 = vsel %vm11897_vm12, %v1961_v50, %v1963_v54 }
 0x234   : >> { %2008 = vmatpush1.bf16.msra.mxu1 %v1978_v57  ;;  %v1965_v59 = vpop.permute.xlu0 %1964 }
 0x235   : >> { %1793 = vmatmul.mubr.bf16.gmra.mrb[12].mxu1 %v8229_v53 }
 0x236   : >> { %v1967_v61 = vpop.permute.xlu1 %1966  ;;  %2265 = vrot.lane.b32.xlu1 %v2176_v60, %s8376_s8  ;;  %1802 = vmatprep.mubr.bf16.mxu1 %v11927_v10 }
 0x237   : >> { %2267 = vrot.lane.b32.xlu0 %v2177_v63, %s8376_s8  ;;  %2009 = vmatprep.subr.bf16.mxu1 %v1967_v61  ;;  %v1979_v5 = vsel %vm11897_vm12, %v1965_v59, %v1967_v61 }
 0x238   : >> { %2010 = vmatpush1.bf16.msra.mxu1 %v1979_v5  ;;  %v1969_v17 = vpop.permute.xlu0 %1968 }
 0x23a   : >> { %v1971_v40 = vpop.permute.xlu1 %1970  ;;  %2269 = vrot.lane.b32.xlu1 %v2178_v12, %s8376_s8 }
 0x23b   : >> { %2271 = vrot.lane.b32.xlu0 %v2179_v21, %s8376_s8  ;;  %2011 = vmatprep.subr.bf16.mxu1 %v1971_v40  ;;  %v1980_v23 = vsel %vm11897_vm12, %v1969_v17, %v1971_v40 }
 0x23c   : >> { %2012 = vmatpush1.bf16.msra.mxu1 %v1980_v23 }
 0x23d   : >> { %1803 = vmatmul.mubr.bf16.gmra.mrb[16].mxu1 %v8230_v16 }
 0x23e   : >> { %2273 = vrot.lane.b32.xlu1 %v2180_v24, %s8376_s8  ;;  %1812 = vmatprep.mubr.bf16.mxu1 %v11927_v10 }
 0x23f   : >> { %2275 = vrot.lane.b32.xlu0 %v2181_v26, %s8376_s8 }
 0x242   : >> { %2277 = vrot.lane.b32.xlu1 %v2182_v27, %s8376_s8 }
 0x245   : >> { %1813 = vmatmul.mubr.bf16.gmra.mrb[20].mxu1 %v8231_v28 }
 0x246   : >> { %1822 = vmatprep.mubr.bf16.mxu1 %v11927_v10 }
 0x24d   : >> { %1823 = vmatmul.mubr.bf16.gmra.mrb[24].mxu1 %v8232_v30 }
 0x24e   : >> { %1832 = vmatprep.mubr.bf16.mxu1 %v11927_v10 }
 0x255   : >> { %1833 = vmatmul.mubr.bf16.gmra.mrb[28].mxu1 %v8233_v31 }
 0x256   : >> { %2029 = vmatprep.mubr.bf16.mxu1 %v11927_v10 }
 0x25d   : >> { %2030 = vmatmul.mubr.bf16.vlgmr.msra.gmra.mrb[0].mxu1 %v8234_v33 }
 0x25e   : >> { %2039 = vmatprep.mubr.bf16.mxu1 %v11927_v10 }
 0x265   : >> { %2040 = vmatmul.mubr.bf16.gmra.mrb[4].mxu1 %v8235_v34 }
 0x266   : >> { %2049 = vmatprep.mubr.bf16.mxu1 %v11927_v10 }
 0x26d   : >> { %2050 = vmatmul.mubr.bf16.gmra.mrb[8].mxu1 %v8236_v35 }
 0x26e   : >> { %2059 = vmatprep.mubr.bf16.mxu1 %v11927_v10 }
 0x275   : >> { %2060 = vmatmul.mubr.bf16.gmra.mrb[12].mxu1 %v8237_v39 }
 0x276   : >> { %2069 = vmatprep.mubr.bf16.mxu1 %v11927_v10 }
 0x27d   : >> { %2070 = vmatmul.mubr.bf16.gmra.mrb[16].mxu1 %v8238_v43 }
 0x27e   : >> { %2079 = vmatprep.mubr.bf16.mxu1 %v11927_v10 }
 0x285   : >> { %2080 = vmatmul.mubr.bf16.gmra.mrb[20].mxu1 %v8239_v45 }
 0x286   : >> { %2089 = vmatprep.mubr.bf16.mxu1 %v11927_v10 }
 0x28d   : >> { %2090 = vmatmul.mubr.bf16.gmra.mrb[24].mxu1 %v8240_v46 }
 0x28e   : >> { %2099 = vmatprep.mubr.bf16.mxu1 %v11927_v10 }
 0x291   : >> { %v2248_v47 = vpop.permute.xlu0 %2247 }
 0x294   : >> { %v2250_v50 = vpop.permute.xlu1 %2249 }
 0x295   : >> { %2304 = vmatprep.subr.bf16.mxu1 %v2250_v50  ;;  %v8935_v52 = vpop.permute.xlu0 %2466  ;;  %v2280_v53 = vsel %vm11896_vm4, %v2248_v47, %v2250_v50  ;;  %2100 = vmatmul.mubr.bf16.gmra.mrb[28].mxu1 %v8241_v49 }
 0x296   : >> { %12000 = vst [vmem:[#allocation15_spill] sm:$0xff] %v8935_v52  ;;  %vm11911_vm5 = vcmp.ne.s16.totalorder %v8935_v52, 0  ;;  %2305 = vmatpush1.bf16.msra.mxu1 %v2280_v53  ;;  %2336 = vmatprep.mubr.bf16.mxu1 %v11927_v10 }
 0x297   : >> { %v2474_v54 = vsel %vm11911_vm5, %v8618_v11, 0  ;;  %v2476_v60 = vsel %vm11911_vm5, %v8633_v18, 0  ;;  %v2478_v16 = vsel %vm11911_vm5, %v8648_v25, 0  ;;  %v2480_v24 = vsel %vm11911_vm5, %v8663_v32, 0 }
 0x298   : >> { %v2469_v56 = vpop.permute.xlu1 %2468  ;;  %2554 = vrot.lane.b32.xlu0 %v2474_v54, %s8378_s30  ;;  %v2482_v31 = vsel %vm11911_vm5, %v8678_v44, 0  ;;  %v2484_v43 = vsel %vm11911_vm5, %v8693_v51, 0  ;;  %v2486_v50 = vsel %vm11911_vm5, %v8708_v58, 0 }
 0x299   : >> { %v8945_v57 = vsel %vm2470_vm10, %v8935_v52, %v2469_v56  ;;  %v2252_v59 = vpop.permute.xlu0 %2251  ;;  %vm11898_vm10 = vcmask 785408  }
 0x29a   : >> { %12001 = vst [vmem:[#allocation16_spill] sm:$0xff] %v8945_v57  ;;  %vm11910_vm13 = vcmp.ne.s16.totalorder %v8945_v57, 0 }
 0x29b   : >> { %v2475_v61 = vsel %vm11910_vm13, %v8625_v15, 0  ;;  %v2477_v17 = vsel %vm11910_vm13, %v8640_v22, 0  ;;  %v2479_v26 = vsel %vm11910_vm13, %v8655_v29, 0  ;;  %v2481_v33 = vsel %vm11910_vm13, %v8670_v36, 0 }
 0x29c   : >> { %v2254_v63 = vpop.permute.xlu1 %2253  ;;  %2558 = vrot.lane.b32.xlu0 %v2476_v60, %s8378_s30  ;;  %2556 = vrot.lane.b32.xlu1 %v2475_v61, %s8378_s30  ;;  %v2483_v45 = vsel %vm11910_vm13, %v8685_v48, 0  ;;  %v2485_v53 = vsel %vm11910_vm13, %v8700_v55, 0  ;;  %v2487_v60 = vsel %vm11910_vm13, %v8715_v62, 0 }
 0x29d   : >> { %2306 = vmatprep.subr.bf16.mxu1 %v2254_v63  ;;  %v2256_v5 = vpop.permute.xlu0 %2255  ;;  %v2281_v12 = vsel %vm11896_vm4, %v2252_v59, %v2254_v63  ;;  %v2488_v59 = vsel %vm11911_vm5, %v8723_v3, 0  ;;  %vm11917_vm5 = vcmask 523264  }
 0x29e   : >> { %2307 = vmatpush1.bf16.msra.mxu1 %v2281_v12  ;;  %v8242_v12 = vld [vmem:[%s11891_s3 + $0x140] sm:$0xff]  }
 0x2a0   : >> { %v2258_v40 = vpop.permute.xlu1 %2257  ;;  %2562 = vrot.lane.b32.xlu0 %v2478_v16, %s8378_s30  ;;  %2560 = vrot.lane.b32.xlu1 %v2477_v17, %s8378_s30  ;;  %v2489_v16 = vsel %vm11910_vm13, %v8734_v14, 0  ;;  %v8243_v17 = vld [vmem:[%s11891_s3 + $0x148] sm:$0xff]   ;;  %vm11915_vm13 = vcmask 637952  }
 0x2a1   : >> { %2308 = vmatprep.subr.bf16.mxu1 %v2258_v40  ;;  %v2260_v21 = vpop.permute.xlu0 %2259  ;;  %v2282_v23 = vsel %vm11896_vm4, %v2256_v5, %v2258_v40  ;;  %v8244_v40 = vld [vmem:[%s11891_s3 + $0x150] sm:$0xff]  }
 0x2a2   : >> { %2309 = vmatpush1.bf16.msra.mxu1 %v2282_v23  ;;  %v8246_v23 = vld [vmem:[%s11891_s3 + $0x160] sm:$0xff]  }
 0x2a4   : >> { %v2262_v27 = vpop.permute.xlu1 %2261  ;;  %2566 = vrot.lane.b32.xlu0 %v2480_v24, %s8378_s30  ;;  %2564 = vrot.lane.b32.xlu1 %v2479_v26, %s8378_s30  ;;  %v8247_v24 = vld [vmem:[%s11891_s3 + $0x168] sm:$0xff]   ;;  %v8248_v26 = vld [vmem:[%s11891_s3 + $0x170] sm:$0xff]  }
 0x2a5   : >> { %2310 = vmatprep.subr.bf16.mxu1 %v2262_v27  ;;  %v2264_v28 = vpop.permute.xlu0 %2263  ;;  %v2283_v30 = vsel %vm11896_vm4, %v2260_v21, %v2262_v27  ;;  %v8245_v21 = vld [vmem:[%s11891_s3 + $0x158] sm:$0xff]  }
 0x2a6   : >> { %2311 = vmatpush1.bf16.msra.mxu1 %v2283_v30  ;;  %v8249_v27 = vld [vmem:[%s11891_s3 + $0x178] sm:$0xff]  }
 0x2a8   : >> { %v2266_v34 = vpop.permute.xlu1 %2265  ;;  %2570 = vrot.lane.b32.xlu0 %v2482_v31, %s8378_s30  ;;  %2568 = vrot.lane.b32.xlu1 %v2481_v33, %s8378_s30 }
 0x2a9   : >> { %2312 = vmatprep.subr.bf16.mxu1 %v2266_v34  ;;  %v2268_v35 = vpop.permute.xlu0 %2267  ;;  %v2284_v39 = vsel %vm11896_vm4, %v2264_v28, %v2266_v34 }
 0x2aa   : >> { %2313 = vmatpush1.bf16.msra.mxu1 %v2284_v39 }
 0x2ac   : >> { %v2270_v46 = vpop.permute.xlu1 %2269  ;;  %2574 = vrot.lane.b32.xlu0 %v2484_v43, %s8378_s30  ;;  %2572 = vrot.lane.b32.xlu1 %v2483_v45, %s8378_s30 }
 0x2ad   : >> { %2314 = vmatprep.subr.bf16.mxu1 %v2270_v46  ;;  %v2285_v47 = vsel %vm11896_vm4, %v2268_v35, %v2270_v46  ;;  %v2272_v49 = vpop.permute.xlu0 %2271 }
 0x2ae   : >> { %2315 = vmatpush1.bf16.msra.mxu1 %v2285_v47 }
 0x2b0   : >> { %v2274_v54 = vpop.permute.xlu1 %2273  ;;  %2578 = vrot.lane.b32.xlu0 %v2486_v50, %s8378_s30  ;;  %2576 = vrot.lane.b32.xlu1 %v2485_v53, %s8378_s30 }
 0x2b1   : >> { %2316 = vmatprep.subr.bf16.mxu1 %v2274_v54  ;;  %v2286_v56 = vsel %vm11896_vm4, %v2272_v49, %v2274_v54  ;;  %v2276_v61 = vpop.permute.xlu0 %2275 }
 0x2b2   : >> { %2317 = vmatpush1.bf16.msra.mxu1 %v2286_v56 }
 0x2b4   : >> { %v2278_v63 = vpop.permute.xlu1 %2277  ;;  %2582 = vrot.lane.b32.xlu0 %v2488_v59, %s8378_s30  ;;  %2580 = vrot.lane.b32.xlu1 %v2487_v60, %s8378_s30 }
 0x2b5   : >> { %2318 = vmatprep.subr.bf16.mxu1 %v2278_v63  ;;  %v2287_v5 = vsel %vm11896_vm4, %v2276_v61, %v2278_v63  ;;  %vm11900_vm4 = vcmask 777216  }
 0x2b6   : >> { %2319 = vmatpush1.bf16.msra.mxu1 %v2287_v5 }
 0x2b8   : >> { %2821 = vrot.lane.b32.xlu0 %v8618_v11, %s8379_s14  ;;  %2584 = vrot.lane.b32.xlu1 %v2489_v16, %s8378_s30 }
 0x2b9   : >> { %2337 = vmatmul.mubr.bf16.vlgmr.msra.gmra.mrb[0].mxu1 %v8242_v12 }
 0x2ba   : >> { %2346 = vmatprep.mubr.bf16.mxu1 %v11927_v10 }
 0x2bc   : >> { %3040 = vrot.lane.b32.xlu0 %v8745_v19, %s8380_s15  ;;  %2823 = vrot.lane.b32.xlu1 %v8625_v15, %s8379_s14 }
 0x2c0   : >> { %2825 = vrot.lane.b32.xlu0 %v8633_v18, %s8379_s14  ;;  %3042 = vrot.lane.b32.xlu1 %v8751_v20, %s8380_s15  ;;  %s8391_s15 = smov 66  }
 0x2c1   : >> { %2347 = vmatmul.mubr.bf16.gmra.mrb[4].mxu1 %v8243_v17 }
 0x2c2   : >> { %2356 = vmatprep.mubr.bf16.mxu1 %v11927_v10 }
 0x2c4   : >> { %2829 = vrot.lane.b32.xlu0 %v8648_v25, %s8379_s14  ;;  %2827 = vrot.lane.b32.xlu1 %v8640_v22, %s8379_s14 }
 0x2c8   : >> { %2833 = vrot.lane.b32.xlu0 %v8663_v32, %s8379_s14  ;;  %2831 = vrot.lane.b32.xlu1 %v8655_v29, %s8379_s14 }
 0x2c9   : >> { %2357 = vmatmul.mubr.bf16.gmra.mrb[8].mxu1 %v8244_v40 }
 0x2ca   : >> { %2366 = vmatprep.mubr.bf16.mxu1 %v11927_v10 }
 0x2cc   : >> { %2837 = vrot.lane.b32.xlu0 %v8678_v44, %s8379_s14  ;;  %2835 = vrot.lane.b32.xlu1 %v8670_v36, %s8379_s14 }
 0x2d0   : >> { %2841 = vrot.lane.b32.xlu0 %v8693_v51, %s8379_s14  ;;  %2839 = vrot.lane.b32.xlu1 %v8685_v48, %s8379_s14 }
 0x2d1   : >> { %2367 = vmatmul.mubr.bf16.gmra.mrb[12].mxu1 %v8245_v21  ;;  %v8250_v21 = vld [vmem:[%s11891_s3 + $0x180] sm:$0xff]  }
 0x2d2   : >> { %2376 = vmatprep.mubr.bf16.mxu1 %v11927_v10 }
 0x2d4   : >> { %2845 = vrot.lane.b32.xlu0 %v8708_v58, %s8379_s14  ;;  %2843 = vrot.lane.b32.xlu1 %v8700_v55, %s8379_s14 }
 0x2d8   : >> { %2849 = vrot.lane.b32.xlu0 %v8723_v3, %s8379_s14  ;;  %2847 = vrot.lane.b32.xlu1 %v8715_v62, %s8379_s14 }
 0x2d9   : >> { %2377 = vmatmul.mubr.bf16.gmra.mrb[16].mxu1 %v8246_v23 }
 0x2da   : >> { %2386 = vmatprep.mubr.bf16.mxu1 %v11927_v10 }
 0x2dc   : >> { %2851 = vrot.lane.b32.xlu1 %v8734_v14, %s8379_s14 }
 0x2e1   : >> { %2387 = vmatmul.mubr.bf16.gmra.mrb[20].mxu1 %v8247_v24 }
 0x2e2   : >> { %2396 = vmatprep.mubr.bf16.mxu1 %v11927_v10 }
 0x2e9   : >> { %2397 = vmatmul.mubr.bf16.gmra.mrb[24].mxu1 %v8248_v26 }
 0x2ea   : >> { %2406 = vmatprep.mubr.bf16.mxu1 %v11927_v10 }
 0x2f1   : >> { %2407 = vmatmul.mubr.bf16.gmra.mrb[28].mxu1 %v8249_v27 }
 0x2f2   : >> { %2643 = vmatprep.mubr.bf16.mxu1 %v11927_v10 }
 0x30a   : >> { %v2555_v28 = vpop.permute.xlu0 %2554 }
 0x30e   : >> { %v2557_v30 = vpop.permute.xlu1 %2556  ;;  %v2559_v31 = vpop.permute.xlu0 %2558 }
 0x30f   : >> { %2611 = vmatprep.subr.bf16.mxu1 %v2557_v30  ;;  %v2587_v33 = vsel %vm11898_vm10, %v2555_v28, %v2557_v30 }
 0x310   : >> { %2612 = vmatpush1.bf16.msra.mxu1 %v2587_v33  ;;  %v8251_v33 = vld [vmem:[%s11891_s3 + $0x188] sm:$0xff]  }
 0x312   : >> { %v2561_v34 = vpop.permute.xlu1 %2560  ;;  %v2563_v35 = vpop.permute.xlu0 %2562 }
 0x313   : >> { %2613 = vmatprep.subr.bf16.mxu1 %v2561_v34  ;;  %v2588_v39 = vsel %vm11898_vm10, %v2559_v31, %v2561_v34 }
 0x314   : >> { %2614 = vmatpush1.bf16.msra.mxu1 %v2588_v39 }
 0x316   : >> { %v2565_v43 = vpop.permute.xlu1 %2564  ;;  %v2567_v45 = vpop.permute.xlu0 %2566 }
 0x317   : >> { %2615 = vmatprep.subr.bf16.mxu1 %v2565_v43  ;;  %v2589_v46 = vsel %vm11898_vm10, %v2563_v35, %v2565_v43 }
 0x318   : >> { %2616 = vmatpush1.bf16.msra.mxu1 %v2589_v46 }
 0x31a   : >> { %v2569_v47 = vpop.permute.xlu1 %2568  ;;  %v2571_v49 = vpop.permute.xlu0 %2570 }
 0x31b   : >> { %2617 = vmatprep.subr.bf16.mxu1 %v2569_v47  ;;  %v2590_v50 = vsel %vm11898_vm10, %v2567_v45, %v2569_v47 }
 0x31c   : >> { %2618 = vmatpush1.bf16.msra.mxu1 %v2590_v50  ;;  %v8252_v50 = vld [vmem:[%s11891_s3 + $0x190] sm:$0xff]  }
 0x31e   : >> { %v2573_v53 = vpop.permute.xlu1 %2572  ;;  %v2575_v54 = vpop.permute.xlu0 %2574 }
 0x31f   : >> { %2619 = vmatprep.subr.bf16.mxu1 %v2573_v53  ;;  %v2591_v56 = vsel %vm11898_vm10, %v2571_v49, %v2573_v53 }
 0x320   : >> { %2620 = vmatpush1.bf16.msra.mxu1 %v2591_v56 }
 0x322   : >> { %v2577_v59 = vpop.permute.xlu1 %2576  ;;  %v2579_v60 = vpop.permute.xlu0 %2578 }
 0x323   : >> { %2621 = vmatprep.subr.bf16.mxu1 %v2577_v59  ;;  %v2592_v61 = vsel %vm11898_vm10, %v2575_v54, %v2577_v59 }
 0x324   : >> { %2622 = vmatpush1.bf16.msra.mxu1 %v2592_v61 }
 0x326   : >> { %v2581_v63 = vpop.permute.xlu1 %2580  ;;  %v2583_v5 = vpop.permute.xlu0 %2582 }
 0x327   : >> { %2623 = vmatprep.subr.bf16.mxu1 %v2581_v63  ;;  %v2593_v12 = vsel %vm11898_vm10, %v2579_v60, %v2581_v63 }
 0x328   : >> { %2624 = vmatpush1.bf16.msra.mxu1 %v2593_v12 }
 0x32a   : >> { %v2585_v16 = vpop.permute.xlu1 %2584  ;;  %v2822_v17 = vpop.permute.xlu0 %2821 }
 0x32b   : >> { %2625 = vmatprep.subr.bf16.mxu1 %v2585_v16  ;;  %v2594_v40 = vsel %vm11898_vm10, %v2583_v5, %v2585_v16  ;;  %vm3044_vm10 = vcmask 277504  }
 0x32c   : >> { %2626 = vmatpush1.bf16.msra.mxu1 %v2594_v40 }
 0x32e   : >> { %v2824_v23 = vpop.permute.xlu1 %2823  ;;  %v9092_v24 = vpop.permute.xlu0 %3040 }
 0x32f   : >> { %12002 = vst [vmem:[#allocation17_spill] sm:$0xff] %v9092_v24  ;;  %vm11902_vm12 = vcmp.ne.s16.totalorder %v9092_v24, 0  ;;  %2878 = vmatprep.subr.bf16.mxu1 %v2824_v23  ;;  %2644 = vmatmul.mubr.bf16.vlgmr.msra.gmra.mrb[0].mxu1 %v8250_v21  ;;  %v2854_v26 = vsel %vm11900_vm4, %v2822_v17, %v2824_v23  ;;  %v8253_v17 = vld [vmem:[%s11891_s3 + $0x198] sm:$0xff]  }
 0x330   : >> { %2879 = vmatpush1.bf16.msra.mxu1 %v2854_v26  ;;  %v3048_v27 = vsel %vm11902_vm12, %v8618_v11, 0  ;;  %2653 = vmatprep.mubr.bf16.mxu1 %v11927_v10  ;;  %v3050_v45 = vsel %vm11902_vm12, %v8633_v18, 0  ;;  %v3052_v53 = vsel %vm11902_vm12, %v8648_v25, 0  ;;  %v3054_v61 = vsel %vm11902_vm12, %v8663_v32, 0 }
 0x331   : >> { %3128 = vrot.lane.b32.xlu0 %v3048_v27, %s8381_s18  ;;  %v3056_v40 = vsel %vm11902_vm12, %v8678_v44, 0 }
 0x332   : >> { %v3043_v28 = vpop.permute.xlu1 %3042  ;;  %v2826_v30 = vpop.permute.xlu0 %2825 }
 0x333   : >> { %v9102_v31 = vsel %vm3044_vm10, %v9092_v24, %v3043_v28  ;;  %v3058_v28 = vsel %vm11902_vm12, %v8693_v51, 0  ;;  %vm11903_vm10 = vcmask 769024  }
 0x334   : >> { %12003 = vst [vmem:[#allocation18_spill] sm:$0xff] %v9102_v31  ;;  %vm11901_vm11 = vcmp.ne.s16.totalorder %v9102_v31, 0 }
 0x335   : >> { %3347 = vrot.lane.b32.xlu0 %v8585_v41, %s8382_s21  ;;  %v3049_v34 = vsel %vm11901_vm11, %v8625_v15, 0  ;;  %v3051_v54 = vsel %vm11901_vm11, %v8640_v22, 0  ;;  %v3053_v63 = vsel %vm11901_vm11, %v8655_v29, 0  ;;  %v3055_v21 = vsel %vm11901_vm11, %v8670_v36, 0 }
 0x336   : >> { %v2828_v35 = vpop.permute.xlu1 %2827  ;;  %3130 = vrot.lane.b32.xlu1 %v3049_v34, %s8381_s18  ;;  %v2830_v39 = vpop.permute.xlu0 %2829 }
 0x337   : >> { %2880 = vmatprep.subr.bf16.mxu1 %v2828_v35  ;;  %v2855_v43 = vsel %vm11900_vm4, %v2826_v30, %v2828_v35  ;;  %2654 = vmatmul.mubr.bf16.gmra.mrb[4].mxu1 %v8251_v33  ;;  %v3057_v30 = vsel %vm11901_vm11, %v8685_v48, 0  ;;  %v8254_v35 = vld [vmem:[%s11891_s3 + $0x1a0] sm:$0xff]  }
 0x338   : >> { %2881 = vmatpush1.bf16.msra.mxu1 %v2855_v43  ;;  %2663 = vmatprep.mubr.bf16.mxu1 %v11927_v10  ;;  %v3059_v43 = vsel %vm11901_vm11, %v8700_v55, 0 }
 0x339   : >> { %3132 = vrot.lane.b32.xlu0 %v3050_v45, %s8381_s18 }
 0x33a   : >> { %v2832_v46 = vpop.permute.xlu1 %2831  ;;  %3349 = vrot.lane.b32.xlu1 %v8589_v42, %s8382_s21  ;;  %v2834_v47 = vpop.permute.xlu0 %2833  ;;  %s8390_s21 = smov 126  }
 0x33b   : >> { %2882 = vmatprep.subr.bf16.mxu1 %v2832_v46  ;;  %v2856_v49 = vsel %vm11900_vm4, %v2830_v39, %v2832_v46  ;;  %v3060_v39 = vsel %vm11902_vm12, %v8708_v58, 0 }
 0x33c   : >> { %2883 = vmatpush1.bf16.msra.mxu1 %v2856_v49  ;;  %v3062_v49 = vsel %vm11902_vm12, %v8723_v3, 0 }
 0x33d   : >> { %3136 = vrot.lane.b32.xlu0 %v3052_v53, %s8381_s18  ;;  %v8255_v53 = vld [vmem:[%s11891_s3 + $0x1a8] sm:$0xff]  }
 0x33e   : >> { %v2836_v56 = vpop.permute.xlu1 %2835  ;;  %3134 = vrot.lane.b32.xlu1 %v3051_v54, %s8381_s18  ;;  %v2838_v59 = vpop.permute.xlu0 %2837  ;;  %v3063_v54 = vsel %vm11901_vm11, %v8734_v14, 0 }
 0x33f   : >> { %2884 = vmatprep.subr.bf16.mxu1 %v2836_v56  ;;  %v2857_v60 = vsel %vm11900_vm4, %v2834_v47, %v2836_v56  ;;  %2664 = vmatmul.mubr.bf16.gmra.mrb[8].mxu1 %v8252_v50  ;;  %v3061_v50 = vsel %vm11901_vm11, %v8715_v62, 0  ;;  %v8256_v56 = vld [vmem:[%s11891_s3 + $0x1b0] sm:$0xff]   ;;  %vm3351_vm11 = vcmask 392192  }
 0x340   : >> { %2885 = vmatpush1.bf16.msra.mxu1 %v2857_v60  ;;  %2673 = vmatprep.mubr.bf16.mxu1 %v11927_v10  ;;  %v8258_v60 = vld [vmem:[%s11891_s3 + $0x1c0] sm:$0xff]  }
 0x341   : >> { %3140 = vrot.lane.b32.xlu0 %v3054_v61, %s8381_s18  ;;  %v8259_v61 = vld [vmem:[%s11891_s3 + $0x1c8] sm:$0xff]  }
 0x342   : >> { %v2840_v5 = vpop.permute.xlu1 %2839  ;;  %3138 = vrot.lane.b32.xlu1 %v3053_v63, %s8381_s18  ;;  %v2842_v12 = vpop.permute.xlu0 %2841  ;;  %v8260_v63 = vld [vmem:[%s11891_s3 + $0x1d0] sm:$0xff]  }
 0x343   : >> { %2886 = vmatprep.subr.bf16.mxu1 %v2840_v5  ;;  %v2858_v16 = vsel %vm11900_vm4, %v2838_v59, %v2840_v5  ;;  %v8257_v59 = vld [vmem:[%s11891_s3 + $0x1b8] sm:$0xff]  }
 0x344   : >> { %2887 = vmatpush1.bf16.msra.mxu1 %v2858_v16  ;;  %v8261_v5 = vld [vmem:[%s11891_s3 + $0x1d8] sm:$0xff]   ;;  %v8263_v16 = vld [vmem:[%s11891_s3 + $0x1e8] sm:$0xff]  }
 0x345   : >> { %3144 = vrot.lane.b32.xlu0 %v3056_v40, %s8381_s18 }
 0x346   : >> { %v2844_v23 = vpop.permute.xlu1 %2843  ;;  %3142 = vrot.lane.b32.xlu1 %v3055_v21, %s8381_s18  ;;  %v2846_v27 = vpop.permute.xlu0 %2845  ;;  %v8265_v21 = vld [vmem:[%s11891_s3 + $0x1f8] sm:$0xff]  }
 0x347   : >> { %2888 = vmatprep.subr.bf16.mxu1 %v2844_v23  ;;  %v2859_v26 = vsel %vm11900_vm4, %v2842_v12, %v2844_v23  ;;  %2674 = vmatmul.mubr.bf16.gmra.mrb[12].mxu1 %v8253_v17  ;;  %v8262_v12 = vld [vmem:[%s11891_s3 + $0x1e0] sm:$0xff]   ;;  %v8264_v17 = vld [vmem:[%s11891_s3 + $0x1f0] sm:$0xff]  }
 0x348   : >> { %2889 = vmatpush1.bf16.msra.mxu1 %v2859_v26  ;;  %2683 = vmatprep.mubr.bf16.mxu1 %v11927_v10 }
 0x349   : >> { %3148 = vrot.lane.b32.xlu0 %v3058_v28, %s8381_s18 }
 0x34a   : >> { %v2848_v33 = vpop.permute.xlu1 %2847  ;;  %3146 = vrot.lane.b32.xlu1 %v3057_v30, %s8381_s18  ;;  %v2850_v45 = vpop.permute.xlu0 %2849 }
 0x34b   : >> { %2890 = vmatprep.subr.bf16.mxu1 %v2848_v33  ;;  %v2860_v34 = vsel %vm11900_vm4, %v2846_v27, %v2848_v33 }
 0x34c   : >> { %2891 = vmatpush1.bf16.msra.mxu1 %v2860_v34 }
 0x34d   : >> { %3152 = vrot.lane.b32.xlu0 %v3060_v39, %s8381_s18 }
 0x34e   : >> { %v2852_v46 = vpop.permute.xlu1 %2851  ;;  %3150 = vrot.lane.b32.xlu1 %v3059_v43, %s8381_s18 }
 0x34f   : >> { %2892 = vmatprep.subr.bf16.mxu1 %v2852_v46  ;;  %v2861_v47 = vsel %vm11900_vm4, %v2850_v45, %v2852_v46  ;;  %2684 = vmatmul.mubr.bf16.gmra.mrb[16].mxu1 %v8254_v35 }
 0x350   : >> { %2893 = vmatpush1.bf16.msra.mxu1 %v2861_v47  ;;  %2693 = vmatprep.mubr.bf16.mxu1 %v11927_v10 }
 0x351   : >> { %3156 = vrot.lane.b32.xlu0 %v3062_v49, %s8381_s18 }
 0x352   : >> { %3154 = vrot.lane.b32.xlu1 %v3061_v50, %s8381_s18 }
 0x356   : >> { %3158 = vrot.lane.b32.xlu1 %v3063_v54, %s8381_s18 }
 0x357   : >> { %2694 = vmatmul.mubr.bf16.gmra.mrb[20].mxu1 %v8255_v53 }
 0x358   : >> { %2703 = vmatprep.mubr.bf16.mxu1 %v11927_v10 }
 0x35f   : >> { %2704 = vmatmul.mubr.bf16.gmra.mrb[24].mxu1 %v8256_v56 }
 0x360   : >> { %2713 = vmatprep.mubr.bf16.mxu1 %v11927_v10 }
 0x367   : >> { %2714 = vmatmul.mubr.bf16.gmra.mrb[28].mxu1 %v8257_v59 }
 0x368   : >> { %2910 = vmatprep.mubr.bf16.mxu1 %v11927_v10 }
 0x36f   : >> { %2911 = vmatmul.mubr.bf16.vlgmr.msra.gmra.mrb[0].mxu1 %v8258_v60 }
 0x370   : >> { %2920 = vmatprep.mubr.bf16.mxu1 %v11927_v10 }
 0x377   : >> { %2921 = vmatmul.mubr.bf16.gmra.mrb[4].mxu1 %v8259_v61 }
 0x378   : >> { %2930 = vmatprep.mubr.bf16.mxu1 %v11927_v10 }
 0x37f   : >> { %2931 = vmatmul.mubr.bf16.gmra.mrb[8].mxu1 %v8260_v63 }
 0x380   : >> { %2940 = vmatprep.mubr.bf16.mxu1 %v11927_v10 }
 0x387   : >> { %2941 = vmatmul.mubr.bf16.gmra.mrb[12].mxu1 %v8261_v5 }
 0x388   : >> { %2950 = vmatprep.mubr.bf16.mxu1 %v11927_v10 }
 0x38f   : >> { %2951 = vmatmul.mubr.bf16.gmra.mrb[16].mxu1 %v8262_v12 }
 0x390   : >> { %2960 = vmatprep.mubr.bf16.mxu1 %v11927_v10 }
 0x397   : >> { %2961 = vmatmul.mubr.bf16.gmra.mrb[20].mxu1 %v8263_v16 }
 0x398   : >> { %2970 = vmatprep.mubr.bf16.mxu1 %v11927_v10 }
 0x39f   : >> { %2971 = vmatmul.mubr.bf16.gmra.mrb[24].mxu1 %v8264_v17 }
 0x3a0   : >> { %2980 = vmatprep.mubr.bf16.mxu1 %v11927_v10 }
 0x3a3   : >> { %v3129_v40 = vpop.permute.xlu0 %3128 }
 0x3a7   : >> { %v9233_v23 = vpop.permute.xlu0 %3347  ;;  %2981 = vmatmul.mubr.bf16.gmra.mrb[28].mxu1 %v8265_v21 }
 0x3a8   : >> { %12004 = vst [vmem:[#allocation19_spill] sm:$0xff] %v9233_v23  ;;  %vm11906_vm4 = vcmp.ne.s16.totalorder %v9233_v23, 0  ;;  %v3131_v26 = vpop.permute.xlu1 %3130  ;;  %3217 = vmatprep.mubr.bf16.mxu1 %v11927_v10 }
 0x3a9   : >> { %3185 = vmatprep.subr.bf16.mxu1 %v3131_v26  ;;  %v3161_v27 = vsel %vm11903_vm10, %v3129_v40, %v3131_v26  ;;  %v3355_v28 = vsel %vm11906_vm4, %v8618_v11, 0  ;;  %v3357_v35 = vsel %vm11906_vm4, %v8633_v18, 0  ;;  %v3359_v46 = vsel %vm11906_vm4, %v8648_v25, 0 }
 0x3aa   : >> { %3186 = vmatpush1.bf16.msra.mxu1 %v3161_v27  ;;  %3435 = vrot.lane.b32.xlu0 %v3355_v28, %s8383_s24  ;;  %v3361_v54 = vsel %vm11906_vm4, %v8663_v32, 0  ;;  %v3363_v63 = vsel %vm11906_vm4, %v8678_v44, 0  ;;  %v3365_v40 = vsel %vm11906_vm4, %v8693_v51, 0  ;;  %v3367_v28 = vsel %vm11906_vm4, %v8708_v58, 0 }
 0x3ab   : >> { %v3133_v30 = vpop.permute.xlu0 %3132 }
 0x3ac   : >> { %v3350_v33 = vpop.permute.xlu1 %3349 }
 0x3ad   : >> { %v9243_v34 = vsel %vm3351_vm11, %v9233_v23, %v3350_v33  ;;  %vm11905_vm11 = vcmask 654336  }
 0x3ae   : >> { %12005 = vst [vmem:[#allocation20_spill] sm:$0xff] %v9243_v34  ;;  %vm11904_vm12 = vcmp.ne.s16.totalorder %v9243_v34, 0  ;;  %3439 = vrot.lane.b32.xlu0 %v3357_v35, %s8383_s24 }
 0x3af   : >> { %v3137_v39 = vpop.permute.xlu0 %3136  ;;  %v3356_v43 = vsel %vm11904_vm12, %v8625_v15, 0  ;;  %v3358_v50 = vsel %vm11904_vm12, %v8640_v22, 0  ;;  %v3360_v60 = vsel %vm11904_vm12, %v8655_v29, 0  ;;  %v3362_v12 = vsel %vm11904_vm12, %v8670_v36, 0 }
 0x3b0   : >> { %v3135_v45 = vpop.permute.xlu1 %3134  ;;  %3437 = vrot.lane.b32.xlu1 %v3356_v43, %s8383_s24  ;;  %v3364_v26 = vsel %vm11904_vm12, %v8685_v48, 0  ;;  %v3366_v35 = vsel %vm11904_vm12, %v8700_v55, 0  ;;  %v3369_v43 = vsel %vm11906_vm4, %v8723_v3, 0 }
 0x3b1   : >> { %3187 = vmatprep.subr.bf16.mxu1 %v3135_v45  ;;  %v3162_v47 = vsel %vm11903_vm10, %v3133_v30, %v3135_v45 }
 0x3b2   : >> { %3443 = vrot.lane.b32.xlu0 %v3359_v46, %s8383_s24  ;;  %3188 = vmatpush1.bf16.msra.mxu1 %v3162_v47  ;;  %v3368_v46 = vsel %vm11904_vm12, %v8715_v62, 0 }
 0x3b3   : >> { %v3141_v49 = vpop.permute.xlu0 %3140 }
 0x3b4   : >> { %v3139_v53 = vpop.permute.xlu1 %3138  ;;  %3441 = vrot.lane.b32.xlu1 %v3358_v50, %s8383_s24 }
 0x3b5   : >> { %3189 = vmatprep.subr.bf16.mxu1 %v3139_v53  ;;  %v3163_v56 = vsel %vm11903_vm10, %v3137_v39, %v3139_v53  ;;  %v8266_v53 = vld [vmem:[%s11891_s3 + $0x200] sm:$0xff]  }
 0x3b6   : >> { %3447 = vrot.lane.b32.xlu0 %v3361_v54, %s8383_s24  ;;  %3190 = vmatpush1.bf16.msra.mxu1 %v3163_v56  ;;  %v3370_v54 = vsel %vm11904_vm12, %v8734_v14, 0  ;;  %v8267_v56 = vld [vmem:[%s11891_s3 + $0x208] sm:$0xff]  }
 0x3b7   : >> { %v3145_v59 = vpop.permute.xlu0 %3144 }
 0x3b8   : >> { %v3143_v61 = vpop.permute.xlu1 %3142  ;;  %3445 = vrot.lane.b32.xlu1 %v3360_v60, %s8383_s24  ;;  %v8269_v60 = vld [vmem:[%s11891_s3 + $0x218] sm:$0xff]  }
 0x3b9   : >> { %3191 = vmatprep.subr.bf16.mxu1 %v3143_v61  ;;  %v3164_v5 = vsel %vm11903_vm10, %v3141_v49, %v3143_v61  ;;  %v8270_v61 = vld [vmem:[%s11891_s3 + $0x220] sm:$0xff]  }
 0x3ba   : >> { %3451 = vrot.lane.b32.xlu0 %v3363_v63, %s8383_s24  ;;  %3192 = vmatpush1.bf16.msra.mxu1 %v3164_v5  ;;  %v8271_v63 = vld [vmem:[%s11891_s3 + $0x228] sm:$0xff]   ;;  %v8272_v5 = vld [vmem:[%s11891_s3 + $0x230] sm:$0xff]  }
 0x3bb   : >> { %v3149_v16 = vpop.permute.xlu0 %3148 }
 0x3bc   : >> { %v3147_v17 = vpop.permute.xlu1 %3146  ;;  %3449 = vrot.lane.b32.xlu1 %v3362_v12, %s8383_s24  ;;  %v8273_v12 = vld [vmem:[%s11891_s3 + $0x238] sm:$0xff]  }
 0x3bd   : >> { %3193 = vmatprep.subr.bf16.mxu1 %v3147_v17  ;;  %v3165_v21 = vsel %vm11903_vm10, %v3145_v59, %v3147_v17  ;;  %v8268_v59 = vld [vmem:[%s11891_s3 + $0x210] sm:$0xff]  }
 0x3be   : >> { %3455 = vrot.lane.b32.xlu0 %v3365_v40, %s8383_s24  ;;  %3194 = vmatpush1.bf16.msra.mxu1 %v3165_v21 }
 0x3bf   : >> { %v3153_v33 = vpop.permute.xlu0 %3152 }
 0x3c0   : >> { %v3151_v27 = vpop.permute.xlu1 %3150  ;;  %3453 = vrot.lane.b32.xlu1 %v3364_v26, %s8383_s24 }
 0x3c1   : >> { %3195 = vmatprep.subr.bf16.mxu1 %v3151_v27  ;;  %v3166_v30 = vsel %vm11903_vm10, %v3149_v16, %v3151_v27 }
 0x3c2   : >> { %3459 = vrot.lane.b32.xlu0 %v3367_v28, %s8383_s24  ;;  %3196 = vmatpush1.bf16.msra.mxu1 %v3166_v30 }
 0x3c3   : >> { %v3157_v47 = vpop.permute.xlu0 %3156 }
 0x3c4   : >> { %v3155_v39 = vpop.permute.xlu1 %3154  ;;  %3457 = vrot.lane.b32.xlu1 %v3366_v35, %s8383_s24 }
 0x3c5   : >> { %3197 = vmatprep.subr.bf16.mxu1 %v3155_v39  ;;  %v3167_v45 = vsel %vm11903_vm10, %v3153_v33, %v3155_v39 }
 0x3c6   : >> { %3463 = vrot.lane.b32.xlu0 %v3369_v43, %s8383_s24  ;;  %3198 = vmatpush1.bf16.msra.mxu1 %v3167_v45 }
 0x3c8   : >> { %v3159_v49 = vpop.permute.xlu1 %3158  ;;  %3461 = vrot.lane.b32.xlu1 %v3368_v46, %s8383_s24 }
 0x3c9   : >> { %3199 = vmatprep.subr.bf16.mxu1 %v3159_v49  ;;  %v3168_v50 = vsel %vm11903_vm10, %v3157_v47, %v3159_v49  ;;  %vm11907_vm10 = vcmask 646144  }
 0x3ca   : >> { %3702 = vrot.lane.b32.xlu0 %v8618_v11, %s8384_s10  ;;  %3200 = vmatpush1.bf16.msra.mxu1 %v3168_v50 }
 0x3cc   : >> { %3465 = vrot.lane.b32.xlu1 %v3370_v54, %s8383_s24 }
 0x3cd   : >> { %3218 = vmatmul.mubr.bf16.vlgmr.msra.gmra.mrb[0].mxu1 %v8266_v53 }
 0x3ce   : >> { %3921 = vrot.lane.b32.xlu0 %v8745_v19, %s8385_s11  ;;  %3227 = vmatprep.mubr.bf16.mxu1 %v11927_v10 }
 0x3d0   : >> { %3704 = vrot.lane.b32.xlu1 %v8625_v15, %s8384_s10 }
 0x3d2   : >> { %3706 = vrot.lane.b32.xlu0 %v8633_v18, %s8384_s10 }
 0x3d4   : >> { %3923 = vrot.lane.b32.xlu1 %v8751_v20, %s8385_s11  ;;  %s11921_s11 = smov 62  }
 0x3d5   : >> { %3228 = vmatmul.mubr.bf16.gmra.mrb[4].mxu1 %v8267_v56 }
 0x3d6   : >> { %3710 = vrot.lane.b32.xlu0 %v8648_v25, %s8384_s10  ;;  %3237 = vmatprep.mubr.bf16.mxu1 %v11927_v10 }
 0x3d8   : >> { %3708 = vrot.lane.b32.xlu1 %v8640_v22, %s8384_s10 }
 0x3da   : >> { %3714 = vrot.lane.b32.xlu0 %v8663_v32, %s8384_s10 }
 0x3dc   : >> { %3712 = vrot.lane.b32.xlu1 %v8655_v29, %s8384_s10 }
 0x3dd   : >> { %3238 = vmatmul.mubr.bf16.gmra.mrb[8].mxu1 %v8268_v59 }
 0x3de   : >> { %3718 = vrot.lane.b32.xlu0 %v8678_v44, %s8384_s10  ;;  %3247 = vmatprep.mubr.bf16.mxu1 %v11927_v10 }
 0x3e0   : >> { %3716 = vrot.lane.b32.xlu1 %v8670_v36, %s8384_s10 }
 0x3e2   : >> { %3722 = vrot.lane.b32.xlu0 %v8693_v51, %s8384_s10 }
 0x3e4   : >> { %3720 = vrot.lane.b32.xlu1 %v8685_v48, %s8384_s10 }
 0x3e5   : >> { %3248 = vmatmul.mubr.bf16.gmra.mrb[12].mxu1 %v8269_v60 }
 0x3e6   : >> { %3726 = vrot.lane.b32.xlu0 %v8708_v58, %s8384_s10  ;;  %3257 = vmatprep.mubr.bf16.mxu1 %v11927_v10 }
 0x3e8   : >> { %3724 = vrot.lane.b32.xlu1 %v8700_v55, %s8384_s10 }
 0x3ea   : >> { %3730 = vrot.lane.b32.xlu0 %v8723_v3, %s8384_s10 }
 0x3ec   : >> { %3728 = vrot.lane.b32.xlu1 %v8715_v62, %s8384_s10 }
 0x3ed   : >> { %3258 = vmatmul.mubr.bf16.gmra.mrb[16].mxu1 %v8270_v61 }
 0x3ee   : >> { %916 = vrot.lane.b32.xlu0 %v8618_v11, %s8386_s6  ;;  %3267 = vmatprep.mubr.bf16.mxu1 %v11927_v10 }
 0x3f0   : >> { %3732 = vrot.lane.b32.xlu1 %v8734_v14, %s8384_s10 }
 0x3f2   : >> { %920 = vrot.lane.b32.xlu0 %v8633_v18, %s8386_s6 }
 0x3f4   : >> { %918 = vrot.lane.b32.xlu1 %v8625_v15, %s8386_s6 }
 0x3f5   : >> { %3268 = vmatmul.mubr.bf16.gmra.mrb[20].mxu1 %v8271_v63 }
 0x3f6   : >> { %924 = vrot.lane.b32.xlu0 %v8648_v25, %s8386_s6  ;;  %3277 = vmatprep.mubr.bf16.mxu1 %v11927_v10 }
 0x3f8   : >> { %922 = vrot.lane.b32.xlu1 %v8640_v22, %s8386_s6 }
 0x3fa   : >> { %928 = vrot.lane.b32.xlu0 %v8663_v32, %s8386_s6 }
 0x3fc   : >> { %926 = vrot.lane.b32.xlu1 %v8655_v29, %s8386_s6 }
 0x3fd   : >> { %3278 = vmatmul.mubr.bf16.gmra.mrb[24].mxu1 %v8272_v5 }
 0x3fe   : >> { %932 = vrot.lane.b32.xlu0 %v8678_v44, %s8386_s6  ;;  %3287 = vmatprep.mubr.bf16.mxu1 %v11927_v10 }
 0x400   : >> { %930 = vrot.lane.b32.xlu1 %v8670_v36, %s8386_s6 }
 0x402   : >> { %936 = vrot.lane.b32.xlu0 %v8693_v51, %s8386_s6 }
 0x404   : >> { %934 = vrot.lane.b32.xlu1 %v8685_v48, %s8386_s6 }
 0x405   : >> { %3288 = vmatmul.mubr.bf16.gmra.mrb[28].mxu1 %v8273_v12 }
 0x406   : >> { %940 = vrot.lane.b32.xlu0 %v8708_v58, %s8386_s6  ;;  %3524 = vmatprep.mubr.bf16.mxu1 %v11927_v10 }
 0x408   : >> { %938 = vrot.lane.b32.xlu1 %v8700_v55, %s8386_s6 }
 0x40a   : >> { %944 = vrot.lane.b32.xlu0 %v8723_v3, %s8386_s6 }
 0x40c   : >> { %942 = vrot.lane.b32.xlu1 %v8715_v62, %s8386_s6 }
 0x410   : >> { %946 = vrot.lane.b32.xlu1 %v8734_v14, %s8386_s6 }
 0x41c   : >> { %v3436_v16 = vpop.permute.xlu0 %3435 }
 0x420   : >> { %v3440_v17 = vpop.permute.xlu0 %3439 }
 0x422   : >> { %v3438_v40 = vpop.permute.xlu1 %3437 }
 0x423   : >> { %3492 = vmatprep.subr.bf16.mxu1 %v3438_v40  ;;  %v3468_v21 = vsel %vm11905_vm11, %v3436_v16, %v3438_v40  ;;  %v8274_v16 = vld [vmem:[%s11891_s3 + $0x240] sm:$0xff]  }
 0x424   : >> { %3493 = vmatpush1.bf16.msra.mxu1 %v3468_v21  ;;  %v3444_v26 = vpop.permute.xlu0 %3443 }
 0x426   : >> { %v3442_v27 = vpop.permute.xlu1 %3441 }
 0x427   : >> { %3494 = vmatprep.subr.bf16.mxu1 %v3442_v27  ;;  %v3469_v28 = vsel %vm11905_vm11, %v3440_v17, %v3442_v27 }
 0x428   : >> { %3495 = vmatpush1.bf16.msra.mxu1 %v3469_v28  ;;  %v3448_v30 = vpop.permute.xlu0 %3447 }
 0x42a   : >> { %v3446_v33 = vpop.permute.xlu1 %3445 }
 0x42b   : >> { %3496 = vmatprep.subr.bf16.mxu1 %v3446_v33  ;;  %v3470_v35 = vsel %vm11905_vm11, %v3444_v26, %v3446_v33 }
 0x42c   : >> { %3497 = vmatpush1.bf16.msra.mxu1 %v3470_v35  ;;  %v3452_v39 = vpop.permute.xlu0 %3451  ;;  %v8275_v35 = vld [vmem:[%s11891_s3 + $0x248] sm:$0xff]  }
 0x42e   : >> { %v3450_v43 = vpop.permute.xlu1 %3449 }
 0x42f   : >> { %3498 = vmatprep.subr.bf16.mxu1 %v3450_v43  ;;  %v3471_v45 = vsel %vm11905_vm11, %v3448_v30, %v3450_v43 }
 0x430   : >> { %3499 = vmatpush1.bf16.msra.mxu1 %v3471_v45  ;;  %v3456_v46 = vpop.permute.xlu0 %3455 }
 0x432   : >> { %v3454_v47 = vpop.permute.xlu1 %3453 }
 0x433   : >> { %3500 = vmatprep.subr.bf16.mxu1 %v3454_v47  ;;  %v3472_v49 = vsel %vm11905_vm11, %v3452_v39, %v3454_v47 }
 0x434   : >> { %3501 = vmatpush1.bf16.msra.mxu1 %v3472_v49  ;;  %v3460_v50 = vpop.permute.xlu0 %3459 }
 0x436   : >> { %v3458_v53 = vpop.permute.xlu1 %3457 }
 0x437   : >> { %3502 = vmatprep.subr.bf16.mxu1 %v3458_v53  ;;  %v3473_v54 = vsel %vm11905_vm11, %v3456_v46, %v3458_v53 }
 0x438   : >> { %3503 = vmatpush1.bf16.msra.mxu1 %v3473_v54  ;;  %v3464_v56 = vpop.permute.xlu0 %3463 }
 0x43a   : >> { %v3462_v59 = vpop.permute.xlu1 %3461 }
 0x43b   : >> { %3504 = vmatprep.subr.bf16.mxu1 %v3462_v59  ;;  %v3474_v60 = vsel %vm11905_vm11, %v3460_v50, %v3462_v59 }
 0x43c   : >> { %3505 = vmatpush1.bf16.msra.mxu1 %v3474_v60  ;;  %v3703_v61 = vpop.permute.xlu0 %3702 }
 0x43e   : >> { %v3466_v63 = vpop.permute.xlu1 %3465 }
 0x43f   : >> { %3506 = vmatprep.subr.bf16.mxu1 %v3466_v63  ;;  %v3475_v5 = vsel %vm11905_vm11, %v3464_v56, %v3466_v63  ;;  %vm3925_vm11 = vcmask 408576   ;;  %v8277_v56 = vld [vmem:[%s11891_s3 + $0x250] sm:$0xff]  }
 0x440   : >> { %3507 = vmatpush1.bf16.msra.mxu1 %v3475_v5  ;;  %v9419_v12 = vpop.permute.xlu0 %3921 }
 0x441   : >> { %12006 = vst [vmem:[#allocation21_spill] sm:$0xff] %v9419_v12  ;;  %vm11909_vm12 = vcmp.ne.s16.totalorder %v9419_v12, 0 }
 0x442   : >> { %v3705_v17 = vpop.permute.xlu1 %3704  ;;  %v3929_v40 = vsel %vm11909_vm12, %v8618_v11, 0  ;;  %v3931_v43 = vsel %vm11909_vm12, %v8633_v18, 0  ;;  %v3933_v49 = vsel %vm11909_vm12, %v8648_v25, 0  ;;  %v3935_v60 = vsel %vm11909_vm12, %v8663_v32, 0 }
 0x443   : >> { %3759 = vmatprep.subr.bf16.mxu1 %v3705_v17  ;;  %4009 = vrot.lane.b32.xlu0 %v3929_v40, %s8387_s22  ;;  %v3735_v21 = vsel %vm11907_vm10, %v3703_v61, %v3705_v17  ;;  %v3937_v17 = vsel %vm11909_vm12, %v8678_v44, 0 }
 0x444   : >> { %3525 = vmatmul.mubr.bf16.vlgmr.msra.gmra.mrb[0].mxu1 %v8274_v16  ;;  %v3707_v26 = vpop.permute.xlu0 %3706 }
 0x445   : >> { %3760 = vmatpush1.bf16.msra.mxu1 %v3735_v21  ;;  %3534 = vmatprep.mubr.bf16.mxu1 %v11927_v10 }
 0x446   : >> { %v3924_v27 = vpop.permute.xlu1 %3923 }
 0x447   : >> { %v9432_v28 = vsel %vm3925_vm11, %v9419_v12, %v3924_v27  ;;  %4228 = vrot.lane.b32.xlu0 %v8585_v41, %s11923_s23  ;;  %v8278_v27 = vld [vmem:[%s11891_s3 + $0x258] sm:$0xff]   ;;  %vm948_vm11 = vcmask 1039360  }
 0x448   : >> { %12007 = vst [vmem:[#allocation22_spill] sm:$0xff] %v9432_v28  ;;  %vm11908_vm4 = vcmp.ne.s16.totalorder %v9432_v28, 0  ;;  %v3711_v30 = vpop.permute.xlu0 %3710 }
 0x449   : >> { %v3930_v33 = vsel %vm11908_vm4, %v8625_v15, 0  ;;  %v3932_v54 = vsel %vm11908_vm4, %v8640_v22, 0  ;;  %v3934_v5 = vsel %vm11908_vm4, %v8655_v29, 0 }
 0x44a   : >> { %v3709_v39 = vpop.permute.xlu1 %3708  ;;  %4011 = vrot.lane.b32.xlu1 %v3930_v33, %s8387_s22  ;;  %v3939_v33 = vsel %vm11909_vm12, %v8693_v51, 0 }
 0x44b   : >> { %3761 = vmatprep.subr.bf16.mxu1 %v3709_v39  ;;  %4013 = vrot.lane.b32.xlu0 %v3931_v43, %s8387_s22  ;;  %v3736_v45 = vsel %vm11907_vm10, %v3707_v26, %v3709_v39  ;;  %v3936_v26 = vsel %vm11908_vm4, %v8670_v36, 0  ;;  %v3938_v43 = vsel %vm11908_vm4, %v8685_v48, 0 }
 0x44c   : >> { %3762 = vmatpush1.bf16.msra.mxu1 %v3736_v45  ;;  %v3715_v46 = vpop.permute.xlu0 %3714 }
 0x44d   : >> { %3535 = vmatmul.mubr.bf16.gmra.mrb[4].mxu1 %v8275_v35 }
 0x44e   : >> { %v3713_v47 = vpop.permute.xlu1 %3712  ;;  %4230 = vrot.lane.b32.xlu1 %v8589_v42, %s11923_s23  ;;  %3544 = vmatprep.mubr.bf16.mxu1 %v11927_v10 }
 0x44f   : >> { %4017 = vrot.lane.b32.xlu0 %v3933_v49, %s8387_s22  ;;  %3763 = vmatprep.subr.bf16.mxu1 %v3713_v47  ;;  %v3737_v50 = vsel %vm11907_vm10, %v3711_v30, %v3713_v47 }
 0x450   : >> { %3764 = vmatpush1.bf16.msra.mxu1 %v3737_v50  ;;  %v3719_v53 = vpop.permute.xlu0 %3718  ;;  %v3940_v50 = vsel %vm11908_vm4, %v8700_v55, 0 }
 0x452   : >> { %v3717_v59 = vpop.permute.xlu1 %3716  ;;  %4015 = vrot.lane.b32.xlu1 %v3932_v54, %s8387_s22 }
 0x453   : >> { %4021 = vrot.lane.b32.xlu0 %v3935_v60, %s8387_s22  ;;  %3765 = vmatprep.subr.bf16.mxu1 %v3717_v59  ;;  %v3738_v61 = vsel %vm11907_vm10, %v3715_v46, %v3717_v59  ;;  %v3941_v46 = vsel %vm11909_vm12, %v8708_v58, 0 }
 0x454   : >> { %3766 = vmatpush1.bf16.msra.mxu1 %v3738_v61  ;;  %v3723_v63 = vpop.permute.xlu0 %3722  ;;  %v3942_v61 = vsel %vm11908_vm4, %v8715_v62, 0 }
 0x455   : >> { %3545 = vmatmul.mubr.bf16.gmra.mrb[8].mxu1 %v8277_v56  ;;  %v3943_v56 = vsel %vm11909_vm12, %v8723_v3, 0 }
 0x456   : >> { %v3721_v16 = vpop.permute.xlu1 %3720  ;;  %4019 = vrot.lane.b32.xlu1 %v3934_v5, %s8387_s22  ;;  %3554 = vmatprep.mubr.bf16.mxu1 %v11927_v10 }
 0x457   : >> { %4025 = vrot.lane.b32.xlu0 %v3937_v17, %s8387_s22  ;;  %3767 = vmatprep.subr.bf16.mxu1 %v3721_v16  ;;  %v3739_v40 = vsel %vm11907_vm10, %v3719_v53, %v3721_v16  ;;  %v8279_v53 = vld [vmem:[%s11891_s3 + $0x260] sm:$0xff]   ;;  %v3944_v17 = vsel %vm11908_vm4, %v8734_v14, 0  ;;  %vm11912_vm4 = vcmp.ne.s16.totalorder %v8585_v41, 0 }
 0x458   : >> { %3768 = vmatpush1.bf16.msra.mxu1 %v3739_v40  ;;  %v3727_v21 = vpop.permute.xlu0 %3726  ;;  %v8280_v40 = vld [vmem:[%s11891_s3 + $0x268] sm:$0xff]  }
 0x45a   : >> { %v3725_v30 = vpop.permute.xlu1 %3724  ;;  %4023 = vrot.lane.b32.xlu1 %v3936_v26, %s8387_s22 }
 0x45b   : >> { %4029 = vrot.lane.b32.xlu0 %v3939_v33, %s8387_s22  ;;  %3769 = vmatprep.subr.bf16.mxu1 %v3725_v30  ;;  %v3740_v35 = vsel %vm11907_vm10, %v3723_v63, %v3725_v30 }
 0x45c   : >> { %3770 = vmatpush1.bf16.msra.mxu1 %v3740_v35  ;;  %v3731_v39 = vpop.permute.xlu0 %3730 }
 0x45d   : >> { %3555 = vmatmul.mubr.bf16.gmra.mrb[12].mxu1 %v8278_v27 }
 0x45e   : >> { %v3729_v45 = vpop.permute.xlu1 %3728  ;;  %4027 = vrot.lane.b32.xlu1 %v3938_v43, %s8387_s22  ;;  %3564 = vmatprep.mubr.bf16.mxu1 %v11927_v10 }
 0x45f   : >> { %4033 = vrot.lane.b32.xlu0 %v3941_v46, %s8387_s22  ;;  %3771 = vmatprep.subr.bf16.mxu1 %v3729_v45  ;;  %v3741_v47 = vsel %vm11907_vm10, %v3727_v21, %v3729_v45 }
 0x460   : >> { %3772 = vmatpush1.bf16.msra.mxu1 %v3741_v47  ;;  %v917_v49 = vpop.permute.xlu0 %916 }
 0x462   : >> { %v3733_v54 = vpop.permute.xlu1 %3732  ;;  %4031 = vrot.lane.b32.xlu1 %v3940_v50, %s8387_s22  ;;  %v8282_v50 = vld [vmem:[%s11891_s3 + $0x278] sm:$0xff]  }
 0x463   : >> { %4037 = vrot.lane.b32.xlu0 %v3943_v56, %s8387_s22  ;;  %3773 = vmatprep.subr.bf16.mxu1 %v3733_v54  ;;  %v3742_v59 = vsel %vm11907_vm10, %v3731_v39, %v3733_v54  ;;  %v8281_v39 = vld [vmem:[%s11891_s3 + $0x270] sm:$0xff]   ;;  %vm11913_vm10 = vcmp.ne.s16.totalorder %v8589_v42, 0 }
 0x464   : >> { %3774 = vmatpush1.bf16.msra.mxu1 %v3742_v59  ;;  %v921_v60 = vpop.permute.xlu0 %920 }
 0x465   : >> { %3565 = vmatmul.mubr.bf16.gmra.mrb[16].mxu1 %v8279_v53 }
 0x466   : >> { %v919_v63 = vpop.permute.xlu1 %918  ;;  %4035 = vrot.lane.b32.xlu1 %v3942_v61, %s8387_s22  ;;  %3574 = vmatprep.mubr.bf16.mxu1 %v11927_v10  ;;  %v8283_v61 = vld [vmem:[%s11891_s3 + $0x280] sm:$0xff]  }
 0x467   : >> { %973 = vmatprep.subr.bf16.mxu0 %v919_v63  ;;  %1278 = vrot.lane.b32.xlu0 %v8745_v19, %s8389_s29  ;;  %v949_v5 = vsel %vm948_vm11, %v917_v49, %v919_v63 }
 0x468   : >> { %974 = vmatpush1.bf16.msra.mxu0 %v949_v5  ;;  %v925_v16 = vpop.permute.xlu0 %924 }
 0x46a   : >> { %v923_v21 = vpop.permute.xlu1 %922  ;;  %4039 = vrot.lane.b32.xlu1 %v3944_v17, %s8387_s22  ;;  %v8276_v17 = vld [vmem:[%s11891_s3 + $0x40] sm:$0xff]  }
 0x46b   : >> { %975 = vmatprep.subr.bf16.mxu0 %v923_v21  ;;  %v950_v26 = vsel %vm948_vm11, %v921_v60, %v923_v21  ;;  %v8284_v21 = vld [vmem:[%s11891_s3 + $0x288] sm:$0xff]  }
 0x46c   : >> { %976 = vmatpush1.bf16.msra.mxu0 %v950_v26  ;;  %v929_v27 = vpop.permute.xlu0 %928  ;;  %v821_v26 = vsel %vm11912_vm4, %v8633_v18, 0 }
 0x46d   : >> { %3575 = vmatmul.mubr.bf16.gmra.mrb[20].mxu1 %v8280_v40  ;;  %v819_v40 = vsel %vm11912_vm4, %v8618_v11, 0 }
 0x46e   : >> { %v927_v30 = vpop.permute.xlu1 %926  ;;  %1280 = vrot.lane.b32.xlu1 %v8751_v20, %s8389_s29  ;;  %3584 = vmatprep.mubr.bf16.mxu1 %v11927_v10 }
 0x46f   : >> { %977 = vmatprep.subr.bf16.mxu0 %v927_v30  ;;  %v951_v33 = vsel %vm948_vm11, %v925_v16, %v927_v30  ;;  %v823_v30 = vsel %vm11912_vm4, %v8648_v25, 0 }
 0x470   : >> { %978 = vmatpush1.bf16.msra.mxu0 %v951_v33  ;;  %v933_v35 = vpop.permute.xlu0 %932  ;;  %v8285_v33 = vld [vmem:[%s11891_s3 + $0x290] sm:$0xff]  }
 0x472   : >> { %v931_v43 = vpop.permute.xlu1 %930 }
 0x473   : >> { %979 = vmatprep.subr.bf16.mxu0 %v931_v43  ;;  %v952_v45 = vsel %vm948_vm11, %v929_v27, %v931_v43  ;;  %v8288_v27 = vld [vmem:[%s11891_s3 + $0x48] sm:$0xff]   ;;  %v827_v43 = vsel %vm11912_vm4, %v8678_v44, 0 }
 0x474   : >> { %980 = vmatpush1.bf16.msra.mxu0 %v952_v45  ;;  %v937_v46 = vpop.permute.xlu0 %936  ;;  %v8286_v45 = vld [vmem:[%s11891_s3 + $0x298] sm:$0xff]  }
 0x475   : >> { %3585 = vmatmul.mubr.bf16.gmra.mrb[24].mxu1 %v8281_v39  ;;  %v8290_v39 = vld [vmem:[%s11891_s3 + $0x50] sm:$0xff]  }
 0x476   : >> { %v935_v47 = vpop.permute.xlu1 %934  ;;  %3594 = vmatprep.mubr.bf16.mxu1 %v11927_v10 }
 0x477   : >> { %981 = vmatprep.subr.bf16.mxu0 %v935_v47  ;;  %v953_v49 = vsel %vm948_vm11, %v933_v35, %v935_v47  ;;  %v825_v35 = vsel %vm11912_vm4, %v8663_v32, 0  ;;  %v8292_v47 = vld [vmem:[%s11891_s3 + $0x58] sm:$0xff]  }
 0x478   : >> { %982 = vmatpush1.bf16.msra.mxu0 %v953_v49  ;;  %v941_v56 = vpop.permute.xlu0 %940  ;;  %v831_v49 = vsel %vm11912_vm4, %v8708_v58, 0 }
 0x47a   : >> { %v939_v53 = vpop.permute.xlu1 %938 }
 0x47b   : >> { %983 = vmatprep.subr.bf16.mxu0 %v939_v53  ;;  %v954_v54 = vsel %vm948_vm11, %v937_v46, %v939_v53  ;;  %v829_v46 = vsel %vm11912_vm4, %v8693_v51, 0  ;;  %v833_v53 = vsel %vm11912_vm4, %v8723_v3, 0 }
 0x47c   : >> { %984 = vmatpush1.bf16.msra.mxu0 %v954_v54  ;;  %v945_v63 = vpop.permute.xlu0 %944  ;;  %v8294_v54 = vld [vmem:[%s11891_s3 + $0x60] sm:$0xff]  }
 0x47d   : >> { %3595 = vmatmul.mubr.bf16.gmra.mrb[28].mxu1 %v8282_v50  ;;  %v8287_v50 = vld [vmem:[%s11891_s3 + $0x2a0] sm:$0xff]  }
 0x47e   : >> { %v943_v59 = vpop.permute.xlu1 %942  ;;  %3791 = vmatprep.mubr.bf16.mxu1 %v11927_v10 }
 0x47f   : >> { %985 = vmatprep.subr.bf16.mxu0 %v943_v59  ;;  %v955_v60 = vsel %vm948_vm11, %v941_v56, %v943_v59  ;;  %v8289_v56 = vld [vmem:[%s11891_s3 + $0x2a8] sm:$0xff]  }
 0x480   : >> { %986 = vmatpush1.bf16.msra.mxu0 %v955_v60  ;;  %v8296_v59 = vld [vmem:[%s11891_s3 + $0x68] sm:$0xff]   ;;  %v8291_v60 = vld [vmem:[%s11891_s3 + $0x2b0] sm:$0xff]  }
 0x482   : >> { %v947_v5 = vpop.permute.xlu1 %946 }
 0x483   : >> { %987 = vmatprep.subr.bf16.mxu0 %v947_v5  ;;  %v956_v16 = vsel %vm948_vm11, %v945_v63, %v947_v5 }
 0x484   : >> { %988 = vmatpush1.bf16.msra.mxu0 %v956_v16  ;;  %v8293_v16 = vld [vmem:[%s11891_s3 + $0x2b8] sm:$0xff]  }
 0x485   : >> { %7364 = vmatprep.subr.msk.bf16.mxu0 %vm11913_vm10, %v8625_v15  ;;  %3792 = vmatmul.mubr.bf16.vlgmr.msra.gmra.mrb[0].mxu1 %v8283_v61  ;;  %v8298_v61 = vld [vmem:[%s11891_s3 + $0x70] sm:$0xff]  }
 0x486   : >> { %3801 = vmatprep.mubr.bf16.mxu1 %v11927_v10 }
 0x487   : >> { %1006 = vmatmul.mubr.bf16.vlgmr.msra.gmra.mrb[32].mxu0 %v8276_v17 }
 0x488   : >> { %1135 = vmatpush1.bf16.msra.mxu0 %v819_v40  ;;  %1015 = vmatprep.mubr.bf16.mxu0 %v11927_v10  ;;  %v8300_v40 = vld [vmem:[%s11891_s3 + $0x78] sm:$0xff]  }
 0x489   : >> { %7365 = vmatprep.subr.msk.bf16.mxu0 %vm11913_vm10, %v8640_v22 }
 0x48c   : >> { %1137 = vmatpush1.bf16.msra.mxu0 %v821_v26 }
 0x48d   : >> { %7366 = vmatprep.subr.msk.bf16.mxu0 %vm11913_vm10, %v8655_v29  ;;  %3802 = vmatmul.mubr.bf16.gmra.mrb[4].mxu1 %v8284_v21 }
 0x48e   : >> { %3811 = vmatprep.mubr.bf16.mxu1 %v11927_v10 }
 0x48f   : >> { %1016 = vmatmul.mubr.bf16.gmra.mrb[36].mxu0 %v8288_v27 }
 0x490   : >> { %1139 = vmatpush1.bf16.msra.mxu0 %v823_v30  ;;  %1025 = vmatprep.mubr.bf16.mxu0 %v11927_v10 }
 0x491   : >> { %7367 = vmatprep.subr.msk.bf16.mxu0 %vm11913_vm10, %v8670_v36 }
 0x494   : >> { %1141 = vmatpush1.bf16.msra.mxu0 %v825_v35 }
 0x495   : >> { %7368 = vmatprep.subr.msk.bf16.mxu0 %vm11913_vm10, %v8685_v48  ;;  %3812 = vmatmul.mubr.bf16.gmra.mrb[8].mxu1 %v8285_v33 }
 0x496   : >> { %3821 = vmatprep.mubr.bf16.mxu1 %v11927_v10 }
 0x497   : >> { %1026 = vmatmul.mubr.bf16.gmra.mrb[40].mxu0 %v8290_v39 }
 0x498   : >> { %1143 = vmatpush1.bf16.msra.mxu0 %v827_v43  ;;  %1035 = vmatprep.mubr.bf16.mxu0 %v11927_v10 }
 0x499   : >> { %7369 = vmatprep.subr.msk.bf16.mxu0 %vm11913_vm10, %v8700_v55 }
 0x49c   : >> { %1145 = vmatpush1.bf16.msra.mxu0 %v829_v46  ;;  %v8302_v46 = vld [vmem:[%s11891_s3] sm:$0xff]  }
 0x49d   : >> { %7370 = vmatprep.subr.msk.bf16.mxu0 %vm11913_vm10, %v8715_v62  ;;  %3822 = vmatmul.mubr.bf16.gmra.mrb[12].mxu1 %v8286_v45 }
 0x49e   : >> { %3831 = vmatprep.mubr.bf16.mxu1 %v11927_v10 }
 0x49f   : >> { %1036 = vmatmul.mubr.bf16.gmra.mrb[44].mxu0 %v8292_v47 }
 0x4a0   : >> { %1147 = vmatpush1.bf16.msra.mxu0 %v831_v49  ;;  %1045 = vmatprep.mubr.bf16.mxu0 %v11927_v10 }
 0x4a1   : >> { %7371 = vmatprep.subr.msk.bf16.mxu0 %vm11913_vm10, %v8734_v14 }
 0x4a4   : >> { %1149 = vmatpush1.bf16.msra.mxu0 %v833_v53 }
 0x4a5   : >> { %3832 = vmatmul.mubr.bf16.gmra.mrb[16].mxu1 %v8287_v50 }
 0x4a6   : >> { %3841 = vmatprep.mubr.bf16.mxu1 %v11927_v10 }
 0x4a7   : >> { %1046 = vmatmul.mubr.bf16.gmra.mrb[48].mxu0 %v8294_v54 }
 0x4a8   : >> { %1055 = vmatprep.mubr.bf16.mxu0 %v11927_v10 }
 0x4ad   : >> { %3842 = vmatmul.mubr.bf16.gmra.mrb[20].mxu1 %v8289_v56 }
 0x4ae   : >> { %3851 = vmatprep.mubr.bf16.mxu1 %v11927_v10 }
 0x4af   : >> { %1056 = vmatmul.mubr.bf16.gmra.mrb[52].mxu0 %v8296_v59 }
 0x4b0   : >> { %1065 = vmatprep.mubr.bf16.mxu0 %v11927_v10 }
 0x4b5   : >> { %v4010_v63 = vpop.permute.xlu0 %4009  ;;  %3852 = vmatmul.mubr.bf16.gmra.mrb[24].mxu1 %v8291_v60 }
 0x4b6   : >> { %3861 = vmatprep.mubr.bf16.mxu1 %v11927_v10 }
 0x4b7   : >> { %1066 = vmatmul.mubr.bf16.gmra.mrb[56].mxu0 %v8298_v61 }
 0x4b8   : >> { %1075 = vmatprep.mubr.bf16.mxu0 %v11927_v10 }
 0x4b9   : >> { %v9650_v5 = vpop.permute.xlu0 %4228 }
 0x4ba   : >> { %12008 = vst [vmem:[#allocation23_spill] sm:$0xff] %v9650_v5  ;;  %vm11914_vm12 = vcmp.ne.s16.totalorder %v9650_v5, 0 }
 0x4bb   : >> { %v4236_v17 = vsel %vm11914_vm12, %v8618_v11, 0  ;;  %v4238_v30 = vsel %vm11914_vm12, %v8633_v18, 0  ;;  %v4240_v43 = vsel %vm11914_vm12, %v8648_v25, 0  ;;  %v4242_v53 = vsel %vm11914_vm12, %v8663_v32, 0 }
 0x4bc   : >> { %v4012_v21 = vpop.permute.xlu1 %4011  ;;  %4316 = vrot.lane.b32.xlu0 %v4236_v17, %s11923_s23  ;;  %v4244_v61 = vsel %vm11914_vm12, %v8678_v44, 0 }
 0x4bd   : >> { %4066 = vmatprep.subr.bf16.mxu1 %v4012_v21  ;;  %v4014_v26 = vpop.permute.xlu0 %4013  ;;  %v4042_v27 = vsel %vm11915_vm13, %v4010_v63, %v4012_v21  ;;  %3862 = vmatmul.mubr.bf16.gmra.mrb[28].mxu1 %v8293_v16  ;;  %v8304_v16 = vld [vmem:[%s11891_s3 + $0x8] sm:$0xff]  }
 0x4be   : >> { %4067 = vmatpush1.bf16.msra.mxu1 %v4042_v27  ;;  %4098 = vmatprep.mubr.bf16.mxu1 %v11927_v10 }
 0x4bf   : >> { %1076 = vmatmul.mubr.bf16.gmra.mrb[60].mxu0 %v8300_v40 }
 0x4c0   : >> { %v4231_v33 = vpop.permute.xlu1 %4230  ;;  %4320 = vrot.lane.b32.xlu0 %v4238_v30, %s11923_s23  ;;  %1166 = vmatprep.mubr.bf16.mxu0 %v11927_v10 }
 0x4c1   : >> { %v9672_v35 = vsel %vm11917_vm5, %v9650_v5, %v4231_v33  ;;  %v4018_v39 = vpop.permute.xlu0 %4017 }
 0x4c2   : >> { %12009 = vst [vmem:[#allocation24_spill] sm:$0xff] %v9672_v35  ;;  %vm11916_vm4 = vcmp.ne.s16.totalorder %v9672_v35, 0 }
 0x4c3   : >> { %v4237_v45 = vsel %vm11916_vm4, %v8625_v15, 0  ;;  %v4239_v54 = vsel %vm11916_vm4, %v8640_v22, 0  ;;  %v4241_v63 = vsel %vm11916_vm4, %v8655_v29, 0  ;;  %v4243_v27 = vsel %vm11916_vm4, %v8670_v36, 0 }
 0x4c4   : >> { %v4016_v47 = vpop.permute.xlu1 %4015  ;;  %4324 = vrot.lane.b32.xlu0 %v4240_v43, %s11923_s23  ;;  %4318 = vrot.lane.b32.xlu1 %v4237_v45, %s11923_s23  ;;  %v4248_v43 = vsel %vm11914_vm12, %v8708_v58, 0  ;;  %v4245_v45 = vsel %vm11916_vm4, %v8685_v48, 0 }
 0x4c5   : >> { %4068 = vmatprep.subr.bf16.mxu1 %v4016_v47  ;;  %v4022_v49 = vpop.permute.xlu0 %4021  ;;  %v4043_v50 = vsel %vm11915_vm13, %v4014_v26, %v4016_v47  ;;  %v4246_v26 = vsel %vm11914_vm12, %v8693_v51, 0 }
 0x4c6   : >> { %4069 = vmatpush1.bf16.msra.mxu1 %v4043_v50 }
 0x4c7   : >> { %1167 = vmatmul.mubr.bf16.vlgmr.msra.gmra.mrb[32].mxu0 %v8302_v46  ;;  %v8306_v46 = vld [vmem:[%s11891_s3 + $0x10] sm:$0xff]  }
 0x4c8   : >> { %v4020_v56 = vpop.permute.xlu1 %4019  ;;  %4328 = vrot.lane.b32.xlu0 %v4242_v53, %s11923_s23  ;;  %4322 = vrot.lane.b32.xlu1 %v4239_v54, %s11923_s23  ;;  %v4250_v53 = vsel %vm11914_vm12, %v8723_v3, 0  ;;  %v4247_v54 = vsel %vm11916_vm4, %v8700_v55, 0  ;;  %vm1282_vm12 = vcmask 15360  }
 0x4c9   : >> { %4070 = vmatprep.subr.bf16.mxu1 %v4020_v56  ;;  %v4026_v59 = vpop.permute.xlu0 %4025  ;;  %v4044_v60 = vsel %vm11915_vm13, %v4018_v39, %v4020_v56  ;;  %1176 = vmatprep.mubr.bf16.mxu0 %v11927_v10 }
 0x4ca   : >> { %4071 = vmatpush1.bf16.msra.mxu1 %v4044_v60 }
 0x4cc   : >> { %v4024_v17 = vpop.permute.xlu1 %4023  ;;  %4332 = vrot.lane.b32.xlu0 %v4244_v61, %s11923_s23  ;;  %4326 = vrot.lane.b32.xlu1 %v4241_v63, %s11923_s23  ;;  %v4249_v61 = vsel %vm11916_vm4, %v8715_v62, 0 }
 0x4cd   : >> { %4072 = vmatprep.subr.bf16.mxu1 %v4024_v17  ;;  %v4030_v40 = vpop.permute.xlu0 %4029  ;;  %v4045_v21 = vsel %vm11915_vm13, %v4022_v49, %v4024_v17 }
 0x4ce   : >> { %4073 = vmatpush1.bf16.msra.mxu1 %v4045_v21  ;;  %v8295_v21 = vld [vmem:[%s11891_s3 + $0x2c0] sm:$0xff]  }
 0x4cf   : >> { %1177 = vmatmul.mubr.bf16.gmra.mrb[36].mxu0 %v8304_v16  ;;  %v8308_v16 = vld [vmem:[%s11891_s3 + $0x18] sm:$0xff]  }
 0x4d0   : >> { %v4028_v30 = vpop.permute.xlu1 %4027  ;;  %4336 = vrot.lane.b32.xlu0 %v4246_v26, %s11923_s23  ;;  %4330 = vrot.lane.b32.xlu1 %v4243_v27, %s11923_s23  ;;  %v4251_v26 = vsel %vm11916_vm4, %v8734_v14, 0  ;;  %vm1398_vm4 = vcmask 1031168  }
 0x4d1   : >> { %4074 = vmatprep.subr.bf16.mxu1 %v4028_v30  ;;  %v4034_v33 = vpop.permute.xlu0 %4033  ;;  %v4046_v39 = vsel %vm11915_vm13, %v4026_v59, %v4028_v30  ;;  %1186 = vmatprep.mubr.bf16.mxu0 %v11927_v10 }
 0x4d2   : >> { %4075 = vmatpush1.bf16.msra.mxu1 %v4046_v39 }
 0x4d4   : >> { %v4032_v47 = vpop.permute.xlu1 %4031  ;;  %4340 = vrot.lane.b32.xlu0 %v4248_v43, %s11923_s23  ;;  %4334 = vrot.lane.b32.xlu1 %v4245_v45, %s11923_s23  ;;  %v8297_v43 = vld [vmem:[%s11891_s3 + $0x2c8] sm:$0xff]  }
 0x4d5   : >> { %4076 = vmatprep.subr.bf16.mxu1 %v4032_v47  ;;  %v4038_v49 = vpop.permute.xlu0 %4037  ;;  %v4047_v50 = vsel %vm11915_vm13, %v4030_v40, %v4032_v47 }
 0x4d6   : >> { %4077 = vmatpush1.bf16.msra.mxu1 %v4047_v50 }
 0x4d7   : >> { %1187 = vmatmul.mubr.bf16.gmra.mrb[40].mxu0 %v8306_v46 }
 0x4d8   : >> { %v4036_v56 = vpop.permute.xlu1 %4035  ;;  %4344 = vrot.lane.b32.xlu0 %v4250_v53, %s11923_s23  ;;  %4338 = vrot.lane.b32.xlu1 %v4247_v54, %s11923_s23 }
 0x4d9   : >> { %4078 = vmatprep.subr.bf16.mxu1 %v4036_v56  ;;  %v9739_v59 = vpop.permute.xlu0 %1278  ;;  %v4048_v60 = vsel %vm11915_vm13, %v4034_v33, %v4036_v56  ;;  %1196 = vmatprep.mubr.bf16.mxu0 %v11927_v10 }
 0x4da   : >> { %12010 = vst [vmem:[#allocation25_spill] sm:$0xff] %v9739_v59  ;;  %vm1284_vm10 = vcmp.ne.s16.totalorder %v9739_v59, 0  ;;  %4079 = vmatpush1.bf16.msra.mxu1 %v4048_v60  ;;  %v8314_v60 = vld [vmem:[%s11891_s3 + $0x30] sm:$0xff]  }
 0x4db   : >> { %v1286_v63 = vsel %vm1284_vm10, %v8618_v11, 0  ;;  %v1288_v33 = vsel %vm1284_vm10, %v8633_v18, 0  ;;  %v1290_v45 = vsel %vm1284_vm10, %v8648_v25, 0  ;;  %v1292_v46 = vsel %vm1284_vm10, %v8663_v32, 0 }
 0x4dc   : >> { %v4040_v17 = vpop.permute.xlu1 %4039  ;;  %4342 = vrot.lane.b32.xlu1 %v4249_v61, %s11923_s23  ;;  %1366 = vrot.lane.b32.xlu0 %v1286_v63, %s8390_s21  ;;  %v1294_v50 = vsel %vm1284_vm10, %v8678_v44, 0  ;;  %v1296_v54 = vsel %vm1284_vm10, %v8693_v51, 0  ;;  %v8301_v61 = vld [vmem:[%s11891_s3 + $0x2d8] sm:$0xff]   ;;  %v1298_v63 = vsel %vm1284_vm10, %v8708_v58, 0 }
 0x4dd   : >> { %4080 = vmatprep.subr.bf16.mxu1 %v4040_v17  ;;  %v4049_v40 = vsel %vm11915_vm13, %v4038_v49, %v4040_v17  ;;  %v8312_v49 = vld [vmem:[%s11891_s3 + $0x28] sm:$0xff]   ;;  %v1300_v17 = vsel %vm1284_vm10, %v8723_v3, 0 }
 0x4de   : >> { %4081 = vmatpush1.bf16.msra.mxu1 %v4049_v40 }
 0x4df   : >> { %1197 = vmatmul.mubr.bf16.gmra.mrb[44].mxu0 %v8308_v16 }
 0x4e0   : >> { %v1281_v27 = vpop.permute.xlu1 %1280  ;;  %4346 = vrot.lane.b32.xlu1 %v4251_v26, %s11923_s23  ;;  %4801 = vrot.lane.b32.xlu0 %v8745_v19, %s8391_s15  ;;  %v8310_v19 = vld [vmem:[%s11891_s3 + $0x20] sm:$0xff]  }
 0x4e1   : >> { %v9765_v30 = vsel %vm1282_vm12, %v9739_v59, %v1281_v27  ;;  %4099 = vmatmul.mubr.bf16.vlgmr.msra.gmra.mrb[0].mxu1 %v8295_v21  ;;  %1206 = vmatprep.mubr.bf16.mxu0 %v11927_v10  ;;  %v8316_v21 = vld [vmem:[%s11891_s3 + $0x38] sm:$0xff]   ;;  %v8303_v26 = vld [vmem:[%s11891_s3 + $0x2e0] sm:$0xff]  }
 0x4e2   : >> { %12011 = vst [vmem:[#allocation26_spill] sm:$0xff] %v9765_v30  ;;  %vm1285_vm13 = vcmp.ne.s16.totalorder %v9765_v30, 0  ;;  %4108 = vmatprep.mubr.bf16.mxu1 %v11927_v10 }
 0x4e3   : >> { %v1287_v39 = vsel %vm1285_vm13, %v8625_v15, 0  ;;  %v1289_v47 = vsel %vm1285_vm13, %v8640_v22, 0  ;;  %v1291_v53 = vsel %vm1285_vm13, %v8655_v29, 0  ;;  %v1293_v56 = vsel %vm1285_vm13, %v8670_v36, 0 }
 0x4e4   : >> { %1370 = vrot.lane.b32.xlu0 %v1288_v33, %s8390_s21  ;;  %1368 = vrot.lane.b32.xlu1 %v1287_v39, %s8390_s21  ;;  %v1295_v16 = vsel %vm1285_vm13, %v8685_v48, 0  ;;  %v1297_v40 = vsel %vm1285_vm13, %v8700_v55, 0  ;;  %v1299_v27 = vsel %vm1285_vm13, %v8715_v62, 0  ;;  %v1301_v33 = vsel %vm1285_vm13, %v8734_v14, 0  ;;  %v8305_v39 = vld [vmem:[%s11891_s3 + $0x2e8] sm:$0xff]  }
 0x4e7   : >> { %1207 = vmatmul.mubr.bf16.gmra.mrb[48].mxu0 %v8310_v19  ;;  %v8307_v19 = vld [vmem:[%s11891_s3 + $0x2f0] sm:$0xff]  }
 0x4e8   : >> { %1374 = vrot.lane.b32.xlu0 %v1290_v45, %s8390_s21  ;;  %4803 = vrot.lane.b32.xlu1 %v8751_v20, %s8391_s15  ;;  %v8299_v20 = vld [vmem:[%s11891_s3 + $0x2d0] sm:$0xff]   ;;  %s7227_s15 = sshra.s32 %s8368_s13, 3 }
 0x4e9   : >> { %4109 = vmatmul.mubr.bf16.gmra.mrb[4].mxu1 %v8297_v43  ;;  %1216 = vmatprep.mubr.bf16.mxu0 %v11927_v10  ;;  %v8309_v43 = vld [vmem:[%s11891_s3 + $0x2f8] sm:$0xff]  }
 0x4ea   : >> { %4118 = vmatprep.mubr.bf16.mxu1 %v11927_v10 }
 0x4ec   : >> { %1378 = vrot.lane.b32.xlu0 %v1292_v46, %s8390_s21  ;;  %1372 = vrot.lane.b32.xlu1 %v1289_v47, %s8390_s21 }
 0x4ef   : >> { %1217 = vmatmul.mubr.bf16.gmra.mrb[52].mxu0 %v8312_v49 }
 0x4f0   : >> { %1382 = vrot.lane.b32.xlu0 %v1294_v50, %s8390_s21  ;;  %1376 = vrot.lane.b32.xlu1 %v1291_v53, %s8390_s21 }
 0x4f1   : >> { %4119 = vmatmul.mubr.bf16.gmra.mrb[8].mxu1 %v8299_v20  ;;  %1226 = vmatprep.mubr.bf16.mxu0 %v11927_v10 }
 0x4f2   : >> { %4128 = vmatprep.mubr.bf16.mxu1 %v11927_v10 }
 0x4f4   : >> { %1386 = vrot.lane.b32.xlu0 %v1296_v54, %s8390_s21  ;;  %1380 = vrot.lane.b32.xlu1 %v1293_v56, %s8390_s21 }
 0x4f7   : >> { %1227 = vmatmul.mubr.bf16.gmra.mrb[56].mxu0 %v8314_v60 }
 0x4f8   : >> { %1390 = vrot.lane.b32.xlu0 %v1298_v63, %s8390_s21  ;;  %1384 = vrot.lane.b32.xlu1 %v1295_v16, %s8390_s21 }
 0x4f9   : >> { %4129 = vmatmul.mubr.bf16.gmra.mrb[12].mxu1 %v8301_v61  ;;  %1236 = vmatprep.mubr.bf16.mxu0 %v11927_v10 }
 0x4fa   : >> { %4138 = vmatprep.mubr.bf16.mxu1 %v11927_v10 }
 0x4fc   : >> { %1394 = vrot.lane.b32.xlu0 %v1300_v17, %s8390_s21  ;;  %1388 = vrot.lane.b32.xlu1 %v1297_v40, %s8390_s21 }
 0x4ff   : >> { %1237 = vmatmul.mubr.bf16.gmra.mrb[60].mxu0 %v8316_v21 }
 0x500   : >> { %4582 = vrot.lane.b32.xlu0 %v8618_v11, %s11919_s19  ;;  %1392 = vrot.lane.b32.xlu1 %v1299_v27, %s8390_s21 }
 0x501   : >> { %4139 = vmatmul.mubr.bf16.gmra.mrb[16].mxu1 %v8303_v26  ;;  %1455 = vmatprep.mubr.bf16.mxu0 %v11927_v10 }
 0x502   : >> { %4148 = vmatprep.mubr.bf16.mxu1 %v11927_v10 }
 0x504   : >> { %4586 = vrot.lane.b32.xlu0 %v8633_v18, %s11919_s19  ;;  %1396 = vrot.lane.b32.xlu1 %v1301_v33, %s8390_s21 }
 0x508   : >> { %4590 = vrot.lane.b32.xlu0 %v8648_v25, %s11919_s19  ;;  %4584 = vrot.lane.b32.xlu1 %v8625_v15, %s11919_s19 }
 0x509   : >> { %4149 = vmatmul.mubr.bf16.gmra.mrb[20].mxu1 %v8305_v39 }
 0x50a   : >> { %4158 = vmatprep.mubr.bf16.mxu1 %v11927_v10 }
 0x50c   : >> { %4594 = vrot.lane.b32.xlu0 %v8663_v32, %s11919_s19  ;;  %4588 = vrot.lane.b32.xlu1 %v8640_v22, %s11919_s19 }
 0x510   : >> { %4598 = vrot.lane.b32.xlu0 %v8678_v44, %s11919_s19  ;;  %4592 = vrot.lane.b32.xlu1 %v8655_v29, %s11919_s19 }
 0x511   : >> { %4159 = vmatmul.mubr.bf16.gmra.mrb[24].mxu1 %v8307_v19 }
 0x512   : >> { %4168 = vmatprep.mubr.bf16.mxu1 %v11927_v10 }
 0x514   : >> { %4602 = vrot.lane.b32.xlu0 %v8693_v51, %s11919_s19  ;;  %4596 = vrot.lane.b32.xlu1 %v8670_v36, %s11919_s19 }
 0x518   : >> { %4606 = vrot.lane.b32.xlu0 %v8708_v58, %s11919_s19  ;;  %4600 = vrot.lane.b32.xlu1 %v8685_v48, %s11919_s19 }
 0x519   : >> { %4169 = vmatmul.mubr.bf16.gmra.mrb[28].mxu1 %v8309_v43 }
 0x51a   : >> { %4404 = vmatprep.mubr.bf16.mxu1 %v11927_v10 }
 0x51c   : >> { %4610 = vrot.lane.b32.xlu0 %v8723_v3, %s11919_s19  ;;  %4604 = vrot.lane.b32.xlu1 %v8700_v55, %s11919_s19 }
 0x520   : >> { %4608 = vrot.lane.b32.xlu1 %v8715_v62, %s11919_s19 }
 0x524   : >> { %4612 = vrot.lane.b32.xlu1 %v8734_v14, %s11919_s19 }
 0x52e   : >> { %v4317_v45 = vpop.permute.xlu0 %4316 }
 0x532   : >> { %v4321_v46 = vpop.permute.xlu0 %4320 }
 0x536   : >> { %v4319_v47 = vpop.permute.xlu1 %4318  ;;  %v4325_v49 = vpop.permute.xlu0 %4324 }
 0x537   : >> { %4372 = vmatprep.subr.bf16.mxu1 %v4319_v47  ;;  %v4348_v20 = vsel %vm11917_vm5, %v4317_v45, %v4319_v47 }
 0x538   : >> { %4373 = vmatpush1.bf16.msra.mxu1 %v4348_v20  ;;  %v8311_v20 = vld [vmem:[%s11891_s3 + $0x300] sm:$0xff]  }
 0x53a   : >> { %v4323_v50 = vpop.permute.xlu1 %4322  ;;  %v4329_v53 = vpop.permute.xlu0 %4328 }
 0x53b   : >> { %4374 = vmatprep.subr.bf16.mxu1 %v4323_v50  ;;  %v4349_v54 = vsel %vm11917_vm5, %v4321_v46, %v4323_v50 }
 0x53c   : >> { %4375 = vmatpush1.bf16.msra.mxu1 %v4349_v54 }
 0x53e   : >> { %v4327_v56 = vpop.permute.xlu1 %4326  ;;  %v4333_v60 = vpop.permute.xlu0 %4332 }
 0x53f   : >> { %4376 = vmatprep.subr.bf16.mxu1 %v4327_v56  ;;  %v4350_v61 = vsel %vm11917_vm5, %v4325_v49, %v4327_v56 }
 0x540   : >> { %4377 = vmatpush1.bf16.msra.mxu1 %v4350_v61 }
 0x542   : >> { %v4331_v63 = vpop.permute.xlu1 %4330  ;;  %v4337_v16 = vpop.permute.xlu0 %4336 }
 0x543   : >> { %4378 = vmatprep.subr.bf16.mxu1 %v4331_v63  ;;  %v4351_v17 = vsel %vm11917_vm5, %v4329_v53, %v4331_v63 }
 0x544   : >> { %4379 = vmatpush1.bf16.msra.mxu1 %v4351_v17 }
 0x546   : >> { %v4335_v40 = vpop.permute.xlu1 %4334  ;;  %v4341_v21 = vpop.permute.xlu0 %4340 }
 0x547   : >> { %4380 = vmatprep.subr.bf16.mxu1 %v4335_v40  ;;  %v4352_v26 = vsel %vm11917_vm5, %v4333_v60, %v4335_v40 }
 0x548   : >> { %4381 = vmatpush1.bf16.msra.mxu1 %v4352_v26 }
 0x54a   : >> { %v4339_v27 = vpop.permute.xlu1 %4338  ;;  %v4345_v33 = vpop.permute.xlu0 %4344 }
 0x54b   : >> { %4382 = vmatprep.subr.bf16.mxu1 %v4339_v27  ;;  %v4353_v39 = vsel %vm11917_vm5, %v4337_v16, %v4339_v27  ;;  %v8313_v16 = vld [vmem:[%s11891_s3 + $0x308] sm:$0xff]  }
 0x54c   : >> { %4383 = vmatpush1.bf16.msra.mxu1 %v4353_v39 }
 0x54e   : >> { %v4343_v19 = vpop.permute.xlu1 %4342  ;;  %v1367_v43 = vpop.permute.xlu0 %1366 }
 0x54f   : >> { %4384 = vmatprep.subr.bf16.mxu1 %v4343_v19  ;;  %v4354_v45 = vsel %vm11917_vm5, %v4341_v21, %v4343_v19  ;;  %v8315_v19 = vld [vmem:[%s11891_s3 + $0x310] sm:$0xff]  }
 0x550   : >> { %4385 = vmatpush1.bf16.msra.mxu1 %v4354_v45 }
 0x552   : >> { %v4347_v46 = vpop.permute.xlu1 %4346  ;;  %v9914_v47 = vpop.permute.xlu0 %4801 }
 0x553   : >> { %12012 = vst [vmem:[#allocation27_spill] sm:$0xff] %v9914_v47  ;;  %vm4807_vm12 = vcmp.ne.s16.totalorder %v9914_v47, 0  ;;  %4386 = vmatprep.subr.bf16.mxu1 %v4347_v46  ;;  %v4355_v49 = vsel %vm11917_vm5, %v4345_v33, %v4347_v46  ;;  %vm4805_vm5 = vcmask 539648  }
 0x554   : >> { %4387 = vmatpush1.bf16.msra.mxu1 %v4355_v49  ;;  %v4809_v50 = vsel %vm4807_vm12, %v8618_v11, 0  ;;  %v4811_v60 = vsel %vm4807_vm12, %v8633_v18, 0  ;;  %v4813_v18 = vsel %vm4807_vm12, %v8648_v25, 0  ;;  %v4815_v27 = vsel %vm4807_vm12, %v8663_v32, 0 }
 0x555   : >> { %4889 = vrot.lane.b32.xlu0 %v4809_v50, %s11921_s11  ;;  %v4817_v32 = vsel %vm4807_vm12, %v8678_v44, 0  ;;  %v4819_v49 = vsel %vm4807_vm12, %v8693_v51, 0  ;;  %v4821_v51 = vsel %vm4807_vm12, %v8708_v58, 0 }
 0x556   : >> { %v1369_v53 = vpop.permute.xlu1 %1368  ;;  %v1371_v54 = vpop.permute.xlu0 %1370 }
 0x557   : >> { %1423 = vmatprep.subr.bf16.mxu0 %v1369_v53  ;;  %v1399_v56 = vsel %vm1398_vm4, %v1367_v43, %v1369_v53  ;;  %4405 = vmatmul.mubr.bf16.vlgmr.msra.gmra.mrb[0].mxu1 %v8311_v20  ;;  %v8317_v53 = vld [vmem:[%s11891_s3 + $0x318] sm:$0xff]  }
 0x558   : >> { %1424 = vmatpush1.bf16.msra.mxu0 %v1399_v56  ;;  %4414 = vmatprep.mubr.bf16.mxu1 %v11927_v10 }
 0x559   : >> { %4893 = vrot.lane.b32.xlu0 %v4811_v60, %s11921_s11 }
 0x55a   : >> { %v4804_v11 = vpop.permute.xlu1 %4803  ;;  %v1375_v61 = vpop.permute.xlu0 %1374 }
 0x55b   : >> { %v9932_v63 = vsel %vm4805_vm5, %v9914_v47, %v4804_v11  ;;  %v4823_v11 = vsel %vm4807_vm12, %v8723_v3, 0  ;;  %v8319_v3 = vld [vmem:[%s11891_s3 + $0x320] sm:$0xff]   ;;  %vm11925_vm5 = vcmask 515072  }
 0x55c   : >> { %12013 = vst [vmem:[#allocation28_spill] sm:$0xff] %v9932_v63  ;;  %vm4808_vm15 = vcmp.ne.s16.totalorder %v9932_v63, 0 }
 0x55d   : >> { %4897 = vrot.lane.b32.xlu0 %v4813_v18, %s11921_s11  ;;  %v4810_v17 = vsel %vm4808_vm15, %v8625_v15, 0  ;;  %v4812_v15 = vsel %vm4808_vm15, %v8640_v22, 0  ;;  %v4814_v22 = vsel %vm4808_vm15, %v8655_v29, 0  ;;  %v4816_v29 = vsel %vm4808_vm15, %v8670_v36, 0 }
 0x55e   : >> { %v1373_v40 = vpop.permute.xlu1 %1372  ;;  %4891 = vrot.lane.b32.xlu1 %v4810_v17, %s11921_s11  ;;  %v1379_v21 = vpop.permute.xlu0 %1378  ;;  %v4818_v36 = vsel %vm4808_vm15, %v8685_v48, 0  ;;  %v4820_v48 = vsel %vm4808_vm15, %v8700_v55, 0  ;;  %v4822_v55 = vsel %vm4808_vm15, %v8715_v62, 0  ;;  %v4824_v62 = vsel %vm4808_vm15, %v8734_v14, 0  ;;  %v8321_v14 = vld [vmem:[%s11891_s3 + $0x328] sm:$0xff]  }
 0x55f   : >> { %1425 = vmatprep.subr.bf16.mxu0 %v1373_v40  ;;  %v1400_v26 = vsel %vm1398_vm4, %v1371_v54, %v1373_v40  ;;  %4415 = vmatmul.mubr.bf16.gmra.mrb[4].mxu1 %v8313_v16  ;;  %v5091_v16 = vld [vmem:[%s11892_s4] sm:$0xff] }
 0x560   : >> { %1426 = vmatpush1.bf16.msra.mxu0 %v1400_v26  ;;  %4424 = vmatprep.mubr.bf16.mxu1 %v11927_v10 }
 0x561   : >> { %4901 = vrot.lane.b32.xlu0 %v4815_v27, %s11921_s11  ;;  %v8318_v27 = vld [vmem:[%s11891_s3 + $0x80] sm:$0xff]  }
 0x562   : >> { %v1377_v25 = vpop.permute.xlu1 %1376  ;;  %4895 = vrot.lane.b32.xlu1 %v4812_v15, %s11921_s11  ;;  %v1383_v33 = vpop.permute.xlu0 %1382 }
 0x563   : >> { %1427 = vmatprep.subr.bf16.mxu0 %v1377_v25  ;;  %v1401_v39 = vsel %vm1398_vm4, %v1375_v61, %v1377_v25 }
 0x564   : >> { %1428 = vmatpush1.bf16.msra.mxu0 %v1401_v39 }
 0x565   : >> { %4905 = vrot.lane.b32.xlu0 %v4817_v32, %s11921_s11 }
 0x566   : >> { %v1381_v43 = vpop.permute.xlu1 %1380  ;;  %4899 = vrot.lane.b32.xlu1 %v4814_v22, %s11921_s11  ;;  %v1387_v45 = vpop.permute.xlu0 %1386 }
 0x567   : >> { %1429 = vmatprep.subr.bf16.mxu0 %v1381_v43  ;;  %v1402_v46 = vsel %vm1398_vm4, %v1379_v21, %v1381_v43  ;;  %4425 = vmatmul.mubr.bf16.gmra.mrb[8].mxu1 %v8315_v19  ;;  %v5093_v21 = vld [vmem:[%s11892_s4 + $0x10] sm:$0xff]  ;;  %v5092_v19 = vld [vmem:[%s11892_s4 + $0x8] sm:$0xff] }
 0x568   : >> { %1430 = vmatpush1.bf16.msra.mxu0 %v1402_v46  ;;  %4434 = vmatprep.mubr.bf16.mxu1 %v11927_v10  ;;  %v5097_v43 = vld [vmem:[%s11892_s4 + $0x30] sm:$0xff]  ;;  %v5094_v46 = vld [vmem:[%s11892_s4 + $0x18] sm:$0xff] }
 0x569   : >> { %4909 = vrot.lane.b32.xlu0 %v4819_v49, %s11921_s11  ;;  %v8320_v49 = vld [vmem:[%s11891_s3 + $0x88] sm:$0xff]  }
 0x56a   : >> { %v1385_v44 = vpop.permute.xlu1 %1384  ;;  %4903 = vrot.lane.b32.xlu1 %v4816_v29, %s11921_s11  ;;  %v1391_v20 = vpop.permute.xlu0 %1390 }
 0x56b   : >> { %1431 = vmatprep.subr.bf16.mxu0 %v1385_v44  ;;  %v1403_v50 = vsel %vm1398_vm4, %v1383_v33, %v1385_v44  ;;  %v5095_v33 = vld [vmem:[%s11892_s4 + $0x20] sm:$0xff] }
 0x56c   : >> { %1432 = vmatpush1.bf16.msra.mxu0 %v1403_v50  ;;  %v5099_v44 = vld [vmem:[%s11892_s4 + $0x40] sm:$0xff]  ;;  %v5096_v50 = vld [vmem:[%s11892_s4 + $0x28] sm:$0xff] }
 0x56d   : >> { %4913 = vrot.lane.b32.xlu0 %v4821_v51, %s11921_s11 }
 0x56e   : >> { %v1389_v54 = vpop.permute.xlu1 %1388  ;;  %4907 = vrot.lane.b32.xlu1 %v4818_v36, %s11921_s11  ;;  %v1395_v56 = vpop.permute.xlu0 %1394 }
 0x56f   : >> { %1433 = vmatprep.subr.bf16.mxu0 %v1389_v54  ;;  %v1404_v60 = vsel %vm1398_vm4, %v1387_v45, %v1389_v54  ;;  %4435 = vmatmul.mubr.bf16.gmra.mrb[12].mxu1 %v8317_v53  ;;  %v8323_v53 = vld [vmem:[%s11891_s3 + $0x330] sm:$0xff]  }
 0x570   : >> { %1434 = vmatpush1.bf16.msra.mxu0 %v1404_v60  ;;  %4444 = vmatprep.mubr.bf16.mxu1 %v11927_v10  ;;  %v5101_v54 = vld [vmem:[%s11892_s4 + $0x50] sm:$0xff]  ;;  %v5098_v60 = vld [vmem:[%s11892_s4 + $0x38] sm:$0xff] }
 0x571   : >> { %4917 = vrot.lane.b32.xlu0 %v4823_v11, %s11921_s11  ;;  %v8322_v11 = vld [vmem:[%s11891_s3 + $0x90] sm:$0xff]  }
 0x572   : >> { %v1393_v58 = vpop.permute.xlu1 %1392  ;;  %4911 = vrot.lane.b32.xlu1 %v4820_v48, %s11921_s11  ;;  %v4583_v61 = vpop.permute.xlu0 %4582 }
 0x573   : >> { %1435 = vmatprep.subr.bf16.mxu0 %v1393_v58  ;;  %v1405_v18 = vsel %vm1398_vm4, %v1391_v20, %v1393_v58 }
 0x574   : >> { %1436 = vmatpush1.bf16.msra.mxu0 %v1405_v18  ;;  %v5100_v18 = vld [vmem:[%s11892_s4 + $0x48] sm:$0xff] }
 0x575   : >> { %5109 = vperm.xlu0 %8213, %v5091_v16  }
 0x576   : >> { %v1397_v17 = vpop.permute.xlu1 %1396  ;;  %4915 = vrot.lane.b32.xlu1 %v4822_v55, %s11921_s11  ;;  %v4587_v40 = vpop.permute.xlu0 %4586 }
 0x577   : >> { %1437 = vmatprep.subr.bf16.mxu0 %v1397_v17  ;;  %v1406_v26 = vsel %vm1398_vm4, %v1395_v56, %v1397_v17  ;;  %4445 = vmatmul.mubr.bf16.gmra.mrb[16].mxu1 %v8319_v3  ;;  %v8325_v3 = vld [vmem:[%s11891_s3 + $0x338] sm:$0xff]   ;;  %v5105_v17 = vld [vmem:[%s11892_s4 + $0x70] sm:$0xff] }
 0x578   : >> { %1438 = vmatpush1.bf16.msra.mxu0 %v1406_v26  ;;  %4454 = vmatprep.mubr.bf16.mxu1 %v11927_v10  ;;  %v8324_v26 = vld [vmem:[%s11891_s3 + $0x98] sm:$0xff]  }
 0x579   : >> { %5119 = vperm.xlu0 %8213, %v5093_v21   ;;  %v5102_v21 = vld [vmem:[%s11892_s4 + $0x58] sm:$0xff] }
 0x57a   : >> { %v4585_v15 = vpop.permute.xlu1 %4584  ;;  %4919 = vrot.lane.b32.xlu1 %v4824_v62, %s11921_s11  ;;  %v4591_v25 = vpop.permute.xlu0 %4590 }
 0x57b   : >> { %1456 = vmatmul.mubr.bf16.vlgmr.msra.gmra.mrb[32].mxu0 %v8318_v27  ;;  %4639 = vmatprep.subr.bf16.mxu1 %v4585_v15  ;;  %v4615_v39 = vsel %vm11925_vm5, %v4583_v61, %v4585_v15  ;;  %v5103_v61 = vld [vmem:[%s11892_s4 + $0x60] sm:$0xff] }
 0x57c   : >> { %4640 = vmatpush1.bf16.msra.mxu1 %v4615_v39  ;;  %1465 = vmatprep.mubr.bf16.mxu0 %v11927_v10 }
 0x57d   : >> { %5129 = vperm.xlu0 %8213, %v5095_v33  }
 0x57e   : >> { %v4589_v32 = vpop.permute.xlu1 %4588  ;;  %5114 = vperm.xlu1 %8214, %v5092_v19   ;;  %v4595_v22 = vpop.permute.xlu0 %4594 }
 0x57f   : >> { %4641 = vmatprep.subr.bf16.mxu1 %v4589_v32  ;;  %v4616_v45 = vsel %vm11925_vm5, %v4587_v40, %v4589_v32  ;;  %4455 = vmatmul.mubr.bf16.gmra.mrb[20].mxu1 %v8321_v14  ;;  %v5106_v14 = vld [vmem:[%s11892_s4 + $0x78] sm:$0xff]  ;;  %v8326_v32 = vld [vmem:[%s11891_s3 + $0xa0] sm:$0xff]  }
 0x580   : >> { %4642 = vmatpush1.bf16.msra.mxu1 %v4616_v45  ;;  %4464 = vmatprep.mubr.bf16.mxu1 %v11927_v10  ;;  %v8329_v45 = vld [vmem:[%s11891_s3 + $0x348] sm:$0xff]  }
 0x581   : >> { %5139 = vperm.xlu0 %8213, %v5097_v43   ;;  %v8328_v43 = vld [vmem:[%s11891_s3 + $0xa8] sm:$0xff]  }
 0x582   : >> { %v4593_v29 = vpop.permute.xlu1 %4592  ;;  %5124 = vperm.xlu1 %8214, %v5094_v46   ;;  %v4599_v51 = vpop.permute.xlu0 %4598  ;;  %v8330_v46 = vld [vmem:[%s11891_s3 + $0xb0] sm:$0xff]  }
 0x583   : >> { %1466 = vmatmul.mubr.bf16.gmra.mrb[36].mxu0 %v8320_v49  ;;  %4643 = vmatprep.subr.bf16.mxu1 %v4593_v29  ;;  %v4617_v20 = vsel %vm11925_vm5, %v4591_v25, %v4593_v29  ;;  %v5104_v25 = vld [vmem:[%s11892_s4 + $0x68] sm:$0xff]  ;;  %v8331_v49 = vld [vmem:[%s11891_s3 + $0x350] sm:$0xff]   ;;  %v8332_v29 = vld [vmem:[%s11891_s3 + $0xb8] sm:$0xff]  }
 0x584   : >> { %4644 = vmatpush1.bf16.msra.mxu1 %v4617_v20  ;;  %1475 = vmatprep.mubr.bf16.mxu0 %v11927_v10  ;;  %v8334_v20 = vld [vmem:[%s11891_s3 + $0x360] sm:$0xff]  }
 0x585   : >> { %5149 = vperm.xlu0 %8213, %v5099_v44   ;;  %v8333_v44 = vld [vmem:[%s11891_s3 + $0x358] sm:$0xff]  }
 0x586   : >> { %v4597_v36 = vpop.permute.xlu1 %4596  ;;  %5134 = vperm.xlu1 %8214, %v5096_v50   ;;  %v4603_v48 = vpop.permute.xlu0 %4602  ;;  %v8335_v50 = vld [vmem:[%s11891_s3 + $0x368] sm:$0xff]  }
 0x587   : >> { %4645 = vmatprep.subr.bf16.mxu1 %v4597_v36  ;;  %v4618_v56 = vsel %vm11925_vm5, %v4595_v22, %v4597_v36  ;;  %4465 = vmatmul.mubr.bf16.gmra.mrb[24].mxu1 %v8323_v53  ;;  %v8327_v22 = vld [vmem:[%s11891_s3 + $0x340] sm:$0xff]  }
 0x588   : >> { %4646 = vmatpush1.bf16.msra.mxu1 %v4618_v56  ;;  %4474 = vmatprep.mubr.bf16.mxu1 %v11927_v10  ;;  %v8337_v56 = vld [vmem:[%s11891_s3 + $0x378] sm:$0xff]  }
 0x589   : >> { %5159 = vperm.xlu0 %8213, %v5101_v54  }
 0x58a   : >> { %v4601_v58 = vpop.permute.xlu1 %4600  ;;  %5144 = vperm.xlu1 %8214, %v5098_v60   ;;  %v4607_v27 = vpop.permute.xlu0 %4606 }
 0x58b   : >> { %1476 = vmatmul.mubr.bf16.gmra.mrb[40].mxu0 %v8322_v11  ;;  %4647 = vmatprep.subr.bf16.mxu1 %v4601_v58  ;;  %v4619_v16 = vsel %vm11925_vm5, %v4599_v51, %v4601_v58  ;;  %v8336_v51 = vld [vmem:[%s11891_s3 + $0x370] sm:$0xff]  }
 0x58c   : >> { %4648 = vmatpush1.bf16.msra.mxu1 %v4619_v16  ;;  %1485 = vmatprep.mubr.bf16.mxu0 %v11927_v10 }
 0x58d   : >> { %5169 = vperm.xlu0 %8213, %v5103_v61  }
 0x58e   : >> { %v4605_v55 = vpop.permute.xlu1 %4604  ;;  %5154 = vperm.xlu1 %8214, %v5100_v18   ;;  %v4611_v33 = vpop.permute.xlu0 %4610 }
 0x58f   : >> { %4649 = vmatprep.subr.bf16.mxu1 %v4605_v55  ;;  %v4620_v40 = vsel %vm11925_vm5, %v4603_v48, %v4605_v55  ;;  %4475 = vmatmul.mubr.bf16.gmra.mrb[28].mxu1 %v8325_v3 }
 0x590   : >> { %4650 = vmatpush1.bf16.msra.mxu1 %v4620_v40  ;;  %4671 = vmatprep.mubr.bf16.mxu1 %v11927_v10 }
 0x591   : >> { %5179 = vperm.xlu0 %8213, %v5105_v17  }
 0x592   : >> { %v4609_v62 = vpop.permute.xlu1 %4608  ;;  %5164 = vperm.xlu1 %8214, %v5102_v21  }
 0x593   : >> { %1486 = vmatmul.mubr.bf16.gmra.mrb[44].mxu0 %v8324_v26  ;;  %4651 = vmatprep.subr.bf16.mxu1 %v4609_v62  ;;  %v4621_v15 = vsel %vm11925_vm5, %v4607_v27, %v4609_v62 }
 0x594   : >> { %4652 = vmatpush1.bf16.msra.mxu1 %v4621_v15  ;;  %1495 = vmatprep.mubr.bf16.mxu0 %v11927_v10 }
 0x596   : >> { %v4613_v39 = vpop.permute.xlu1 %4612  ;;  %5174 = vperm.xlu1 %8214, %v5104_v25  }
 0x597   : >> { %4653 = vmatprep.subr.bf16.mxu1 %v4613_v39  ;;  %v4622_v19 = vsel %vm11925_vm5, %v4611_v33, %v4613_v39  ;;  %vm4921_vm5 = vcmask 506880  }
 0x598   : >> { %4654 = vmatpush1.bf16.msra.mxu1 %v4622_v19 }
 0x59a   : >> { %5184 = vperm.xlu1 %8214, %v5106_v14  }
 0x59b   : >> { %1496 = vmatmul.mubr.bf16.gmra.mrb[48].mxu0 %v8326_v32  ;;  %4672 = vmatmul.mubr.bf16.vlgmr.msra.gmra.mrb[0].mxu1 %v8327_v22  ;;  %v8338_v32 = vld [vmem:[%s11891_s3 + $0x380] sm:$0xff]   ;;  %v8339_v22 = vld [vmem:[%s11891_s3 + $0x3a8] sm:$0xff]  }
 0x59c   : >> { %1505 = vmatprep.mubr.bf16.mxu0 %v11927_v10  ;;  %4681 = vmatprep.mubr.bf16.mxu1 %v11927_v10 }
 0x5a3   : >> { %1506 = vmatmul.mubr.bf16.gmra.mrb[52].mxu0 %v8328_v43  ;;  %4682 = vmatmul.mubr.bf16.gmra.mrb[4].mxu1 %v8329_v45  ;;  %v8340_v43 = vld [vmem:[%s11891_s3 + $0x388] sm:$0xff]   ;;  %v8341_v45 = vld [vmem:[%s11891_s3 + $0x3b0] sm:$0xff]  }
 0x5a4   : >> { %1515 = vmatprep.mubr.bf16.mxu0 %v11927_v10  ;;  %4691 = vmatprep.mubr.bf16.mxu1 %v11927_v10 }
 0x5ab   : >> { %1516 = vmatmul.mubr.bf16.gmra.mrb[56].mxu0 %v8330_v46  ;;  %4692 = vmatmul.mubr.bf16.gmra.mrb[8].mxu1 %v8331_v49  ;;  %v8342_v46 = vld [vmem:[%s11891_s3 + $0x390] sm:$0xff]   ;;  %v8343_v49 = vld [vmem:[%s11891_s3 + $0x3b8] sm:$0xff]  }
 0x5ac   : >> { %1525 = vmatprep.mubr.bf16.mxu0 %v11927_v10  ;;  %4701 = vmatprep.mubr.bf16.mxu1 %v11927_v10 }
 0x5b3   : >> { %1526 = vmatmul.mubr.bf16.gmra.mrb[60].mxu0 %v8332_v29  ;;  %4702 = vmatmul.mubr.bf16.gmra.mrb[12].mxu1 %v8333_v44  ;;  %v8344_v29 = vld [vmem:[%s11891_s3 + $0x398] sm:$0xff]   ;;  %v8345_v44 = vld [vmem:[%s11891_s3 + $0x3a0] sm:$0xff]  }
 0x5b4   : >> { %4711 = vmatprep.mubr.bf16.mxu1 %v11927_v10  ;;  %4978 = vmatprep.mubr.bf16.mxu0 %v11927_v10 }
 0x5bb   : >> { %4712 = vmatmul.mubr.bf16.gmra.mrb[16].mxu1 %v8334_v20 }
 0x5bc   : >> { %4721 = vmatprep.mubr.bf16.mxu1 %v11927_v10 }
 0x5c3   : >> { %4722 = vmatmul.mubr.bf16.gmra.mrb[20].mxu1 %v8335_v50 }
 0x5c4   : >> { %4731 = vmatprep.mubr.bf16.mxu1 %v11927_v10 }
 0x5c7   : >> { %v4890_v53 = vpop.permute.xlu0 %4889 }
 0x5cb   : >> { %v4894_v36 = vpop.permute.xlu0 %4893  ;;  %4732 = vmatmul.mubr.bf16.gmra.mrb[24].mxu1 %v8336_v51 }
 0x5cc   : >> { %4741 = vmatprep.mubr.bf16.mxu1 %v11927_v10 }
 0x5cf   : >> { %v4898_v54 = vpop.permute.xlu0 %4897 }
 0x5d0   : >> { %v4892_v60 = vpop.permute.xlu1 %4891 }
 0x5d1   : >> { %4946 = vmatprep.subr.bf16.mxu0 %v4892_v60  ;;  %7708 = vmatprep.subr.bf16.mxu1 %v4892_v60  ;;  %v4922_v11 = vsel %vm4921_vm5, %v4890_v53, %v4892_v60 }
 0x5d2   : >> { %4947 = vmatpush1.bf16.msra.mxu0 %v4922_v11  ;;  %7716 = vmatpush1.bf16.msra.mxu1 %v4922_v11 }
 0x5d3   : >> { %4742 = vmatmul.mubr.bf16.gmra.mrb[28].mxu1 %v8337_v56  ;;  %v4902_v48 = vpop.permute.xlu0 %4901 }
 0x5d4   : >> { %v4896_v58 = vpop.permute.xlu1 %4895  ;;  %5028 = vmatprep.mubr.bf16.mxu1 %v11927_v10 }
 0x5d5   : >> { %4948 = vmatprep.subr.bf16.mxu0 %v4896_v58  ;;  %7709 = vmatprep.subr.bf16.mxu1 %v4896_v58  ;;  %v4923_v61 = vsel %vm4921_vm5, %v4894_v36, %v4896_v58 }
 0x5d6   : >> { %4949 = vmatpush1.bf16.msra.mxu0 %v4923_v61  ;;  %7717 = vmatpush1.bf16.msra.mxu1 %v4923_v61 }
 0x5d7   : >> { %v4906_v3 = vpop.permute.xlu0 %4905 }
 0x5d8   : >> { %v4900_v16 = vpop.permute.xlu1 %4899 }
 0x5d9   : >> { %4950 = vmatprep.subr.bf16.mxu0 %v4900_v16  ;;  %7710 = vmatprep.subr.bf16.mxu1 %v4900_v16  ;;  %v4924_v18 = vsel %vm4921_vm5, %v4898_v54, %v4900_v16 }
 0x5da   : >> { %4951 = vmatpush1.bf16.msra.mxu0 %v4924_v18  ;;  %7718 = vmatpush1.bf16.msra.mxu1 %v4924_v18 }
 0x5db   : >> { %v4910_v40 = vpop.permute.xlu0 %4909 }
 0x5dc   : >> { %v4904_v55 = vpop.permute.xlu1 %4903 }
 0x5dd   : >> { %4952 = vmatprep.subr.bf16.mxu0 %v4904_v55  ;;  %7711 = vmatprep.subr.bf16.mxu1 %v4904_v55  ;;  %v4925_v17 = vsel %vm4921_vm5, %v4902_v48, %v4904_v55 }
 0x5de   : >> { %4953 = vmatpush1.bf16.msra.mxu0 %v4925_v17  ;;  %7719 = vmatpush1.bf16.msra.mxu1 %v4925_v17 }
 0x5df   : >> { %v4914_v15 = vpop.permute.xlu0 %4913 }
 0x5e0   : >> { %v4908_v21 = vpop.permute.xlu1 %4907 }
 0x5e1   : >> { %4954 = vmatprep.subr.bf16.mxu0 %v4908_v21  ;;  %7712 = vmatprep.subr.bf16.mxu1 %v4908_v21  ;;  %v4926_v26 = vsel %vm4921_vm5, %v4906_v3, %v4908_v21 }
 0x5e2   : >> { %4955 = vmatpush1.bf16.msra.mxu0 %v4926_v26  ;;  %7720 = vmatpush1.bf16.msra.mxu1 %v4926_v26 }
 0x5e3   : >> { %v4918_v39 = vpop.permute.xlu0 %4917 }
 0x5e4   : >> { %v4912_v27 = vpop.permute.xlu1 %4911 }
 0x5e5   : >> { %4956 = vmatprep.subr.bf16.mxu0 %v4912_v27  ;;  %7713 = vmatprep.subr.bf16.mxu1 %v4912_v27  ;;  %v4927_v62 = vsel %vm4921_vm5, %v4910_v40, %v4912_v27 }
 0x5e6   : >> { %4957 = vmatpush1.bf16.msra.mxu0 %v4927_v62  ;;  %7721 = vmatpush1.bf16.msra.mxu1 %v4927_v62 }
 0x5e8   : >> { %v4916_v25 = vpop.permute.xlu1 %4915 }
 0x5e9   : >> { %4958 = vmatprep.subr.bf16.mxu0 %v4916_v25  ;;  %7714 = vmatprep.subr.bf16.mxu1 %v4916_v25  ;;  %v4928_v33 = vsel %vm4921_vm5, %v4914_v15, %v4916_v25 }
 0x5ea   : >> { %4959 = vmatpush1.bf16.msra.mxu0 %v4928_v33  ;;  %7722 = vmatpush1.bf16.msra.mxu1 %v4928_v33 }
 0x5ec   : >> { %v4920_v19 = vpop.permute.xlu1 %4919 }
 0x5ed   : >> { %4960 = vmatprep.subr.bf16.mxu0 %v4920_v19  ;;  %7715 = vmatprep.subr.bf16.mxu1 %v4920_v19  ;;  %v4929_v14 = vsel %vm4921_vm5, %v4918_v39, %v4920_v19 }
 0x5ee   : >> { %4961 = vmatpush1.bf16.msra.mxu0 %v4929_v14  ;;  %7723 = vmatpush1.bf16.msra.mxu1 %v4929_v14 }
 0x5f1   : >> { %4979 = vmatmul.mubr.bf16.vlgmr.msra.gmra.mrb[64].mxu0 %v8338_v32  ;;  %5029 = vmatmul.mubr.bf16.vlgmr.msra.gmra.mrb[20].mxu1 %v8339_v22 }
 0x5f2   : >> { %4988 = vmatprep.mubr.bf16.mxu0 %v11927_v10  ;;  %5038 = vmatprep.mubr.bf16.mxu1 %v11927_v10 }
 0x5f4   : >> { %v5110_v63 = vpop.permute.xlu0 %5109 }
 0x5f9   : >> { %4989 = vmatmul.mubr.bf16.gmra.mrb[68].mxu0 %v8340_v43  ;;  %5039 = vmatmul.mubr.bf16.gmra.mrb[24].mxu1 %v8341_v45 }
 0x5fa   : >> { %4998 = vmatprep.mubr.bf16.mxu0 %v11927_v10  ;;  %5048 = vmatprep.mubr.bf16.mxu1 %v11927_v10 }
 0x601   : >> { %4999 = vmatmul.mubr.bf16.gmra.mrb[72].mxu0 %v8342_v46  ;;  %5049 = vmatmul.mubr.bf16.gmra.mrb[28].mxu1 %v8343_v49 }
 0x602   : >> { %5008 = vmatprep.mubr.bf16.mxu0 %v11927_v10 }
 0x609   : >> { %5009 = vmatmul.mubr.bf16.gmra.mrb[76].mxu0 %v8344_v29 }
 0x60a   : >> { %5018 = vmatprep.mubr.bf16.mxu0 %v11927_v10 }
 0x611   : >> { %5019 = vmatmul.mubr.bf16.gmra.mrb[80].mxu0 %v8345_v44 }
 0x612   : >> { %5499 = vmatprep.mubr.bf16.mxu0 %v11927_v10 }
 0x64e   : >> { %v1457_v20 = vpop.f32.mrb[32].mxu0 }
 0x64f   : >> { %v1459_v50 = vpop.f32.mrb[33].mxu0 }
 0x650   : >> { %v1461_v53 = vpop.f32.mrb[34].mxu0 }
 0x651   : >> { %v1463_v51 = vpop.f32.mrb[35].mxu0 }
 0x656   : >> { %v1467_v36 = vpop.f32.mrb[36].mxu0 }
 0x657   : >> { %v1469_v54 = vpop.f32.mrb[37].mxu0 }
 0x658   : >> { %v1471_v56 = vpop.f32.mrb[38].mxu0 }
 0x659   : >> { %v1473_v60 = vpop.f32.mrb[39].mxu0 }
 0x65e   : >> { %v1477_v11 = vpop.f32.mrb[40].mxu0 }
 0x65f   : >> { %v1479_v48 = vpop.f32.mrb[41].mxu0 }
 0x660   : >> { %v1481_v58 = vpop.f32.mrb[42].mxu0 }
 0x661   : >> { %v1483_v61 = vpop.f32.mrb[43].mxu0 }
 0x666   : >> { %v1487_v16 = vpop.f32.mrb[44].mxu0 }
 0x667   : >> { %v1489_v18 = vpop.f32.mrb[45].mxu0 }
 0x668   : >> { %v1491_v3 = vpop.f32.mrb[46].mxu0 }
 0x669   : >> { %v1493_v55 = vpop.f32.mrb[47].mxu0 }
 0x66e   : >> { %v1497_v17 = vpop.f32.mrb[48].mxu0  ;;  %v4673_v40 = vpop.f32.mrb[0].mxu1 }
 0x66f   : >> { %v10185_v21 = vadd.f32 %v4673_v40, %v1457_v20  ;;  %v1499_v26 = vpop.f32.mrb[49].mxu0  ;;  %v4675_v27 = vpop.f32.mrb[1].mxu1 }
 0x670   : >> { %v10187_v62 = vadd.f32 %v4675_v27, %v1459_v50  ;;  %v1501_v15 = vpop.f32.mrb[50].mxu0  ;;  %v4677_v25 = vpop.f32.mrb[2].mxu1 }
 0x671   : >> { %v10189_v33 = vadd.f32 %v4677_v25, %v1461_v53  ;;  %v1503_v39 = vpop.f32.mrb[51].mxu0  ;;  %v4679_v19 = vpop.f32.mrb[3].mxu1 }
 0x672   : >> { %v10191_v14 = vadd.f32 %v4679_v19, %v1463_v51 }
 0x676   : >> { %v1507_v32 = vpop.f32.mrb[52].mxu0  ;;  %v4683_v22 = vpop.f32.mrb[4].mxu1 }
 0x677   : >> { %v10193_v43 = vadd.f32 %v4683_v22, %v1467_v36  ;;  %v1509_v45 = vpop.f32.mrb[53].mxu0  ;;  %v4685_v46 = vpop.f32.mrb[5].mxu1 }
 0x678   : >> { %v10195_v49 = vadd.f32 %v4685_v46, %v1469_v54  ;;  %v1511_v29 = vpop.f32.mrb[54].mxu0  ;;  %v4687_v44 = vpop.f32.mrb[6].mxu1 }
 0x679   : >> { %v10197_v20 = vadd.f32 %v4687_v44, %v1471_v56  ;;  %v10199_v50 = vpop.f32.mrb[55].mxu0  ;;  %v4689_v53 = vpop.f32.mrb[7].mxu1 }
 0x67a   : >> { %v10201_v40 = vadd.f32 %v4689_v53, %v1473_v60 }
 0x67e   : >> { %v10203_v27 = vpop.f32.mrb[56].mxu0  ;;  %v4693_v51 = vpop.f32.mrb[8].mxu1 }
 0x67f   : >> { %v10205_v25 = vadd.f32 %v4693_v51, %v1477_v11  ;;  %v10207_v36 = vpop.f32.mrb[57].mxu0  ;;  %v4695_v19 = vpop.f32.mrb[9].mxu1 }
 0x680   : >> { %v10209_v22 = vadd.f32 %v4695_v19, %v1479_v48  ;;  %v10211_v54 = vpop.f32.mrb[58].mxu0  ;;  %v4697_v46 = vpop.f32.mrb[10].mxu1 }
 0x681   : >> { %v10213_v56 = vadd.f32 %v4697_v46, %v1481_v58  ;;  %v10215_v44 = vpop.f32.mrb[59].mxu0  ;;  %v4699_v1 = vpop.f32.mrb[11].mxu1 }
 0x682   : >> { %v10217_v60 = vadd.f32 %v4699_v1, %v1483_v61 }
 0x686   : >> { %v10219_v53 = vpop.f32.mrb[60].mxu0  ;;  %v4703_v10 = vpop.f32.mrb[12].mxu1 }
 0x687   : >> { %v10221_v11 = vadd.f32 %v4703_v10, %v1487_v16  ;;  %v10223_v51 = vpop.f32.mrb[61].mxu0  ;;  %v4705_v6 = vpop.f32.mrb[13].mxu1 }
 0x688   : >> { %v10225_v48 = vadd.f32 %v4705_v6, %v1489_v18  ;;  %v10227_v19 = vpop.f32.mrb[62].mxu0  ;;  %v4707_v7 = vpop.f32.mrb[14].mxu1 }
 0x689   : >> { %v10229_v58 = vadd.f32 %v4707_v7, %v1491_v3  ;;  %v10231_v46 = vpop.f32.mrb[63].mxu0  ;;  %v4709_v8 = vpop.f32.mrb[15].mxu1 }
 0x68a   : >> { %v10233_v1 = vadd.f32 %v4709_v8, %v1493_v55  ;;  %v5115_v7 = vpop.permute.xlu1 %5114  ;;  %v10243_v3 = vpop.permute.xlu0 %5119 }
 0x68e   : >> { %v4713_v61 = vpop.f32.mrb[16].mxu1  ;;  %v10245_v47 = vpop.permute.xlu1 %5124 }
 0x68f   : >> { %v10235_v9 = vadd.f32 %v4713_v61, %v1497_v17  ;;  %v4715_v10 = vpop.f32.mrb[17].mxu1  ;;  %v10247_v8 = vpop.permute.xlu0 %5129 }
 0x690   : >> { %v10237_v16 = vadd.f32 %v4715_v10, %v1499_v26  ;;  %v4717_v37 = vpop.f32.mrb[18].mxu1 }
 0x691   : >> { %v10239_v38 = vadd.f32 %v4717_v37, %v1501_v15  ;;  %v4719_v6 = vpop.f32.mrb[19].mxu1 }
 0x692   : >> { %v10241_v18 = vadd.f32 %v4719_v6, %v1503_v39  ;;  %v10249_v55 = vpop.permute.xlu1 %5134 }
 0x693   : >> { %v10251_v17 = vpop.permute.xlu0 %5139 }
 0x696   : >> { %v10253_v26 = vpop.permute.xlu1 %5144 }
 0x697   : >> { %v10255_v61 = vpop.permute.xlu0 %5149 }
 0x69a   : >> { %v10257_v37 = vpop.permute.xlu1 %5154 }
 0x69b   : >> { %v5160_v15 = vpop.permute.xlu0 %5159 }
 0x69e   : >> { %v5165_v0 = vpop.permute.xlu1 %5164 }
 0x6c4   : >> { %v4980_v39 = vpop.f32.mrb[64].mxu0  ;;  %v5030_v10 = vpop.f32.mrb[20].mxu1 }
 0x6c5   : >> { %v7725_v6 = vadd.f32 %v10185_v21, %v4980_v39  ;;  %v7764_v35 = vadd.f32 %v5030_v10, %v1507_v32  ;;  %v4982_v5 = vpop.f32.mrb[65].mxu0  ;;  %v5032_v28 = vpop.f32.mrb[21].mxu1 }
 0x6c6   : >> { %v7727_v12 = vadd.f32 %v10187_v62, %v4982_v5  ;;  %v7765_v34 = vadd.f32 %v5032_v28, %v1509_v45  ;;  %v4984_v23 = vpop.f32.mrb[66].mxu0  ;;  %v5034_v31 = vpop.f32.mrb[22].mxu1 }
 0x6c7   : >> { %v5187_v24 = vadd.f32 %v7725_v6, %v5110_v63  ;;  %v5207_v57 = vadd.f32 %v7764_v35, %v5160_v15  ;;  %v7729_v52 = vadd.f32 %v10189_v33, %v4984_v23  ;;  %v7766_v41 = vadd.f32 %v5034_v31, %v1511_v29  ;;  %v4986_v42 = vpop.f32.mrb[67].mxu0  ;;  %v5036_v13 = vpop.f32.mrb[23].mxu1 }
 0x6c8   : >> { %v5188_v4 = vadd.f32 %v7727_v12, %v5110_v63  ;;  %v5208_v2 = vadd.f32 %v7765_v34, %v5160_v15  ;;  %v7731_v21 = vadd.f32 %v10191_v14, %v4986_v42  ;;  %v7767_v32 = vadd.f32 %v5036_v13, %v10199_v50  ;;  %v5170_v62 = vpop.permute.xlu0 %5169  ;;  %v5175_v15 = vpop.permute.xlu1 %5174 }
 0x6c9   : >> { %v5189_v39 = vadd.f32 %v7729_v52, %v5115_v7  ;;  %v5209_v10 = vadd.f32 %v7766_v41, %v5165_v0  ;;  %v5219_v45 = vmax.f32 %v5187_v24, 0.0  ;;  %v5239_v6 = vmax.f32 %v5207_v57, 0.0 }
 0x6ca   : >> { %v5190_v5 = vadd.f32 %v7731_v21, %v5115_v7  ;;  %v5210_v28 = vadd.f32 %v7767_v32, %v5165_v0  ;;  %v5220_v23 = vmax.f32 %v5188_v4, 0.0  ;;  %v5240_v31 = vmax.f32 %v5208_v2, 0.0 }
 0x6cb   : >> { %v5221_v35 = vmax.f32 %v5189_v39, 0.0  ;;  %v5241_v30 = vmax.f32 %v5209_v10, 0.0 }
 0x6cc   : >> { %v5222_v33 = vmax.f32 %v5190_v5, 0.0  ;;  %v5242_v29 = vmax.f32 %v5210_v28, 0.0  ;;  %v4990_v59 = vpop.f32.mrb[68].mxu0  ;;  %v5040_v12 = vpop.f32.mrb[24].mxu1 }
 0x6cd   : >> { %v5251_v34 = vpack.c.bf16 %v5221_v35, %v5219_v45  ;;  %v10264_v63 = vpack.c.bf16 %v5241_v30, %v5239_v6  ;;  %v7733_v42 = vadd.f32 %v10193_v43, %v4990_v59  ;;  %v7768_v41 = vadd.f32 %v5040_v12, %v10203_v27  ;;  %v4992_v13 = vpop.f32.mrb[69].mxu0  ;;  %v5042_v0 = vpop.f32.mrb[25].mxu1 }
 0x6ce   : >> { %v5252_v52 = vpack.c.bf16 %v5222_v33, %v5220_v23  ;;  %v10268_v24 = vpack.c.bf16 %v5242_v29, %v5240_v31  ;;  %v7735_v57 = vadd.f32 %v10195_v49, %v4992_v13  ;;  %v7769_v2 = vadd.f32 %v5042_v0, %v10207_v36  ;;  %v4994_v4 = vpop.f32.mrb[70].mxu0  ;;  %v5044_v14 = vpop.f32.mrb[26].mxu1 }
 0x6cf   : >> { %v5191_v50 = vadd.f32 %v7733_v42, %v10243_v3  ;;  %v5211_v7 = vadd.f32 %v7768_v41, %v5170_v62  ;;  %v7737_v30 = vadd.f32 %v10197_v20, %v4994_v4  ;;  %v7770_v59 = vadd.f32 %v5044_v14, %v10211_v54  ;;  %v4996_v43 = vpop.f32.mrb[71].mxu0  ;;  %v5046_v27 = vpop.f32.mrb[27].mxu1  ;;  %5283 = vrot.lane.b32.xlu0 %v5251_v34, %s8372_s25 }
 0x6d0   : >> { %v5192_v21 = vadd.f32 %v7735_v57, %v10243_v3  ;;  %v5212_v32 = vadd.f32 %v7769_v2, %v5170_v62  ;;  %v7739_v49 = vadd.f32 %v10201_v40, %v4996_v43  ;;  %v7771_v36 = vadd.f32 %v5046_v27, %v10215_v44  ;;  %5285 = vrot.lane.b32.xlu1 %v5252_v52, %s8372_s25  ;;  %v5180_v5 = vpop.permute.xlu0 %5179 }
 0x6d1   : >> { %v5193_v39 = vadd.f32 %v7737_v30, %v10245_v47  ;;  %v5213_v10 = vadd.f32 %v7770_v59, %v5175_v15  ;;  %v5223_v28 = vmax.f32 %v5191_v50, 0.0  ;;  %v5243_v45 = vmax.f32 %v5211_v7, 0.0  ;;  %v5185_v30 = vpop.permute.xlu1 %5184 }
 0x6d2   : >> { %v5194_v20 = vadd.f32 %v7739_v49, %v10245_v47  ;;  %v5214_v54 = vadd.f32 %v7771_v36, %v5175_v15  ;;  %v5224_v23 = vmax.f32 %v5192_v21, 0.0  ;;  %v5244_v3 = vmax.f32 %v5212_v32, 0.0 }
 0x6d3   : >> { %v5225_v6 = vmax.f32 %v5193_v39, 0.0  ;;  %v5245_v35 = vmax.f32 %v5213_v10, 0.0 }
 0x6d4   : >> { %v5226_v62 = vmax.f32 %v5194_v20, 0.0  ;;  %v5246_v31 = vmax.f32 %v5214_v54, 0.0  ;;  %v5000_v40 = vpop.f32.mrb[72].mxu0  ;;  %v5050_v33 = vpop.f32.mrb[28].mxu1 }
 0x6d5   : >> { %v5253_v44 = vpack.c.bf16 %v5225_v6, %v5223_v28  ;;  %v10282_v29 = vpack.c.bf16 %v5245_v35, %v5243_v45  ;;  %v7741_v12 = vadd.f32 %v10205_v25, %v5000_v40  ;;  %v7772_v34 = vadd.f32 %v5050_v33, %v10219_v53  ;;  %v5002_v47 = vpop.f32.mrb[73].mxu0  ;;  %v5052_v42 = vpop.f32.mrb[29].mxu1 }
 0x6d6   : >> { %v5254_v41 = vpack.c.bf16 %v5226_v62, %v5224_v23  ;;  %v10286_v13 = vpack.c.bf16 %v5246_v31, %v5244_v3  ;;  %v7743_v0 = vadd.f32 %v10209_v22, %v5002_v47  ;;  %v7773_v52 = vadd.f32 %v5052_v42, %v10223_v51  ;;  %v5004_v57 = vpop.f32.mrb[74].mxu0  ;;  %v5054_v2 = vpop.f32.mrb[30].mxu1 }
 0x6d7   : >> { %v5195_v4 = vadd.f32 %v7741_v12, %v10247_v8  ;;  %v5215_v14 = vadd.f32 %v7772_v34, %v5180_v5  ;;  %v7745_v50 = vadd.f32 %v10213_v56, %v5004_v57  ;;  %v7774_v25 = vadd.f32 %v5054_v2, %v10227_v19  ;;  %v5006_v7 = vpop.f32.mrb[75].mxu0  ;;  %v5056_v53 = vpop.f32.mrb[31].mxu1  ;;  %5287 = vrot.lane.b32.xlu0 %v5253_v44, %s8372_s25 }
 0x6d8   : >> { %v5196_v59 = vadd.f32 %v7743_v0, %v10247_v8  ;;  %v5216_v43 = vadd.f32 %v7773_v52, %v5180_v5  ;;  %v7747_v22 = vadd.f32 %v10217_v60, %v5006_v7  ;;  %v7775_v51 = vadd.f32 %v5056_v53, %v10231_v46  ;;  %5289 = vrot.lane.b32.xlu1 %v5254_v41, %s8372_s25 }
 0x6d9   : >> { %v5197_v27 = vadd.f32 %v7745_v50, %v10249_v55  ;;  %v5217_v15 = vadd.f32 %v7774_v25, %v5185_v30  ;;  %v5227_v21 = vmax.f32 %v5195_v4, 0.0  ;;  %v5247_v32 = vmax.f32 %v5215_v14, 0.0 }
 0x6da   : >> { %v5198_v56 = vadd.f32 %v7747_v22, %v10249_v55  ;;  %v5218_v19 = vadd.f32 %v7775_v51, %v5185_v30  ;;  %v5228_v39 = vmax.f32 %v5196_v59, 0.0  ;;  %v5248_v10 = vmax.f32 %v5216_v43, 0.0 }
 0x6db   : >> { %v5229_v49 = vmax.f32 %v5197_v27, 0.0  ;;  %v5249_v36 = vmax.f32 %v5217_v15, 0.0 }
 0x6dc   : >> { %v5230_v8 = vmax.f32 %v5198_v56, 0.0  ;;  %v5250_v20 = vmax.f32 %v5218_v19, 0.0  ;;  %v5010_v54 = vpop.f32.mrb[76].mxu0 }
 0x6dd   : >> { %v5255_v60 = vpack.c.bf16 %v5229_v49, %v5227_v21  ;;  %v5265_v5 = vpack.c.bf16 %v5249_v36, %v5247_v32  ;;  %v7749_v46 = vadd.f32 %v10221_v11, %v5010_v54  ;;  %v5012_v28 = vpop.f32.mrb[77].mxu0 }
 0x6de   : >> { %v5256_v45 = vpack.c.bf16 %v5230_v8, %v5228_v39  ;;  %v5266_v6 = vpack.c.bf16 %v5250_v20, %v5248_v10  ;;  %v7751_v35 = vadd.f32 %v10225_v48, %v5012_v28  ;;  %v5014_v55 = vpop.f32.mrb[78].mxu0 }
 0x6df   : >> { %v5199_v23 = vadd.f32 %v7749_v46, %v10251_v17  ;;  %v7753_v3 = vadd.f32 %v10229_v58, %v5014_v55  ;;  %v5016_v62 = vpop.f32.mrb[79].mxu0  ;;  %5291 = vrot.lane.b32.xlu0 %v5255_v60, %s8372_s25 }
 0x6e0   : >> { %v5200_v31 = vadd.f32 %v7751_v35, %v10251_v17  ;;  %v7755_v40 = vadd.f32 %v10233_v1, %v5016_v62  ;;  %5293 = vrot.lane.b32.xlu1 %v5256_v45, %s8372_s25 }
 0x6e1   : >> { %v5201_v11 = vadd.f32 %v7753_v3, %v10253_v26  ;;  %v5231_v44 = vmax.f32 %v5199_v23, 0.0 }
 0x6e2   : >> { %v5202_v33 = vadd.f32 %v7755_v40, %v10253_v26  ;;  %v5232_v12 = vmax.f32 %v5200_v31, 0.0 }
 0x6e3   : >> { %v5233_v48 = vmax.f32 %v5201_v11, 0.0 }
 0x6e4   : >> { %v5234_v34 = vmax.f32 %v5202_v33, 0.0  ;;  %v5020_v47 = vpop.f32.mrb[80].mxu0 }
 0x6e5   : >> { %v5257_v42 = vpack.c.bf16 %v5233_v48, %v5231_v44  ;;  %v7757_v58 = vadd.f32 %v10235_v9, %v5020_v47  ;;  %v5022_v41 = vpop.f32.mrb[81].mxu0 }
 0x6e6   : >> { %v5258_v0 = vpack.c.bf16 %v5234_v34, %v5232_v12  ;;  %v7759_v17 = vadd.f32 %v10237_v16, %v5022_v41  ;;  %v5024_v52 = vpop.f32.mrb[82].mxu0  ;;  %v12019_v12 = vld [vmem:[#allocation14_spill] sm:$0xff] }
 0x6e7   : >> { %v5203_v1 = vadd.f32 %v7757_v58, %v10255_v61  ;;  %v7761_v57 = vadd.f32 %v10239_v38, %v5024_v52  ;;  %v5026_v2 = vpop.f32.mrb[83].mxu0  ;;  %5295 = vrot.lane.b32.xlu0 %v5257_v42, %s8372_s25 }
 0x6e8   : >> { %v5204_v26 = vadd.f32 %v7759_v17, %v10255_v61  ;;  %v7763_v4 = vadd.f32 %v10241_v18, %v5026_v2  ;;  %5297 = vrot.lane.b32.xlu1 %v5258_v0, %s8372_s25 }
 0x6e9   : >> { %v5205_v9 = vadd.f32 %v7761_v57, %v10257_v37  ;;  %v5235_v50 = vmax.f32 %v5203_v1, 0.0 }
 0x6ea   : >> { %v5206_v14 = vadd.f32 %v7763_v4, %v10257_v37  ;;  %v5236_v25 = vmax.f32 %v5204_v26, 0.0 }
 0x6eb   : >> { %v5237_v16 = vmax.f32 %v5205_v9, 0.0 }
 0x6ec   : >> { %v5238_v7 = vmax.f32 %v5206_v14, 0.0 }
 0x6ed   : >> { %v5259_v53 = vpack.c.bf16 %v5237_v16, %v5235_v50 }
 0x6ee   : >> { %v5260_v30 = vpack.c.bf16 %v5238_v7, %v5236_v25 }
 0x6ef   : >> { %5299 = vrot.lane.b32.xlu0 %v5259_v53, %s8372_s25 }
 0x6f0   : >> { %5301 = vrot.lane.b32.xlu1 %v5260_v30, %s8372_s25 }
 0x6f3   : >> { %5303 = vrot.lane.b32.xlu0 %v10264_v63, %s8372_s25 }
 0x6f4   : >> { %5305 = vrot.lane.b32.xlu1 %v10268_v24, %s8372_s25 }
 0x6f7   : >> { %5307 = vrot.lane.b32.xlu0 %v10282_v29, %s8372_s25 }
 0x6f8   : >> { %5309 = vrot.lane.b32.xlu1 %v10286_v13, %s8372_s25 }
 0x6fb   : >> { %5311 = vrot.lane.b32.xlu0 %v5265_v5, %s8372_s25 }
 0x6fc   : >> { %5313 = vrot.lane.b32.xlu1 %v5266_v6, %s8372_s25  ;;  %s7230_s25 = sand.u32 7, %s8368_s13  ;;  %s325_s13 = sadd.s32 1, %s8368_s13  }
 0x6fd   : >> { %p322_p5 = scmp.ge.s32.totalorder %s325_s13, 8  }
 0x741   : >> { %v5284_v38 = vpop.permute.xlu0 %5283 }
 0x742   : >> { %v10333_v18 = vsel %vm727_vm6, 0, %v5284_v38  ;;  %v5286_v61 = vpop.permute.xlu1 %5285 }
 0x743   : >> { %v5315_v37 = vsel %vm727_vm6, %v5284_v38, %v5286_v61  ;;  %5411 = vrot.lane.b32.xlu0 %v10333_v18, %s8386_s6  ;;  %v5550_v48 = vsel %vm1284_vm10, %v10333_v18, 0  ;;  %v5686_v16 = vsel %vm1591_vm7, %v10333_v18, 0 }
 0x744   : >> { %v10339_v63 = vsel %vm762_vm8, %v5315_v37, 0 }
 0x745   : >> { %5413 = vrot.lane.b32.xlu1 %v10339_v63, %s8386_s6  ;;  %v5551_v34 = vsel %vm1285_vm13, %v10339_v63, 0  ;;  %v5687_v7 = vsel %vm1592_vm9, %v10339_v63, 0 }
 0x749   : >> { %v5288_v24 = vpop.permute.xlu0 %5287 }
 0x74a   : >> { %v10344_v29 = vsel %vm727_vm6, 0, %v5288_v24  ;;  %v5290_v13 = vpop.permute.xlu1 %5289 }
 0x74b   : >> { %v5316_v59 = vsel %vm727_vm6, %v5288_v24, %v5290_v13  ;;  %5415 = vrot.lane.b32.xlu0 %v10344_v29, %s8386_s6  ;;  %v5552_v47 = vsel %vm1284_vm10, %v10344_v29, 0  ;;  %v5688_v53 = vsel %vm1591_vm7, %v10344_v29, 0 }
 0x74c   : >> { %v10350_v43 = vsel %vm762_vm8, %v5316_v59, 0 }
 0x74d   : >> { %5417 = vrot.lane.b32.xlu1 %v10350_v43, %s8386_s6  ;;  %v5553_v42 = vsel %vm1285_vm13, %v10350_v43, 0  ;;  %v5689_v30 = vsel %vm1592_vm9, %v10350_v43, 0 }
 0x751   : >> { %v5292_v22 = vpop.permute.xlu0 %5291 }
 0x752   : >> { %v10355_v51 = vsel %vm727_vm6, 0, %v5292_v22  ;;  %v5294_v27 = vpop.permute.xlu1 %5293 }
 0x753   : >> { %v5317_v15 = vsel %vm727_vm6, %v5292_v22, %v5294_v27  ;;  %5419 = vrot.lane.b32.xlu0 %v10355_v51, %s8386_s6  ;;  %v5554_v58 = vsel %vm1284_vm10, %v10355_v51, 0  ;;  %v5690_v38 = vsel %vm1591_vm7, %v10355_v51, 0 }
 0x754   : >> { %v10361_v56 = vsel %vm762_vm8, %v5317_v15, 0 }
 0x755   : >> { %5421 = vrot.lane.b32.xlu1 %v10361_v56, %s8386_s6  ;;  %v5555_v41 = vsel %vm1285_vm13, %v10361_v56, 0  ;;  %v5691_v61 = vsel %vm1592_vm9, %v10361_v56, 0 }
 0x759   : >> { %v5296_v19 = vpop.permute.xlu0 %5295 }
 0x75a   : >> { %v10366_v21 = vsel %vm727_vm6, 0, %v5296_v19  ;;  %v5298_v32 = vpop.permute.xlu1 %5297 }
 0x75b   : >> { %v5318_v49 = vsel %vm727_vm6, %v5296_v19, %v5298_v32  ;;  %5423 = vrot.lane.b32.xlu0 %v10366_v21, %s8386_s6  ;;  %v5556_v0 = vsel %vm1284_vm10, %v10366_v21, 0  ;;  %v5692_v37 = vsel %vm1591_vm7, %v10366_v21, 0 }
 0x75c   : >> { %v10372_v36 = vsel %vm762_vm8, %v5318_v49, 0 }
 0x75d   : >> { %5425 = vrot.lane.b32.xlu1 %v10372_v36, %s8386_s6  ;;  %v5557_v17 = vsel %vm1285_vm13, %v10372_v36, 0  ;;  %v5693_v24 = vsel %vm1592_vm9, %v10372_v36, 0 }
 0x761   : >> { %v5300_v39 = vpop.permute.xlu0 %5299 }
 0x762   : >> { %v10377_v10 = vsel %vm727_vm6, 0, %v5300_v39  ;;  %v5302_v8 = vpop.permute.xlu1 %5301 }
 0x763   : >> { %v5319_v20 = vsel %vm727_vm6, %v5300_v39, %v5302_v8  ;;  %5427 = vrot.lane.b32.xlu0 %v10377_v10, %s8386_s6  ;;  %v5558_v52 = vsel %vm1284_vm10, %v10377_v10, 0  ;;  %v5694_v13 = vsel %vm1591_vm7, %v10377_v10, 0 }
 0x764   : >> { %v10383_v54 = vsel %vm762_vm8, %v5319_v20, 0 }
 0x765   : >> { %5429 = vrot.lane.b32.xlu1 %v10383_v54, %s8386_s6  ;;  %v5304_v60 = vpop.permute.xlu0 %5303  ;;  %v5559_v1 = vsel %vm1285_vm13, %v10383_v54, 0  ;;  %v5695_v59 = vsel %vm1592_vm9, %v10383_v54, 0 }
 0x766   : >> { %v10388_v5 = vsel %vm727_vm6, 0, %v5304_v60  ;;  %v5306_v46 = vpop.permute.xlu1 %5305 }
 0x767   : >> { %v5320_v28 = vsel %vm727_vm6, %v5304_v60, %v5306_v46  ;;  %5431 = vrot.lane.b32.xlu0 %v10388_v5, %s8386_s6  ;;  %v5560_v57 = vsel %vm1284_vm10, %v10388_v5, 0  ;;  %v5696_v22 = vsel %vm1591_vm7, %v10388_v5, 0 }
 0x768   : >> { %v10394_v45 = vsel %vm762_vm8, %v5320_v28, 0 }
 0x769   : >> { %5433 = vrot.lane.b32.xlu1 %v10394_v45, %s8386_s6  ;;  %v5308_v6 = vpop.permute.xlu0 %5307  ;;  %v5561_v2 = vsel %vm1285_vm13, %v10394_v45, 0  ;;  %v5697_v27 = vsel %vm1592_vm9, %v10394_v45, 0 }
 0x76a   : >> { %v10399_v35 = vsel %vm727_vm6, 0, %v5308_v6  ;;  %v5310_v55 = vpop.permute.xlu1 %5309 }
 0x76b   : >> { %v5321_v23 = vsel %vm727_vm6, %v5308_v6, %v5310_v55  ;;  %5435 = vrot.lane.b32.xlu0 %v10399_v35, %s8386_s6  ;;  %v5562_v26 = vsel %vm1284_vm10, %v10399_v35, 0  ;;  %v5698_v15 = vsel %vm1591_vm7, %v10399_v35, 0 }
 0x76c   : >> { %v10405_v3 = vsel %vm762_vm8, %v5321_v23, 0 }
 0x76d   : >> { %5437 = vrot.lane.b32.xlu1 %v10405_v3, %s8386_s6  ;;  %v5312_v62 = vpop.permute.xlu0 %5311  ;;  %v5563_v4 = vsel %vm1285_vm13, %v10405_v3, 0  ;;  %v5699_v19 = vsel %vm1592_vm9, %v10405_v3, 0 }
 0x76e   : >> { %v10410_v31 = vsel %vm727_vm6, 0, %v5312_v62  ;;  %v5314_v40 = vpop.permute.xlu1 %5313 }
 0x76f   : >> { %v5322_v11 = vsel %vm727_vm6, %v5312_v62, %v5314_v40  ;;  %5439 = vrot.lane.b32.xlu0 %v10410_v31, %s8386_s6  ;;  %v5564_v9 = vsel %vm1284_vm10, %v10410_v31, 0  ;;  %v5700_v32 = vsel %vm1591_vm7, %v10410_v31, 0  ;;  %vm12020_vm6 = vcmp.ne.s16.totalorder %v12019_v12, 0 }
 0x770   : >> { %v10416_v33 = vsel %vm762_vm8, %v5322_v11, 0  ;;  %vm12021_vm7 = vmmov %vm12020_vm6 }
 0x771   : >> { %5441 = vrot.lane.b32.xlu1 %v10416_v33, %s8386_s6  ;;  %v5565_v14 = vsel %vm1285_vm13, %v10416_v33, 0  ;;  %v5701_v49 = vsel %vm1592_vm9, %v10416_v33, 0  ;;  %vm12022_vm8 = vmmov %vm12020_vm6  ;;  %s12156_s6 = smov 63  }
 0x772   : >> { %vm12023_vm9 = vmmov %vm12020_vm6 }
 0x773   : >> { %5587 = vrot.lane.b32.xlu0 %v5550_v48, %s8390_s21  ;;  %v5927_v48 = vsel %vm2165_vm14, %v10333_v18, 0  ;;  %v5934_v50 = vsel %vm12023_vm9, %v10372_v36, 0  ;;  %vm12024_vm13 = vmmov %vm12020_vm6 }
 0x775   : >> { %5589 = vrot.lane.b32.xlu1 %v5551_v34, %s8390_s21  ;;  %v5928_v34 = vsel %vm12020_vm6, %v10339_v63, 0 }
 0x777   : >> { %5591 = vrot.lane.b32.xlu0 %v5552_v47, %s8390_s21 }
 0x779   : >> { %5593 = vrot.lane.b32.xlu1 %v5553_v42, %s8390_s21  ;;  %v5929_v42 = vsel %vm2165_vm14, %v10344_v29, 0 }
 0x77b   : >> { %5595 = vrot.lane.b32.xlu0 %v5554_v58, %s8390_s21 }
 0x77d   : >> { %5597 = vrot.lane.b32.xlu1 %v5555_v41, %s8390_s21  ;;  %v5930_v41 = vsel %vm12021_vm7, %v10350_v43, 0 }
 0x77f   : >> { %5599 = vrot.lane.b32.xlu0 %v5556_v0, %s8390_s21 }
 0x781   : >> { %5601 = vrot.lane.b32.xlu1 %v5557_v17, %s8390_s21 }
 0x783   : >> { %5603 = vrot.lane.b32.xlu0 %v5558_v52, %s8390_s21  ;;  %v5931_v52 = vsel %vm2165_vm14, %v10355_v51, 0 }
 0x785   : >> { %5605 = vrot.lane.b32.xlu1 %v5559_v1, %s8390_s21 }
 0x787   : >> { %5607 = vrot.lane.b32.xlu0 %v5560_v57, %s8390_s21  ;;  %v5932_v57 = vsel %vm12022_vm8, %v10361_v56, 0 }
 0x789   : >> { %5609 = vrot.lane.b32.xlu1 %v5561_v2, %s8390_s21 }
 0x78b   : >> { %5611 = vrot.lane.b32.xlu0 %v5562_v26, %s8390_s21 }
 0x78d   : >> { %5613 = vrot.lane.b32.xlu1 %v5563_v4, %s8390_s21  ;;  %v10613_v4 = vld [vmem:[%s11893_s5] sm:$0x1] }
 0x78e   : >> { %v7684_v25 = vcombine.low %v10613_v4, %v10613_v4 }
 0x78f   : >> { %5615 = vrot.lane.b32.xlu0 %v5564_v9, %s8390_s21  ;;  %v5933_v9 = vsel %vm2165_vm14, %v10366_v21, 0 }
 0x791   : >> { %5617 = vrot.lane.b32.xlu1 %v5565_v14, %s8390_s21 }
 0x793   : >> { %5723 = vrot.lane.b32.xlu0 %v5686_v16, %s8373_s27 }
 0x795   : >> { %5725 = vrot.lane.b32.xlu1 %v5687_v7, %s8373_s27 }
 0x797   : >> { %5727 = vrot.lane.b32.xlu0 %v5688_v53, %s8373_s27  ;;  %v5935_v53 = vsel %vm2165_vm14, %v10377_v10, 0 }
 0x799   : >> { %5729 = vrot.lane.b32.xlu1 %v5689_v30, %s8373_s27 }
 0x79b   : >> { %5731 = vrot.lane.b32.xlu0 %v5690_v38, %s8373_s27  ;;  %v5936_v38 = vsel %vm12024_vm13, %v10383_v54, 0 }
 0x79d   : >> { %5733 = vrot.lane.b32.xlu1 %v5691_v61, %s8373_s27 }
 0x79f   : >> { %5735 = vrot.lane.b32.xlu0 %v5692_v37, %s8373_s27  ;;  %v5392_v37 = vshrl.u32 %v7684_v25, 16 }
 0x7a1   : >> { %5737 = vrot.lane.b32.xlu1 %v5693_v24, %s8373_s27 }
 0x7a3   : >> { %5739 = vrot.lane.b32.xlu0 %v5694_v13, %s8373_s27  ;;  %v12025_v13 = vld [vmem:[#allocation10_spill] sm:$0xff] }
 0x7a4   : >> { %vm12026_vm10 = vcmp.ne.s16.totalorder %v12025_v13, 0 }
 0x7a5   : >> { %5741 = vrot.lane.b32.xlu1 %v5695_v59, %s8373_s27  ;;  %v5937_v59 = vsel %vm2165_vm14, %v10388_v5, 0  ;;  %vm12030_vm7 = vmmov %vm12026_vm10 }
 0x7a6   : >> { %vm12033_vm13 = vmmov %vm12030_vm7 }
 0x7a7   : >> { %5743 = vrot.lane.b32.xlu0 %v5696_v22, %s8373_s27 }
 0x7a9   : >> { %5745 = vrot.lane.b32.xlu1 %v5697_v27, %s8373_s27 }
 0x7ab   : >> { %5747 = vrot.lane.b32.xlu0 %v5698_v15, %s8373_s27  ;;  %v12028_v15 = vld [vmem:[#allocation9_spill] sm:$0xff] }
 0x7ad   : >> { %5749 = vrot.lane.b32.xlu1 %v5699_v19, %s8373_s27 }
 0x7af   : >> { %5751 = vrot.lane.b32.xlu0 %v5700_v32, %s8373_s27 }
 0x7b1   : >> { %5753 = vrot.lane.b32.xlu1 %v5701_v49, %s8373_s27  ;;  %v5939_v49 = vsel %vm2165_vm14, %v10399_v35, 0  ;;  %s7707_s27 = sshll.u32 %s7227_s15, 4 }
 0x7b3   : >> { %5828 = vrot.lane.b32.xlu0 %v10333_v18, %s8374_s28 }
 0x7b5   : >> { %5830 = vrot.lane.b32.xlu1 %v10339_v63, %s8374_s28  ;;  %v5412_v39 = vpop.permute.xlu0 %5411 }
 0x7b7   : >> { %v5414_v8 = vpop.permute.xlu1 %5413  ;;  %5832 = vrot.lane.b32.xlu0 %v10344_v29, %s8374_s28 }
 0x7b8   : >> { %5467 = vmatprep.subr.bf16.mxu0 %v5414_v8  ;;  %v5443_v20 = vsel %vm948_vm11, %v5412_v39, %v5414_v8  ;;  %v12031_v39 = vmov 0  }
 0x7b9   : >> { %5834 = vrot.lane.b32.xlu1 %v10350_v43, %s8374_s28  ;;  %5468 = vmatpush1.bf16.msra.mxu0 %v5443_v20  ;;  %v5940_v20 = vsel %vm12022_vm8, %v10405_v3, 0 }
 0x7bb   : >> { %5836 = vrot.lane.b32.xlu0 %v10355_v51, %s8374_s28 }
 0x7bd   : >> { %5838 = vrot.lane.b32.xlu1 %v10361_v56, %s8374_s28  ;;  %v5416_v60 = vpop.permute.xlu0 %5415 }
 0x7bf   : >> { %v5418_v46 = vpop.permute.xlu1 %5417  ;;  %5840 = vrot.lane.b32.xlu0 %v10366_v21, %s8374_s28 }
 0x7c0   : >> { %5469 = vmatprep.subr.bf16.mxu0 %v5418_v46  ;;  %v5444_v28 = vsel %vm948_vm11, %v5416_v60, %v5418_v46 }
 0x7c1   : >> { %5842 = vrot.lane.b32.xlu1 %v10372_v36, %s8374_s28  ;;  %5470 = vmatpush1.bf16.msra.mxu0 %v5444_v28  ;;  %v5941_v28 = vsel %vm2165_vm14, %v10410_v31, 0  ;;  %vm12036_vm14 = vmmov %vm12030_vm7 }
 0x7c3   : >> { %5844 = vrot.lane.b32.xlu0 %v10377_v10, %s8374_s28 }
 0x7c5   : >> { %5846 = vrot.lane.b32.xlu1 %v10383_v54, %s8374_s28  ;;  %v5420_v6 = vpop.permute.xlu0 %5419 }
 0x7c7   : >> { %v5422_v55 = vpop.permute.xlu1 %5421  ;;  %5848 = vrot.lane.b32.xlu0 %v10388_v5, %s8374_s28 }
 0x7c8   : >> { %5471 = vmatprep.subr.bf16.mxu0 %v5422_v55  ;;  %v5445_v23 = vsel %vm948_vm11, %v5420_v6, %v5422_v55 }
 0x7c9   : >> { %5850 = vrot.lane.b32.xlu1 %v10394_v45, %s8374_s28  ;;  %5472 = vmatpush1.bf16.msra.mxu0 %v5445_v23 }
 0x7cb   : >> { %5852 = vrot.lane.b32.xlu0 %v10399_v35, %s8374_s28 }
 0x7cd   : >> { %5854 = vrot.lane.b32.xlu1 %v10405_v3, %s8374_s28  ;;  %v5424_v62 = vpop.permute.xlu0 %5423 }
 0x7cf   : >> { %v5426_v40 = vpop.permute.xlu1 %5425  ;;  %5856 = vrot.lane.b32.xlu0 %v10410_v31, %s8374_s28 }
 0x7d0   : >> { %5473 = vmatprep.subr.bf16.mxu0 %v5426_v40  ;;  %v5446_v11 = vsel %vm948_vm11, %v5424_v62, %v5426_v40  ;;  %v12037_v40 = vld [vmem:[#allocation15_spill] sm:$0xff] }
 0x7d1   : >> { %5858 = vrot.lane.b32.xlu1 %v10416_v33, %s8374_s28  ;;  %5474 = vmatpush1.bf16.msra.mxu0 %v5446_v11  ;;  %s7233_s28 = sadd.s32 %s7707_s27, %s7230_s25 }
 0x7d3   : >> { %5964 = vrot.lane.b32.xlu0 %v5927_v48, %s8376_s8  ;;  %v12039_v48 = vld [vmem:[#allocation16_spill] sm:$0xff] }
 0x7d5   : >> { %5966 = vrot.lane.b32.xlu1 %v5928_v34, %s8376_s8  ;;  %v5428_v47 = vpop.permute.xlu0 %5427 }
 0x7d7   : >> { %v5430_v58 = vpop.permute.xlu1 %5429  ;;  %5968 = vrot.lane.b32.xlu0 %v5929_v42, %s8376_s8 }
 0x7d8   : >> { %5475 = vmatprep.subr.bf16.mxu0 %v5430_v58  ;;  %v5447_v0 = vsel %vm948_vm11, %v5428_v47, %v5430_v58 }
 0x7d9   : >> { %5970 = vrot.lane.b32.xlu1 %v5930_v41, %s8376_s8  ;;  %5476 = vmatpush1.bf16.msra.mxu0 %v5447_v0  ;;  %v5432_v17 = vpop.permute.xlu0 %5431 }
 0x7db   : >> { %v5434_v1 = vpop.permute.xlu1 %5433  ;;  %5972 = vrot.lane.b32.xlu0 %v5931_v52, %s8376_s8 }
 0x7dc   : >> { %5477 = vmatprep.subr.bf16.mxu0 %v5434_v1  ;;  %v5448_v2 = vsel %vm948_vm11, %v5432_v17, %v5434_v1 }
 0x7dd   : >> { %5974 = vrot.lane.b32.xlu1 %v5932_v57, %s8376_s8  ;;  %5478 = vmatpush1.bf16.msra.mxu0 %v5448_v2  ;;  %v5436_v26 = vpop.permute.xlu0 %5435 }
 0x7df   : >> { %v5438_v14 = vpop.permute.xlu1 %5437  ;;  %5976 = vrot.lane.b32.xlu0 %v5933_v9, %s8376_s8 }
 0x7e0   : >> { %5479 = vmatprep.subr.bf16.mxu0 %v5438_v14  ;;  %v5449_v16 = vsel %vm948_vm11, %v5436_v26, %v5438_v14 }
 0x7e1   : >> { %5978 = vrot.lane.b32.xlu1 %v5934_v50, %s8376_s8  ;;  %5480 = vmatpush1.bf16.msra.mxu0 %v5449_v16  ;;  %v5440_v7 = vpop.permute.xlu0 %5439 }
 0x7e3   : >> { %5980 = vrot.lane.b32.xlu0 %v5935_v53, %s8376_s8  ;;  %v5442_v30 = vpop.permute.xlu1 %5441 }
 0x7e4   : >> { %5481 = vmatprep.subr.bf16.mxu0 %v5442_v30  ;;  %v5450_v61 = vsel %vm948_vm11, %v5440_v7, %v5442_v30  ;;  %vm12027_vm11 = vmmov %vm12020_vm6  ;;  %vm12029_vm6 = vcmp.ne.s16.totalorder %v12028_v15, 0 }
 0x7e5   : >> { %5982 = vrot.lane.b32.xlu1 %v5936_v38, %s8376_s8  ;;  %5482 = vmatpush1.bf16.msra.mxu0 %v5450_v61  ;;  %v10635_v24 = vpop.permute.xlu0 %5587  ;;  %v5938_v27 = vsel %vm12027_vm11, %v10394_v45, 0  ;;  %v5372_v19 = vsel %vm12029_vm6, %v10333_v18, 0  ;;  %vm12032_vm9 = vmmov %vm12029_vm6 }
 0x7e6   : >> { %7685 = vmatprep.subr.msk.bf16.mxu0 %vm12026_vm10, %v10339_v63  ;;  %v5374_v60 = vsel %vm12032_vm9, %v10344_v29, 0  ;;  %vm12034_vm10 = vmmov %vm12022_vm8 }
 0x7e7   : >> { %5984 = vrot.lane.b32.xlu0 %v5937_v59, %s8376_s8  ;;  %v10644_v22 = vpop.permute.xlu1 %5589  ;;  %v5942_v55 = vsel %vm12034_vm10, %v10416_v33, 0  ;;  %vm12035_vm11 = vmmov %vm12029_vm6  ;;  %vm12038_vm6 = vcmp.ne.s16.totalorder %v12037_v40, 0 }
 0x7e8   : >> { %5500 = vmatmul.mubr.bf16.vlgmr.msra.gmra.mrb[84].mxu0 %v5392_v37  ;;  %v5376_v23 = vsel %vm12035_vm11, %v10355_v51, 0  ;;  %v6064_v11 = vsel %vm12038_vm6, %v10333_v18, 0  ;;  %vm12041_vm8 = vmmov %vm12032_vm9  ;;  %v6068_v52 = vsel %vm12038_vm6, %v10355_v51, 0  ;;  %v6072_v7 = vsel %vm12038_vm6, %v10377_v10, 0 }
 0x7e9   : >> { %5986 = vrot.lane.b32.xlu1 %v5938_v27, %s8376_s8  ;;  %5509 = vmatpush1.bf16.msra.mxu0 %v5372_v19  ;;  %v10653_v32 = vpop.permute.xlu0 %5591  ;;  %v5378_v34 = vsel %vm12041_vm8, %v10366_v21, 0  ;;  %vm12042_vm9 = vmmov %vm12033_vm13  ;;  %v5382_v2 = vsel %vm12041_vm8, %v10388_v5, 0  ;;  %v5386_v38 = vsel %vm12041_vm8, %v10410_v31, 0  ;;  %v5619_v27 = vsel %vm1398_vm4, %v10635_v24, %v10644_v22 }
 0x7ea   : >> { %7686 = vmatprep.subr.msk.bf16.mxu0 %vm12030_vm7, %v10350_v43  ;;  %5540 = vmatprep.mubr.bf16.mxu0 %v12031_v39  ;;  %vm12040_vm7 = vcmp.ne.s16.totalorder %v12039_v48, 0  ;;  %vm12045_vm11 = vmmov %vm12041_vm8 }
 0x7eb   : >> { %5988 = vrot.lane.b32.xlu0 %v5939_v49, %s8376_s8  ;;  %v10663_v8 = vpop.permute.xlu1 %5593  ;;  %v6065_v12 = vsel %vm12040_vm7, %v10339_v63, 0  ;;  %vm12044_vm10 = vmmov %vm12040_vm7  ;;  %v5380_v0 = vsel %vm12045_vm11, %v10377_v10, 0  ;;  %v6069_v57 = vsel %vm12040_vm7, %v10361_v56, 0  ;;  %v6073_v30 = vsel %vm12040_vm7, %v10383_v54, 0 }
 0x7ec   : >> { %v6067_v41 = vsel %vm12044_vm10, %v10350_v43, 0  ;;  %vm12048_vm10 = vmmov %vm12040_vm7 }
 0x7ed   : >> { %5990 = vrot.lane.b32.xlu1 %v5940_v20, %s8376_s8  ;;  %5511 = vmatpush1.bf16.msra.mxu0 %v5374_v60  ;;  %v10672_v46 = vpop.permute.xlu0 %5595  ;;  %v6071_v50 = vsel %vm12048_vm10, %v10372_v36, 0  ;;  %vm12049_vm11 = vmmov %vm12041_vm8 }
 0x7ee   : >> { %7687 = vmatprep.subr.msk.bf16.mxu0 %vm12033_vm13, %v10361_v56  ;;  %vm12043_vm13 = vmmov %vm12038_vm6  ;;  %v5384_v16 = vsel %vm12049_vm11, %v10399_v35, 0 }
 0x7ef   : >> { %5992 = vrot.lane.b32.xlu0 %v5941_v28, %s8376_s8  ;;  %v10681_v6 = vpop.permute.xlu1 %5597  ;;  %v6066_v42 = vsel %vm12043_vm13, %v10344_v29, 0  ;;  %vm12047_vm13 = vmmov %vm12038_vm6 }
 0x7f0   : >> { %v6070_v9 = vsel %vm12047_vm13, %v10366_v21, 0  ;;  %vm12052_vm13 = vmmov %vm12040_vm7 }
 0x7f1   : >> { %5994 = vrot.lane.b32.xlu1 %v5942_v55, %s8376_s8  ;;  %5513 = vmatpush1.bf16.msra.mxu0 %v5376_v23  ;;  %v10690_v62 = vpop.permute.xlu0 %5599  ;;  %v6075_v59 = vsel %vm12052_vm13, %v10394_v45, 0  ;;  %vm12053_vm10 = vmmov %vm12038_vm6  ;;  %s7234_s8 = scalar_lea.vmem %s8450_s9, %s7233_s28 }
 0x7f2   : >> { %7688 = vmatprep.subr.msk.bf16.mxu0 %vm12036_vm14, %v10372_v36  ;;  %vm12046_vm14 = vmmov %vm12042_vm9  ;;  %v6076_v19 = vsel %vm12053_vm10, %v10399_v35, 0 }
 0x7f3   : >> { %6101 = vrot.lane.b32.xlu0 %v6064_v11, %s8378_s30  ;;  %v10699_v44 = vpop.permute.xlu1 %5601  ;;  %vm12054_vm11 = vmmov %vm12040_vm7 }
 0x7f4   : >> { %v6077_v24 = vsel %vm12054_vm11, %v10405_v3, 0  ;;  %v5622_v23 = vsel %vm1398_vm4, %v10690_v62, %v10699_v44 }
 0x7f5   : >> { %6103 = vrot.lane.b32.xlu1 %v6065_v12, %s8378_s30  ;;  %5515 = vmatpush1.bf16.msra.mxu0 %v5378_v34  ;;  %v10708_v47 = vpop.permute.xlu0 %5603 }
 0x7f6   : >> { %7689 = vmatprep.subr.msk.bf16.mxu0 %vm12042_vm9, %v10383_v54 }
 0x7f7   : >> { %6105 = vrot.lane.b32.xlu0 %v6066_v42, %s8378_s30  ;;  %v10717_v58 = vpop.permute.xlu1 %5605 }
 0x7f8   : >> { %v5623_v40 = vsel %vm1398_vm4, %v10708_v47, %v10717_v58  ;;  %v10879_v47 = vld [vmem:[%s11893_s5] ss:$0 sps:$4 sm:$0x22]  }
 0x7f9   : >> { %6107 = vrot.lane.b32.xlu1 %v6067_v41, %s8378_s30  ;;  %5517 = vmatpush1.bf16.msra.mxu0 %v5380_v0  ;;  %v10726_v17 = vpop.permute.xlu0 %5607  ;;  %v5569_v0 = vrot.slane %v10879_v47, 1 }
 0x7fa   : >> { %7690 = vmatprep.subr.msk.bf16.mxu0 %vm12046_vm14, %v10394_v45  ;;  %vm12050_vm14 = vmmov %vm12042_vm9 }
 0x7fb   : >> { %6109 = vrot.lane.b32.xlu0 %v6068_v52, %s8378_s30  ;;  %v10735_v1 = vpop.permute.xlu1 %5609 }
 0x7fd   : >> { %6111 = vrot.lane.b32.xlu1 %v6069_v57, %s8378_s30  ;;  %5519 = vmatpush1.bf16.msra.mxu0 %v5382_v2  ;;  %v10744_v26 = vpop.permute.xlu0 %5611 }
 0x7fe   : >> { %7691 = vmatprep.subr.msk.bf16.mxu0 %vm12042_vm9, %v10405_v3  ;;  %vm12051_vm9 = vmmov %vm12038_vm6 }
 0x7ff   : >> { %6113 = vrot.lane.b32.xlu0 %v6070_v9, %s8378_s30  ;;  %v10753_v14 = vpop.permute.xlu1 %5613  ;;  %v6074_v37 = vsel %vm12051_vm9, %v10388_v5, 0 }
 0x800   : >> { %v5625_v34 = vsel %vm1398_vm4, %v10744_v26, %v10753_v14 }
 0x801   : >> { %6115 = vrot.lane.b32.xlu1 %v6071_v50, %s8378_s30  ;;  %5521 = vmatpush1.bf16.msra.mxu0 %v5384_v16  ;;  %v10762_v25 = vpop.permute.xlu0 %5615 }
 0x802   : >> { %7692 = vmatprep.subr.msk.bf16.mxu0 %vm12050_vm14, %v10416_v33  ;;  %vm12055_vm14 = vmmov %vm12038_vm6 }
 0x803   : >> { %6117 = vrot.lane.b32.xlu0 %v6072_v7, %s8378_s30  ;;  %v10771_v53 = vpop.permute.xlu1 %5617  ;;  %v6078_v20 = vsel %vm12055_vm14, %v10410_v31, 0  ;;  %vm12056_vm6 = vmmov %vm12040_vm7  ;;  %vm12057_vm7 = vcmask 916480  }
 0x804   : >> { %v6079_v28 = vsel %vm12056_vm6, %v10416_v33, 0  ;;  %v5626_v41 = vsel %vm1398_vm4, %v10762_v25, %v10771_v53  ;;  %v12060_v25 = vld [vmem:[#allocation17_spill] sm:$0xff] }
 0x805   : >> { %6119 = vrot.lane.b32.xlu1 %v6073_v30, %s8378_s30  ;;  %5523 = vmatpush1.bf16.msra.mxu0 %v5386_v38  ;;  %v10780_v61 = vpop.permute.xlu0 %5723  ;;  %vm12061_vm9 = vcmp.ne.s16.totalorder %v12060_v25, 0  ;;  %v12062_v30 = vld [vmem:[#allocation18_spill] sm:$0xff]  ;;  %v12083_v25 = vld [vmem:[#allocation19_spill] sm:$0xff] }
 0x806   : >> { %5643 = vmatprep.subr.bf16.mxu0 %v10644_v22  ;;  %v5620_v22 = vsel %vm1398_vm4, %v10653_v32, %v10663_v8  ;;  %v5621_v32 = vsel %vm1398_vm4, %v10672_v46, %v10681_v6  ;;  %v6305_v7 = vsel %vm12061_vm9, %v10333_v18, 0  ;;  %vm12063_vm13 = vcmp.ne.s16.totalorder %v12062_v30, 0  ;;  %vm12065_vm11 = vmmov %vm12061_vm9  ;;  %v12085_v30 = vld [vmem:[#allocation20_spill] sm:$0xff] }
 0x807   : >> { %6121 = vrot.lane.b32.xlu0 %v6074_v37, %s8378_s30  ;;  %v10787_v13 = vpop.permute.xlu1 %5725  ;;  %v6306_v38 = vsel %vm12063_vm13, %v10339_v63, 0  ;;  %vm12066_vm14 = vmmov %vm12063_vm13 }
 0x808   : >> { %5541 = vmatmul.mubr.bf16.vlgmr.msra.gmra.mrb[88].mxu0 %v10613_v4 }
 0x809   : >> { %6123 = vrot.lane.b32.xlu1 %v6075_v59, %s8378_s30  ;;  %5644 = vmatpush1.bf16.msra.mxu0 %v5619_v27  ;;  %v10797_v15 = vpop.permute.xlu0 %5727  ;;  %v6308_v27 = vsel %vm12066_vm14, %v10350_v43, 0 }
 0x80a   : >> { %5645 = vmatprep.subr.bf16.mxu0 %v10663_v8  ;;  %5675 = vmatprep.mubr.bf16.mxu0 %v12031_v39 }
 0x80b   : >> { %6125 = vrot.lane.b32.xlu0 %v6076_v19, %s8378_s30  ;;  %v10805_v4 = vpop.permute.xlu1 %5729 }
 0x80d   : >> { %6127 = vrot.lane.b32.xlu1 %v6077_v24, %s8378_s30  ;;  %5646 = vmatpush1.bf16.msra.mxu0 %v5620_v22  ;;  %v10814_v49 = vpop.permute.xlu0 %5731 }
 0x80e   : >> { %5647 = vmatprep.subr.bf16.mxu0 %v10681_v6 }
 0x80f   : >> { %6129 = vrot.lane.b32.xlu0 %v6078_v20, %s8378_s30  ;;  %v10821_v60 = vpop.permute.xlu1 %5733 }
 0x811   : >> { %6131 = vrot.lane.b32.xlu1 %v6079_v28, %s8378_s30  ;;  %5648 = vmatpush1.bf16.msra.mxu0 %v5621_v32  ;;  %v10830_v8 = vpop.permute.xlu0 %5735 }
 0x812   : >> { %5649 = vmatprep.subr.bf16.mxu0 %v10699_v44  ;;  %v5624_v44 = vsel %vm1398_vm4, %v10726_v17, %v10735_v1  ;;  %vm12058_vm4 = vmmov %vm12057_vm7 }
 0x813   : >> { %6205 = vrot.lane.b32.xlu0 %v10333_v18, %s8379_s14  ;;  %v10835_v55 = vpop.permute.xlu1 %5737  ;;  %v5756_v26 = vsel %vm12058_vm4, %v10797_v15, %v10805_v4  ;;  %vm12059_vm8 = vmmov %vm12058_vm4 }
 0x814   : >> { %v5757_v50 = vsel %vm12059_vm8, %v10814_v49, %v10821_v60  ;;  %vm12064_vm10 = vmmov %vm12058_vm4 }
 0x815   : >> { %6207 = vrot.lane.b32.xlu1 %v10339_v63, %s8379_s14  ;;  %5650 = vmatpush1.bf16.msra.mxu0 %v5622_v23  ;;  %v10842_v46 = vpop.permute.xlu0 %5739  ;;  %vm12067_vm6 = vmmov %vm12058_vm4 }
 0x816   : >> { %5651 = vmatprep.subr.bf16.mxu0 %v10717_v58  ;;  %vm12069_vm4 = vmmov %vm12063_vm13 }
 0x817   : >> { %v10845_v6 = vpop.permute.xlu1 %5741  ;;  %6209 = vrot.lane.b32.xlu0 %v10344_v29, %s8379_s14  ;;  %v6310_v22 = vsel %vm12069_vm4, %v10361_v56, 0  ;;  %vm12070_vm8 = vmmov %vm12067_vm6 }
 0x818   : >> { %v5759_v15 = vsel %vm12067_vm6, %v10842_v46, %v10845_v6  ;;  %vm12072_vm13 = vmmov %vm12069_vm4 }
 0x819   : >> { %6211 = vrot.lane.b32.xlu1 %v10350_v43, %s8379_s14  ;;  %5652 = vmatpush1.bf16.msra.mxu0 %v5623_v40  ;;  %v10854_v62 = vpop.permute.xlu0 %5743  ;;  %v6312_v32 = vsel %vm12072_vm13, %v10372_v36, 0  ;;  %vm12075_vm14 = vmmov %vm12069_vm4 }
 0x81a   : >> { %5653 = vmatprep.subr.bf16.mxu0 %v10735_v1  ;;  %v5755_v1 = vsel %vm12057_vm7, %v10780_v61, %v10787_v13  ;;  %v5758_v61 = vsel %vm12064_vm10, %v10830_v8, %v10835_v55  ;;  %vm12068_vm7 = vmmov %vm12061_vm9  ;;  %v6314_v40 = vsel %vm12075_vm14, %v10383_v54, 0 }
 0x81b   : >> { %v10857_v11 = vpop.permute.xlu1 %5745  ;;  %6213 = vrot.lane.b32.xlu0 %v10355_v51, %s8379_s14  ;;  %vm12071_vm9 = vmmov %vm12068_vm7 }
 0x81c   : >> { %v5760_v49 = vsel %vm12070_vm8, %v10854_v62, %v10857_v11  ;;  %vm12073_vm10 = vmmov %vm12067_vm6  ;;  %vm12076_vm8 = vcmask 908288  }
 0x81d   : >> { %6215 = vrot.lane.b32.xlu1 %v10361_v56, %s8379_s14  ;;  %5654 = vmatpush1.bf16.msra.mxu0 %v5624_v44  ;;  %v10866_v48 = vpop.permute.xlu0 %5747  ;;  %vm12078_vm13 = vmmov %vm12069_vm4 }
 0x81e   : >> { %5655 = vmatprep.subr.bf16.mxu0 %v10753_v14  ;;  %vm12081_vm14 = vmmov %vm12069_vm4 }
 0x81f   : >> { %v10869_v12 = vpop.permute.xlu1 %5749  ;;  %6217 = vrot.lane.b32.xlu0 %v10366_v21, %s8379_s14 }
 0x820   : >> { %v5761_v8 = vsel %vm12073_vm10, %v10866_v48, %v10869_v12  ;;  %v6315_v48 = vsel %vm12068_vm7, %v10388_v5, 0  ;;  %vm12079_vm10 = vmmov %vm12076_vm8 }
 0x821   : >> { %6219 = vrot.lane.b32.xlu1 %v10372_v36, %s8379_s14  ;;  %5656 = vmatpush1.bf16.msra.mxu0 %v5625_v34  ;;  %v10883_v42 = vpop.permute.xlu0 %5751  ;;  %v6316_v34 = vsel %vm12069_vm4, %v10394_v45, 0  ;;  %vm12086_vm4 = vcmp.ne.s16.totalorder %v12085_v30, 0 }
 0x822   : >> { %5657 = vmatprep.subr.bf16.mxu0 %v10771_v53 }
 0x823   : >> { %v10886_v58 = vpop.permute.xlu1 %5753  ;;  %6221 = vrot.lane.b32.xlu0 %v10377_v10, %s8379_s14 }
 0x824   : >> { %v5762_v62 = vsel %vm12067_vm6, %v10883_v42, %v10886_v58  ;;  %vm12082_vm6 = vmmov %vm12076_vm8 }
 0x825   : >> { %6223 = vrot.lane.b32.xlu1 %v10383_v54, %s8379_s14  ;;  %5658 = vmatpush1.bf16.msra.mxu0 %v5626_v41  ;;  %v10896_v17 = vpop.permute.xlu0 %5828 }
 0x826   : >> { %5779 = vmatprep.subr.bf16.mxu0 %v10787_v13  ;;  %v6307_v13 = vsel %vm12065_vm11, %v10344_v29, 0  ;;  %vm12074_vm11 = vmmov %vm12068_vm7 }
 0x827   : >> { %v10899_v52 = vpop.permute.xlu1 %5830  ;;  %6225 = vrot.lane.b32.xlu0 %v10388_v5, %s8379_s14  ;;  %v6313_v46 = vsel %vm12074_vm11, %v10377_v10, 0  ;;  %vm12080_vm11 = vmmov %vm12068_vm7 }
 0x828   : >> { %5676 = vmatmul.mubr.bf16.vlgmr.msra.gmra.mrb[92].mxu0 %v5569_v0  ;;  %v6318_v0 = vsel %vm12078_vm13, %v10405_v3, 0  ;;  %vm12089_vm13 = vmmov %vm12086_vm4 }
 0x829   : >> { %6227 = vrot.lane.b32.xlu1 %v10394_v45, %s8379_s14  ;;  %5780 = vmatpush1.bf16.msra.mxu0 %v5755_v1  ;;  %v10908_v57 = vpop.permute.xlu0 %5832  ;;  %v6319_v1 = vsel %vm12080_vm11, %v10410_v31, 0 }
 0x82a   : >> { %5781 = vmatprep.subr.bf16.mxu0 %v10805_v4  ;;  %5811 = vmatprep.mubr.bf16.mxu0 %v12031_v39  ;;  %v6309_v4 = vsel %vm12068_vm7, %v10355_v51, 0 }
 0x82b   : >> { %v10912_v2 = vpop.permute.xlu1 %5834  ;;  %6229 = vrot.lane.b32.xlu0 %v10399_v35, %s8379_s14 }
 0x82d   : >> { %6231 = vrot.lane.b32.xlu1 %v10405_v3, %s8379_s14  ;;  %5782 = vmatpush1.bf16.msra.mxu0 %v5756_v26  ;;  %v10921_v9 = vpop.permute.xlu0 %5836 }
 0x82e   : >> { %5783 = vmatprep.subr.bf16.mxu0 %v10821_v60  ;;  %v6311_v60 = vsel %vm12071_vm9, %v10366_v21, 0  ;;  %vm12077_vm9 = vmmov %vm12068_vm7  ;;  %vm12084_vm7 = vcmp.ne.s16.totalorder %v12083_v25, 0 }
 0x82f   : >> { %v10924_v14 = vpop.permute.xlu1 %5838  ;;  %6233 = vrot.lane.b32.xlu0 %v10410_v31, %s8379_s14  ;;  %vm12091_vm11 = vmmov %vm12084_vm7 }
 0x831   : >> { %6235 = vrot.lane.b32.xlu1 %v10416_v33, %s8379_s14  ;;  %5784 = vmatpush1.bf16.msra.mxu0 %v5757_v50  ;;  %v10933_v16 = vpop.permute.xlu0 %5840  ;;  %v6320_v50 = vsel %vm12081_vm14, %v10416_v33, 0  ;;  %vm12092_vm14 = vmmov %vm12086_vm4 }
 0x832   : >> { %5785 = vmatprep.subr.bf16.mxu0 %v10835_v55  ;;  %v5703_v55 = vshrl.u32 %v10879_v47, 16  ;;  %v5860_v47 = vsel %vm12076_vm8, %v10896_v17, %v10899_v52  ;;  %v5861_v17 = vsel %vm12079_vm10, %v10908_v57, %v10912_v2  ;;  %v5862_v57 = vsel %vm12082_vm6, %v10921_v9, %v10924_v14  ;;  %vm12087_vm8 = vmmov %vm12082_vm6 }
 0x833   : >> { %v10939_v53 = vpop.permute.xlu1 %5842  ;;  %6337 = vrot.lane.b32.xlu0 %v6305_v7, %s8381_s18  ;;  %v6436_v7 = vsel %vm12084_vm7, %v10333_v18, 0  ;;  %vm12090_vm10 = vmmov %vm12082_vm6 }
 0x834   : >> { %v5863_v9 = vsel %vm12087_vm8, %v10933_v16, %v10939_v53  ;;  %vm12093_vm8 = vmmov %vm12082_vm6 }
 0x835   : >> { %6339 = vrot.lane.b32.xlu1 %v6306_v38, %s8381_s18  ;;  %5786 = vmatpush1.bf16.msra.mxu0 %v5758_v61  ;;  %v10949_v37 = vpop.permute.xlu0 %5844  ;;  %v6437_v61 = vsel %vm12086_vm4, %v10339_v63, 0 }
 0x836   : >> { %5787 = vmatprep.subr.bf16.mxu0 %v10845_v6 }
 0x837   : >> { %v10955_v59 = vpop.permute.xlu1 %5846  ;;  %6341 = vrot.lane.b32.xlu0 %v6307_v13, %s8381_s18 }
 0x838   : >> { %v5864_v16 = vsel %vm12090_vm10, %v10949_v37, %v10955_v59  ;;  %vm12096_vm10 = vmmov %vm12082_vm6 }
 0x839   : >> { %6343 = vrot.lane.b32.xlu1 %v6308_v27, %s8381_s18  ;;  %5788 = vmatpush1.bf16.msra.mxu0 %v5759_v15  ;;  %v10965_v19 = vpop.permute.xlu0 %5848  ;;  %v6439_v15 = vsel %vm12089_vm13, %v10350_v43, 0  ;;  %vm12095_vm13 = vmmov %vm12086_vm4 }
 0x83a   : >> { %5789 = vmatprep.subr.bf16.mxu0 %v10857_v11  ;;  %v5705_v11 = vrot.slane %v5703_v55, 1 }
 0x83b   : >> { %v10971_v24 = vpop.permute.xlu1 %5850  ;;  %6345 = vrot.lane.b32.xlu0 %v6309_v4, %s8381_s18  ;;  %v6440_v4 = vsel %vm12091_vm11, %v10355_v51, 0  ;;  %vm12097_vm11 = vmmov %vm12084_vm7 }
 0x83c   : >> { %v5865_v37 = vsel %vm12082_vm6, %v10965_v19, %v10971_v24  ;;  %vm12099_vm6 = vcmask 900096  }
 0x83d   : >> { %6347 = vrot.lane.b32.xlu1 %v6310_v22, %s8381_s18  ;;  %5790 = vmatpush1.bf16.msra.mxu0 %v5760_v49  ;;  %v10981_v20 = vpop.permute.xlu0 %5852  ;;  %v6441_v49 = vsel %vm12092_vm14, %v10361_v56, 0  ;;  %vm12098_vm14 = vmmov %vm12086_vm4 }
 0x83e   : >> { %5791 = vmatprep.subr.bf16.mxu0 %v10869_v12 }
 0x83f   : >> { %v10987_v28 = vpop.permute.xlu1 %5854  ;;  %6349 = vrot.lane.b32.xlu0 %v6311_v60, %s8381_s18  ;;  %v6442_v60 = vsel %vm12084_vm7, %v10366_v21, 0 }
 0x840   : >> { %v5866_v19 = vsel %vm12093_vm8, %v10981_v20, %v10987_v28  ;;  %v6445_v20 = vsel %vm12095_vm13, %v10383_v54, 0  ;;  %vm12100_vm8 = vmmov %vm12099_vm6 }
 0x841   : >> { %6351 = vrot.lane.b32.xlu1 %v6312_v32, %s8381_s18  ;;  %5792 = vmatpush1.bf16.msra.mxu0 %v5761_v8  ;;  %v10998_v23 = vpop.permute.xlu0 %5856  ;;  %v6443_v8 = vsel %vm12086_vm4, %v10372_v36, 0  ;;  %vm12102_vm13 = vmmov %vm12086_vm4 }
 0x842   : >> { %5793 = vmatprep.subr.bf16.mxu0 %v10886_v58  ;;  %v6317_v58 = vsel %vm12077_vm9, %v10399_v35, 0  ;;  %vm12088_vm9 = vmmov %vm12084_vm7 }
 0x843   : >> { %v11004_v6 = vpop.permute.xlu1 %5858  ;;  %6353 = vrot.lane.b32.xlu0 %v6313_v46, %s8381_s18  ;;  %v6438_v13 = vsel %vm12088_vm9, %v10344_v29, 0  ;;  %vm12094_vm9 = vmmov %vm12084_vm7 }
 0x844   : >> { %v6444_v46 = vsel %vm12094_vm9, %v10377_v10, 0  ;;  %vm12101_vm9 = vmmov %vm12084_vm7 }
 0x845   : >> { %6355 = vrot.lane.b32.xlu1 %v6314_v40, %s8381_s18  ;;  %5794 = vmatpush1.bf16.msra.mxu0 %v5762_v62  ;;  %v11014_v44 = vpop.permute.xlu0 %5964 }
 0x846   : >> { %5884 = vmatprep.subr.bf16.mxu0 %v10899_v52 }
 0x847   : >> { %v11020_v12 = vpop.permute.xlu1 %5966  ;;  %6357 = vrot.lane.b32.xlu0 %v6315_v48, %s8381_s18  ;;  %v6446_v48 = vsel %vm12097_vm11, %v10388_v5, 0  ;;  %vm12104_vm11 = vmmov %vm12099_vm6 }
 0x848   : >> { %5812 = vmatmul.mubr.bf16.vlgmr.msra.gmra.mrb[96].mxu0 %v5705_v11 }
 0x849   : >> { %6359 = vrot.lane.b32.xlu1 %v6316_v34, %s8381_s18  ;;  %5885 = vmatpush1.bf16.msra.mxu0 %v5860_v47  ;;  %v11030_v42 = vpop.permute.xlu0 %5968 }
 0x84a   : >> { %5886 = vmatprep.subr.bf16.mxu0 %v10912_v2  ;;  %5916 = vmatprep.mubr.bf16.mxu0 %v12031_v39 }
 0x84b   : >> { %v11037_v41 = vpop.permute.xlu1 %5970  ;;  %6361 = vrot.lane.b32.xlu0 %v6317_v58, %s8381_s18  ;;  %v6448_v58 = vsel %vm12084_vm7, %v10399_v35, 0  ;;  %vm12106_vm7 = vmmov %vm12099_vm6 }
 0x84d   : >> { %6363 = vrot.lane.b32.xlu1 %v6318_v0, %s8381_s18  ;;  %5887 = vmatpush1.bf16.msra.mxu0 %v5861_v17  ;;  %v11047_v52 = vpop.permute.xlu0 %5972 }
 0x84e   : >> { %5888 = vmatprep.subr.bf16.mxu0 %v10924_v14 }
 0x84f   : >> { %v11053_v26 = vpop.permute.xlu1 %5974  ;;  %6365 = vrot.lane.b32.xlu0 %v6319_v1, %s8381_s18  ;;  %v6450_v1 = vsel %vm12101_vm9, %v10410_v31, 0 }
 0x851   : >> { %6367 = vrot.lane.b32.xlu1 %v6320_v50, %s8381_s18  ;;  %5889 = vmatpush1.bf16.msra.mxu0 %v5862_v57  ;;  %v11063_v2 = vpop.permute.xlu0 %5976  ;;  %v6451_v57 = vsel %vm12102_vm13, %v10416_v33, 0 }
 0x852   : >> { %5890 = vmatprep.subr.bf16.mxu0 %v10939_v53 }
 0x853   : >> { %v11069_v38 = vpop.permute.xlu1 %5978  ;;  %6475 = vrot.lane.b32.xlu0 %v6436_v7, %s8383_s24 }
 0x854   : >> { %v5999_v7 = vsel %vm12104_vm11, %v11063_v2, %v11069_v38 }
 0x855   : >> { %6477 = vrot.lane.b32.xlu1 %v6437_v61, %s8383_s24  ;;  %5891 = vmatpush1.bf16.msra.mxu0 %v5863_v9  ;;  %v11079_v14 = vpop.permute.xlu0 %5980 }
 0x856   : >> { %5892 = vmatprep.subr.bf16.mxu0 %v10955_v59 }
 0x857   : >> { %v11085_v27 = vpop.permute.xlu1 %5982  ;;  %6479 = vrot.lane.b32.xlu0 %v6438_v13, %s8383_s24 }
 0x859   : >> { %6481 = vrot.lane.b32.xlu1 %v6439_v15, %s8383_s24  ;;  %5893 = vmatpush1.bf16.msra.mxu0 %v5864_v16  ;;  %v11095_v53 = vpop.permute.xlu0 %5984 }
 0x85a   : >> { %5894 = vmatprep.subr.bf16.mxu0 %v10971_v24  ;;  %v11129_v24 = vld [vmem:[%s11893_s5] ss:$0 sps:$4 sm:$0x44]  }
 0x85b   : >> { %v11101_v22 = vpop.permute.xlu1 %5986  ;;  %6483 = vrot.lane.b32.xlu0 %v6440_v4, %s8383_s24  ;;  %v5826_v62 = vrot.slane %v11129_v24, 2 }
 0x85c   : >> { %v6001_v61 = vsel %vm12099_vm6, %v11095_v53, %v11101_v22 }
 0x85d   : >> { %6485 = vrot.lane.b32.xlu1 %v6441_v49, %s8383_s24  ;;  %5895 = vmatpush1.bf16.msra.mxu0 %v5865_v37  ;;  %v11111_v59 = vpop.permute.xlu0 %5988 }
 0x85e   : >> { %5896 = vmatprep.subr.bf16.mxu0 %v10987_v28  ;;  %v5867_v28 = vsel %vm12096_vm10, %v10998_v23, %v11004_v6  ;;  %v6447_v23 = vsel %vm12098_vm14, %v10394_v45, 0  ;;  %vm12103_vm10 = vmmov %vm12099_vm6 }
 0x85f   : >> { %v11117_v32 = vpop.permute.xlu1 %5990  ;;  %6487 = vrot.lane.b32.xlu0 %v6442_v60, %s8383_s24  ;;  %vm12105_vm14 = vmmov %vm12099_vm6 }
 0x860   : >> { %v6000_v30 = vsel %vm12105_vm14, %v11079_v14, %v11085_v27  ;;  %v6002_v13 = vsel %vm12106_vm7, %v11111_v59, %v11117_v32 }
 0x861   : >> { %6489 = vrot.lane.b32.xlu1 %v6443_v8, %s8383_s24  ;;  %5897 = vmatpush1.bf16.msra.mxu0 %v5866_v19  ;;  %v11132_v55 = vpop.permute.xlu0 %5992 }
 0x862   : >> { %5898 = vmatprep.subr.bf16.mxu0 %v11004_v6  ;;  %v5996_v6 = vsel %vm12099_vm6, %v11014_v44, %v11020_v12  ;;  %v6449_v44 = vsel %vm12086_vm4, %v10405_v3, 0  ;;  %vm12107_vm4 = vmmov %vm12099_vm6 }
 0x863   : >> { %v11138_v40 = vpop.permute.xlu1 %5994  ;;  %6491 = vrot.lane.b32.xlu0 %v6444_v46, %s8383_s24  ;;  %v12111_v46 = vld [vmem:[#allocation21_spill] sm:$0xff] }
 0x864   : >> { %v6003_v53 = vsel %vm12107_vm4, %v11132_v55, %v11138_v40 }
 0x865   : >> { %6493 = vrot.lane.b32.xlu1 %v6445_v20, %s8383_s24  ;;  %5899 = vmatpush1.bf16.msra.mxu0 %v5867_v28  ;;  %v11149_v11 = vpop.permute.xlu0 %6101  ;;  %v12113_v28 = vld [vmem:[#allocation22_spill] sm:$0xff] }
 0x866   : >> { %6020 = vmatprep.subr.bf16.mxu0 %v11020_v12  ;;  %v5997_v12 = vsel %vm12100_vm8, %v11030_v42, %v11037_v41  ;;  %v5998_v42 = vsel %vm12103_vm10, %v11047_v52, %v11053_v26  ;;  %vm12108_vm8 = vcmask 785408   ;;  %vm12112_vm10 = vcmp.ne.s16.totalorder %v12111_v46, 0  ;;  %v12132_v46 = vld [vmem:[#allocation23_spill] sm:$0xff] }
 0x867   : >> { %v11155_v34 = vpop.permute.xlu1 %6103  ;;  %6495 = vrot.lane.b32.xlu0 %v6446_v48, %s8383_s24  ;;  %vm12109_vm9 = vmmov %vm12108_vm8  ;;  %vm12114_vm11 = vcmp.ne.s16.totalorder %v12113_v28, 0  ;;  %v12135_v28 = vld [vmem:[#allocation24_spill] sm:$0xff] }
 0x868   : >> { %5917 = vmatmul.mubr.bf16.vlgmr.msra.gmra.mrb[100].mxu0 %v5826_v62  ;;  %v6133_v37 = vsel %vm12108_vm8, %v11149_v11, %v11155_v34  ;;  %vm12110_vm13 = vmmov %vm12108_vm8  ;;  %v6680_v62 = vsel %vm12114_vm11, %v10339_v63, 0 }
 0x869   : >> { %6497 = vrot.lane.b32.xlu1 %v6447_v23, %s8383_s24  ;;  %6021 = vmatpush1.bf16.msra.mxu0 %v5996_v6  ;;  %v11165_v47 = vpop.permute.xlu0 %6105  ;;  %vm12115_vm14 = vmmov %vm12108_vm8 }
 0x86a   : >> { %6022 = vmatprep.subr.bf16.mxu0 %v11037_v41  ;;  %6052 = vmatprep.mubr.bf16.mxu0 %v12031_v39  ;;  %vm12116_vm6 = vmmov %vm12112_vm10 }
 0x86b   : >> { %v11172_v0 = vpop.permute.xlu1 %6107  ;;  %6499 = vrot.lane.b32.xlu0 %v6448_v58, %s8383_s24  ;;  %vm12117_vm7 = vmmov %vm12114_vm11 }
 0x86c   : >> { %v6682_v6 = vsel %vm12117_vm7, %v10350_v43, 0  ;;  %vm12118_vm4 = vmmov %vm12108_vm8 }
 0x86d   : >> { %6501 = vrot.lane.b32.xlu1 %v6449_v44, %s8383_s24  ;;  %6023 = vmatpush1.bf16.msra.mxu0 %v5997_v12  ;;  %v11182_v17 = vpop.permute.xlu0 %6109  ;;  %vm12119_vm8 = vmmov %vm12116_vm6 }
 0x86e   : >> { %6024 = vmatprep.subr.bf16.mxu0 %v11053_v26  ;;  %vm12123_vm11 = vmmov %vm12117_vm7 }
 0x86f   : >> { %v11188_v50 = vpop.permute.xlu1 %6111  ;;  %6503 = vrot.lane.b32.xlu0 %v6450_v1, %s8383_s24 }
 0x871   : >> { %6505 = vrot.lane.b32.xlu1 %v6451_v57, %s8383_s24  ;;  %6025 = vmatpush1.bf16.msra.mxu0 %v5998_v42  ;;  %v11198_v41 = vpop.permute.xlu0 %6113  ;;  %v6686_v42 = vsel %vm12123_vm11, %v10372_v36, 0  ;;  %vm12129_vm11 = vmmov %vm12117_vm7 }
 0x872   : >> { %6026 = vmatprep.subr.bf16.mxu0 %v11069_v38 }
 0x873   : >> { %v11201_v25 = vpop.permute.xlu1 %6115  ;;  %6580 = vrot.lane.b32.xlu0 %v10333_v18, %s8384_s10 }
 0x874   : >> { %v6136_v11 = vsel %vm12115_vm14, %v11198_v41, %v11201_v25  ;;  %vm12124_vm14 = vmmov %vm12118_vm4 }
 0x875   : >> { %6582 = vrot.lane.b32.xlu1 %v10339_v63, %s8384_s10  ;;  %6027 = vmatpush1.bf16.msra.mxu0 %v5999_v7  ;;  %v11210_v52 = vpop.permute.xlu0 %6117 }
 0x876   : >> { %6028 = vmatprep.subr.bf16.mxu0 %v11085_v27  ;;  %v5944_v27 = vshrl.u32 %v11129_v24, 16  ;;  %v6135_v24 = vsel %vm12110_vm13, %v11182_v17, %v11188_v50  ;;  %vm12121_vm13 = vmmov %vm12118_vm4 }
 0x877   : >> { %v11213_v26 = vpop.permute.xlu1 %6119  ;;  %6584 = vrot.lane.b32.xlu0 %v10344_v29, %s8384_s10 }
 0x878   : >> { %v5946_v4 = vrot.slane %v5944_v27, 2 }
 0x879   : >> { %6586 = vrot.lane.b32.xlu1 %v10350_v43, %s8384_s10  ;;  %6029 = vmatpush1.bf16.msra.mxu0 %v6000_v30  ;;  %v11222_v2 = vpop.permute.xlu0 %6121  ;;  %v6688_v30 = vsel %vm12117_vm7, %v10383_v54, 0 }
 0x87a   : >> { %6030 = vmatprep.subr.bf16.mxu0 %v11101_v22 }
 0x87b   : >> { %v11225_v38 = vpop.permute.xlu1 %6123  ;;  %6588 = vrot.lane.b32.xlu0 %v10355_v51, %s8384_s10 }
 0x87c   : >> { %v6138_v17 = vsel %vm12121_vm13, %v11222_v2, %v11225_v38  ;;  %vm12127_vm13 = vcmask 777216  }
 0x87d   : >> { %6590 = vrot.lane.b32.xlu1 %v10361_v56, %s8384_s10  ;;  %6031 = vmatpush1.bf16.msra.mxu0 %v6001_v61  ;;  %v11234_v9 = vpop.permute.xlu0 %6125 }
 0x87e   : >> { %6032 = vmatprep.subr.bf16.mxu0 %v11117_v32  ;;  %v6134_v32 = vsel %vm12109_vm9, %v11165_v47, %v11172_v0  ;;  %v6137_v47 = vsel %vm12118_vm4, %v11210_v52, %v11213_v26  ;;  %vm12120_vm9 = vmmov %vm12117_vm7  ;;  %v6687_v52 = vsel %vm12116_vm6, %v10377_v10, 0 }
 0x87f   : >> { %v11237_v14 = vpop.permute.xlu1 %6127  ;;  %6592 = vrot.lane.b32.xlu0 %v10366_v21, %s8384_s10  ;;  %v6684_v12 = vsel %vm12120_vm9, %v10361_v56, 0  ;;  %vm12126_vm9 = vmmov %vm12117_vm7 }
 0x880   : >> { %v6139_v41 = vsel %vm12124_vm14, %v11234_v9, %v11237_v14  ;;  %vm12130_vm14 = vmmov %vm12127_vm13 }
 0x881   : >> { %6594 = vrot.lane.b32.xlu1 %v10372_v36, %s8384_s10  ;;  %6033 = vmatpush1.bf16.msra.mxu0 %v6002_v13  ;;  %v11247_v15 = vpop.permute.xlu0 %6129  ;;  %v6690_v13 = vsel %vm12126_vm9, %v10394_v45, 0  ;;  %vm12136_vm9 = vcmp.ne.s16.totalorder %v12135_v28, 0 }
 0x882   : >> { %6034 = vmatprep.subr.bf16.mxu0 %v11138_v40  ;;  %v6679_v40 = vsel %vm12112_vm10, %v10333_v18, 0  ;;  %vm12122_vm10 = vmmov %vm12116_vm6 }
 0x883   : >> { %v11250_v16 = vpop.permute.xlu1 %6131  ;;  %6596 = vrot.lane.b32.xlu0 %v10377_v10, %s8384_s10 }
 0x884   : >> { %v6140_v2 = vsel %vm12118_vm4, %v11247_v15, %v11250_v16  ;;  %vm12131_vm4 = vmmov %vm12127_vm13 }
 0x885   : >> { %6598 = vrot.lane.b32.xlu1 %v10383_v54, %s8384_s10  ;;  %6035 = vmatpush1.bf16.msra.mxu0 %v6003_v53  ;;  %v11259_v22 = vpop.permute.xlu0 %6205 }
 0x886   : >> { %6157 = vmatprep.subr.bf16.mxu0 %v11155_v34  ;;  %v6681_v34 = vsel %vm12116_vm6, %v10344_v29, 0 }
 0x887   : >> { %v11262_v49 = vpop.permute.xlu1 %6207  ;;  %6600 = vrot.lane.b32.xlu0 %v10388_v5, %s8384_s10 }
 0x888   : >> { %6053 = vmatmul.mubr.bf16.vlgmr.msra.gmra.mrb[104].mxu0 %v5946_v4  ;;  %v6237_v27 = vsel %vm12127_vm13, %v11259_v22, %v11262_v49  ;;  %v6692_v4 = vsel %vm12129_vm11, %v10405_v3, 0  ;;  %vm12137_vm13 = vmmov %vm12131_vm4 }
 0x889   : >> { %6602 = vrot.lane.b32.xlu1 %v10394_v45, %s8384_s10  ;;  %6158 = vmatpush1.bf16.msra.mxu0 %v6133_v37  ;;  %v11271_v59 = vpop.permute.xlu0 %6209  ;;  %v6693_v37 = vsel %vm12116_vm6, %v10410_v31, 0  ;;  %vm12139_vm11 = vmmov %vm12136_vm9 }
 0x88a   : >> { %6159 = vmatprep.subr.bf16.mxu0 %v11172_v0  ;;  %6189 = vmatprep.mubr.bf16.mxu0 %v12031_v39  ;;  %v6683_v0 = vsel %vm12119_vm8, %v10355_v51, 0  ;;  %vm12125_vm8 = vmmov %vm12116_vm6 }
 0x88b   : >> { %v11275_v60 = vpop.permute.xlu1 %6211  ;;  %6604 = vrot.lane.b32.xlu0 %v10399_v35, %s8384_s10  ;;  %v6689_v9 = vsel %vm12125_vm8, %v10388_v5, 0  ;;  %vm12133_vm8 = vcmp.ne.s16.totalorder %v12132_v46, 0 }
 0x88c   : >> { %v6238_v22 = vsel %vm12130_vm14, %v11271_v59, %v11275_v60  ;;  %vm12140_vm14 = vmmov %vm12131_vm4 }
 0x88d   : >> { %6606 = vrot.lane.b32.xlu1 %v10405_v3, %s8384_s10  ;;  %6160 = vmatpush1.bf16.msra.mxu0 %v6134_v32  ;;  %v11284_v8 = vpop.permute.xlu0 %6213 }
 0x88e   : >> { %6161 = vmatprep.subr.bf16.mxu0 %v11188_v50  ;;  %v6685_v50 = vsel %vm12122_vm10, %v10366_v21, 0  ;;  %vm12128_vm10 = vmmov %vm12116_vm6 }
 0x88f   : >> { %v11287_v19 = vpop.permute.xlu1 %6215  ;;  %6608 = vrot.lane.b32.xlu0 %v10410_v31, %s8384_s10  ;;  %vm12141_vm6 = vmmov %vm12133_vm8 }
 0x890   : >> { %v6239_v59 = vsel %vm12131_vm4, %v11284_v8, %v11287_v19 }
 0x891   : >> { %6610 = vrot.lane.b32.xlu1 %v10416_v33, %s8384_s10  ;;  %6162 = vmatpush1.bf16.msra.mxu0 %v6135_v24  ;;  %v11296_v55 = vpop.permute.xlu0 %6217  ;;  %v6694_v24 = vsel %vm12117_vm7, %v10416_v33, 0  ;;  %s12134_s10 = smov 64   ;;  %vm12142_vm7 = vmmov %vm12136_vm9 }
 0x892   : >> { %6163 = vmatprep.subr.bf16.mxu0 %v11201_v25  ;;  %v11362_v25 = vld [vmem:[%s11893_s5] ss:$0 sps:$4 sm:$0x88]  }
 0x893   : >> { %v11302_v20 = vpop.permute.xlu1 %6219  ;;  %6716 = vrot.lane.b32.xlu0 %v6679_v40, %s8387_s22  ;;  %v6816_v40 = vsel %vm12133_vm8, %v10333_v18, 0 }
 0x894   : >> { %v6240_v8 = vsel %vm12137_vm13, %v11296_v55, %v11302_v20  ;;  %vm12145_vm13 = vmmov %vm12131_vm4 }
 0x895   : >> { %6718 = vrot.lane.b32.xlu1 %v6680_v62, %s8387_s22  ;;  %6164 = vmatpush1.bf16.msra.mxu0 %v6136_v11  ;;  %v11312_v48 = vpop.permute.xlu0 %6221  ;;  %v6817_v11 = vsel %vm12136_vm9, %v10339_v63, 0  ;;  %vm12144_vm9 = vmmov %vm12142_vm7 }
 0x896   : >> { %6165 = vmatprep.subr.bf16.mxu0 %v11213_v26 }
 0x897   : >> { %v11318_v23 = vpop.permute.xlu1 %6223  ;;  %6720 = vrot.lane.b32.xlu0 %v6681_v34, %s8387_s22 }
 0x898   : >> { %v6241_v55 = vsel %vm12140_vm14, %v11312_v48, %v11318_v23  ;;  %v6821_v48 = vsel %vm12142_vm7, %v10361_v56, 0  ;;  %vm12148_vm14 = vmmov %vm12131_vm4 }
 0x899   : >> { %6722 = vrot.lane.b32.xlu1 %v6682_v6, %s8387_s22  ;;  %6166 = vmatpush1.bf16.msra.mxu0 %v6137_v47  ;;  %v11328_v58 = vpop.permute.xlu0 %6225  ;;  %v6819_v47 = vsel %vm12139_vm11, %v10350_v43, 0  ;;  %vm12147_vm11 = vmmov %vm12142_vm7 }
 0x89a   : >> { %6167 = vmatprep.subr.bf16.mxu0 %v11225_v38  ;;  %v6083_v38 = vrot.slane %v11362_v25, 3 }
 0x89b   : >> { %v11334_v44 = vpop.permute.xlu1 %6227  ;;  %6724 = vrot.lane.b32.xlu0 %v6683_v0, %s8387_s22  ;;  %v6820_v0 = vsel %vm12141_vm6, %v10355_v51, 0 }
 0x89d   : >> { %6726 = vrot.lane.b32.xlu1 %v6684_v12, %s8387_s22  ;;  %6168 = vmatpush1.bf16.msra.mxu0 %v6138_v17  ;;  %v11344_v1 = vpop.permute.xlu0 %6229 }
 0x89e   : >> { %6169 = vmatprep.subr.bf16.mxu0 %v11237_v14 }
 0x89f   : >> { %v11350_v57 = vpop.permute.xlu1 %6231  ;;  %6728 = vrot.lane.b32.xlu0 %v6685_v50, %s8387_s22 }
 0x8a1   : >> { %6730 = vrot.lane.b32.xlu1 %v6686_v42, %s8387_s22  ;;  %6170 = vmatpush1.bf16.msra.mxu0 %v6139_v41  ;;  %v11365_v7 = vpop.permute.xlu0 %6233 }
 0x8a2   : >> { %6171 = vmatprep.subr.bf16.mxu0 %v11250_v16  ;;  %v6691_v16 = vsel %vm12128_vm10, %v10399_v35, 0  ;;  %vm12138_vm10 = vmmov %vm12133_vm8 }
 0x8a3   : >> { %v11371_v26 = vpop.permute.xlu1 %6235  ;;  %6732 = vrot.lane.b32.xlu0 %v6687_v52, %s8387_s22  ;;  %v6818_v34 = vsel %vm12138_vm10, %v10344_v29, 0  ;;  %vm12143_vm8 = vmmov %vm12141_vm6 }
 0x8a4   : >> { %v6822_v52 = vsel %vm12143_vm8, %v10366_v21, 0  ;;  %vm12146_vm10 = vmmov %vm12141_vm6 }
 0x8a5   : >> { %6734 = vrot.lane.b32.xlu1 %v6688_v30, %s8387_s22  ;;  %6172 = vmatpush1.bf16.msra.mxu0 %v6140_v2  ;;  %v11382_v61 = vpop.permute.xlu0 %6337  ;;  %vm12150_vm8 = vmmov %vm12141_vm6 }
 0x8a6   : >> { %6261 = vmatprep.subr.bf16.mxu0 %v11262_v49 }
 0x8a7   : >> { %v11388_v14 = vpop.permute.xlu1 %6339  ;;  %6736 = vrot.lane.b32.xlu0 %v6689_v9, %s8387_s22 }
 0x8a8   : >> { %6190 = vmatmul.mubr.bf16.vlgmr.msra.gmra.mrb[108].mxu0 %v6083_v38  ;;  %v6201_v38 = vshrl.u32 %v11362_v25, 16 }
 0x8a9   : >> { %6738 = vrot.lane.b32.xlu1 %v6690_v13, %s8387_s22  ;;  %6262 = vmatpush1.bf16.msra.mxu0 %v6237_v27  ;;  %v11398_v15 = vpop.permute.xlu0 %6341  ;;  %v6824_v13 = vsel %vm12146_vm10, %v10377_v10, 0  ;;  %vm12153_vm10 = vmmov %vm12141_vm6 }
 0x8aa   : >> { %6263 = vmatprep.subr.bf16.mxu0 %v11275_v60  ;;  %6293 = vmatprep.mubr.bf16.mxu0 %v12031_v39  ;;  %v6203_v25 = vrot.slane %v6201_v38, 3 }
 0x8ab   : >> { %v11405_v53 = vpop.permute.xlu1 %6343  ;;  %6740 = vrot.lane.b32.xlu0 %v6691_v16, %s8387_s22 }
 0x8ad   : >> { %6742 = vrot.lane.b32.xlu1 %v6692_v4, %s8387_s22  ;;  %6264 = vmatpush1.bf16.msra.mxu0 %v6238_v22  ;;  %v11415_v49 = vpop.permute.xlu0 %6345  ;;  %v6826_v4 = vsel %vm12141_vm6, %v10388_v5, 0 }
 0x8ae   : >> { %6265 = vmatprep.subr.bf16.mxu0 %v11287_v19 }
 0x8af   : >> { %v11421_v32 = vpop.permute.xlu1 %6347  ;;  %6744 = vrot.lane.b32.xlu0 %v6693_v37, %s8387_s22 }
 0x8b1   : >> { %6746 = vrot.lane.b32.xlu1 %v6694_v24, %s8387_s22  ;;  %6266 = vmatpush1.bf16.msra.mxu0 %v6239_v59  ;;  %v11431_v60 = vpop.permute.xlu0 %6349  ;;  %v6828_v24 = vsel %vm12150_vm8, %v10399_v35, 0 }
 0x8b2   : >> { %6267 = vmatprep.subr.bf16.mxu0 %v11302_v20 }
 0x8b3   : >> { %v11437_v62 = vpop.permute.xlu1 %6351  ;;  %6853 = vrot.lane.b32.xlu0 %v6816_v40, %s12134_s10 }
 0x8b5   : >> { %6855 = vrot.lane.b32.xlu1 %v6817_v11, %s12134_s10  ;;  %6268 = vmatpush1.bf16.msra.mxu0 %v6240_v8  ;;  %v11447_v19 = vpop.permute.xlu0 %6353  ;;  %v6830_v11 = vsel %vm12153_vm10, %v10410_v31, 0 }
 0x8b6   : >> { %6269 = vmatprep.subr.bf16.mxu0 %v11318_v23  ;;  %v6242_v23 = vsel %vm12131_vm4, %v11328_v58, %v11334_v44  ;;  %v6823_v58 = vsel %vm12144_vm9, %v10372_v36, 0  ;;  %vm12149_vm4 = vcmask 769024   ;;  %vm12151_vm9 = vmmov %vm12142_vm7 }
 0x8b7   : >> { %v11453_v6 = vpop.permute.xlu1 %6355  ;;  %6857 = vrot.lane.b32.xlu0 %v6818_v34, %s12134_s10  ;;  %vm12157_vm6 = vmmov %vm12149_vm4 }
 0x8b8   : >> { %v6372_v28 = vsel %vm12157_vm6, %v11431_v60, %v11437_v62  ;;  %vm12159_vm8 = vmmov %vm12149_vm4 }
 0x8b9   : >> { %6859 = vrot.lane.b32.xlu1 %v6819_v47, %s12134_s10  ;;  %6270 = vmatpush1.bf16.msra.mxu0 %v6241_v55  ;;  %v11463_v20 = vpop.permute.xlu0 %6357 }
 0x8ba   : >> { %6271 = vmatprep.subr.bf16.mxu0 %v11334_v44  ;;  %v6243_v44 = vsel %vm12145_vm13, %v11344_v1, %v11350_v57  ;;  %v6825_v1 = vsel %vm12147_vm11, %v10383_v54, 0  ;;  %vm12152_vm13 = vmmov %vm12149_vm4 }
 0x8bb   : >> { %v11469_v12 = vpop.permute.xlu1 %6359  ;;  %6861 = vrot.lane.b32.xlu0 %v6820_v0, %s12134_s10  ;;  %v11472_v17 = vpop.f32.mrb[84].mxu0  ;;  %vm12154_vm11 = vmmov %vm12142_vm7 }
 0x8bc   : >> { %v11480_v50 = vpop.f32.mrb[85].mxu0  ;;  %v6831_v34 = vsel %vm12154_vm11, %v10416_v33, 0 }
 0x8bd   : >> { %6863 = vrot.lane.b32.xlu1 %v6821_v48, %s12134_s10  ;;  %6272 = vmatpush1.bf16.msra.mxu0 %v6242_v23  ;;  %v11483_v42 = vpop.permute.xlu0 %6361  ;;  %v5505_v41 = vpop.f32.mrb[86].mxu0 }
 0x8be   : >> { %6273 = vmatprep.subr.bf16.mxu0 %v11350_v57  ;;  %v5506_v30 = vpop.f32.mrb[87].mxu0  ;;  %v6244_v57 = vsel %vm12148_vm14, %v11365_v7, %v11371_v26  ;;  %v6827_v7 = vsel %vm12142_vm7, %v10394_v45, 0  ;;  %vm12155_vm14 = vmmov %vm12149_vm4 }
 0x8bf   : >> { %v11489_v2 = vpop.permute.xlu1 %6363  ;;  %6865 = vrot.lane.b32.xlu0 %v6822_v52, %s12134_s10  ;;  %vm12158_vm7 = vmmov %vm12149_vm4 }
 0x8c0   : >> { %v6373_v47 = vsel %vm12158_vm7, %v11447_v19, %v11453_v6  ;;  %v6374_v19 = vsel %vm12149_vm4, %v11463_v20, %v11469_v12  ;;  %v6375_v20 = vsel %vm12159_vm8, %v11483_v42, %v11489_v2 }
 0x8c1   : >> { %6867 = vrot.lane.b32.xlu1 %v6823_v58, %s12134_s10  ;;  %6274 = vmatpush1.bf16.msra.mxu0 %v6243_v44  ;;  %v11500_v9 = vpop.permute.xlu0 %6365 }
 0x8c2   : >> { %6275 = vmatprep.subr.bf16.mxu0 %v11371_v26  ;;  %v6369_v26 = vsel %vm12149_vm4, %v11382_v61, %v11388_v14  ;;  %v6829_v61 = vsel %vm12151_vm9, %v10405_v3, 0  ;;  %vm12160_vm9 = vmmov %vm12149_vm4 }
 0x8c3   : >> { %v11506_v27 = vpop.permute.xlu1 %6367  ;;  %6869 = vrot.lane.b32.xlu0 %v6824_v13, %s12134_s10 }
 0x8c4   : >> { %v6376_v30 = vsel %vm12160_vm9, %v11500_v9, %v11506_v27  ;;  %vm12172_vm9 = vcmask 646144  }
 0x8c5   : >> { %6871 = vrot.lane.b32.xlu1 %v6825_v1, %s12134_s10  ;;  %6276 = vmatpush1.bf16.msra.mxu0 %v6244_v57  ;;  %v11516_v16 = vpop.permute.xlu0 %6475 }
 0x8c6   : >> { %6393 = vmatprep.subr.bf16.mxu0 %v11388_v14  ;;  %v6370_v14 = vsel %vm12152_vm13, %v11398_v15, %v11405_v53  ;;  %v6371_v15 = vsel %vm12155_vm14, %v11415_v49, %v11421_v32  ;;  %vm12161_vm13 = vcmask 654336  }
 0x8c7   : >> { %v11522_v22 = vpop.permute.xlu1 %6477  ;;  %6873 = vrot.lane.b32.xlu0 %v6826_v4, %s12134_s10  ;;  %vm12162_vm10 = vmmov %vm12161_vm13  ;;  %v7057_v4 = vsel %vm4807_vm12, %v10333_v18, 0 }
 0x8c8   : >> { %6294 = vmatmul.mubr.bf16.vlgmr.msra.gmra.mrb[112].mxu0 %v6203_v25  ;;  %v6507_v44 = vsel %vm12161_vm13, %v11516_v16, %v11522_v22  ;;  %vm12163_vm11 = vmmov %vm12162_vm10 }
 0x8c9   : >> { %6875 = vrot.lane.b32.xlu1 %v6827_v7, %s12134_s10  ;;  %6394 = vmatpush1.bf16.msra.mxu0 %v6369_v26  ;;  %v11532_v37 = vpop.permute.xlu0 %6479  ;;  %vm12166_vm14 = vmmov %vm12162_vm10 }
 0x8ca   : >> { %6395 = vmatprep.subr.bf16.mxu0 %v11405_v53  ;;  %6425 = vmatprep.mubr.bf16.mxu0 %v12031_v39  ;;  %vm12168_vm6 = vmmov %vm12162_vm10 }
 0x8cb   : >> { %v11539_v59 = vpop.permute.xlu1 %6481  ;;  %6877 = vrot.lane.b32.xlu0 %v6828_v24, %s12134_s10  ;;  %vm12169_vm7 = vmmov %vm12168_vm6 }
 0x8cc   : >> { %v6508_v13 = vsel %vm12162_vm10, %v11532_v37, %v11539_v59  ;;  %v7058_v37 = vsel %vm4808_vm15, %v10339_v63, 0  ;;  %vm12170_vm4 = vmmov %vm12168_vm6 }
 0x8cd   : >> { %6879 = vrot.lane.b32.xlu1 %v6829_v61, %s12134_s10  ;;  %6396 = vmatpush1.bf16.msra.mxu0 %v6370_v14  ;;  %v11549_v40 = vpop.permute.xlu0 %6483  ;;  %vm12171_vm8 = vmmov %vm12170_vm4 }
 0x8ce   : >> { %6397 = vmatprep.subr.bf16.mxu0 %v11421_v32  ;;  %vm12173_vm13 = vmmov %vm12172_vm9 }
 0x8cf   : >> { %v11555_v8 = vpop.permute.xlu1 %6485  ;;  %6881 = vrot.lane.b32.xlu0 %v6830_v11, %s12134_s10  ;;  %vm12174_vm10 = vmmov %vm12172_vm9 }
 0x8d0   : >> { %v6509_v57 = vsel %vm12163_vm11, %v11549_v40, %v11555_v8  ;;  %vm12177_vm11 = vmmov %vm12172_vm9 }
 0x8d1   : >> { %6883 = vrot.lane.b32.xlu1 %v6831_v34, %s12134_s10  ;;  %6398 = vmatpush1.bf16.msra.mxu0 %v6371_v15  ;;  %v11565_v53 = vpop.permute.xlu0 %6487  ;;  %v7062_v15 = vsel %vm4808_vm15, %v10361_v56, 0 }
 0x8d2   : >> { %6399 = vmatprep.subr.bf16.mxu0 %v11437_v62 }
 0x8d3   : >> { %v11568_v46 = vpop.permute.xlu1 %6489  ;;  %6957 = vrot.lane.b32.xlu0 %v10333_v18, %s12156_s6  ;;  %v7059_v18 = vsel %vm4807_vm12, %v10344_v29, 0 }
 0x8d4   : >> { %v6510_v7 = vsel %vm12166_vm14, %v11565_v53, %v11568_v46  ;;  %vm12178_vm14 = vmmov %vm12172_vm9 }
 0x8d5   : >> { %6959 = vrot.lane.b32.xlu1 %v10339_v63, %s12156_s6  ;;  %6400 = vmatpush1.bf16.msra.mxu0 %v6372_v28  ;;  %v11577_v49 = vpop.permute.xlu0 %6491  ;;  %v7060_v63 = vsel %vm4808_vm15, %v10350_v43, 0  ;;  %v7063_v28 = vsel %vm4807_vm12, %v10366_v21, 0 }
 0x8d6   : >> { %6401 = vmatprep.subr.bf16.mxu0 %v11453_v6 }
 0x8d7   : >> { %v11580_v32 = vpop.permute.xlu1 %6493  ;;  %6961 = vrot.lane.b32.xlu0 %v10344_v29, %s12156_s6  ;;  %v7061_v29 = vsel %vm4807_vm12, %v10355_v51, 0 }
 0x8d8   : >> { %v6511_v61 = vsel %vm12168_vm6, %v11577_v49, %v11580_v32  ;;  %vm12179_vm6 = vmmov %vm12172_vm9 }
 0x8d9   : >> { %6963 = vrot.lane.b32.xlu1 %v10350_v43, %s12156_s6  ;;  %6402 = vmatpush1.bf16.msra.mxu0 %v6373_v47  ;;  %v11589_v60 = vpop.permute.xlu0 %6495 }
 0x8da   : >> { %6403 = vmatprep.subr.bf16.mxu0 %v11469_v12 }
 0x8db   : >> { %v11592_v62 = vpop.permute.xlu1 %6497  ;;  %6965 = vrot.lane.b32.xlu0 %v10355_v51, %s12156_s6  ;;  %v5542_v55 = vpop.f32.mrb[88].mxu0 }
 0x8dc   : >> { %v11597_v0 = vadd.f32 %v5542_v55, %v11472_v17  ;;  %v5544_v48 = vpop.f32.mrb[89].mxu0  ;;  %v6512_v43 = vsel %vm12169_vm7, %v11589_v60, %v11592_v62  ;;  %v7064_v60 = vsel %vm4808_vm15, %v10372_v36, 0  ;;  %vm12180_vm7 = vcmask 637952  }
 0x8dd   : >> { %6967 = vrot.lane.b32.xlu1 %v10361_v56, %s12156_s6  ;;  %v11605_v6 = vadd.f32 %v5544_v48, %v11480_v50  ;;  %6404 = vmatpush1.bf16.msra.mxu0 %v6374_v19  ;;  %v11607_v23 = vpop.permute.xlu0 %6499  ;;  %v5546_v41 = vpop.f32.mrb[90].mxu0  ;;  %v7066_v48 = vsel %vm4808_vm15, %v10383_v54, 0 }
 0x8de   : >> { %6405 = vmatprep.subr.bf16.mxu0 %v11489_v2  ;;  %v5547_v52 = vpop.f32.mrb[91].mxu0  ;;  %v11636_v2 = vld [vmem:[%s11893_s5 + $0x4] sm:$0x1] }
 0x8df   : >> { %v11610_v17 = vpop.permute.xlu1 %6501  ;;  %6969 = vrot.lane.b32.xlu0 %v10366_v21, %s12156_s6  ;;  %v7696_v47 = vcombine.low %v11636_v2, %v11636_v2 }
 0x8e0   : >> { %v6513_v56 = vsel %vm12170_vm4, %v11607_v23, %v11610_v17  ;;  %vm12181_vm4 = vmmov %vm12180_vm7 }
 0x8e1   : >> { %6971 = vrot.lane.b32.xlu1 %v10372_v36, %s12156_s6  ;;  %6406 = vmatpush1.bf16.msra.mxu0 %v6375_v20  ;;  %v11619_v12 = vpop.permute.xlu0 %6503  ;;  %v6456_v36 = vshrl.u32 %v7696_v47, 16 }
 0x8e2   : >> { %6407 = vmatprep.subr.bf16.mxu0 %v11506_v27 }
 0x8e3   : >> { %v11622_v50 = vpop.permute.xlu1 %6505  ;;  %6973 = vrot.lane.b32.xlu0 %v10377_v10, %s12156_s6 }
 0x8e5   : >> { %6975 = vrot.lane.b32.xlu1 %v10383_v54, %s12156_s6  ;;  %6408 = vmatpush1.bf16.msra.mxu0 %v6376_v30  ;;  %v11631_v42 = vpop.permute.xlu0 %6580  ;;  %v7068_v54 = vsel %vm4808_vm15, %v10394_v45, 0  ;;  %v7193_v30 = vld [vmem:[#allocation2] sm:$0x1] }
 0x8e6   : >> { %6531 = vmatprep.subr.bf16.mxu0 %v11522_v22 }
 0x8e7   : >> { %v11639_v58 = vpop.permute.xlu1 %6582  ;;  %6977 = vrot.lane.b32.xlu0 %v10388_v5, %s12156_s6 }
 0x8e8   : >> { %6426 = vmatmul.mubr.bf16.vlgmr.msra.gmra.mrb[116].mxu0 %v11636_v2  ;;  %v6612_v23 = vsel %vm12172_vm9, %v11631_v42, %v11639_v58 }
 0x8e9   : >> { %6979 = vrot.lane.b32.xlu1 %v10394_v45, %s12156_s6  ;;  %6532 = vmatpush1.bf16.msra.mxu0 %v6507_v44  ;;  %v11649_v38 = vpop.permute.xlu0 %6584 }
 0x8ea   : >> { %6533 = vmatprep.subr.bf16.mxu0 %v11539_v59  ;;  %6563 = vmatprep.mubr.bf16.mxu0 %v12031_v39 }
 0x8eb   : >> { %v11653_v9 = vpop.permute.xlu1 %6586  ;;  %6981 = vrot.lane.b32.xlu0 %v10399_v35, %s12156_s6 }
 0x8ec   : >> { %v6613_v45 = vsel %vm12173_vm13, %v11649_v38, %v11653_v9  ;;  %vm12184_vm13 = vmmov %vm12181_vm4 }
 0x8ed   : >> { %6983 = vrot.lane.b32.xlu1 %v10405_v3, %s12156_s6  ;;  %6534 = vmatpush1.bf16.msra.mxu0 %v6508_v13  ;;  %v11662_v27 = vpop.permute.xlu0 %6588 }
 0x8ee   : >> { %6535 = vmatprep.subr.bf16.mxu0 %v11555_v8 }
 0x8ef   : >> { %v11665_v1 = vpop.permute.xlu1 %6590  ;;  %6985 = vrot.lane.b32.xlu0 %v10410_v31, %s12156_s6 }
 0x8f1   : >> { %6987 = vrot.lane.b32.xlu1 %v10416_v33, %s12156_s6  ;;  %6536 = vmatpush1.bf16.msra.mxu0 %v6509_v57  ;;  %v11674_v25 = vpop.permute.xlu0 %6592 }
 0x8f2   : >> { %6537 = vmatprep.subr.bf16.mxu0 %v11568_v46 }
 0x8f3   : >> { %v11680_v22 = vpop.permute.xlu1 %6594  ;;  %7094 = vrot.lane.b32.xlu0 %v7057_v4, %s12165_s16 }
 0x8f5   : >> { %7096 = vrot.lane.b32.xlu1 %v7058_v37, %s12165_s16  ;;  %6538 = vmatpush1.bf16.msra.mxu0 %v6510_v7  ;;  %v11690_v24 = vpop.permute.xlu0 %6596  ;;  %v8351_v37 = vld [vmem:[%s11893_s5 + $0x4] ss:$0 sps:$4 sm:$0x22]  }
 0x8f6   : >> { %6539 = vmatprep.subr.bf16.mxu0 %v11580_v32 }
 0x8f7   : >> { %v11696_v59 = vpop.permute.xlu1 %6598  ;;  %7098 = vrot.lane.b32.xlu0 %v7059_v18, %s12165_s16 }
 0x8f9   : >> { %7100 = vrot.lane.b32.xlu1 %v7060_v63, %s12165_s16  ;;  %6540 = vmatpush1.bf16.msra.mxu0 %v6511_v61  ;;  %v11706_v14 = vpop.permute.xlu0 %6600  ;;  %v6578_v61 = vrot.slane %v8351_v37, 1 }
 0x8fa   : >> { %6541 = vmatprep.subr.bf16.mxu0 %v11592_v62  ;;  %v7065_v62 = vsel %vm4807_vm12, %v10377_v10, 0  ;;  %v7067_v10 = vsel %vm4807_vm12, %v10388_v5, 0  ;;  %v7069_v5 = vsel %vm4807_vm12, %v10399_v35, 0  ;;  %v7071_v35 = vsel %vm4807_vm12, %v10410_v31, 0  ;;  %vm12175_vm12 = vmmov %vm12172_vm9 }
 0x8fb   : >> { %v11712_v40 = vpop.permute.xlu1 %6602  ;;  %v5677_v11 = vpop.f32.mrb[92].mxu0  ;;  %7102 = vrot.lane.b32.xlu0 %v7061_v29, %s12165_s16  ;;  %v6615_v31 = vsel %vm12175_vm12, %v11674_v25, %v11680_v22  ;;  %vm12186_vm12 = vmmov %vm12181_vm4 }
 0x8fc   : >> { %v11719_v8 = vadd.f32 %v5677_v11, %v11597_v0  ;;  %v5679_v34 = vpop.f32.mrb[93].mxu0  ;;  %v6514_v0 = vsel %vm12171_vm8, %v11619_v12, %v11622_v50  ;;  %vm12182_vm8 = vmmov %vm12181_vm4 }
 0x8fd   : >> { %v11725_v53 = vadd.f32 %v5679_v34, %v11605_v6  ;;  %7104 = vrot.lane.b32.xlu1 %v7062_v15, %s12165_s16  ;;  %6542 = vmatpush1.bf16.msra.mxu0 %v6512_v43  ;;  %v11728_v51 = vpop.permute.xlu0 %6604  ;;  %v5681_v46 = vpop.f32.mrb[94].mxu0 }
 0x8fe   : >> { %6543 = vmatprep.subr.bf16.mxu0 %v11610_v17  ;;  %v5682_v49 = vpop.f32.mrb[95].mxu0  ;;  %v7070_v17 = vsel %vm4808_vm15, %v10405_v3, 0  ;;  %v7072_v3 = vsel %vm4808_vm15, %v10416_v33, 0  ;;  %vm12176_vm15 = vmmov %vm12172_vm9 }
 0x8ff   : >> { %v11734_v32 = vpop.permute.xlu1 %6606  ;;  %7106 = vrot.lane.b32.xlu0 %v7063_v28, %s12165_s16  ;;  %v6616_v33 = vsel %vm12176_vm15, %v11690_v24, %v11696_v59  ;;  %vm12183_vm9 = vmmov %vm12181_vm4 }
 0x900   : >> { %v6618_v26 = vsel %vm12178_vm14, %v11728_v51, %v11734_v32  ;;  %vm12187_vm15 = vmmov %vm12181_vm4 }
 0x901   : >> { %7108 = vrot.lane.b32.xlu1 %v7064_v60, %s12165_s16  ;;  %6544 = vmatpush1.bf16.msra.mxu0 %v6513_v56  ;;  %v11746_v21 = vpop.permute.xlu0 %6608 }
 0x902   : >> { %6545 = vmatprep.subr.bf16.mxu0 %v11622_v50  ;;  %v6614_v50 = vsel %vm12174_vm10, %v11662_v27, %v11665_v1  ;;  %v6617_v27 = vsel %vm12177_vm11, %v11706_v14, %v11712_v40  ;;  %vm12185_vm10 = vmmov %vm12181_vm4  ;;  %vm12188_vm11 = vcmask 523264  }
 0x903   : >> { %v11752_v55 = vpop.permute.xlu1 %6610  ;;  %7110 = vrot.lane.b32.xlu0 %v7065_v62, %s12165_s16  ;;  %vm12189_vm14 = vmmov %vm12188_vm11 }
 0x905   : >> { %7112 = vrot.lane.b32.xlu1 %v7066_v48, %s12165_s16  ;;  %6546 = vmatpush1.bf16.msra.mxu0 %v6514_v0  ;;  %v11762_v19 = vpop.permute.xlu0 %6716 }
 0x906   : >> { %6636 = vmatprep.subr.bf16.mxu0 %v11639_v58 }
 0x907   : >> { %v11768_v6 = vpop.permute.xlu1 %6718  ;;  %7114 = vrot.lane.b32.xlu0 %v7067_v10, %s12165_s16 }
 0x908   : >> { %6564 = vmatmul.mubr.bf16.vlgmr.msra.gmra.mrb[120].mxu0 %v6456_v36  ;;  %v6748_v29 = vsel %vm12180_vm7, %v11762_v19, %v11768_v6 }
 0x909   : >> { %7116 = vrot.lane.b32.xlu1 %v7068_v54, %s12165_s16  ;;  %6637 = vmatpush1.bf16.msra.mxu0 %v6612_v23  ;;  %v11778_v41 = vpop.permute.xlu0 %6720  ;;  %v6696_v23 = vshrl.u32 %v8351_v37, 16 }
 0x90a   : >> { %6638 = vmatprep.subr.bf16.mxu0 %v11653_v9  ;;  %6668 = vmatprep.mubr.bf16.mxu0 %v12031_v39 }
 0x90b   : >> { %v6723_v52 = vpop.permute.xlu1 %6722  ;;  %7118 = vrot.lane.b32.xlu0 %v7069_v5, %s12165_s16 }
 0x90c   : >> { %v6749_v43 = vsel %vm12181_vm4, %v11778_v41, %v6723_v52 }
 0x90d   : >> { %7120 = vrot.lane.b32.xlu1 %v7070_v17, %s12165_s16  ;;  %6639 = vmatpush1.bf16.msra.mxu0 %v6613_v45  ;;  %v6725_v20 = vpop.permute.xlu0 %6724 }
 0x90e   : >> { %6640 = vmatprep.subr.bf16.mxu0 %v11665_v1 }
 0x90f   : >> { %v6727_v12 = vpop.permute.xlu1 %6726  ;;  %7122 = vrot.lane.b32.xlu0 %v7071_v35, %s12165_s16 }
 0x910   : >> { %v6750_v15 = vsel %vm12182_vm8, %v6725_v20, %v6727_v12 }
 0x911   : >> { %7124 = vrot.lane.b32.xlu1 %v7072_v3, %s12165_s16  ;;  %6641 = vmatpush1.bf16.msra.mxu0 %v6614_v50  ;;  %v6729_v42 = vpop.permute.xlu0 %6728 }
 0x912   : >> { %6642 = vmatprep.subr.bf16.mxu0 %v11680_v22 }
 0x913   : >> { %v6731_v2 = vpop.permute.xlu1 %6730  ;;  %7196 = vperm.xlu0 %8213, %v7193_v30  }
 0x914   : >> { %v6751_v46 = vsel %vm12183_vm9, %v6729_v42, %v6731_v2 }
 0x915   : >> { %6643 = vmatpush1.bf16.msra.mxu0 %v6615_v31  ;;  %v6733_v58 = vpop.permute.xlu0 %6732 }
 0x916   : >> { %6644 = vmatprep.subr.bf16.mxu0 %v11696_v59  ;;  %v6619_v59 = vsel %vm12179_vm6, %v11746_v21, %v11752_v55  ;;  %vm12190_vm6 = vmmov %vm12188_vm11 }
 0x917   : >> { %v6735_v44 = vpop.permute.xlu1 %6734  ;;  %vm12191_vm7 = vmmov %vm12190_vm6 }
 0x918   : >> { %vm12192_vm4 = vmmov %vm12190_vm6 }
 0x919   : >> { %6645 = vmatpush1.bf16.msra.mxu0 %v6616_v33  ;;  %v6737_v38 = vpop.permute.xlu0 %6736  ;;  %vm12193_vm8 = vmmov %vm12192_vm4 }
 0x91a   : >> { %6646 = vmatprep.subr.bf16.mxu0 %v11712_v40  ;;  %vm12194_vm9 = vmmov %vm12192_vm4 }
 0x91b   : >> { %v6739_v9 = vpop.permute.xlu1 %6738  ;;  %v5813_v13 = vpop.f32.mrb[96].mxu0 }
 0x91c   : >> { %v5820_v1 = vadd.f32 %v5813_v13, %v11719_v8  ;;  %v5815_v57 = vpop.f32.mrb[97].mxu0  ;;  %v6753_v21 = vsel %vm12185_vm10, %v6737_v38, %v6739_v9  ;;  %vm12196_vm10 = vcmask 515072  }
 0x91d   : >> { %v5821_v25 = vadd.f32 %v5815_v57, %v11725_v53  ;;  %6647 = vmatpush1.bf16.msra.mxu0 %v6617_v27  ;;  %v6741_v16 = vpop.permute.xlu0 %6740  ;;  %v5817_v4 = vpop.f32.mrb[98].mxu0 }
 0x91e   : >> { %6648 = vmatprep.subr.bf16.mxu0 %v11734_v32  ;;  %v5818_v22 = vpop.f32.mrb[99].mxu0  ;;  %v6752_v32 = vsel %vm12184_vm13, %v6733_v58, %v6735_v44  ;;  %v8352_v4 = vld [vmem:[%s11893_s5 + $0x4] ss:$0 sps:$4 sm:$0x44]   ;;  %vm12195_vm13 = vmmov %vm12192_vm4 }
 0x91f   : >> { %v6743_v7 = vpop.permute.xlu1 %6742 }
 0x921   : >> { %6649 = vmatpush1.bf16.msra.mxu0 %v6618_v26  ;;  %v6745_v24 = vpop.permute.xlu0 %6744  ;;  %v6835_v26 = vrot.slane %v8352_v4, 2 }
 0x922   : >> { %6650 = vmatprep.subr.bf16.mxu0 %v11752_v55 }
 0x923   : >> { %v6747_v18 = vpop.permute.xlu1 %6746 }
 0x924   : >> { %v6755_v5 = vsel %vm12187_vm15, %v6745_v24, %v6747_v18  ;;  %vm12198_vm15 = vmmov %vm12196_vm10 }
 0x925   : >> { %6651 = vmatpush1.bf16.msra.mxu0 %v6619_v59  ;;  %v6854_v63 = vpop.permute.xlu0 %6853 }
 0x926   : >> { %6772 = vmatprep.subr.bf16.mxu0 %v11768_v6  ;;  %v6754_v6 = vsel %vm12186_vm12, %v6741_v16, %v6743_v7  ;;  %vm12197_vm12 = vmmov %vm12196_vm10 }
 0x927   : >> { %v6856_v14 = vpop.permute.xlu1 %6855 }
 0x928   : >> { %6669 = vmatmul.mubr.bf16.vlgmr.msra.gmra.mrb[124].mxu0 %v6578_v61  ;;  %v6885_v17 = vsel %vm12188_vm11, %v6854_v63, %v6856_v14  ;;  %vm12199_vm11 = vmmov %vm12196_vm10 }
 0x929   : >> { %6773 = vmatpush1.bf16.msra.mxu0 %v6748_v29  ;;  %v6858_v40 = vpop.permute.xlu0 %6857  ;;  %6804 = vmatprep.mubr.bf16.mxu0 %v12031_v39 }
 0x92a   : >> { %6774 = vmatprep.subr.bf16.mxu0 %v6723_v52  ;;  %v6698_v52 = vrot.slane %v6696_v23, 1 }
 0x92b   : >> { %v6860_v11 = vpop.permute.xlu1 %6859 }
 0x92c   : >> { %v6886_v35 = vsel %vm12189_vm14, %v6858_v40, %v6860_v11  ;;  %vm12200_vm14 = vmmov %vm12196_vm10 }
 0x92d   : >> { %6775 = vmatpush1.bf16.msra.mxu0 %v6749_v43  ;;  %v6862_v8 = vpop.permute.xlu0 %6861 }
 0x92e   : >> { %6776 = vmatprep.subr.bf16.mxu0 %v6727_v12 }
 0x92f   : >> { %v6864_v34 = vpop.permute.xlu1 %6863 }
 0x930   : >> { %v6887_v3 = vsel %vm12190_vm6, %v6862_v8, %v6864_v34  ;;  %vm12201_vm6 = vmmov %vm12196_vm10 }
 0x931   : >> { %6777 = vmatpush1.bf16.msra.mxu0 %v6750_v15  ;;  %v6866_v53 = vpop.permute.xlu0 %6865 }
 0x932   : >> { %6778 = vmatprep.subr.bf16.mxu0 %v6731_v2 }
 0x933   : >> { %v6868_v51 = vpop.permute.xlu1 %6867 }
 0x934   : >> { %v6888_v42 = vsel %vm12191_vm7, %v6866_v53, %v6868_v51  ;;  %vm12202_vm7 = vmmov %vm12201_vm6 }
 0x935   : >> { %6779 = vmatpush1.bf16.msra.mxu0 %v6751_v46  ;;  %v6870_v28 = vpop.permute.xlu0 %6869 }
 0x936   : >> { %6780 = vmatprep.subr.bf16.mxu0 %v6735_v44 }
 0x937   : >> { %v6872_v49 = vpop.permute.xlu1 %6871 }
 0x938   : >> { %v6889_v31 = vsel %vm12192_vm4, %v6870_v28, %v6872_v49  ;;  %vm12203_vm4 = vmmov %vm12201_vm6 }
 0x939   : >> { %6781 = vmatpush1.bf16.msra.mxu0 %v6752_v32  ;;  %v6874_v56 = vpop.permute.xlu0 %6873 }
 0x93a   : >> { %6782 = vmatprep.subr.bf16.mxu0 %v6739_v9 }
 0x93b   : >> { %v6876_v47 = vpop.permute.xlu1 %6875  ;;  %v5918_v60 = vpop.f32.mrb[100].mxu0 }
 0x93c   : >> { %v5925_v62 = vadd.f32 %v5918_v60, %v5820_v1  ;;  %v5920_v55 = vpop.f32.mrb[101].mxu0  ;;  %v6890_v38 = vsel %vm12193_vm8, %v6874_v56, %v6876_v47 }
 0x93d   : >> { %v5926_v0 = vadd.f32 %v5920_v55, %v5821_v25  ;;  %6783 = vmatpush1.bf16.msra.mxu0 %v6753_v21  ;;  %v6878_v36 = vpop.permute.xlu0 %6877  ;;  %v5922_v48 = vpop.f32.mrb[102].mxu0  ;;  %v6953_v21 = vshrl.u32 %v8352_v4, 16 }
 0x93e   : >> { %6784 = vmatprep.subr.bf16.mxu0 %v6743_v7  ;;  %v5923_v19 = vpop.f32.mrb[103].mxu0 }
 0x93f   : >> { %v6880_v10 = vpop.permute.xlu1 %6879 }
 0x940   : >> { %v6891_v16 = vsel %vm12194_vm9, %v6878_v36, %v6880_v10 }
 0x941   : >> { %6785 = vmatpush1.bf16.msra.mxu0 %v6754_v6  ;;  %v6882_v54 = vpop.permute.xlu0 %6881 }
 0x942   : >> { %6786 = vmatprep.subr.bf16.mxu0 %v6747_v18 }
 0x943   : >> { %v6884_v41 = vpop.permute.xlu1 %6883 }
 0x944   : >> { %v6892_v7 = vsel %vm12195_vm13, %v6882_v54, %v6884_v41 }
 0x945   : >> { %6787 = vmatpush1.bf16.msra.mxu0 %v6755_v5  ;;  %v6958_v20 = vpop.permute.xlu0 %6957 }
 0x946   : >> { %6909 = vmatprep.subr.bf16.mxu0 %v6856_v14 }
 0x947   : >> { %v6960_v45 = vpop.permute.xlu1 %6959 }
 0x948   : >> { %6805 = vmatmul.mubr.bf16.vlgmr.msra.gmra.mrb[128].mxu0 %v6698_v52  ;;  %v6989_v18 = vsel %vm12196_vm10, %v6958_v20, %v6960_v45 }
 0x949   : >> { %6910 = vmatpush1.bf16.msra.mxu0 %v6885_v17  ;;  %6941 = vmatprep.mubr.bf16.mxu0 %v12031_v39  ;;  %v6962_v50 = vpop.permute.xlu0 %6961 }
 0x94a   : >> { %6911 = vmatprep.subr.bf16.mxu0 %v6860_v11 }
 0x94b   : >> { %v6964_v12 = vpop.permute.xlu1 %6963 }
 0x94c   : >> { %v6990_v61 = vsel %vm12197_vm12, %v6962_v50, %v6964_v12 }
 0x94d   : >> { %6912 = vmatpush1.bf16.msra.mxu0 %v6886_v35  ;;  %v6966_v2 = vpop.permute.xlu0 %6965 }
 0x94e   : >> { %6913 = vmatprep.subr.bf16.mxu0 %v6864_v34 }
 0x94f   : >> { %v6968_v30 = vpop.permute.xlu1 %6967 }
 0x950   : >> { %v6991_v14 = vsel %vm12198_vm15, %v6966_v2, %v6968_v30 }
 0x951   : >> { %6914 = vmatpush1.bf16.msra.mxu0 %v6887_v3  ;;  %v6970_v44 = vpop.permute.xlu0 %6969 }
 0x952   : >> { %6915 = vmatprep.subr.bf16.mxu0 %v6868_v51 }
 0x953   : >> { %v6972_v58 = vpop.permute.xlu1 %6971 }
 0x954   : >> { %v6992_v11 = vsel %vm12199_vm11, %v6970_v44, %v6972_v58 }
 0x955   : >> { %6916 = vmatpush1.bf16.msra.mxu0 %v6888_v42  ;;  %v6974_v22 = vpop.permute.xlu0 %6973 }
 0x956   : >> { %6917 = vmatprep.subr.bf16.mxu0 %v6872_v49 }
 0x957   : >> { %v6976_v25 = vpop.permute.xlu1 %6975 }
 0x958   : >> { %v6993_v8 = vsel %vm12200_vm14, %v6974_v22, %v6976_v25 }
 0x959   : >> { %6918 = vmatpush1.bf16.msra.mxu0 %v6889_v31  ;;  %v6978_v24 = vpop.permute.xlu0 %6977 }
 0x95a   : >> { %6919 = vmatprep.subr.bf16.mxu0 %v6876_v47 }
 0x95b   : >> { %v6054_v33 = vpop.f32.mrb[104].mxu0  ;;  %v6980_v37 = vpop.permute.xlu1 %6979 }
 0x95c   : >> { %v6061_v9 = vadd.f32 %v6054_v33, %v5925_v62  ;;  %v6056_v13 = vpop.f32.mrb[105].mxu0  ;;  %v6994_v53 = vsel %vm12201_vm6, %v6978_v24, %v6980_v37 }
 0x95d   : >> { %v6062_v27 = vadd.f32 %v6056_v13, %v5926_v0  ;;  %6920 = vmatpush1.bf16.msra.mxu0 %v6890_v38  ;;  %v6058_v1 = vpop.f32.mrb[106].mxu0  ;;  %v6982_v63 = vpop.permute.xlu0 %6981  ;;  %v6955_v0 = vrot.slane %v6953_v21, 2 }
 0x95e   : >> { %6921 = vmatprep.subr.bf16.mxu0 %v6880_v10  ;;  %v6059_v57 = vpop.f32.mrb[107].mxu0 }
 0x95f   : >> { %v6984_v59 = vpop.permute.xlu1 %6983 }
 0x960   : >> { %v6995_v60 = vsel %vm12202_vm7, %v6982_v63, %v6984_v59 }
 0x961   : >> { %6922 = vmatpush1.bf16.msra.mxu0 %v6891_v16  ;;  %v6986_v40 = vpop.permute.xlu0 %6985 }
 0x962   : >> { %6923 = vmatprep.subr.bf16.mxu0 %v6884_v41 }
 0x963   : >> { %v6988_v29 = vpop.permute.xlu1 %6987 }
 0x964   : >> { %v6996_v55 = vsel %vm12203_vm4, %v6986_v40, %v6988_v29 }
 0x965   : >> { %6924 = vmatpush1.bf16.msra.mxu0 %v6892_v7  ;;  %v7095_v34 = vpop.permute.xlu0 %7094 }
 0x966   : >> { %7013 = vmatprep.subr.bf16.mxu0 %v6960_v45 }
 0x967   : >> { %v7097_v43 = vpop.permute.xlu1 %7096 }
 0x968   : >> { %6942 = vmatmul.mubr.bf16.vlgmr.msra.gmra.mrb[132].mxu0 %v6835_v26  ;;  %v7126_v48 = vsel %vm4921_vm5, %v7095_v34, %v7097_v43 }
 0x969   : >> { %7014 = vmatpush1.bf16.msra.mxu0 %v6989_v18  ;;  %7045 = vmatprep.mubr.bf16.mxu0 %v12031_v39  ;;  %v7099_v47 = vpop.permute.xlu0 %7098 }
 0x96a   : >> { %7015 = vmatprep.subr.bf16.mxu0 %v6964_v12 }
 0x96b   : >> { %v7101_v28 = vpop.permute.xlu1 %7100 }
 0x96c   : >> { %v7127_v6 = vsel %vm4921_vm5, %v7099_v47, %v7101_v28 }
 0x96d   : >> { %7016 = vmatpush1.bf16.msra.mxu0 %v6990_v61  ;;  %v7103_v36 = vpop.permute.xlu0 %7102 }
 0x96e   : >> { %7017 = vmatprep.subr.bf16.mxu0 %v6968_v30 }
 0x96f   : >> { %v7105_v62 = vpop.permute.xlu1 %7104 }
 0x970   : >> { %v7128_v54 = vsel %vm4921_vm5, %v7103_v36, %v7105_v62 }
 0x971   : >> { %7018 = vmatpush1.bf16.msra.mxu0 %v6991_v14  ;;  %v7107_v10 = vpop.permute.xlu0 %7106 }
 0x972   : >> { %7019 = vmatprep.subr.bf16.mxu0 %v6972_v58  ;;  %v8353_v58 = vld [vmem:[%s11893_s5 + $0x4] ss:$0 sps:$4 sm:$0x88]  }
 0x973   : >> { %v7109_v19 = vpop.permute.xlu1 %7108 }
 0x974   : >> { %v7129_v5 = vsel %vm4921_vm5, %v7107_v10, %v7109_v19 }
 0x975   : >> { %7020 = vmatpush1.bf16.msra.mxu0 %v6992_v11  ;;  %v7111_v41 = vpop.permute.xlu0 %7110 }
 0x976   : >> { %7021 = vmatprep.subr.bf16.mxu0 %v6976_v25 }
 0x977   : >> { %v7113_v23 = vpop.permute.xlu1 %7112 }
 0x979   : >> { %7022 = vmatpush1.bf16.msra.mxu0 %v6993_v8  ;;  %v7115_v45 = vpop.permute.xlu0 %7114 }
 0x97a   : >> { %7023 = vmatprep.subr.bf16.mxu0 %v6980_v37 }
 0x97b   : >> { %v6191_v15 = vpop.f32.mrb[108].mxu0  ;;  %v7117_v52 = vpop.permute.xlu1 %7116 }
 0x97c   : >> { %v6198_v51 = vadd.f32 %v6191_v15, %v6061_v9  ;;  %v6193_v46 = vpop.f32.mrb[109].mxu0  ;;  %v7131_v35 = vsel %vm4921_vm5, %v7115_v45, %v7117_v52  ;;  %v7076_v9 = vrot.slane %v8353_v58, 3 }
 0x97d   : >> { %v6199_v49 = vadd.f32 %v6193_v46, %v6062_v27  ;;  %7024 = vmatpush1.bf16.msra.mxu0 %v6994_v53  ;;  %v6195_v32 = vpop.f32.mrb[110].mxu0  ;;  %v7119_v3 = vpop.permute.xlu0 %7118 }
 0x97e   : >> { %7025 = vmatprep.subr.bf16.mxu0 %v6984_v59  ;;  %v6196_v56 = vpop.f32.mrb[111].mxu0 }
 0x97f   : >> { %v7121_v17 = vpop.permute.xlu1 %7120 }
 0x980   : >> { %v7132_v31 = vsel %vm4921_vm5, %v7119_v3, %v7121_v17  ;;  %v12206_v3 = vlaneseq }
 0x981   : >> { %7026 = vmatpush1.bf16.msra.mxu0 %v6995_v60  ;;  %v7123_v33 = vpop.permute.xlu0 %7122 }
 0x982   : >> { %7027 = vmatprep.subr.bf16.mxu0 %v6988_v29 }
 0x983   : >> { %v7125_v44 = vpop.permute.xlu1 %7124 }
 0x984   : >> { %v7133_v38 = vsel %vm4921_vm5, %v7123_v33, %v7125_v44 }
 0x985   : >> { %7028 = vmatpush1.bf16.msra.mxu0 %v6996_v55 }
 0x986   : >> { %7150 = vmatprep.subr.bf16.mxu0 %v7097_v43 }
 0x988   : >> { %7046 = vmatmul.mubr.bf16.vlgmr.msra.gmra.mrb[136].mxu0 %v6955_v0  ;;  %v8394_v0 = vmov 1966171168  }
 0x989   : >> { %7151 = vmatpush1.bf16.msra.mxu0 %v7126_v48  ;;  %7182 = vmatprep.mubr.bf16.mxu0 %v12031_v39  ;;  %v7130_v39 = vsel %vm4921_vm5, %v7111_v41, %v7113_v23  ;;  %v7209_v36 = vunpack.c.l.s4 %v8394_v0  ;;  %vm7225_vm5 = vcmp.lt.s32.totalorder %v12206_v3, 176 }
 0x98a   : >> { %7152 = vmatprep.subr.bf16.mxu0 %v7101_v28 }
 0x98b   : >> { %v7210_v10 = vunpack.c.0.s8 %v7209_v36 }
 0x98d   : >> { %7153 = vmatpush1.bf16.msra.mxu0 %v7127_v6  ;;  %v12204_v6 = vld [vmem:[#allocation8_spill] sm:$0xff] }
 0x98e   : >> { %7154 = vmatprep.subr.bf16.mxu0 %v7105_v62 }
 0x991   : >> { %7155 = vmatpush1.bf16.msra.mxu0 %v7128_v54 }
 0x992   : >> { %7156 = vmatprep.subr.bf16.mxu0 %v7109_v19  ;;  %v7197_v48 = vpop.permute.xlu0 %7196 }
 0x995   : >> { %7157 = vmatpush1.bf16.msra.mxu0 %v7129_v5 }
 0x996   : >> { %7158 = vmatprep.subr.bf16.mxu0 %v7113_v23  ;;  %v7202_v23 = vrot.slane %v7197_v48, %v12204_v6 }
 0x999   : >> { %7159 = vmatpush1.bf16.msra.mxu0 %v7130_v39 }
 0x99a   : >> { %7160 = vmatprep.subr.bf16.mxu0 %v7117_v52 }
 0x99b   : >> { %v6295_v20 = vpop.f32.mrb[112].mxu0 }
 0x99c   : >> { %v6302_v12 = vadd.f32 %v6295_v20, %v6198_v51  ;;  %v6297_v50 = vpop.f32.mrb[113].mxu0  ;;  %v12205_v20 = vld [vmem:[#allocation7_spill] sm:$0xff] }
 0x99d   : >> { %v6303_v30 = vadd.f32 %v6297_v50, %v6199_v49  ;;  %7161 = vmatpush1.bf16.msra.mxu0 %v7131_v35  ;;  %v6299_v42 = vpop.f32.mrb[114].mxu0  ;;  %v7213_v35 = vsub.s32 %v7210_v10, %v12205_v20 }
 0x99e   : >> { %7162 = vmatprep.subr.bf16.mxu0 %v7121_v17  ;;  %v6300_v2 = vpop.f32.mrb[115].mxu0 }
 0x9a1   : >> { %7163 = vmatpush1.bf16.msra.mxu0 %v7132_v31 }
 0x9a2   : >> { %7164 = vmatprep.subr.bf16.mxu0 %v7125_v44 }
 0x9a5   : >> { %7165 = vmatpush1.bf16.msra.mxu0 %v7133_v38 }
 0x9a8   : >> { %7183 = vmatmul.mubr.bf16.vlgmr.msra.gmra.mrb[140].mxu0 %v7076_v9 }
 0x9bb   : >> { %v6427_v13 = vpop.f32.mrb[116].mxu0 }
 0x9bc   : >> { %v6434_v27 = vadd.f32 %v6427_v13, %v6302_v12  ;;  %v6429_v1 = vpop.f32.mrb[117].mxu0 }
 0x9bd   : >> { %v6435_v57 = vadd.f32 %v6429_v1, %v6303_v30  ;;  %v6431_v25 = vpop.f32.mrb[118].mxu0 }
 0x9be   : >> { %v6432_v16 = vpop.f32.mrb[119].mxu0 }
 0x9db   : >> { %v6565_v4 = vpop.f32.mrb[120].mxu0 }
 0x9dc   : >> { %v6572_v22 = vadd.f32 %v6565_v4, %v6434_v27  ;;  %v6567_v7 = vpop.f32.mrb[121].mxu0 }
 0x9dd   : >> { %v6573_v26 = vadd.f32 %v6567_v7, %v6435_v57  ;;  %v6569_v37 = vpop.f32.mrb[122].mxu0 }
 0x9de   : >> { %v6570_v24 = vpop.f32.mrb[123].mxu0 }
 0x9fb   : >> { %v6670_v18 = vpop.f32.mrb[124].mxu0 }
 0x9fc   : >> { %v6677_v59 = vadd.f32 %v6670_v18, %v6572_v22  ;;  %v6672_v61 = vpop.f32.mrb[125].mxu0 }
 0x9fd   : >> { %v6678_v63 = vadd.f32 %v6672_v61, %v6573_v26  ;;  %v6674_v14 = vpop.f32.mrb[126].mxu0 }
 0x9fe   : >> { %v6675_v29 = vpop.f32.mrb[127].mxu0 }
 0xa1b   : >> { %v6806_v40 = vpop.f32.mrb[128].mxu0 }
 0xa1c   : >> { %v6813_v11 = vadd.f32 %v6806_v40, %v6677_v59  ;;  %v6808_v43 = vpop.f32.mrb[129].mxu0 }
 0xa1d   : >> { %v6814_v8 = vadd.f32 %v6808_v43, %v6678_v63  ;;  %v6810_v34 = vpop.f32.mrb[130].mxu0 }
 0xa1e   : >> { %v6811_v15 = vpop.f32.mrb[131].mxu0 }
 0xa3b   : >> { %v6943_v53 = vpop.f32.mrb[132].mxu0 }
 0xa3c   : >> { %v6950_v51 = vadd.f32 %v6943_v53, %v6813_v11  ;;  %v6945_v46 = vpop.f32.mrb[133].mxu0 }
 0xa3d   : >> { %v6951_v28 = vadd.f32 %v6945_v46, %v6814_v8  ;;  %v6947_v49 = vpop.f32.mrb[134].mxu0 }
 0xa3e   : >> { %v6948_v32 = vpop.f32.mrb[135].mxu0 }
 0xa5b   : >> { %v7047_v56 = vpop.f32.mrb[136].mxu0 }
 0xa5c   : >> { %v7054_v47 = vadd.f32 %v7047_v56, %v6950_v51  ;;  %v7049_v60 = vpop.f32.mrb[137].mxu0 }
 0xa5d   : >> { %v7055_v21 = vadd.f32 %v7049_v60, %v6951_v28  ;;  %v7051_v62 = vpop.f32.mrb[138].mxu0 }
 0xa5e   : >> { %v7052_v55 = vpop.f32.mrb[139].mxu0 }
 0xa7b   : >> { %v7184_v19 = vpop.f32.mrb[140].mxu0 }
 0xa7c   : >> { %v7191_v54 = vadd.f32 %v7184_v19, %v7054_v47  ;;  %v7186_v41 = vpop.f32.mrb[141].mxu0 }
 0xa7d   : >> { %v7192_v5 = vadd.f32 %v7186_v41, %v7055_v21  ;;  %v7188_v52 = vpop.f32.mrb[142].mxu0 }
 0xa7e   : >> { %v7203_v45 = vadd.f32 %v7202_v23, %v7191_v54  ;;  %v7189_v39 = vpop.f32.mrb[143].mxu0 }
 0xa7f   : >> { %v7204_v17 = vadd.f32 %v7202_v23, %v7192_v5 }
 0xa81   : >> { %v7207_v12 = vcombine.low %v7203_v45, %v7204_v17  ;;  %324 = sbr.rel (!%p322_p5) target bundleno = 18 (0x12), region = 101 }
 0xa83   : >> { %v7214_v50 = vrot.slane %v7207_v12, %v7213_v35 }
 0xa85   : >> { %v7221_v30 = vrot.slane %v7214_v50, %v7213_v35 }
 0xa87   : >> { %7235 = vst.msk [vmem:[%s7234_s8] ss:$8 sm:$0x3] %vm7225_vm5, %v7221_v30 }
 0xa88 PF: > { %s19_s26 = sadd.s32 1, %s8364_s26  }
 0xa89   : > { %p16_p6 = scmp.ge.s32.totalorder %s19_s26, 4  }
 0xa8b   :  { %18 = sbr.rel (!%p16_p6) target bundleno = 3 (0x3), region = 112 }

</bundles_post_ra>
